<compile_context>
chip_gen: v7x
topology: tpu7x:2x2x1
jax: 0.10.0
libtpu: 0.0.40
codegen_flags: <defaults>
</compile_context>

<pallas_src>
import functools

import jax
import jax.numpy as jnp
from jax import lax
from jax.experimental import pallas as pl
from jax.experimental.pallas import tpu as pltpu

LANE = 128

# (out_channels, kernel, stride) for the three conv layers (fixed by the module).
_CONV_CFG = ((32, 8, 4), (64, 4, 2), (64, 3, 1))


def _round_up(x, m):
    return (x + m - 1) // m * m


def _geometry(state_space_dim):
    H, W, C = state_space_dim
    sizes = [(H, W)]
    for _, k, s in _CONV_CFG:
        h, w = sizes[-1]
        sizes.append(((h - k) // s + 1, (w - k) // s + 1))
    (h1, w1), (h2, w2), (h3, w3) = sizes[1], sizes[2], sizes[3]
    conv_dim = _CONV_CFG[-1][0] * h3 * w3
    return dict(C=C, H=H, W=W, h1=h1, w1=w1, h2=h2, w2=w2, h3=h3, w3=w3,
                conv_dim=conv_dim)


def _pad2d(a, rows, cols, dtype):
    out = jnp.zeros((rows, cols), dtype)
    return out.at[:a.shape[0], :a.shape[1]].set(a.astype(dtype))


# ------------------------------ fused Pallas kernel ---------------------------

def _copy_patches(src_ref, dst_ref, *, batch, ih, iw, kh, kw, stride, oh, ow):
    """In-kernel im2col.

    src_ref: (round_up(batch*ih*iw, 8), LANE) f32 -- activation rows in
             (b, h, w) order with channels padded to LANE.
    dst_ref: (round_up(batch*oh*ow, 8), kh*kw*LANE) f32 -- patch rows in
             (b, oh, ow) order, features in (dh, dw, c_pad) order, so every
             copy is a lane-aligned (1, LANE) move (static indices, unrolled).
    """
    for b in range(batch):
        for o_h in range(oh):
            for o_w in range(ow):
                drow = (b * oh + o_h) * ow + o_w
                for dh in range(kh):
                    for dw in range(kw):
                        srow = (b * ih + (o_h * stride + dh)) * iw + (o_w * stride + dw)
                        chunk = dh * kw + dw
                        dst_ref[pl.ds(drow, 1), pl.ds(chunk * LANE, LANE)] = (
                            src_ref[pl.ds(srow, 1), :])


def _gemm_bias_relu(x, w_ref, b_ref, *, relu):
    # bf16 x bf16 MXU matmul with f32 accumulation; epilogue stays in f32.
    acc = jnp.dot(x.astype(w_ref.dtype), w_ref[...],
                  preferred_element_type=jnp.float32)
    acc = acc + b_ref[...]
    if relu:
        acc = jnp.maximum(acc, 0.0)
    return acc


def _fused_dqn_kernel(p1_ref,
                      w1_ref, b1_ref, w2_ref, b2_ref, w3_ref, b3_ref,
                      w4_ref, b4_ref, w5_ref, b5_ref,
                      out_ref,
                      a1_ref, p2_ref, a2_ref, p3_ref, a3_ref, p4_ref,
                      *, geom):
    (B, oh1, ow1, k2h, k2w, s2, oh2, ow2, k3h, k3w, s3, oh3, ow3) = geom

    # conv1: patches were built by the wrapper (strided slices of x) -> one GEMM.
    a1_ref[...] = _gemm_bias_relu(p1_ref[...], w1_ref, b1_ref, relu=True)

    # conv2: im2col in VMEM, then one GEMM.
    p2_ref[...] = jnp.zeros_like(p2_ref)
    _copy_patches(a1_ref, p2_ref, batch=B, ih=oh1, iw=ow1,
                  kh=k2h, kw=k2w, stride=s2, oh=oh2, ow=ow2)
    a2_ref[...] = _gemm_bias_relu(p2_ref[...], w2_ref, b2_ref, relu=True)

    # conv3.
    p3_ref[...] = jnp.zeros_like(p3_ref)
    _copy_patches(a2_ref, p3_ref, batch=B, ih=oh2, iw=ow2,
                  kh=k3h, kw=k3w, stride=s3, oh=oh3, ow=ow3)
    a3_ref[...] = _gemm_bias_relu(p3_ref[...], w3_ref, b3_ref, relu=True)

    # flatten conv3 output per batch (feature order (h3, w3, c_pad)) -> fc1 -> fc2.
    p4_ref[...] = jnp.zeros_like(p4_ref)
    _copy_patches(a3_ref, p4_ref, batch=B, ih=oh3, iw=ow3,
                  kh=oh3, kw=ow3, stride=1, oh=1, ow=1)
    a4 = _gemm_bias_relu(p4_ref[...], w4_ref, b4_ref, relu=True)
    out_ref[...] = _gemm_bias_relu(a4, w5_ref, b5_ref, relu=False)


# ------------------------- conv1 im2col (no gather) ---------------------------

def _im2col_input(x_nchw, kh, kw, stride):
    """Strided-slice im2col of the network input (no XLA gather).

    Rows in (b, oh, ow) order, features in (dh, dw, c) order.
    """
    B, C, H, W = x_nchw.shape
    OH = (H - kh) // stride + 1
    OW = (W - kw) // stride + 1
    x = jnp.transpose(x_nchw, (0, 2, 3, 1))  # one tiny NHWC transpose of the input
    slabs = []
    for dh in range(kh):
        for dw in range(kw):
            slabs.append(lax.slice(
                x, (0, dh, dw, 0),
                (B, dh + (OH - 1) * stride + 1, dw + (OW - 1) * stride + 1, C),
                (1, stride, stride, 1)))  # (B, OH, OW, C)
    patches = jnp.concatenate(slabs, axis=-1)  # (B, OH, OW, kh*kw*C)
    return patches.reshape(B * OH * OW, kh * kw * C), OH, OW


# --------------------------- parameter preparation ----------------------------

def init_params(key, state_space_dim, action_space_dim):
    """Raw parameters in PyTorch layouts (Conv2d OIHW, Linear [out, in])."""
    g = _geometry(state_space_dim)
    C, conv_dim = g["C"], g["conv_dim"]

    def uniform(key, shape, fan_in):
        bound = 1.0 / jnp.sqrt(jnp.float32(fan_in))
        return jax.random.uniform(key, shape, jnp.float32, -bound, bound)

    ks = jax.random.split(key, 10)
    params = {
        "conv1_w": uniform(ks[0], (32, C, 8, 8), C * 8 * 8),
        "conv1_b": uniform(ks[1], (32,), C * 8 * 8),
        "conv2_w": uniform(ks[2], (64, 32, 4, 4), 32 * 4 * 4),
        "conv2_b": uniform(ks[3], (64,), 32 * 4 * 4),
        "conv3_w": uniform(ks[4], (64, 64, 3, 3), 64 * 3 * 3),
        "conv3_b": uniform(ks[5], (64,), 64 * 3 * 3),
        "fc1_w": uniform(ks[6], (400, conv_dim), conv_dim),
        "fc1_b": uniform(ks[7], (400,), conv_dim),
        "fc2_w": uniform(ks[8], (action_space_dim, 400), 400),
        "fc2_b": uniform(ks[9], (action_space_dim,), 400),
    }
    return params, conv_dim


def prepare_params(params, state_space_dim, action_space_dim):
    """One-time conversion of PyTorch-layout params into padded bf16 kernel operands."""
    g = _geometry(state_space_dim)
    C = g["C"]
    f32, bf16 = jnp.float32, jnp.bfloat16

    def conv1_weight(w):
        # (OC, C, kh, kw) -> (round_up(kh*kw*C, 128), 128), rows in (dh, dw, c) order.
        OC, Ci, kh, kw = w.shape
        wr = jnp.transpose(w, (2, 3, 1, 0)).reshape(kh * kw * Ci, OC)
        return _pad2d(wr, _round_up(kh * kw * Ci, LANE), LANE, bf16)

    def conv_weight_chanpad(w):
        # (OC, Cin, kh, kw) -> (kh*kw*LANE, LANE), rows in (dh, dw, c_pad128) order.
        OC, Cin, kh, kw = w.shape
        wr = jnp.transpose(w, (2, 3, 1, 0))  # (kh, kw, Cin, OC)
        full = jnp.zeros((kh, kw, LANE, LANE), f32)
        full = full.at[:, :, :Cin, :OC].set(wr)
        return full.reshape(kh * kw * LANE, LANE).astype(bf16)

    def bias_pad(b, n):
        return _pad2d(b.reshape(1, -1), 1, n, f32)

    # fc1: kernel feature order is (h3, w3, c_pad128); PyTorch flatten is (c, h3, w3).
    C3 = _CONV_CFG[-1][0]
    h3, w3 = g["h3"], g["w3"]
    n4p = _round_up(400, LANE)
    fc1 = params["fc1_w"].reshape(400, C3, h3, w3)
    fc1 = jnp.transpose(fc1, (2, 3, 1, 0))  # (h3, w3, C3, 400)
    w4 = jnp.zeros((h3, w3, LANE, n4p), f32)
    w4 = w4.at[:, :, :C3, :400].set(fc1)
    w4 = w4.reshape(h3 * w3 * LANE, n4p).astype(bf16)

    n5p = _round_up(action_space_dim, LANE)
    w5 = _pad2d(params["fc2_w"].T, n4p, n5p, bf16)

    return dict(
        w1=conv1_weight(params["conv1_w"]), b1=bias_pad(params["conv1_b"], LANE),
        w2=conv_weight_chanpad(params["conv2_w"]), b2=bias_pad(params["conv2_b"], LANE),
        w3=conv_weight_chanpad(params["conv3_w"]), b3=bias_pad(params["conv3_b"], LANE),
        w4=w4, b4=bias_pad(params["fc1_b"], n4p),
        w5=w5, b5=bias_pad(params["fc2_b"], n5p),
    )


# ------------------------------- DQN forward ----------------------------------

def dqn_forward(kparams, x_nchw, *, state_space_dim, action_space_dim):
    g = _geometry(state_space_dim)
    B = x_nchw.shape[0]
    (_, k1, s1), (_, k2, s2), (_, k3, s3) = _CONV_CFG
    oh1, ow1 = g["h1"], g["w1"]
    oh2, ow2 = g["h2"], g["w2"]
    oh3, ow3 = g["h3"], g["w3"]

    patches, _, _ = _im2col_input(x_nchw, k1, k1, s1)
    k1p = kparams["w1"].shape[0]
    m1p = _round_up(B * oh1 * ow1, 8)
    m2p = _round_up(B * oh2 * ow2, 8)
    m3p = _round_up(B * oh3 * ow3, 8)
    bp = _round_up(B, 8)
    n4p = kparams["w4"].shape[1]
    n5p = kparams["w5"].shape[1]

    p1 = _pad2d(patches, m1p, k1p, jnp.bfloat16)

    geom = (B, oh1, ow1, k2, k2, s2, oh2, ow2, k3, k3, s3, oh3, ow3)
    kernel = functools.partial(_fused_dqn_kernel, geom=geom)

    def full(shape):
        return pl.BlockSpec(shape, lambda i: (0,) * len(shape))

    args = (p1,
            kparams["w1"], kparams["b1"],
            kparams["w2"], kparams["b2"],
            kparams["w3"], kparams["b3"],
            kparams["w4"], kparams["b4"],
            kparams["w5"], kparams["b5"])

    out = pl.pallas_call(
        kernel,
        out_shape=jax.ShapeDtypeStruct((bp, n5p), jnp.float32),
        grid=(1,),
        in_specs=[full(a.shape) for a in args],
        out_specs=full((bp, n5p)),
        scratch_shapes=[
            pltpu.VMEM((m1p, LANE), jnp.float32),              # a1  (conv1 act)
            pltpu.VMEM((m2p, k2 * k2 * LANE), jnp.float32),    # p2  (conv2 patches)
            pltpu.VMEM((m2p, LANE), jnp.float32),              # a2  (conv2 act)
            pltpu.VMEM((m3p, k3 * k3 * LANE), jnp.float32),    # p3  (conv3 patches)
            pltpu.VMEM((m3p, LANE), jnp.float32),              # a3  (conv3 act)
            pltpu.VMEM((bp, oh3 * ow3 * LANE), jnp.float32),   # p4  (flatten)
        ],
    )(*args)

    return out[:B, :action_space_dim]


# --------------------------- pure-JAX reference check --------------------------

def _reference_forward(params, x):
    def conv(x, w, b, stride):
        y = jax.lax.conv_general_dilated(
            x, w, window_strides=(stride, stride), padding="VALID",
            dimension_numbers=("NCHW", "OIHW", "NCHW"))
        return jax.nn.relu(y + b[None, :, None, None])

    x = conv(x, params["conv1_w"], params["conv1_b"], 4)
    x = conv(x, params["conv2_w"], params["conv2_b"], 2)
    x = conv(x, params["conv3_w"], params["conv3_b"], 1)
    x = x.reshape(x.shape[0], -1)
    x = jax.nn.relu(x @ params["fc1_w"].T + params["fc1_b"])
    return x @ params["fc2_w"].T + params["fc2_b"]


# ----------------------------------- main --------------------------------------

if __name__ == "__main__":
    key = jax.random.PRNGKey(0)
    k_param, k_x = jax.random.split(key)

    # (H, W, C): smallest nice square input that survives the three convs.
    state_space_dim = (40, 40, 4)
    action_space_dim = 3
    batch = 2

    raw_params, conv_dim = init_params(k_param, state_space_dim, action_space_dim)
    kparams = prepare_params(raw_params, state_space_dim, action_space_dim)

    # PyTorch conv inputs are NCHW -> x: [B, C, H, W]
    x = jax.random.normal(
        k_x, (batch, state_space_dim[2], state_space_dim[0], state_space_dim[1]),
        dtype=jnp.float32)

    fwd = jax.jit(functools.partial(
        dqn_forward, state_space_dim=state_space_dim,
        action_space_dim=action_space_dim))

    out = jax.block_until_ready(fwd(kparams, x))
    assert out.shape == (batch, action_space_dim), out.shape

    ref = jax.block_until_ready(_reference_forward(raw_params, x))
    assert jnp.allclose(out, ref, rtol=2e-2, atol=2e-2), (out, ref)

    print("KERNEL_OK")
</pallas_src>

<mosaic_0001>
module attributes {stable_mosaic.version = 11 : i64} {
  func.func @_fused_dqn_kernel(%arg0: i32, %arg1: memref<168x256xbf16, #tpu.memory_space<vmem>>, %arg2: memref<256x128xbf16, #tpu.memory_space<vmem>>, %arg3: memref<1x128xf32, #tpu.memory_space<vmem>>, %arg4: memref<2048x128xbf16, #tpu.memory_space<vmem>>, %arg5: memref<1x128xf32, #tpu.memory_space<vmem>>, %arg6: memref<1152x128xbf16, #tpu.memory_space<vmem>>, %arg7: memref<1x128xf32, #tpu.memory_space<vmem>>, %arg8: memref<128x512xbf16, #tpu.memory_space<vmem>>, %arg9: memref<1x512xf32, #tpu.memory_space<vmem>>, %arg10: memref<512x128xbf16, #tpu.memory_space<vmem>>, %arg11: memref<1x128xf32, #tpu.memory_space<vmem>>, %arg12: memref<8x128xf32, #tpu.memory_space<vmem>>, %arg13: memref<168x128xf32, #tpu.memory_space<vmem>>, %arg14: memref<24x2048xf32, #tpu.memory_space<vmem>>, %arg15: memref<24x128xf32, #tpu.memory_space<vmem>>, %arg16: memref<8x1152xf32, #tpu.memory_space<vmem>>, %arg17: memref<8x128xf32, #tpu.memory_space<vmem>>, %arg18: memref<8x128xf32, #tpu.memory_space<vmem>>) attributes {dimension_semantics = [#tpu.dimension_semantics<arbitrary>], iteration_bounds = array<i64: 1>, scalar_prefetch = 0 : i64, scratch_operands = 6 : i64, tpu.core_type = #tpu.core_type<tc>, window_params = [{pipeline_mode = #tpu.pipeline_mode<synchronous>, transform_indices = @transform_0, window_bounds = array<i64: 168, 256>}, {pipeline_mode = #tpu.pipeline_mode<synchronous>, transform_indices = @transform_1, window_bounds = array<i64: 256, 128>}, {pipeline_mode = #tpu.pipeline_mode<synchronous>, transform_indices = @transform_2, window_bounds = array<i64: 1, 128>}, {pipeline_mode = #tpu.pipeline_mode<synchronous>, transform_indices = @transform_3, window_bounds = array<i64: 2048, 128>}, {pipeline_mode = #tpu.pipeline_mode<synchronous>, transform_indices = @transform_4, window_bounds = array<i64: 1, 128>}, {pipeline_mode = #tpu.pipeline_mode<synchronous>, transform_indices = @transform_5, window_bounds = array<i64: 1152, 128>}, {pipeline_mode = #tpu.pipeline_mode<synchronous>, transform_indices = @transform_6, window_bounds = array<i64: 1, 128>}, {pipeline_mode = #tpu.pipeline_mode<synchronous>, transform_indices = @transform_7, window_bounds = array<i64: 128, 512>}, {pipeline_mode = #tpu.pipeline_mode<synchronous>, transform_indices = @transform_8, window_bounds = array<i64: 1, 512>}, {pipeline_mode = #tpu.pipeline_mode<synchronous>, transform_indices = @transform_9, window_bounds = array<i64: 512, 128>}, {pipeline_mode = #tpu.pipeline_mode<synchronous>, transform_indices = @transform_10, window_bounds = array<i64: 1, 128>}, {pipeline_mode = #tpu.pipeline_mode<synchronous>, transform_indices = @transform_11, window_bounds = array<i64: 8, 128>}]} {
    %c0 = arith.constant 0 : index
    %c0_0 = arith.constant 0 : index
    %0 = vector.load %arg1[%c0, %c0_0] : memref<168x256xbf16, #tpu.memory_space<vmem>>, vector<168x256xbf16>
    %c0_1 = arith.constant 0 : index
    %c0_2 = arith.constant 0 : index
    %1 = vector.load %arg2[%c0_1, %c0_2] : memref<256x128xbf16, #tpu.memory_space<vmem>>, vector<256x128xbf16>
    %cst = arith.constant dense<0.000000e+00> : vector<168x128xf32>
    %2 = tpu.matmul %0, %1, %cst {dimension_numbers = #tpu.dot_dimension_numbers<[1], [0], [0], [1], [0, 0, 1, 1], [], []>} : vector<168x256xbf16>, vector<256x128xbf16>, vector<168x128xf32> -> vector<168x128xf32>
    %c0_3 = arith.constant 0 : index
    %c0_4 = arith.constant 0 : index
    %3 = vector.load %arg3[%c0_3, %c0_4] : memref<1x128xf32, #tpu.memory_space<vmem>>, vector<1x128xf32>
    %4 = vector.broadcast %3 : vector<1x128xf32> to vector<168x128xf32>
    %5 = arith.addf %2, %4 : vector<168x128xf32>
    %cst_5 = arith.constant 0.000000e+00 : f32
    %6 = vector.broadcast %cst_5 : f32 to vector<168x128xf32>
    %7 = arith.maximumf %5, %6 : vector<168x128xf32>
    %c0_6 = arith.constant 0 : index
    %c0_7 = arith.constant 0 : index
    %8 = vector.load %arg13[%c0_6, %c0_7] : memref<168x128xf32, #tpu.memory_space<vmem>>, vector<168x128xf32>
    tpu.vector_store %arg13[%c0_6, %c0_7], %7 {strides = array<i32>} : memref<168x128xf32, #tpu.memory_space<vmem>>, vector<168x128xf32>,
    %cst_8 = arith.constant 0.000000e+00 : f32
    %9 = vector.broadcast %cst_8 : f32 to vector<24x2048xf32>
    %c0_9 = arith.constant 0 : index
    %c0_10 = arith.constant 0 : index
    %10 = vector.load %arg14[%c0_9, %c0_10] : memref<24x2048xf32, #tpu.memory_space<vmem>>, vector<24x2048xf32>
    tpu.vector_store %arg14[%c0_9, %c0_10], %9 {strides = array<i32>} : memref<24x2048xf32, #tpu.memory_space<vmem>>, vector<24x2048xf32>,
    %c0_11 = arith.constant 0 : index
    %c0_12 = arith.constant 0 : index
    %11 = vector.load %arg13[%c0_11, %c0_12] : memref<168x128xf32, #tpu.memory_space<vmem>>, vector<1x128xf32>
    %c0_13 = arith.constant 0 : index
    %c0_14 = arith.constant 0 : index
    %12 = vector.load %arg14[%c0_13, %c0_14] : memref<24x2048xf32, #tpu.memory_space<vmem>>, vector<1x128xf32>
    tpu.vector_store %arg14[%c0_13, %c0_14], %11 {strides = array<i32>} : memref<24x2048xf32, #tpu.memory_space<vmem>>, vector<1x128xf32>,
    %c1 = arith.constant 1 : index
    %c0_15 = arith.constant 0 : index
    %13 = vector.load %arg13[%c1, %c0_15] : memref<168x128xf32, #tpu.memory_space<vmem>>, vector<1x128xf32>
    %c0_16 = arith.constant 0 : index
    %c128 = arith.constant 128 : index
    %14 = vector.load %arg14[%c0_16, %c128] : memref<24x2048xf32, #tpu.memory_space<vmem>>, vector<1x128xf32>
    tpu.vector_store %arg14[%c0_16, %c128], %13 {strides = array<i32>} : memref<24x2048xf32, #tpu.memory_space<vmem>>, vector<1x128xf32>,
    %c2 = arith.constant 2 : index
    %c0_17 = arith.constant 0 : index
    %15 = vector.load %arg13[%c2, %c0_17] : memref<168x128xf32, #tpu.memory_space<vmem>>, vector<1x128xf32>
    %c0_18 = arith.constant 0 : index
    %c256 = arith.constant 256 : index
    %16 = vector.load %arg14[%c0_18, %c256] : memref<24x2048xf32, #tpu.memory_space<vmem>>, vector<1x128xf32>
    tpu.vector_store %arg14[%c0_18, %c256], %15 {strides = array<i32>} : memref<24x2048xf32, #tpu.memory_space<vmem>>, vector<1x128xf32>,
    %c3 = arith.constant 3 : index
    %c0_19 = arith.constant 0 : index
    %17 = vector.load %arg13[%c3, %c0_19] : memref<168x128xf32, #tpu.memory_space<vmem>>, vector<1x128xf32>
    %c0_20 = arith.constant 0 : index
    %c384 = arith.constant 384 : index
    %18 = vector.load %arg14[%c0_20, %c384] : memref<24x2048xf32, #tpu.memory_space<vmem>>, vector<1x128xf32>
    tpu.vector_store %arg14[%c0_20, %c384], %17 {strides = array<i32>} : memref<24x2048xf32, #tpu.memory_space<vmem>>, vector<1x128xf32>,
    %c9 = arith.constant 9 : index
    %c0_21 = arith.constant 0 : index
    %19 = vector.load %arg13[%c9, %c0_21] : memref<168x128xf32, #tpu.memory_space<vmem>>, vector<1x128xf32>
    %c0_22 = arith.constant 0 : index
    %c512 = arith.constant 512 : index
    %20 = vector.load %arg14[%c0_22, %c512] : memref<24x2048xf32, #tpu.memory_space<vmem>>, vector<1x128xf32>
    tpu.vector_store %arg14[%c0_22, %c512], %19 {strides = array<i32>} : memref<24x2048xf32, #tpu.memory_space<vmem>>, vector<1x128xf32>,
    %c10 = arith.constant 10 : index
    %c0_23 = arith.constant 0 : index
    %21 = vector.load %arg13[%c10, %c0_23] : memref<168x128xf32, #tpu.memory_space<vmem>>, vector<1x128xf32>
    %c0_24 = arith.constant 0 : index
    %c640 = arith.constant 640 : index
    %22 = vector.load %arg14[%c0_24, %c640] : memref<24x2048xf32, #tpu.memory_space<vmem>>, vector<1x128xf32>
    tpu.vector_store %arg14[%c0_24, %c640], %21 {strides = array<i32>} : memref<24x2048xf32, #tpu.memory_space<vmem>>, vector<1x128xf32>,
    %c11 = arith.constant 11 : index
    %c0_25 = arith.constant 0 : index
    %23 = vector.load %arg13[%c11, %c0_25] : memref<168x128xf32, #tpu.memory_space<vmem>>, vector<1x128xf32>
    %c0_26 = arith.constant 0 : index
    %c768 = arith.constant 768 : index
    %24 = vector.load %arg14[%c0_26, %c768] : memref<24x2048xf32, #tpu.memory_space<vmem>>, vector<1x128xf32>
    tpu.vector_store %arg14[%c0_26, %c768], %23 {strides = array<i32>} : memref<24x2048xf32, #tpu.memory_space<vmem>>, vector<1x128xf32>,
    %c12 = arith.constant 12 : index
    %c0_27 = arith.constant 0 : index
    %25 = vector.load %arg13[%c12, %c0_27] : memref<168x128xf32, #tpu.memory_space<vmem>>, vector<1x128xf32>
    %c0_28 = arith.constant 0 : index
    %c896 = arith.constant 896 : index
    %26 = vector.load %arg14[%c0_28, %c896] : memref<24x2048xf32, #tpu.memory_space<vmem>>, vector<1x128xf32>
    tpu.vector_store %arg14[%c0_28, %c896], %25 {strides = array<i32>} : memref<24x2048xf32, #tpu.memory_space<vmem>>, vector<1x128xf32>,
    %c18 = arith.constant 18 : index
    %c0_29 = arith.constant 0 : index
    %27 = vector.load %arg13[%c18, %c0_29] : memref<168x128xf32, #tpu.memory_space<vmem>>, vector<1x128xf32>
    %c0_30 = arith.constant 0 : index
    %c1024 = arith.constant 1024 : index
    %28 = vector.load %arg14[%c0_30, %c1024] : memref<24x2048xf32, #tpu.memory_space<vmem>>, vector<1x128xf32>
    tpu.vector_store %arg14[%c0_30, %c1024], %27 {strides = array<i32>} : memref<24x2048xf32, #tpu.memory_space<vmem>>, vector<1x128xf32>,
    %c19 = arith.constant 19 : index
    %c0_31 = arith.constant 0 : index
    %29 = vector.load %arg13[%c19, %c0_31] : memref<168x128xf32, #tpu.memory_space<vmem>>, vector<1x128xf32>
    %c0_32 = arith.constant 0 : index
    %c1152 = arith.constant 1152 : index
    %30 = vector.load %arg14[%c0_32, %c1152] : memref<24x2048xf32, #tpu.memory_space<vmem>>, vector<1x128xf32>
    tpu.vector_store %arg14[%c0_32, %c1152], %29 {strides = array<i32>} : memref<24x2048xf32, #tpu.memory_space<vmem>>, vector<1x128xf32>,
    %c20 = arith.constant 20 : index
    %c0_33 = arith.constant 0 : index
    %31 = vector.load %arg13[%c20, %c0_33] : memref<168x128xf32, #tpu.memory_space<vmem>>, vector<1x128xf32>
    %c0_34 = arith.constant 0 : index
    %c1280 = arith.constant 1280 : index
    %32 = vector.load %arg14[%c0_34, %c1280] : memref<24x2048xf32, #tpu.memory_space<vmem>>, vector<1x128xf32>
    tpu.vector_store %arg14[%c0_34, %c1280], %31 {strides = array<i32>} : memref<24x2048xf32, #tpu.memory_space<vmem>>, vector<1x128xf32>,
    %c21 = arith.constant 21 : index
    %c0_35 = arith.constant 0 : index
    %33 = vector.load %arg13[%c21, %c0_35] : memref<168x128xf32, #tpu.memory_space<vmem>>, vector<1x128xf32>
    %c0_36 = arith.constant 0 : index
    %c1408 = arith.constant 1408 : index
    %34 = vector.load %arg14[%c0_36, %c1408] : memref<24x2048xf32, #tpu.memory_space<vmem>>, vector<1x128xf32>
    tpu.vector_store %arg14[%c0_36, %c1408], %33 {strides = array<i32>} : memref<24x2048xf32, #tpu.memory_space<vmem>>, vector<1x128xf32>,
    %c27 = arith.constant 27 : index
    %c0_37 = arith.constant 0 : index
    %35 = vector.load %arg13[%c27, %c0_37] : memref<168x128xf32, #tpu.memory_space<vmem>>, vector<1x128xf32>
    %c0_38 = arith.constant 0 : index
    %c1536 = arith.constant 1536 : index
    %36 = vector.load %arg14[%c0_38, %c1536] : memref<24x2048xf32, #tpu.memory_space<vmem>>, vector<1x128xf32>
    tpu.vector_store %arg14[%c0_38, %c1536], %35 {strides = array<i32>} : memref<24x2048xf32, #tpu.memory_space<vmem>>, vector<1x128xf32>,
    %c28 = arith.constant 28 : index
    %c0_39 = arith.constant 0 : index
    %37 = vector.load %arg13[%c28, %c0_39] : memref<168x128xf32, #tpu.memory_space<vmem>>, vector<1x128xf32>
    %c0_40 = arith.constant 0 : index
    %c1664 = arith.constant 1664 : index
    %38 = vector.load %arg14[%c0_40, %c1664] : memref<24x2048xf32, #tpu.memory_space<vmem>>, vector<1x128xf32>
    tpu.vector_store %arg14[%c0_40, %c1664], %37 {strides = array<i32>} : memref<24x2048xf32, #tpu.memory_space<vmem>>, vector<1x128xf32>,
    %c29 = arith.constant 29 : index
    %c0_41 = arith.constant 0 : index
    %39 = vector.load %arg13[%c29, %c0_41] : memref<168x128xf32, #tpu.memory_space<vmem>>, vector<1x128xf32>
    %c0_42 = arith.constant 0 : index
    %c1792 = arith.constant 1792 : index
    %40 = vector.load %arg14[%c0_42, %c1792] : memref<24x2048xf32, #tpu.memory_space<vmem>>, vector<1x128xf32>
    tpu.vector_store %arg14[%c0_42, %c1792], %39 {strides = array<i32>} : memref<24x2048xf32, #tpu.memory_space<vmem>>, vector<1x128xf32>,
    %c30 = arith.constant 30 : index
    %c0_43 = arith.constant 0 : index
    %41 = vector.load %arg13[%c30, %c0_43] : memref<168x128xf32, #tpu.memory_space<vmem>>, vector<1x128xf32>
    %c0_44 = arith.constant 0 : index
    %c1920 = arith.constant 1920 : index
    %42 = vector.load %arg14[%c0_44, %c1920] : memref<24x2048xf32, #tpu.memory_space<vmem>>, vector<1x128xf32>
    tpu.vector_store %arg14[%c0_44, %c1920], %41 {strides = array<i32>} : memref<24x2048xf32, #tpu.memory_space<vmem>>, vector<1x128xf32>,
    %c2_45 = arith.constant 2 : index
    %c0_46 = arith.constant 0 : index
    %43 = vector.load %arg13[%c2_45, %c0_46] : memref<168x128xf32, #tpu.memory_space<vmem>>, vector<1x128xf32>
    %c1_47 = arith.constant 1 : index
    %c0_48 = arith.constant 0 : index
    %44 = vector.load %arg14[%c1_47, %c0_48] : memref<24x2048xf32, #tpu.memory_space<vmem>>, vector<1x128xf32>
    tpu.vector_store %arg14[%c1_47, %c0_48], %43 {strides = array<i32>} : memref<24x2048xf32, #tpu.memory_space<vmem>>, vector<1x128xf32>,
    %c3_49 = arith.constant 3 : index
    %c0_50 = arith.constant 0 : index
    %45 = vector.load %arg13[%c3_49, %c0_50] : memref<168x128xf32, #tpu.memory_space<vmem>>, vector<1x128xf32>
    %c1_51 = arith.constant 1 : index
    %c128_52 = arith.constant 128 : index
    %46 = vector.load %arg14[%c1_51, %c128_52] : memref<24x2048xf32, #tpu.memory_space<vmem>>, vector<1x128xf32>
    tpu.vector_store %arg14[%c1_51, %c128_52], %45 {strides = array<i32>} : memref<24x2048xf32, #tpu.memory_space<vmem>>, vector<1x128xf32>,
    %c4 = arith.constant 4 : index
    %c0_53 = arith.constant 0 : index
    %47 = vector.load %arg13[%c4, %c0_53] : memref<168x128xf32, #tpu.memory_space<vmem>>, vector<1x128xf32>
    %c1_54 = arith.constant 1 : index
    %c256_55 = arith.constant 256 : index
    %48 = vector.load %arg14[%c1_54, %c256_55] : memref<24x2048xf32, #tpu.memory_space<vmem>>, vector<1x128xf32>
    tpu.vector_store %arg14[%c1_54, %c256_55], %47 {strides = array<i32>} : memref<24x2048xf32, #tpu.memory_space<vmem>>, vector<1x128xf32>,
    %c5 = arith.constant 5 : index
    %c0_56 = arith.constant 0 : index
    %49 = vector.load %arg13[%c5, %c0_56] : memref<168x128xf32, #tpu.memory_space<vmem>>, vector<1x128xf32>
    %c1_57 = arith.constant 1 : index
    %c384_58 = arith.constant 384 : index
    %50 = vector.load %arg14[%c1_57, %c384_58] : memref<24x2048xf32, #tpu.memory_space<vmem>>, vector<1x128xf32>
    tpu.vector_store %arg14[%c1_57, %c384_58], %49 {strides = array<i32>} : memref<24x2048xf32, #tpu.memory_space<vmem>>, vector<1x128xf32>,
    %c11_59 = arith.constant 11 : index
    %c0_60 = arith.constant 0 : index
    %51 = vector.load %arg13[%c11_59, %c0_60] : memref<168x128xf32, #tpu.memory_space<vmem>>, vector<1x128xf32>
    %c1_61 = arith.constant 1 : index
    %c512_62 = arith.constant 512 : index
    %52 = vector.load %arg14[%c1_61, %c512_62] : memref<24x2048xf32, #tpu.memory_space<vmem>>, vector<1x128xf32>
    tpu.vector_store %arg14[%c1_61, %c512_62], %51 {strides = array<i32>} : memref<24x2048xf32, #tpu.memory_space<vmem>>, vector<1x128xf32>,
    %c12_63 = arith.constant 12 : index
    %c0_64 = arith.constant 0 : index
    %53 = vector.load %arg13[%c12_63, %c0_64] : memref<168x128xf32, #tpu.memory_space<vmem>>, vector<1x128xf32>
    %c1_65 = arith.constant 1 : index
    %c640_66 = arith.constant 640 : index
    %54 = vector.load %arg14[%c1_65, %c640_66] : memref<24x2048xf32, #tpu.memory_space<vmem>>, vector<1x128xf32>
    tpu.vector_store %arg14[%c1_65, %c640_66], %53 {strides = array<i32>} : memref<24x2048xf32, #tpu.memory_space<vmem>>, vector<1x128xf32>,
    %c13 = arith.constant 13 : index
    %c0_67 = arith.constant 0 : index
    %55 = vector.load %arg13[%c13, %c0_67] : memref<168x128xf32, #tpu.memory_space<vmem>>, vector<1x128xf32>
    %c1_68 = arith.constant 1 : index
    %c768_69 = arith.constant 768 : index
    %56 = vector.load %arg14[%c1_68, %c768_69] : memref<24x2048xf32, #tpu.memory_space<vmem>>, vector<1x128xf32>
    tpu.vector_store %arg14[%c1_68, %c768_69], %55 {strides = array<i32>} : memref<24x2048xf32, #tpu.memory_space<vmem>>, vector<1x128xf32>,
    %c14 = arith.constant 14 : index
    %c0_70 = arith.constant 0 : index
    %57 = vector.load %arg13[%c14, %c0_70] : memref<168x128xf32, #tpu.memory_space<vmem>>, vector<1x128xf32>
    %c1_71 = arith.constant 1 : index
    %c896_72 = arith.constant 896 : index
    %58 = vector.load %arg14[%c1_71, %c896_72] : memref<24x2048xf32, #tpu.memory_space<vmem>>, vector<1x128xf32>
    tpu.vector_store %arg14[%c1_71, %c896_72], %57 {strides = array<i32>} : memref<24x2048xf32, #tpu.memory_space<vmem>>, vector<1x128xf32>,
    %c20_73 = arith.constant 20 : index
    %c0_74 = arith.constant 0 : index
    %59 = vector.load %arg13[%c20_73, %c0_74] : memref<168x128xf32, #tpu.memory_space<vmem>>, vector<1x128xf32>
    %c1_75 = arith.constant 1 : index
    %c1024_76 = arith.constant 1024 : index
    %60 = vector.load %arg14[%c1_75, %c1024_76] : memref<24x2048xf32, #tpu.memory_space<vmem>>, vector<1x128xf32>
    tpu.vector_store %arg14[%c1_75, %c1024_76], %59 {strides = array<i32>} : memref<24x2048xf32, #tpu.memory_space<vmem>>, vector<1x128xf32>,
    %c21_77 = arith.constant 21 : index
    %c0_78 = arith.constant 0 : index
    %61 = vector.load %arg13[%c21_77, %c0_78] : memref<168x128xf32, #tpu.memory_space<vmem>>, vector<1x128xf32>
    %c1_79 = arith.constant 1 : index
    %c1152_80 = arith.constant 1152 : index
    %62 = vector.load %arg14[%c1_79, %c1152_80] : memref<24x2048xf32, #tpu.memory_space<vmem>>, vector<1x128xf32>
    tpu.vector_store %arg14[%c1_79, %c1152_80], %61 {strides = array<i32>} : memref<24x2048xf32, #tpu.memory_space<vmem>>, vector<1x128xf32>,
    %c22 = arith.constant 22 : index
    %c0_81 = arith.constant 0 : index
    %63 = vector.load %arg13[%c22, %c0_81] : memref<168x128xf32, #tpu.memory_space<vmem>>, vector<1x128xf32>
    %c1_82 = arith.constant 1 : index
    %c1280_83 = arith.constant 1280 : index
    %64 = vector.load %arg14[%c1_82, %c1280_83] : memref<24x2048xf32, #tpu.memory_space<vmem>>, vector<1x128xf32>
    tpu.vector_store %arg14[%c1_82, %c1280_83], %63 {strides = array<i32>} : memref<24x2048xf32, #tpu.memory_space<vmem>>, vector<1x128xf32>,
    %c23 = arith.constant 23 : index
    %c0_84 = arith.constant 0 : index
    %65 = vector.load %arg13[%c23, %c0_84] : memref<168x128xf32, #tpu.memory_space<vmem>>, vector<1x128xf32>
    %c1_85 = arith.constant 1 : index
    %c1408_86 = arith.constant 1408 : index
    %66 = vector.load %arg14[%c1_85, %c1408_86] : memref<24x2048xf32, #tpu.memory_space<vmem>>, vector<1x128xf32>
    tpu.vector_store %arg14[%c1_85, %c1408_86], %65 {strides = array<i32>} : memref<24x2048xf32, #tpu.memory_space<vmem>>, vector<1x128xf32>,
    %c29_87 = arith.constant 29 : index
    %c0_88 = arith.constant 0 : index
    %67 = vector.load %arg13[%c29_87, %c0_88] : memref<168x128xf32, #tpu.memory_space<vmem>>, vector<1x128xf32>
    %c1_89 = arith.constant 1 : index
    %c1536_90 = arith.constant 1536 : index
    %68 = vector.load %arg14[%c1_89, %c1536_90] : memref<24x2048xf32, #tpu.memory_space<vmem>>, vector<1x128xf32>
    tpu.vector_store %arg14[%c1_89, %c1536_90], %67 {strides = array<i32>} : memref<24x2048xf32, #tpu.memory_space<vmem>>, vector<1x128xf32>,
    %c30_91 = arith.constant 30 : index
    %c0_92 = arith.constant 0 : index
    %69 = vector.load %arg13[%c30_91, %c0_92] : memref<168x128xf32, #tpu.memory_space<vmem>>, vector<1x128xf32>
    %c1_93 = arith.constant 1 : index
    %c1664_94 = arith.constant 1664 : index
    %70 = vector.load %arg14[%c1_93, %c1664_94] : memref<24x2048xf32, #tpu.memory_space<vmem>>, vector<1x128xf32>
    tpu.vector_store %arg14[%c1_93, %c1664_94], %69 {strides = array<i32>} : memref<24x2048xf32, #tpu.memory_space<vmem>>, vector<1x128xf32>,
    %c31 = arith.constant 31 : index
    %c0_95 = arith.constant 0 : index
    %71 = vector.load %arg13[%c31, %c0_95] : memref<168x128xf32, #tpu.memory_space<vmem>>, vector<1x128xf32>
    %c1_96 = arith.constant 1 : index
    %c1792_97 = arith.constant 1792 : index
    %72 = vector.load %arg14[%c1_96, %c1792_97] : memref<24x2048xf32, #tpu.memory_space<vmem>>, vector<1x128xf32>
    tpu.vector_store %arg14[%c1_96, %c1792_97], %71 {strides = array<i32>} : memref<24x2048xf32, #tpu.memory_space<vmem>>, vector<1x128xf32>,
    %c32 = arith.constant 32 : index
    %c0_98 = arith.constant 0 : index
    %73 = vector.load %arg13[%c32, %c0_98] : memref<168x128xf32, #tpu.memory_space<vmem>>, vector<1x128xf32>
    %c1_99 = arith.constant 1 : index
    %c1920_100 = arith.constant 1920 : index
    %74 = vector.load %arg14[%c1_99, %c1920_100] : memref<24x2048xf32, #tpu.memory_space<vmem>>, vector<1x128xf32>
    tpu.vector_store %arg14[%c1_99, %c1920_100], %73 {strides = array<i32>} : memref<24x2048xf32, #tpu.memory_space<vmem>>, vector<1x128xf32>,
    %c4_101 = arith.constant 4 : index
    %c0_102 = arith.constant 0 : index
    %75 = vector.load %arg13[%c4_101, %c0_102] : memref<168x128xf32, #tpu.memory_space<vmem>>, vector<1x128xf32>
    %c2_103 = arith.constant 2 : index
    %c0_104 = arith.constant 0 : index
    %76 = vector.load %arg14[%c2_103, %c0_104] : memref<24x2048xf32, #tpu.memory_space<vmem>>, vector<1x128xf32>
    tpu.vector_store %arg14[%c2_103, %c0_104], %75 {strides = array<i32>} : memref<24x2048xf32, #tpu.memory_space<vmem>>, vector<1x128xf32>,
    %c5_105 = arith.constant 5 : index
    %c0_106 = arith.constant 0 : index
    %77 = vector.load %arg13[%c5_105, %c0_106] : memref<168x128xf32, #tpu.memory_space<vmem>>, vector<1x128xf32>
    %c2_107 = arith.constant 2 : index
    %c128_108 = arith.constant 128 : index
    %78 = vector.load %arg14[%c2_107, %c128_108] : memref<24x2048xf32, #tpu.memory_space<vmem>>, vector<1x128xf32>
    tpu.vector_store %arg14[%c2_107, %c128_108], %77 {strides = array<i32>} : memref<24x2048xf32, #tpu.memory_space<vmem>>, vector<1x128xf32>,
    %c6 = arith.constant 6 : index
    %c0_109 = arith.constant 0 : index
    %79 = vector.load %arg13[%c6, %c0_109] : memref<168x128xf32, #tpu.memory_space<vmem>>, vector<1x128xf32>
    %c2_110 = arith.constant 2 : index
    %c256_111 = arith.constant 256 : index
    %80 = vector.load %arg14[%c2_110, %c256_111] : memref<24x2048xf32, #tpu.memory_space<vmem>>, vector<1x128xf32>
    tpu.vector_store %arg14[%c2_110, %c256_111], %79 {strides = array<i32>} : memref<24x2048xf32, #tpu.memory_space<vmem>>, vector<1x128xf32>,
    %c7 = arith.constant 7 : index
    %c0_112 = arith.constant 0 : index
    %81 = vector.load %arg13[%c7, %c0_112] : memref<168x128xf32, #tpu.memory_space<vmem>>, vector<1x128xf32>
    %c2_113 = arith.constant 2 : index
    %c384_114 = arith.constant 384 : index
    %82 = vector.load %arg14[%c2_113, %c384_114] : memref<24x2048xf32, #tpu.memory_space<vmem>>, vector<1x128xf32>
    tpu.vector_store %arg14[%c2_113, %c384_114], %81 {strides = array<i32>} : memref<24x2048xf32, #tpu.memory_space<vmem>>, vector<1x128xf32>,
    %c13_115 = arith.constant 13 : index
    %c0_116 = arith.constant 0 : index
    %83 = vector.load %arg13[%c13_115, %c0_116] : memref<168x128xf32, #tpu.memory_space<vmem>>, vector<1x128xf32>
    %c2_117 = arith.constant 2 : index
    %c512_118 = arith.constant 512 : index
    %84 = vector.load %arg14[%c2_117, %c512_118] : memref<24x2048xf32, #tpu.memory_space<vmem>>, vector<1x128xf32>
    tpu.vector_store %arg14[%c2_117, %c512_118], %83 {strides = array<i32>} : memref<24x2048xf32, #tpu.memory_space<vmem>>, vector<1x128xf32>,
    %c14_119 = arith.constant 14 : index
    %c0_120 = arith.constant 0 : index
    %85 = vector.load %arg13[%c14_119, %c0_120] : memref<168x128xf32, #tpu.memory_space<vmem>>, vector<1x128xf32>
    %c2_121 = arith.constant 2 : index
    %c640_122 = arith.constant 640 : index
    %86 = vector.load %arg14[%c2_121, %c640_122] : memref<24x2048xf32, #tpu.memory_space<vmem>>, vector<1x128xf32>
    tpu.vector_store %arg14[%c2_121, %c640_122], %85 {strides = array<i32>} : memref<24x2048xf32, #tpu.memory_space<vmem>>, vector<1x128xf32>,
    %c15 = arith.constant 15 : index
    %c0_123 = arith.constant 0 : index
    %87 = vector.load %arg13[%c15, %c0_123] : memref<168x128xf32, #tpu.memory_space<vmem>>, vector<1x128xf32>
    %c2_124 = arith.constant 2 : index
    %c768_125 = arith.constant 768 : index
    %88 = vector.load %arg14[%c2_124, %c768_125] : memref<24x2048xf32, #tpu.memory_space<vmem>>, vector<1x128xf32>
    tpu.vector_store %arg14[%c2_124, %c768_125], %87 {strides = array<i32>} : memref<24x2048xf32, #tpu.memory_space<vmem>>, vector<1x128xf32>,
    %c16 = arith.constant 16 : index
    %c0_126 = arith.constant 0 : index
    %89 = vector.load %arg13[%c16, %c0_126] : memref<168x128xf32, #tpu.memory_space<vmem>>, vector<1x128xf32>
    %c2_127 = arith.constant 2 : index
    %c896_128 = arith.constant 896 : index
    %90 = vector.load %arg14[%c2_127, %c896_128] : memref<24x2048xf32, #tpu.memory_space<vmem>>, vector<1x128xf32>
    tpu.vector_store %arg14[%c2_127, %c896_128], %89 {strides = array<i32>} : memref<24x2048xf32, #tpu.memory_space<vmem>>, vector<1x128xf32>,
    %c22_129 = arith.constant 22 : index
    %c0_130 = arith.constant 0 : index
    %91 = vector.load %arg13[%c22_129, %c0_130] : memref<168x128xf32, #tpu.memory_space<vmem>>, vector<1x128xf32>
    %c2_131 = arith.constant 2 : index
    %c1024_132 = arith.constant 1024 : index
    %92 = vector.load %arg14[%c2_131, %c1024_132] : memref<24x2048xf32, #tpu.memory_space<vmem>>, vector<1x128xf32>
    tpu.vector_store %arg14[%c2_131, %c1024_132], %91 {strides = array<i32>} : memref<24x2048xf32, #tpu.memory_space<vmem>>, vector<1x128xf32>,
    %c23_133 = arith.constant 23 : index
    %c0_134 = arith.constant 0 : index
    %93 = vector.load %arg13[%c23_133, %c0_134] : memref<168x128xf32, #tpu.memory_space<vmem>>, vector<1x128xf32>
    %c2_135 = arith.constant 2 : index
    %c1152_136 = arith.constant 1152 : index
    %94 = vector.load %arg14[%c2_135, %c1152_136] : memref<24x2048xf32, #tpu.memory_space<vmem>>, vector<1x128xf32>
    tpu.vector_store %arg14[%c2_135, %c1152_136], %93 {strides = array<i32>} : memref<24x2048xf32, #tpu.memory_space<vmem>>, vector<1x128xf32>,
    %c24 = arith.constant 24 : index
    %c0_137 = arith.constant 0 : index
    %95 = vector.load %arg13[%c24, %c0_137] : memref<168x128xf32, #tpu.memory_space<vmem>>, vector<1x128xf32>
    %c2_138 = arith.constant 2 : index
    %c1280_139 = arith.constant 1280 : index
    %96 = vector.load %arg14[%c2_138, %c1280_139] : memref<24x2048xf32, #tpu.memory_space<vmem>>, vector<1x128xf32>
    tpu.vector_store %arg14[%c2_138, %c1280_139], %95 {strides = array<i32>} : memref<24x2048xf32, #tpu.memory_space<vmem>>, vector<1x128xf32>,
    %c25 = arith.constant 25 : index
    %c0_140 = arith.constant 0 : index
    %97 = vector.load %arg13[%c25, %c0_140] : memref<168x128xf32, #tpu.memory_space<vmem>>, vector<1x128xf32>
    %c2_141 = arith.constant 2 : index
    %c1408_142 = arith.constant 1408 : index
    %98 = vector.load %arg14[%c2_141, %c1408_142] : memref<24x2048xf32, #tpu.memory_space<vmem>>, vector<1x128xf32>
    tpu.vector_store %arg14[%c2_141, %c1408_142], %97 {strides = array<i32>} : memref<24x2048xf32, #tpu.memory_space<vmem>>, vector<1x128xf32>,
    %c31_143 = arith.constant 31 : index
    %c0_144 = arith.constant 0 : index
    %99 = vector.load %arg13[%c31_143, %c0_144] : memref<168x128xf32, #tpu.memory_space<vmem>>, vector<1x128xf32>
    %c2_145 = arith.constant 2 : index
    %c1536_146 = arith.constant 1536 : index
    %100 = vector.load %arg14[%c2_145, %c1536_146] : memref<24x2048xf32, #tpu.memory_space<vmem>>, vector<1x128xf32>
    tpu.vector_store %arg14[%c2_145, %c1536_146], %99 {strides = array<i32>} : memref<24x2048xf32, #tpu.memory_space<vmem>>, vector<1x128xf32>,
    %c32_147 = arith.constant 32 : index
    %c0_148 = arith.constant 0 : index
    %101 = vector.load %arg13[%c32_147, %c0_148] : memref<168x128xf32, #tpu.memory_space<vmem>>, vector<1x128xf32>
    %c2_149 = arith.constant 2 : index
    %c1664_150 = arith.constant 1664 : index
    %102 = vector.load %arg14[%c2_149, %c1664_150] : memref<24x2048xf32, #tpu.memory_space<vmem>>, vector<1x128xf32>
    tpu.vector_store %arg14[%c2_149, %c1664_150], %101 {strides = array<i32>} : memref<24x2048xf32, #tpu.memory_space<vmem>>, vector<1x128xf32>,
    %c33 = arith.constant 33 : index
    %c0_151 = arith.constant 0 : index
    %103 = vector.load %arg13[%c33, %c0_151] : memref<168x128xf32, #tpu.memory_space<vmem>>, vector<1x128xf32>
    %c2_152 = arith.constant 2 : index
    %c1792_153 = arith.constant 1792 : index
    %104 = vector.load %arg14[%c2_152, %c1792_153] : memref<24x2048xf32, #tpu.memory_space<vmem>>, vector<1x128xf32>
    tpu.vector_store %arg14[%c2_152, %c1792_153], %103 {strides = array<i32>} : memref<24x2048xf32, #tpu.memory_space<vmem>>, vector<1x128xf32>,
    %c34 = arith.constant 34 : index
    %c0_154 = arith.constant 0 : index
    %105 = vector.load %arg13[%c34, %c0_154] : memref<168x128xf32, #tpu.memory_space<vmem>>, vector<1x128xf32>
    %c2_155 = arith.constant 2 : index
    %c1920_156 = arith.constant 1920 : index
    %106 = vector.load %arg14[%c2_155, %c1920_156] : memref<24x2048xf32, #tpu.memory_space<vmem>>, vector<1x128xf32>
    tpu.vector_store %arg14[%c2_155, %c1920_156], %105 {strides = array<i32>} : memref<24x2048xf32, #tpu.memory_space<vmem>>, vector<1x128xf32>,
    %c18_157 = arith.constant 18 : index
    %c0_158 = arith.constant 0 : index
    %107 = vector.load %arg13[%c18_157, %c0_158] : memref<168x128xf32, #tpu.memory_space<vmem>>, vector<1x128xf32>
    %c3_159 = arith.constant 3 : index
    %c0_160 = arith.constant 0 : index
    %108 = vector.load %arg14[%c3_159, %c0_160] : memref<24x2048xf32, #tpu.memory_space<vmem>>, vector<1x128xf32>
    tpu.vector_store %arg14[%c3_159, %c0_160], %107 {strides = array<i32>} : memref<24x2048xf32, #tpu.memory_space<vmem>>, vector<1x128xf32>,
    %c19_161 = arith.constant 19 : index
    %c0_162 = arith.constant 0 : index
    %109 = vector.load %arg13[%c19_161, %c0_162] : memref<168x128xf32, #tpu.memory_space<vmem>>, vector<1x128xf32>
    %c3_163 = arith.constant 3 : index
    %c128_164 = arith.constant 128 : index
    %110 = vector.load %arg14[%c3_163, %c128_164] : memref<24x2048xf32, #tpu.memory_space<vmem>>, vector<1x128xf32>
    tpu.vector_store %arg14[%c3_163, %c128_164], %109 {strides = array<i32>} : memref<24x2048xf32, #tpu.memory_space<vmem>>, vector<1x128xf32>,
    %c20_165 = arith.constant 20 : index
    %c0_166 = arith.constant 0 : index
    %111 = vector.load %arg13[%c20_165, %c0_166] : memref<168x128xf32, #tpu.memory_space<vmem>>, vector<1x128xf32>
    %c3_167 = arith.constant 3 : index
    %c256_168 = arith.constant 256 : index
    %112 = vector.load %arg14[%c3_167, %c256_168] : memref<24x2048xf32, #tpu.memory_space<vmem>>, vector<1x128xf32>
    tpu.vector_store %arg14[%c3_167, %c256_168], %111 {strides = array<i32>} : memref<24x2048xf32, #tpu.memory_space<vmem>>, vector<1x128xf32>,
    %c21_169 = arith.constant 21 : index
    %c0_170 = arith.constant 0 : index
    %113 = vector.load %arg13[%c21_169, %c0_170] : memref<168x128xf32, #tpu.memory_space<vmem>>, vector<1x128xf32>
    %c3_171 = arith.constant 3 : index
    %c384_172 = arith.constant 384 : index
    %114 = vector.load %arg14[%c3_171, %c384_172] : memref<24x2048xf32, #tpu.memory_space<vmem>>, vector<1x128xf32>
    tpu.vector_store %arg14[%c3_171, %c384_172], %113 {strides = array<i32>} : memref<24x2048xf32, #tpu.memory_space<vmem>>, vector<1x128xf32>,
    %c27_173 = arith.constant 27 : index
    %c0_174 = arith.constant 0 : index
    %115 = vector.load %arg13[%c27_173, %c0_174] : memref<168x128xf32, #tpu.memory_space<vmem>>, vector<1x128xf32>
    %c3_175 = arith.constant 3 : index
    %c512_176 = arith.constant 512 : index
    %116 = vector.load %arg14[%c3_175, %c512_176] : memref<24x2048xf32, #tpu.memory_space<vmem>>, vector<1x128xf32>
    tpu.vector_store %arg14[%c3_175, %c512_176], %115 {strides = array<i32>} : memref<24x2048xf32, #tpu.memory_space<vmem>>, vector<1x128xf32>,
    %c28_177 = arith.constant 28 : index
    %c0_178 = arith.constant 0 : index
    %117 = vector.load %arg13[%c28_177, %c0_178] : memref<168x128xf32, #tpu.memory_space<vmem>>, vector<1x128xf32>
    %c3_179 = arith.constant 3 : index
    %c640_180 = arith.constant 640 : index
    %118 = vector.load %arg14[%c3_179, %c640_180] : memref<24x2048xf32, #tpu.memory_space<vmem>>, vector<1x128xf32>
    tpu.vector_store %arg14[%c3_179, %c640_180], %117 {strides = array<i32>} : memref<24x2048xf32, #tpu.memory_space<vmem>>, vector<1x128xf32>,
    %c29_181 = arith.constant 29 : index
    %c0_182 = arith.constant 0 : index
    %119 = vector.load %arg13[%c29_181, %c0_182] : memref<168x128xf32, #tpu.memory_space<vmem>>, vector<1x128xf32>
    %c3_183 = arith.constant 3 : index
    %c768_184 = arith.constant 768 : index
    %120 = vector.load %arg14[%c3_183, %c768_184] : memref<24x2048xf32, #tpu.memory_space<vmem>>, vector<1x128xf32>
    tpu.vector_store %arg14[%c3_183, %c768_184], %119 {strides = array<i32>} : memref<24x2048xf32, #tpu.memory_space<vmem>>, vector<1x128xf32>,
    %c30_185 = arith.constant 30 : index
    %c0_186 = arith.constant 0 : index
    %121 = vector.load %arg13[%c30_185, %c0_186] : memref<168x128xf32, #tpu.memory_space<vmem>>, vector<1x128xf32>
    %c3_187 = arith.constant 3 : index
    %c896_188 = arith.constant 896 : index
    %122 = vector.load %arg14[%c3_187, %c896_188] : memref<24x2048xf32, #tpu.memory_space<vmem>>, vector<1x128xf32>
    tpu.vector_store %arg14[%c3_187, %c896_188], %121 {strides = array<i32>} : memref<24x2048xf32, #tpu.memory_space<vmem>>, vector<1x128xf32>,
    %c36 = arith.constant 36 : index
    %c0_189 = arith.constant 0 : index
    %123 = vector.load %arg13[%c36, %c0_189] : memref<168x128xf32, #tpu.memory_space<vmem>>, vector<1x128xf32>
    %c3_190 = arith.constant 3 : index
    %c1024_191 = arith.constant 1024 : index
    %124 = vector.load %arg14[%c3_190, %c1024_191] : memref<24x2048xf32, #tpu.memory_space<vmem>>, vector<1x128xf32>
    tpu.vector_store %arg14[%c3_190, %c1024_191], %123 {strides = array<i32>} : memref<24x2048xf32, #tpu.memory_space<vmem>>, vector<1x128xf32>,
    %c37 = arith.constant 37 : index
    %c0_192 = arith.constant 0 : index
    %125 = vector.load %arg13[%c37, %c0_192] : memref<168x128xf32, #tpu.memory_space<vmem>>, vector<1x128xf32>
    %c3_193 = arith.constant 3 : index
    %c1152_194 = arith.constant 1152 : index
    %126 = vector.load %arg14[%c3_193, %c1152_194] : memref<24x2048xf32, #tpu.memory_space<vmem>>, vector<1x128xf32>
    tpu.vector_store %arg14[%c3_193, %c1152_194], %125 {strides = array<i32>} : memref<24x2048xf32, #tpu.memory_space<vmem>>, vector<1x128xf32>,
    %c38 = arith.constant 38 : index
    %c0_195 = arith.constant 0 : index
    %127 = vector.load %arg13[%c38, %c0_195] : memref<168x128xf32, #tpu.memory_space<vmem>>, vector<1x128xf32>
    %c3_196 = arith.constant 3 : index
    %c1280_197 = arith.constant 1280 : index
    %128 = vector.load %arg14[%c3_196, %c1280_197] : memref<24x2048xf32, #tpu.memory_space<vmem>>, vector<1x128xf32>
    tpu.vector_store %arg14[%c3_196, %c1280_197], %127 {strides = array<i32>} : memref<24x2048xf32, #tpu.memory_space<vmem>>, vector<1x128xf32>,
    %c39 = arith.constant 39 : index
    %c0_198 = arith.constant 0 : index
    %129 = vector.load %arg13[%c39, %c0_198] : memref<168x128xf32, #tpu.memory_space<vmem>>, vector<1x128xf32>
    %c3_199 = arith.constant 3 : index
    %c1408_200 = arith.constant 1408 : index
    %130 = vector.load %arg14[%c3_199, %c1408_200] : memref<24x2048xf32, #tpu.memory_space<vmem>>, vector<1x128xf32>
    tpu.vector_store %arg14[%c3_199, %c1408_200], %129 {strides = array<i32>} : memref<24x2048xf32, #tpu.memory_space<vmem>>, vector<1x128xf32>,
    %c45 = arith.constant 45 : index
    %c0_201 = arith.constant 0 : index
    %131 = vector.load %arg13[%c45, %c0_201] : memref<168x128xf32, #tpu.memory_space<vmem>>, vector<1x128xf32>
    %c3_202 = arith.constant 3 : index
    %c1536_203 = arith.constant 1536 : index
    %132 = vector.load %arg14[%c3_202, %c1536_203] : memref<24x2048xf32, #tpu.memory_space<vmem>>, vector<1x128xf32>
    tpu.vector_store %arg14[%c3_202, %c1536_203], %131 {strides = array<i32>} : memref<24x2048xf32, #tpu.memory_space<vmem>>, vector<1x128xf32>,
    %c46 = arith.constant 46 : index
    %c0_204 = arith.constant 0 : index
    %133 = vector.load %arg13[%c46, %c0_204] : memref<168x128xf32, #tpu.memory_space<vmem>>, vector<1x128xf32>
    %c3_205 = arith.constant 3 : index
    %c1664_206 = arith.constant 1664 : index
    %134 = vector.load %arg14[%c3_205, %c1664_206] : memref<24x2048xf32, #tpu.memory_space<vmem>>, vector<1x128xf32>
    tpu.vector_store %arg14[%c3_205, %c1664_206], %133 {strides = array<i32>} : memref<24x2048xf32, #tpu.memory_space<vmem>>, vector<1x128xf32>,
    %c47 = arith.constant 47 : index
    %c0_207 = arith.constant 0 : index
    %135 = vector.load %arg13[%c47, %c0_207] : memref<168x128xf32, #tpu.memory_space<vmem>>, vector<1x128xf32>
    %c3_208 = arith.constant 3 : index
    %c1792_209 = arith.constant 1792 : index
    %136 = vector.load %arg14[%c3_208, %c1792_209] : memref<24x2048xf32, #tpu.memory_space<vmem>>, vector<1x128xf32>
    tpu.vector_store %arg14[%c3_208, %c1792_209], %135 {strides = array<i32>} : memref<24x2048xf32, #tpu.memory_space<vmem>>, vector<1x128xf32>,
    %c48 = arith.constant 48 : index
    %c0_210 = arith.constant 0 : index
    %137 = vector.load %arg13[%c48, %c0_210] : memref<168x128xf32, #tpu.memory_space<vmem>>, vector<1x128xf32>
    %c3_211 = arith.constant 3 : index
    %c1920_212 = arith.constant 1920 : index
    %138 = vector.load %arg14[%c3_211, %c1920_212] : memref<24x2048xf32, #tpu.memory_space<vmem>>, vector<1x128xf32>
    tpu.vector_store %arg14[%c3_211, %c1920_212], %137 {strides = array<i32>} : memref<24x2048xf32, #tpu.memory_space<vmem>>, vector<1x128xf32>,
    %c20_213 = arith.constant 20 : index
    %c0_214 = arith.constant 0 : index
    %139 = vector.load %arg13[%c20_213, %c0_214] : memref<168x128xf32, #tpu.memory_space<vmem>>, vector<1x128xf32>
    %c4_215 = arith.constant 4 : index
    %c0_216 = arith.constant 0 : index
    %140 = vector.load %arg14[%c4_215, %c0_216] : memref<24x2048xf32, #tpu.memory_space<vmem>>, vector<1x128xf32>
    tpu.vector_store %arg14[%c4_215, %c0_216], %139 {strides = array<i32>} : memref<24x2048xf32, #tpu.memory_space<vmem>>, vector<1x128xf32>,
    %c21_217 = arith.constant 21 : index
    %c0_218 = arith.constant 0 : index
    %141 = vector.load %arg13[%c21_217, %c0_218] : memref<168x128xf32, #tpu.memory_space<vmem>>, vector<1x128xf32>
    %c4_219 = arith.constant 4 : index
    %c128_220 = arith.constant 128 : index
    %142 = vector.load %arg14[%c4_219, %c128_220] : memref<24x2048xf32, #tpu.memory_space<vmem>>, vector<1x128xf32>
    tpu.vector_store %arg14[%c4_219, %c128_220], %141 {strides = array<i32>} : memref<24x2048xf32, #tpu.memory_space<vmem>>, vector<1x128xf32>,
    %c22_221 = arith.constant 22 : index
    %c0_222 = arith.constant 0 : index
    %143 = vector.load %arg13[%c22_221, %c0_222] : memref<168x128xf32, #tpu.memory_space<vmem>>, vector<1x128xf32>
    %c4_223 = arith.constant 4 : index
    %c256_224 = arith.constant 256 : index
    %144 = vector.load %arg14[%c4_223, %c256_224] : memref<24x2048xf32, #tpu.memory_space<vmem>>, vector<1x128xf32>
    tpu.vector_store %arg14[%c4_223, %c256_224], %143 {strides = array<i32>} : memref<24x2048xf32, #tpu.memory_space<vmem>>, vector<1x128xf32>,
    %c23_225 = arith.constant 23 : index
    %c0_226 = arith.constant 0 : index
    %145 = vector.load %arg13[%c23_225, %c0_226] : memref<168x128xf32, #tpu.memory_space<vmem>>, vector<1x128xf32>
    %c4_227 = arith.constant 4 : index
    %c384_228 = arith.constant 384 : index
    %146 = vector.load %arg14[%c4_227, %c384_228] : memref<24x2048xf32, #tpu.memory_space<vmem>>, vector<1x128xf32>
    tpu.vector_store %arg14[%c4_227, %c384_228], %145 {strides = array<i32>} : memref<24x2048xf32, #tpu.memory_space<vmem>>, vector<1x128xf32>,
    %c29_229 = arith.constant 29 : index
    %c0_230 = arith.constant 0 : index
    %147 = vector.load %arg13[%c29_229, %c0_230] : memref<168x128xf32, #tpu.memory_space<vmem>>, vector<1x128xf32>
    %c4_231 = arith.constant 4 : index
    %c512_232 = arith.constant 512 : index
    %148 = vector.load %arg14[%c4_231, %c512_232] : memref<24x2048xf32, #tpu.memory_space<vmem>>, vector<1x128xf32>
    tpu.vector_store %arg14[%c4_231, %c512_232], %147 {strides = array<i32>} : memref<24x2048xf32, #tpu.memory_space<vmem>>, vector<1x128xf32>,
    %c30_233 = arith.constant 30 : index
    %c0_234 = arith.constant 0 : index
    %149 = vector.load %arg13[%c30_233, %c0_234] : memref<168x128xf32, #tpu.memory_space<vmem>>, vector<1x128xf32>
    %c4_235 = arith.constant 4 : index
    %c640_236 = arith.constant 640 : index
    %150 = vector.load %arg14[%c4_235, %c640_236] : memref<24x2048xf32, #tpu.memory_space<vmem>>, vector<1x128xf32>
    tpu.vector_store %arg14[%c4_235, %c640_236], %149 {strides = array<i32>} : memref<24x2048xf32, #tpu.memory_space<vmem>>, vector<1x128xf32>,
    %c31_237 = arith.constant 31 : index
    %c0_238 = arith.constant 0 : index
    %151 = vector.load %arg13[%c31_237, %c0_238] : memref<168x128xf32, #tpu.memory_space<vmem>>, vector<1x128xf32>
    %c4_239 = arith.constant 4 : index
    %c768_240 = arith.constant 768 : index
    %152 = vector.load %arg14[%c4_239, %c768_240] : memref<24x2048xf32, #tpu.memory_space<vmem>>, vector<1x128xf32>
    tpu.vector_store %arg14[%c4_239, %c768_240], %151 {strides = array<i32>} : memref<24x2048xf32, #tpu.memory_space<vmem>>, vector<1x128xf32>,
    %c32_241 = arith.constant 32 : index
    %c0_242 = arith.constant 0 : index
    %153 = vector.load %arg13[%c32_241, %c0_242] : memref<168x128xf32, #tpu.memory_space<vmem>>, vector<1x128xf32>
    %c4_243 = arith.constant 4 : index
    %c896_244 = arith.constant 896 : index
    %154 = vector.load %arg14[%c4_243, %c896_244] : memref<24x2048xf32, #tpu.memory_space<vmem>>, vector<1x128xf32>
    tpu.vector_store %arg14[%c4_243, %c896_244], %153 {strides = array<i32>} : memref<24x2048xf32, #tpu.memory_space<vmem>>, vector<1x128xf32>,
    %c38_245 = arith.constant 38 : index
    %c0_246 = arith.constant 0 : index
    %155 = vector.load %arg13[%c38_245, %c0_246] : memref<168x128xf32, #tpu.memory_space<vmem>>, vector<1x128xf32>
    %c4_247 = arith.constant 4 : index
    %c1024_248 = arith.constant 1024 : index
    %156 = vector.load %arg14[%c4_247, %c1024_248] : memref<24x2048xf32, #tpu.memory_space<vmem>>, vector<1x128xf32>
    tpu.vector_store %arg14[%c4_247, %c1024_248], %155 {strides = array<i32>} : memref<24x2048xf32, #tpu.memory_space<vmem>>, vector<1x128xf32>,
    %c39_249 = arith.constant 39 : index
    %c0_250 = arith.constant 0 : index
    %157 = vector.load %arg13[%c39_249, %c0_250] : memref<168x128xf32, #tpu.memory_space<vmem>>, vector<1x128xf32>
    %c4_251 = arith.constant 4 : index
    %c1152_252 = arith.constant 1152 : index
    %158 = vector.load %arg14[%c4_251, %c1152_252] : memref<24x2048xf32, #tpu.memory_space<vmem>>, vector<1x128xf32>
    tpu.vector_store %arg14[%c4_251, %c1152_252], %157 {strides = array<i32>} : memref<24x2048xf32, #tpu.memory_space<vmem>>, vector<1x128xf32>,
    %c40 = arith.constant 40 : index
    %c0_253 = arith.constant 0 : index
    %159 = vector.load %arg13[%c40, %c0_253] : memref<168x128xf32, #tpu.memory_space<vmem>>, vector<1x128xf32>
    %c4_254 = arith.constant 4 : index
    %c1280_255 = arith.constant 1280 : index
    %160 = vector.load %arg14[%c4_254, %c1280_255] : memref<24x2048xf32, #tpu.memory_space<vmem>>, vector<1x128xf32>
    tpu.vector_store %arg14[%c4_254, %c1280_255], %159 {strides = array<i32>} : memref<24x2048xf32, #tpu.memory_space<vmem>>, vector<1x128xf32>,
    %c41 = arith.constant 41 : index
    %c0_256 = arith.constant 0 : index
    %161 = vector.load %arg13[%c41, %c0_256] : memref<168x128xf32, #tpu.memory_space<vmem>>, vector<1x128xf32>
    %c4_257 = arith.constant 4 : index
    %c1408_258 = arith.constant 1408 : index
    %162 = vector.load %arg14[%c4_257, %c1408_258] : memref<24x2048xf32, #tpu.memory_space<vmem>>, vector<1x128xf32>
    tpu.vector_store %arg14[%c4_257, %c1408_258], %161 {strides = array<i32>} : memref<24x2048xf32, #tpu.memory_space<vmem>>, vector<1x128xf32>,
    %c47_259 = arith.constant 47 : index
    %c0_260 = arith.constant 0 : index
    %163 = vector.load %arg13[%c47_259, %c0_260] : memref<168x128xf32, #tpu.memory_space<vmem>>, vector<1x128xf32>
    %c4_261 = arith.constant 4 : index
    %c1536_262 = arith.constant 1536 : index
    %164 = vector.load %arg14[%c4_261, %c1536_262] : memref<24x2048xf32, #tpu.memory_space<vmem>>, vector<1x128xf32>
    tpu.vector_store %arg14[%c4_261, %c1536_262], %163 {strides = array<i32>} : memref<24x2048xf32, #tpu.memory_space<vmem>>, vector<1x128xf32>,
    %c48_263 = arith.constant 48 : index
    %c0_264 = arith.constant 0 : index
    %165 = vector.load %arg13[%c48_263, %c0_264] : memref<168x128xf32, #tpu.memory_space<vmem>>, vector<1x128xf32>
    %c4_265 = arith.constant 4 : index
    %c1664_266 = arith.constant 1664 : index
    %166 = vector.load %arg14[%c4_265, %c1664_266] : memref<24x2048xf32, #tpu.memory_space<vmem>>, vector<1x128xf32>
    tpu.vector_store %arg14[%c4_265, %c1664_266], %165 {strides = array<i32>} : memref<24x2048xf32, #tpu.memory_space<vmem>>, vector<1x128xf32>,
    %c49 = arith.constant 49 : index
    %c0_267 = arith.constant 0 : index
    %167 = vector.load %arg13[%c49, %c0_267] : memref<168x128xf32, #tpu.memory_space<vmem>>, vector<1x128xf32>
    %c4_268 = arith.constant 4 : index
    %c1792_269 = arith.constant 1792 : index
    %168 = vector.load %arg14[%c4_268, %c1792_269] : memref<24x2048xf32, #tpu.memory_space<vmem>>, vector<1x128xf32>
    tpu.vector_store %arg14[%c4_268, %c1792_269], %167 {strides = array<i32>} : memref<24x2048xf32, #tpu.memory_space<vmem>>, vector<1x128xf32>,
    %c50 = arith.constant 50 : index
    %c0_270 = arith.constant 0 : index
    %169 = vector.load %arg13[%c50, %c0_270] : memref<168x128xf32, #tpu.memory_space<vmem>>, vector<1x128xf32>
    %c4_271 = arith.constant 4 : index
    %c1920_272 = arith.constant 1920 : index
    %170 = vector.load %arg14[%c4_271, %c1920_272] : memref<24x2048xf32, #tpu.memory_space<vmem>>, vector<1x128xf32>
    tpu.vector_store %arg14[%c4_271, %c1920_272], %169 {strides = array<i32>} : memref<24x2048xf32, #tpu.memory_space<vmem>>, vector<1x128xf32>,
    %c22_273 = arith.constant 22 : index
    %c0_274 = arith.constant 0 : index
    %171 = vector.load %arg13[%c22_273, %c0_274] : memref<168x128xf32, #tpu.memory_space<vmem>>, vector<1x128xf32>
    %c5_275 = arith.constant 5 : index
    %c0_276 = arith.constant 0 : index
    %172 = vector.load %arg14[%c5_275, %c0_276] : memref<24x2048xf32, #tpu.memory_space<vmem>>, vector<1x128xf32>
    tpu.vector_store %arg14[%c5_275, %c0_276], %171 {strides = array<i32>} : memref<24x2048xf32, #tpu.memory_space<vmem>>, vector<1x128xf32>,
    %c23_277 = arith.constant 23 : index
    %c0_278 = arith.constant 0 : index
    %173 = vector.load %arg13[%c23_277, %c0_278] : memref<168x128xf32, #tpu.memory_space<vmem>>, vector<1x128xf32>
    %c5_279 = arith.constant 5 : index
    %c128_280 = arith.constant 128 : index
    %174 = vector.load %arg14[%c5_279, %c128_280] : memref<24x2048xf32, #tpu.memory_space<vmem>>, vector<1x128xf32>
    tpu.vector_store %arg14[%c5_279, %c128_280], %173 {strides = array<i32>} : memref<24x2048xf32, #tpu.memory_space<vmem>>, vector<1x128xf32>,
    %c24_281 = arith.constant 24 : index
    %c0_282 = arith.constant 0 : index
    %175 = vector.load %arg13[%c24_281, %c0_282] : memref<168x128xf32, #tpu.memory_space<vmem>>, vector<1x128xf32>
    %c5_283 = arith.constant 5 : index
    %c256_284 = arith.constant 256 : index
    %176 = vector.load %arg14[%c5_283, %c256_284] : memref<24x2048xf32, #tpu.memory_space<vmem>>, vector<1x128xf32>
    tpu.vector_store %arg14[%c5_283, %c256_284], %175 {strides = array<i32>} : memref<24x2048xf32, #tpu.memory_space<vmem>>, vector<1x128xf32>,
    %c25_285 = arith.constant 25 : index
    %c0_286 = arith.constant 0 : index
    %177 = vector.load %arg13[%c25_285, %c0_286] : memref<168x128xf32, #tpu.memory_space<vmem>>, vector<1x128xf32>
    %c5_287 = arith.constant 5 : index
    %c384_288 = arith.constant 384 : index
    %178 = vector.load %arg14[%c5_287, %c384_288] : memref<24x2048xf32, #tpu.memory_space<vmem>>, vector<1x128xf32>
    tpu.vector_store %arg14[%c5_287, %c384_288], %177 {strides = array<i32>} : memref<24x2048xf32, #tpu.memory_space<vmem>>, vector<1x128xf32>,
    %c31_289 = arith.constant 31 : index
    %c0_290 = arith.constant 0 : index
    %179 = vector.load %arg13[%c31_289, %c0_290] : memref<168x128xf32, #tpu.memory_space<vmem>>, vector<1x128xf32>
    %c5_291 = arith.constant 5 : index
    %c512_292 = arith.constant 512 : index
    %180 = vector.load %arg14[%c5_291, %c512_292] : memref<24x2048xf32, #tpu.memory_space<vmem>>, vector<1x128xf32>
    tpu.vector_store %arg14[%c5_291, %c512_292], %179 {strides = array<i32>} : memref<24x2048xf32, #tpu.memory_space<vmem>>, vector<1x128xf32>,
    %c32_293 = arith.constant 32 : index
    %c0_294 = arith.constant 0 : index
    %181 = vector.load %arg13[%c32_293, %c0_294] : memref<168x128xf32, #tpu.memory_space<vmem>>, vector<1x128xf32>
    %c5_295 = arith.constant 5 : index
    %c640_296 = arith.constant 640 : index
    %182 = vector.load %arg14[%c5_295, %c640_296] : memref<24x2048xf32, #tpu.memory_space<vmem>>, vector<1x128xf32>
    tpu.vector_store %arg14[%c5_295, %c640_296], %181 {strides = array<i32>} : memref<24x2048xf32, #tpu.memory_space<vmem>>, vector<1x128xf32>,
    %c33_297 = arith.constant 33 : index
    %c0_298 = arith.constant 0 : index
    %183 = vector.load %arg13[%c33_297, %c0_298] : memref<168x128xf32, #tpu.memory_space<vmem>>, vector<1x128xf32>
    %c5_299 = arith.constant 5 : index
    %c768_300 = arith.constant 768 : index
    %184 = vector.load %arg14[%c5_299, %c768_300] : memref<24x2048xf32, #tpu.memory_space<vmem>>, vector<1x128xf32>
    tpu.vector_store %arg14[%c5_299, %c768_300], %183 {strides = array<i32>} : memref<24x2048xf32, #tpu.memory_space<vmem>>, vector<1x128xf32>,
    %c34_301 = arith.constant 34 : index
    %c0_302 = arith.constant 0 : index
    %185 = vector.load %arg13[%c34_301, %c0_302] : memref<168x128xf32, #tpu.memory_space<vmem>>, vector<1x128xf32>
    %c5_303 = arith.constant 5 : index
    %c896_304 = arith.constant 896 : index
    %186 = vector.load %arg14[%c5_303, %c896_304] : memref<24x2048xf32, #tpu.memory_space<vmem>>, vector<1x128xf32>
    tpu.vector_store %arg14[%c5_303, %c896_304], %185 {strides = array<i32>} : memref<24x2048xf32, #tpu.memory_space<vmem>>, vector<1x128xf32>,
    %c40_305 = arith.constant 40 : index
    %c0_306 = arith.constant 0 : index
    %187 = vector.load %arg13[%c40_305, %c0_306] : memref<168x128xf32, #tpu.memory_space<vmem>>, vector<1x128xf32>
    %c5_307 = arith.constant 5 : index
    %c1024_308 = arith.constant 1024 : index
    %188 = vector.load %arg14[%c5_307, %c1024_308] : memref<24x2048xf32, #tpu.memory_space<vmem>>, vector<1x128xf32>
    tpu.vector_store %arg14[%c5_307, %c1024_308], %187 {strides = array<i32>} : memref<24x2048xf32, #tpu.memory_space<vmem>>, vector<1x128xf32>,
    %c41_309 = arith.constant 41 : index
    %c0_310 = arith.constant 0 : index
    %189 = vector.load %arg13[%c41_309, %c0_310] : memref<168x128xf32, #tpu.memory_space<vmem>>, vector<1x128xf32>
    %c5_311 = arith.constant 5 : index
    %c1152_312 = arith.constant 1152 : index
    %190 = vector.load %arg14[%c5_311, %c1152_312] : memref<24x2048xf32, #tpu.memory_space<vmem>>, vector<1x128xf32>
    tpu.vector_store %arg14[%c5_311, %c1152_312], %189 {strides = array<i32>} : memref<24x2048xf32, #tpu.memory_space<vmem>>, vector<1x128xf32>,
    %c42 = arith.constant 42 : index
    %c0_313 = arith.constant 0 : index
    %191 = vector.load %arg13[%c42, %c0_313] : memref<168x128xf32, #tpu.memory_space<vmem>>, vector<1x128xf32>
    %c5_314 = arith.constant 5 : index
    %c1280_315 = arith.constant 1280 : index
    %192 = vector.load %arg14[%c5_314, %c1280_315] : memref<24x2048xf32, #tpu.memory_space<vmem>>, vector<1x128xf32>
    tpu.vector_store %arg14[%c5_314, %c1280_315], %191 {strides = array<i32>} : memref<24x2048xf32, #tpu.memory_space<vmem>>, vector<1x128xf32>,
    %c43 = arith.constant 43 : index
    %c0_316 = arith.constant 0 : index
    %193 = vector.load %arg13[%c43, %c0_316] : memref<168x128xf32, #tpu.memory_space<vmem>>, vector<1x128xf32>
    %c5_317 = arith.constant 5 : index
    %c1408_318 = arith.constant 1408 : index
    %194 = vector.load %arg14[%c5_317, %c1408_318] : memref<24x2048xf32, #tpu.memory_space<vmem>>, vector<1x128xf32>
    tpu.vector_store %arg14[%c5_317, %c1408_318], %193 {strides = array<i32>} : memref<24x2048xf32, #tpu.memory_space<vmem>>, vector<1x128xf32>,
    %c49_319 = arith.constant 49 : index
    %c0_320 = arith.constant 0 : index
    %195 = vector.load %arg13[%c49_319, %c0_320] : memref<168x128xf32, #tpu.memory_space<vmem>>, vector<1x128xf32>
    %c5_321 = arith.constant 5 : index
    %c1536_322 = arith.constant 1536 : index
    %196 = vector.load %arg14[%c5_321, %c1536_322] : memref<24x2048xf32, #tpu.memory_space<vmem>>, vector<1x128xf32>
    tpu.vector_store %arg14[%c5_321, %c1536_322], %195 {strides = array<i32>} : memref<24x2048xf32, #tpu.memory_space<vmem>>, vector<1x128xf32>,
    %c50_323 = arith.constant 50 : index
    %c0_324 = arith.constant 0 : index
    %197 = vector.load %arg13[%c50_323, %c0_324] : memref<168x128xf32, #tpu.memory_space<vmem>>, vector<1x128xf32>
    %c5_325 = arith.constant 5 : index
    %c1664_326 = arith.constant 1664 : index
    %198 = vector.load %arg14[%c5_325, %c1664_326] : memref<24x2048xf32, #tpu.memory_space<vmem>>, vector<1x128xf32>
    tpu.vector_store %arg14[%c5_325, %c1664_326], %197 {strides = array<i32>} : memref<24x2048xf32, #tpu.memory_space<vmem>>, vector<1x128xf32>,
    %c51 = arith.constant 51 : index
    %c0_327 = arith.constant 0 : index
    %199 = vector.load %arg13[%c51, %c0_327] : memref<168x128xf32, #tpu.memory_space<vmem>>, vector<1x128xf32>
    %c5_328 = arith.constant 5 : index
    %c1792_329 = arith.constant 1792 : index
    %200 = vector.load %arg14[%c5_328, %c1792_329] : memref<24x2048xf32, #tpu.memory_space<vmem>>, vector<1x128xf32>
    tpu.vector_store %arg14[%c5_328, %c1792_329], %199 {strides = array<i32>} : memref<24x2048xf32, #tpu.memory_space<vmem>>, vector<1x128xf32>,
    %c52 = arith.constant 52 : index
    %c0_330 = arith.constant 0 : index
    %201 = vector.load %arg13[%c52, %c0_330] : memref<168x128xf32, #tpu.memory_space<vmem>>, vector<1x128xf32>
    %c5_331 = arith.constant 5 : index
    %c1920_332 = arith.constant 1920 : index
    %202 = vector.load %arg14[%c5_331, %c1920_332] : memref<24x2048xf32, #tpu.memory_space<vmem>>, vector<1x128xf32>
    tpu.vector_store %arg14[%c5_331, %c1920_332], %201 {strides = array<i32>} : memref<24x2048xf32, #tpu.memory_space<vmem>>, vector<1x128xf32>,
    %c36_333 = arith.constant 36 : index
    %c0_334 = arith.constant 0 : index
    %203 = vector.load %arg13[%c36_333, %c0_334] : memref<168x128xf32, #tpu.memory_space<vmem>>, vector<1x128xf32>
    %c6_335 = arith.constant 6 : index
    %c0_336 = arith.constant 0 : index
    %204 = vector.load %arg14[%c6_335, %c0_336] : memref<24x2048xf32, #tpu.memory_space<vmem>>, vector<1x128xf32>
    tpu.vector_store %arg14[%c6_335, %c0_336], %203 {strides = array<i32>} : memref<24x2048xf32, #tpu.memory_space<vmem>>, vector<1x128xf32>,
    %c37_337 = arith.constant 37 : index
    %c0_338 = arith.constant 0 : index
    %205 = vector.load %arg13[%c37_337, %c0_338] : memref<168x128xf32, #tpu.memory_space<vmem>>, vector<1x128xf32>
    %c6_339 = arith.constant 6 : index
    %c128_340 = arith.constant 128 : index
    %206 = vector.load %arg14[%c6_339, %c128_340] : memref<24x2048xf32, #tpu.memory_space<vmem>>, vector<1x128xf32>
    tpu.vector_store %arg14[%c6_339, %c128_340], %205 {strides = array<i32>} : memref<24x2048xf32, #tpu.memory_space<vmem>>, vector<1x128xf32>,
    %c38_341 = arith.constant 38 : index
    %c0_342 = arith.constant 0 : index
    %207 = vector.load %arg13[%c38_341, %c0_342] : memref<168x128xf32, #tpu.memory_space<vmem>>, vector<1x128xf32>
    %c6_343 = arith.constant 6 : index
    %c256_344 = arith.constant 256 : index
    %208 = vector.load %arg14[%c6_343, %c256_344] : memref<24x2048xf32, #tpu.memory_space<vmem>>, vector<1x128xf32>
    tpu.vector_store %arg14[%c6_343, %c256_344], %207 {strides = array<i32>} : memref<24x2048xf32, #tpu.memory_space<vmem>>, vector<1x128xf32>,
    %c39_345 = arith.constant 39 : index
    %c0_346 = arith.constant 0 : index
    %209 = vector.load %arg13[%c39_345, %c0_346] : memref<168x128xf32, #tpu.memory_space<vmem>>, vector<1x128xf32>
    %c6_347 = arith.constant 6 : index
    %c384_348 = arith.constant 384 : index
    %210 = vector.load %arg14[%c6_347, %c384_348] : memref<24x2048xf32, #tpu.memory_space<vmem>>, vector<1x128xf32>
    tpu.vector_store %arg14[%c6_347, %c384_348], %209 {strides = array<i32>} : memref<24x2048xf32, #tpu.memory_space<vmem>>, vector<1x128xf32>,
    %c45_349 = arith.constant 45 : index
    %c0_350 = arith.constant 0 : index
    %211 = vector.load %arg13[%c45_349, %c0_350] : memref<168x128xf32, #tpu.memory_space<vmem>>, vector<1x128xf32>
    %c6_351 = arith.constant 6 : index
    %c512_352 = arith.constant 512 : index
    %212 = vector.load %arg14[%c6_351, %c512_352] : memref<24x2048xf32, #tpu.memory_space<vmem>>, vector<1x128xf32>
    tpu.vector_store %arg14[%c6_351, %c512_352], %211 {strides = array<i32>} : memref<24x2048xf32, #tpu.memory_space<vmem>>, vector<1x128xf32>,
    %c46_353 = arith.constant 46 : index
    %c0_354 = arith.constant 0 : index
    %213 = vector.load %arg13[%c46_353, %c0_354] : memref<168x128xf32, #tpu.memory_space<vmem>>, vector<1x128xf32>
    %c6_355 = arith.constant 6 : index
    %c640_356 = arith.constant 640 : index
    %214 = vector.load %arg14[%c6_355, %c640_356] : memref<24x2048xf32, #tpu.memory_space<vmem>>, vector<1x128xf32>
    tpu.vector_store %arg14[%c6_355, %c640_356], %213 {strides = array<i32>} : memref<24x2048xf32, #tpu.memory_space<vmem>>, vector<1x128xf32>,
    %c47_357 = arith.constant 47 : index
    %c0_358 = arith.constant 0 : index
    %215 = vector.load %arg13[%c47_357, %c0_358] : memref<168x128xf32, #tpu.memory_space<vmem>>, vector<1x128xf32>
    %c6_359 = arith.constant 6 : index
    %c768_360 = arith.constant 768 : index
    %216 = vector.load %arg14[%c6_359, %c768_360] : memref<24x2048xf32, #tpu.memory_space<vmem>>, vector<1x128xf32>
    tpu.vector_store %arg14[%c6_359, %c768_360], %215 {strides = array<i32>} : memref<24x2048xf32, #tpu.memory_space<vmem>>, vector<1x128xf32>,
    %c48_361 = arith.constant 48 : index
    %c0_362 = arith.constant 0 : index
    %217 = vector.load %arg13[%c48_361, %c0_362] : memref<168x128xf32, #tpu.memory_space<vmem>>, vector<1x128xf32>
    %c6_363 = arith.constant 6 : index
    %c896_364 = arith.constant 896 : index
    %218 = vector.load %arg14[%c6_363, %c896_364] : memref<24x2048xf32, #tpu.memory_space<vmem>>, vector<1x128xf32>
    tpu.vector_store %arg14[%c6_363, %c896_364], %217 {strides = array<i32>} : memref<24x2048xf32, #tpu.memory_space<vmem>>, vector<1x128xf32>,
    %c54 = arith.constant 54 : index
    %c0_365 = arith.constant 0 : index
    %219 = vector.load %arg13[%c54, %c0_365] : memref<168x128xf32, #tpu.memory_space<vmem>>, vector<1x128xf32>
    %c6_366 = arith.constant 6 : index
    %c1024_367 = arith.constant 1024 : index
    %220 = vector.load %arg14[%c6_366, %c1024_367] : memref<24x2048xf32, #tpu.memory_space<vmem>>, vector<1x128xf32>
    tpu.vector_store %arg14[%c6_366, %c1024_367], %219 {strides = array<i32>} : memref<24x2048xf32, #tpu.memory_space<vmem>>, vector<1x128xf32>,
    %c55 = arith.constant 55 : index
    %c0_368 = arith.constant 0 : index
    %221 = vector.load %arg13[%c55, %c0_368] : memref<168x128xf32, #tpu.memory_space<vmem>>, vector<1x128xf32>
    %c6_369 = arith.constant 6 : index
    %c1152_370 = arith.constant 1152 : index
    %222 = vector.load %arg14[%c6_369, %c1152_370] : memref<24x2048xf32, #tpu.memory_space<vmem>>, vector<1x128xf32>
    tpu.vector_store %arg14[%c6_369, %c1152_370], %221 {strides = array<i32>} : memref<24x2048xf32, #tpu.memory_space<vmem>>, vector<1x128xf32>,
    %c56 = arith.constant 56 : index
    %c0_371 = arith.constant 0 : index
    %223 = vector.load %arg13[%c56, %c0_371] : memref<168x128xf32, #tpu.memory_space<vmem>>, vector<1x128xf32>
    %c6_372 = arith.constant 6 : index
    %c1280_373 = arith.constant 1280 : index
    %224 = vector.load %arg14[%c6_372, %c1280_373] : memref<24x2048xf32, #tpu.memory_space<vmem>>, vector<1x128xf32>
    tpu.vector_store %arg14[%c6_372, %c1280_373], %223 {strides = array<i32>} : memref<24x2048xf32, #tpu.memory_space<vmem>>, vector<1x128xf32>,
    %c57 = arith.constant 57 : index
    %c0_374 = arith.constant 0 : index
    %225 = vector.load %arg13[%c57, %c0_374] : memref<168x128xf32, #tpu.memory_space<vmem>>, vector<1x128xf32>
    %c6_375 = arith.constant 6 : index
    %c1408_376 = arith.constant 1408 : index
    %226 = vector.load %arg14[%c6_375, %c1408_376] : memref<24x2048xf32, #tpu.memory_space<vmem>>, vector<1x128xf32>
    tpu.vector_store %arg14[%c6_375, %c1408_376], %225 {strides = array<i32>} : memref<24x2048xf32, #tpu.memory_space<vmem>>, vector<1x128xf32>,
    %c63 = arith.constant 63 : index
    %c0_377 = arith.constant 0 : index
    %227 = vector.load %arg13[%c63, %c0_377] : memref<168x128xf32, #tpu.memory_space<vmem>>, vector<1x128xf32>
    %c6_378 = arith.constant 6 : index
    %c1536_379 = arith.constant 1536 : index
    %228 = vector.load %arg14[%c6_378, %c1536_379] : memref<24x2048xf32, #tpu.memory_space<vmem>>, vector<1x128xf32>
    tpu.vector_store %arg14[%c6_378, %c1536_379], %227 {strides = array<i32>} : memref<24x2048xf32, #tpu.memory_space<vmem>>, vector<1x128xf32>,
    %c64 = arith.constant 64 : index
    %c0_380 = arith.constant 0 : index
    %229 = vector.load %arg13[%c64, %c0_380] : memref<168x128xf32, #tpu.memory_space<vmem>>, vector<1x128xf32>
    %c6_381 = arith.constant 6 : index
    %c1664_382 = arith.constant 1664 : index
    %230 = vector.load %arg14[%c6_381, %c1664_382] : memref<24x2048xf32, #tpu.memory_space<vmem>>, vector<1x128xf32>
    tpu.vector_store %arg14[%c6_381, %c1664_382], %229 {strides = array<i32>} : memref<24x2048xf32, #tpu.memory_space<vmem>>, vector<1x128xf32>,
    %c65 = arith.constant 65 : index
    %c0_383 = arith.constant 0 : index
    %231 = vector.load %arg13[%c65, %c0_383] : memref<168x128xf32, #tpu.memory_space<vmem>>, vector<1x128xf32>
    %c6_384 = arith.constant 6 : index
    %c1792_385 = arith.constant 1792 : index
    %232 = vector.load %arg14[%c6_384, %c1792_385] : memref<24x2048xf32, #tpu.memory_space<vmem>>, vector<1x128xf32>
    tpu.vector_store %arg14[%c6_384, %c1792_385], %231 {strides = array<i32>} : memref<24x2048xf32, #tpu.memory_space<vmem>>, vector<1x128xf32>,
    %c66 = arith.constant 66 : index
    %c0_386 = arith.constant 0 : index
    %233 = vector.load %arg13[%c66, %c0_386] : memref<168x128xf32, #tpu.memory_space<vmem>>, vector<1x128xf32>
    %c6_387 = arith.constant 6 : index
    %c1920_388 = arith.constant 1920 : index
    %234 = vector.load %arg14[%c6_387, %c1920_388] : memref<24x2048xf32, #tpu.memory_space<vmem>>, vector<1x128xf32>
    tpu.vector_store %arg14[%c6_387, %c1920_388], %233 {strides = array<i32>} : memref<24x2048xf32, #tpu.memory_space<vmem>>, vector<1x128xf32>,
    %c38_389 = arith.constant 38 : index
    %c0_390 = arith.constant 0 : index
    %235 = vector.load %arg13[%c38_389, %c0_390] : memref<168x128xf32, #tpu.memory_space<vmem>>, vector<1x128xf32>
    %c7_391 = arith.constant 7 : index
    %c0_392 = arith.constant 0 : index
    %236 = vector.load %arg14[%c7_391, %c0_392] : memref<24x2048xf32, #tpu.memory_space<vmem>>, vector<1x128xf32>
    tpu.vector_store %arg14[%c7_391, %c0_392], %235 {strides = array<i32>} : memref<24x2048xf32, #tpu.memory_space<vmem>>, vector<1x128xf32>,
    %c39_393 = arith.constant 39 : index
    %c0_394 = arith.constant 0 : index
    %237 = vector.load %arg13[%c39_393, %c0_394] : memref<168x128xf32, #tpu.memory_space<vmem>>, vector<1x128xf32>
    %c7_395 = arith.constant 7 : index
    %c128_396 = arith.constant 128 : index
    %238 = vector.load %arg14[%c7_395, %c128_396] : memref<24x2048xf32, #tpu.memory_space<vmem>>, vector<1x128xf32>
    tpu.vector_store %arg14[%c7_395, %c128_396], %237 {strides = array<i32>} : memref<24x2048xf32, #tpu.memory_space<vmem>>, vector<1x128xf32>,
    %c40_397 = arith.constant 40 : index
    %c0_398 = arith.constant 0 : index
    %239 = vector.load %arg13[%c40_397, %c0_398] : memref<168x128xf32, #tpu.memory_space<vmem>>, vector<1x128xf32>
    %c7_399 = arith.constant 7 : index
    %c256_400 = arith.constant 256 : index
    %240 = vector.load %arg14[%c7_399, %c256_400] : memref<24x2048xf32, #tpu.memory_space<vmem>>, vector<1x128xf32>
    tpu.vector_store %arg14[%c7_399, %c256_400], %239 {strides = array<i32>} : memref<24x2048xf32, #tpu.memory_space<vmem>>, vector<1x128xf32>,
    %c41_401 = arith.constant 41 : index
    %c0_402 = arith.constant 0 : index
    %241 = vector.load %arg13[%c41_401, %c0_402] : memref<168x128xf32, #tpu.memory_space<vmem>>, vector<1x128xf32>
    %c7_403 = arith.constant 7 : index
    %c384_404 = arith.constant 384 : index
    %242 = vector.load %arg14[%c7_403, %c384_404] : memref<24x2048xf32, #tpu.memory_space<vmem>>, vector<1x128xf32>
    tpu.vector_store %arg14[%c7_403, %c384_404], %241 {strides = array<i32>} : memref<24x2048xf32, #tpu.memory_space<vmem>>, vector<1x128xf32>,
    %c47_405 = arith.constant 47 : index
    %c0_406 = arith.constant 0 : index
    %243 = vector.load %arg13[%c47_405, %c0_406] : memref<168x128xf32, #tpu.memory_space<vmem>>, vector<1x128xf32>
    %c7_407 = arith.constant 7 : index
    %c512_408 = arith.constant 512 : index
    %244 = vector.load %arg14[%c7_407, %c512_408] : memref<24x2048xf32, #tpu.memory_space<vmem>>, vector<1x128xf32>
    tpu.vector_store %arg14[%c7_407, %c512_408], %243 {strides = array<i32>} : memref<24x2048xf32, #tpu.memory_space<vmem>>, vector<1x128xf32>,
    %c48_409 = arith.constant 48 : index
    %c0_410 = arith.constant 0 : index
    %245 = vector.load %arg13[%c48_409, %c0_410] : memref<168x128xf32, #tpu.memory_space<vmem>>, vector<1x128xf32>
    %c7_411 = arith.constant 7 : index
    %c640_412 = arith.constant 640 : index
    %246 = vector.load %arg14[%c7_411, %c640_412] : memref<24x2048xf32, #tpu.memory_space<vmem>>, vector<1x128xf32>
    tpu.vector_store %arg14[%c7_411, %c640_412], %245 {strides = array<i32>} : memref<24x2048xf32, #tpu.memory_space<vmem>>, vector<1x128xf32>,
    %c49_413 = arith.constant 49 : index
    %c0_414 = arith.constant 0 : index
    %247 = vector.load %arg13[%c49_413, %c0_414] : memref<168x128xf32, #tpu.memory_space<vmem>>, vector<1x128xf32>
    %c7_415 = arith.constant 7 : index
    %c768_416 = arith.constant 768 : index
    %248 = vector.load %arg14[%c7_415, %c768_416] : memref<24x2048xf32, #tpu.memory_space<vmem>>, vector<1x128xf32>
    tpu.vector_store %arg14[%c7_415, %c768_416], %247 {strides = array<i32>} : memref<24x2048xf32, #tpu.memory_space<vmem>>, vector<1x128xf32>,
    %c50_417 = arith.constant 50 : index
    %c0_418 = arith.constant 0 : index
    %249 = vector.load %arg13[%c50_417, %c0_418] : memref<168x128xf32, #tpu.memory_space<vmem>>, vector<1x128xf32>
    %c7_419 = arith.constant 7 : index
    %c896_420 = arith.constant 896 : index
    %250 = vector.load %arg14[%c7_419, %c896_420] : memref<24x2048xf32, #tpu.memory_space<vmem>>, vector<1x128xf32>
    tpu.vector_store %arg14[%c7_419, %c896_420], %249 {strides = array<i32>} : memref<24x2048xf32, #tpu.memory_space<vmem>>, vector<1x128xf32>,
    %c56_421 = arith.constant 56 : index
    %c0_422 = arith.constant 0 : index
    %251 = vector.load %arg13[%c56_421, %c0_422] : memref<168x128xf32, #tpu.memory_space<vmem>>, vector<1x128xf32>
    %c7_423 = arith.constant 7 : index
    %c1024_424 = arith.constant 1024 : index
    %252 = vector.load %arg14[%c7_423, %c1024_424] : memref<24x2048xf32, #tpu.memory_space<vmem>>, vector<1x128xf32>
    tpu.vector_store %arg14[%c7_423, %c1024_424], %251 {strides = array<i32>} : memref<24x2048xf32, #tpu.memory_space<vmem>>, vector<1x128xf32>,
    %c57_425 = arith.constant 57 : index
    %c0_426 = arith.constant 0 : index
    %253 = vector.load %arg13[%c57_425, %c0_426] : memref<168x128xf32, #tpu.memory_space<vmem>>, vector<1x128xf32>
    %c7_427 = arith.constant 7 : index
    %c1152_428 = arith.constant 1152 : index
    %254 = vector.load %arg14[%c7_427, %c1152_428] : memref<24x2048xf32, #tpu.memory_space<vmem>>, vector<1x128xf32>
    tpu.vector_store %arg14[%c7_427, %c1152_428], %253 {strides = array<i32>} : memref<24x2048xf32, #tpu.memory_space<vmem>>, vector<1x128xf32>,
    %c58 = arith.constant 58 : index
    %c0_429 = arith.constant 0 : index
    %255 = vector.load %arg13[%c58, %c0_429] : memref<168x128xf32, #tpu.memory_space<vmem>>, vector<1x128xf32>
    %c7_430 = arith.constant 7 : index
    %c1280_431 = arith.constant 1280 : index
    %256 = vector.load %arg14[%c7_430, %c1280_431] : memref<24x2048xf32, #tpu.memory_space<vmem>>, vector<1x128xf32>
    tpu.vector_store %arg14[%c7_430, %c1280_431], %255 {strides = array<i32>} : memref<24x2048xf32, #tpu.memory_space<vmem>>, vector<1x128xf32>,
    %c59 = arith.constant 59 : index
    %c0_432 = arith.constant 0 : index
    %257 = vector.load %arg13[%c59, %c0_432] : memref<168x128xf32, #tpu.memory_space<vmem>>, vector<1x128xf32>
    %c7_433 = arith.constant 7 : index
    %c1408_434 = arith.constant 1408 : index
    %258 = vector.load %arg14[%c7_433, %c1408_434] : memref<24x2048xf32, #tpu.memory_space<vmem>>, vector<1x128xf32>
    tpu.vector_store %arg14[%c7_433, %c1408_434], %257 {strides = array<i32>} : memref<24x2048xf32, #tpu.memory_space<vmem>>, vector<1x128xf32>,
    %c65_435 = arith.constant 65 : index
    %c0_436 = arith.constant 0 : index
    %259 = vector.load %arg13[%c65_435, %c0_436] : memref<168x128xf32, #tpu.memory_space<vmem>>, vector<1x128xf32>
    %c7_437 = arith.constant 7 : index
    %c1536_438 = arith.constant 1536 : index
    %260 = vector.load %arg14[%c7_437, %c1536_438] : memref<24x2048xf32, #tpu.memory_space<vmem>>, vector<1x128xf32>
    tpu.vector_store %arg14[%c7_437, %c1536_438], %259 {strides = array<i32>} : memref<24x2048xf32, #tpu.memory_space<vmem>>, vector<1x128xf32>,
    %c66_439 = arith.constant 66 : index
    %c0_440 = arith.constant 0 : index
    %261 = vector.load %arg13[%c66_439, %c0_440] : memref<168x128xf32, #tpu.memory_space<vmem>>, vector<1x128xf32>
    %c7_441 = arith.constant 7 : index
    %c1664_442 = arith.constant 1664 : index
    %262 = vector.load %arg14[%c7_441, %c1664_442] : memref<24x2048xf32, #tpu.memory_space<vmem>>, vector<1x128xf32>
    tpu.vector_store %arg14[%c7_441, %c1664_442], %261 {strides = array<i32>} : memref<24x2048xf32, #tpu.memory_space<vmem>>, vector<1x128xf32>,
    %c67 = arith.constant 67 : index
    %c0_443 = arith.constant 0 : index
    %263 = vector.load %arg13[%c67, %c0_443] : memref<168x128xf32, #tpu.memory_space<vmem>>, vector<1x128xf32>
    %c7_444 = arith.constant 7 : index
    %c1792_445 = arith.constant 1792 : index
    %264 = vector.load %arg14[%c7_444, %c1792_445] : memref<24x2048xf32, #tpu.memory_space<vmem>>, vector<1x128xf32>
    tpu.vector_store %arg14[%c7_444, %c1792_445], %263 {strides = array<i32>} : memref<24x2048xf32, #tpu.memory_space<vmem>>, vector<1x128xf32>,
    %c68 = arith.constant 68 : index
    %c0_446 = arith.constant 0 : index
    %265 = vector.load %arg13[%c68, %c0_446] : memref<168x128xf32, #tpu.memory_space<vmem>>, vector<1x128xf32>
    %c7_447 = arith.constant 7 : index
    %c1920_448 = arith.constant 1920 : index
    %266 = vector.load %arg14[%c7_447, %c1920_448] : memref<24x2048xf32, #tpu.memory_space<vmem>>, vector<1x128xf32>
    tpu.vector_store %arg14[%c7_447, %c1920_448], %265 {strides = array<i32>} : memref<24x2048xf32, #tpu.memory_space<vmem>>, vector<1x128xf32>,
    %c40_449 = arith.constant 40 : index
    %c0_450 = arith.constant 0 : index
    %267 = vector.load %arg13[%c40_449, %c0_450] : memref<168x128xf32, #tpu.memory_space<vmem>>, vector<1x128xf32>
    %c8 = arith.constant 8 : index
    %c0_451 = arith.constant 0 : index
    %268 = vector.load %arg14[%c8, %c0_451] : memref<24x2048xf32, #tpu.memory_space<vmem>>, vector<1x128xf32>
    tpu.vector_store %arg14[%c8, %c0_451], %267 {strides = array<i32>} : memref<24x2048xf32, #tpu.memory_space<vmem>>, vector<1x128xf32>,
    %c41_452 = arith.constant 41 : index
    %c0_453 = arith.constant 0 : index
    %269 = vector.load %arg13[%c41_452, %c0_453] : memref<168x128xf32, #tpu.memory_space<vmem>>, vector<1x128xf32>
    %c8_454 = arith.constant 8 : index
    %c128_455 = arith.constant 128 : index
    %270 = vector.load %arg14[%c8_454, %c128_455] : memref<24x2048xf32, #tpu.memory_space<vmem>>, vector<1x128xf32>
    tpu.vector_store %arg14[%c8_454, %c128_455], %269 {strides = array<i32>} : memref<24x2048xf32, #tpu.memory_space<vmem>>, vector<1x128xf32>,
    %c42_456 = arith.constant 42 : index
    %c0_457 = arith.constant 0 : index
    %271 = vector.load %arg13[%c42_456, %c0_457] : memref<168x128xf32, #tpu.memory_space<vmem>>, vector<1x128xf32>
    %c8_458 = arith.constant 8 : index
    %c256_459 = arith.constant 256 : index
    %272 = vector.load %arg14[%c8_458, %c256_459] : memref<24x2048xf32, #tpu.memory_space<vmem>>, vector<1x128xf32>
    tpu.vector_store %arg14[%c8_458, %c256_459], %271 {strides = array<i32>} : memref<24x2048xf32, #tpu.memory_space<vmem>>, vector<1x128xf32>,
    %c43_460 = arith.constant 43 : index
    %c0_461 = arith.constant 0 : index
    %273 = vector.load %arg13[%c43_460, %c0_461] : memref<168x128xf32, #tpu.memory_space<vmem>>, vector<1x128xf32>
    %c8_462 = arith.constant 8 : index
    %c384_463 = arith.constant 384 : index
    %274 = vector.load %arg14[%c8_462, %c384_463] : memref<24x2048xf32, #tpu.memory_space<vmem>>, vector<1x128xf32>
    tpu.vector_store %arg14[%c8_462, %c384_463], %273 {strides = array<i32>} : memref<24x2048xf32, #tpu.memory_space<vmem>>, vector<1x128xf32>,
    %c49_464 = arith.constant 49 : index
    %c0_465 = arith.constant 0 : index
    %275 = vector.load %arg13[%c49_464, %c0_465] : memref<168x128xf32, #tpu.memory_space<vmem>>, vector<1x128xf32>
    %c8_466 = arith.constant 8 : index
    %c512_467 = arith.constant 512 : index
    %276 = vector.load %arg14[%c8_466, %c512_467] : memref<24x2048xf32, #tpu.memory_space<vmem>>, vector<1x128xf32>
    tpu.vector_store %arg14[%c8_466, %c512_467], %275 {strides = array<i32>} : memref<24x2048xf32, #tpu.memory_space<vmem>>, vector<1x128xf32>,
    %c50_468 = arith.constant 50 : index
    %c0_469 = arith.constant 0 : index
    %277 = vector.load %arg13[%c50_468, %c0_469] : memref<168x128xf32, #tpu.memory_space<vmem>>, vector<1x128xf32>
    %c8_470 = arith.constant 8 : index
    %c640_471 = arith.constant 640 : index
    %278 = vector.load %arg14[%c8_470, %c640_471] : memref<24x2048xf32, #tpu.memory_space<vmem>>, vector<1x128xf32>
    tpu.vector_store %arg14[%c8_470, %c640_471], %277 {strides = array<i32>} : memref<24x2048xf32, #tpu.memory_space<vmem>>, vector<1x128xf32>,
    %c51_472 = arith.constant 51 : index
    %c0_473 = arith.constant 0 : index
    %279 = vector.load %arg13[%c51_472, %c0_473] : memref<168x128xf32, #tpu.memory_space<vmem>>, vector<1x128xf32>
    %c8_474 = arith.constant 8 : index
    %c768_475 = arith.constant 768 : index
    %280 = vector.load %arg14[%c8_474, %c768_475] : memref<24x2048xf32, #tpu.memory_space<vmem>>, vector<1x128xf32>
    tpu.vector_store %arg14[%c8_474, %c768_475], %279 {strides = array<i32>} : memref<24x2048xf32, #tpu.memory_space<vmem>>, vector<1x128xf32>,
    %c52_476 = arith.constant 52 : index
    %c0_477 = arith.constant 0 : index
    %281 = vector.load %arg13[%c52_476, %c0_477] : memref<168x128xf32, #tpu.memory_space<vmem>>, vector<1x128xf32>
    %c8_478 = arith.constant 8 : index
    %c896_479 = arith.constant 896 : index
    %282 = vector.load %arg14[%c8_478, %c896_479] : memref<24x2048xf32, #tpu.memory_space<vmem>>, vector<1x128xf32>
    tpu.vector_store %arg14[%c8_478, %c896_479], %281 {strides = array<i32>} : memref<24x2048xf32, #tpu.memory_space<vmem>>, vector<1x128xf32>,
    %c58_480 = arith.constant 58 : index
    %c0_481 = arith.constant 0 : index
    %283 = vector.load %arg13[%c58_480, %c0_481] : memref<168x128xf32, #tpu.memory_space<vmem>>, vector<1x128xf32>
    %c8_482 = arith.constant 8 : index
    %c1024_483 = arith.constant 1024 : index
    %284 = vector.load %arg14[%c8_482, %c1024_483] : memref<24x2048xf32, #tpu.memory_space<vmem>>, vector<1x128xf32>
    tpu.vector_store %arg14[%c8_482, %c1024_483], %283 {strides = array<i32>} : memref<24x2048xf32, #tpu.memory_space<vmem>>, vector<1x128xf32>,
    %c59_484 = arith.constant 59 : index
    %c0_485 = arith.constant 0 : index
    %285 = vector.load %arg13[%c59_484, %c0_485] : memref<168x128xf32, #tpu.memory_space<vmem>>, vector<1x128xf32>
    %c8_486 = arith.constant 8 : index
    %c1152_487 = arith.constant 1152 : index
    %286 = vector.load %arg14[%c8_486, %c1152_487] : memref<24x2048xf32, #tpu.memory_space<vmem>>, vector<1x128xf32>
    tpu.vector_store %arg14[%c8_486, %c1152_487], %285 {strides = array<i32>} : memref<24x2048xf32, #tpu.memory_space<vmem>>, vector<1x128xf32>,
    %c60 = arith.constant 60 : index
    %c0_488 = arith.constant 0 : index
    %287 = vector.load %arg13[%c60, %c0_488] : memref<168x128xf32, #tpu.memory_space<vmem>>, vector<1x128xf32>
    %c8_489 = arith.constant 8 : index
    %c1280_490 = arith.constant 1280 : index
    %288 = vector.load %arg14[%c8_489, %c1280_490] : memref<24x2048xf32, #tpu.memory_space<vmem>>, vector<1x128xf32>
    tpu.vector_store %arg14[%c8_489, %c1280_490], %287 {strides = array<i32>} : memref<24x2048xf32, #tpu.memory_space<vmem>>, vector<1x128xf32>,
    %c61 = arith.constant 61 : index
    %c0_491 = arith.constant 0 : index
    %289 = vector.load %arg13[%c61, %c0_491] : memref<168x128xf32, #tpu.memory_space<vmem>>, vector<1x128xf32>
    %c8_492 = arith.constant 8 : index
    %c1408_493 = arith.constant 1408 : index
    %290 = vector.load %arg14[%c8_492, %c1408_493] : memref<24x2048xf32, #tpu.memory_space<vmem>>, vector<1x128xf32>
    tpu.vector_store %arg14[%c8_492, %c1408_493], %289 {strides = array<i32>} : memref<24x2048xf32, #tpu.memory_space<vmem>>, vector<1x128xf32>,
    %c67_494 = arith.constant 67 : index
    %c0_495 = arith.constant 0 : index
    %291 = vector.load %arg13[%c67_494, %c0_495] : memref<168x128xf32, #tpu.memory_space<vmem>>, vector<1x128xf32>
    %c8_496 = arith.constant 8 : index
    %c1536_497 = arith.constant 1536 : index
    %292 = vector.load %arg14[%c8_496, %c1536_497] : memref<24x2048xf32, #tpu.memory_space<vmem>>, vector<1x128xf32>
    tpu.vector_store %arg14[%c8_496, %c1536_497], %291 {strides = array<i32>} : memref<24x2048xf32, #tpu.memory_space<vmem>>, vector<1x128xf32>,
    %c68_498 = arith.constant 68 : index
    %c0_499 = arith.constant 0 : index
    %293 = vector.load %arg13[%c68_498, %c0_499] : memref<168x128xf32, #tpu.memory_space<vmem>>, vector<1x128xf32>
    %c8_500 = arith.constant 8 : index
    %c1664_501 = arith.constant 1664 : index
    %294 = vector.load %arg14[%c8_500, %c1664_501] : memref<24x2048xf32, #tpu.memory_space<vmem>>, vector<1x128xf32>
    tpu.vector_store %arg14[%c8_500, %c1664_501], %293 {strides = array<i32>} : memref<24x2048xf32, #tpu.memory_space<vmem>>, vector<1x128xf32>,
    %c69 = arith.constant 69 : index
    %c0_502 = arith.constant 0 : index
    %295 = vector.load %arg13[%c69, %c0_502] : memref<168x128xf32, #tpu.memory_space<vmem>>, vector<1x128xf32>
    %c8_503 = arith.constant 8 : index
    %c1792_504 = arith.constant 1792 : index
    %296 = vector.load %arg14[%c8_503, %c1792_504] : memref<24x2048xf32, #tpu.memory_space<vmem>>, vector<1x128xf32>
    tpu.vector_store %arg14[%c8_503, %c1792_504], %295 {strides = array<i32>} : memref<24x2048xf32, #tpu.memory_space<vmem>>, vector<1x128xf32>,
    %c70 = arith.constant 70 : index
    %c0_505 = arith.constant 0 : index
    %297 = vector.load %arg13[%c70, %c0_505] : memref<168x128xf32, #tpu.memory_space<vmem>>, vector<1x128xf32>
    %c8_506 = arith.constant 8 : index
    %c1920_507 = arith.constant 1920 : index
    %298 = vector.load %arg14[%c8_506, %c1920_507] : memref<24x2048xf32, #tpu.memory_space<vmem>>, vector<1x128xf32>
    tpu.vector_store %arg14[%c8_506, %c1920_507], %297 {strides = array<i32>} : memref<24x2048xf32, #tpu.memory_space<vmem>>, vector<1x128xf32>,
    %c81 = arith.constant 81 : index
    %c0_508 = arith.constant 0 : index
    %299 = vector.load %arg13[%c81, %c0_508] : memref<168x128xf32, #tpu.memory_space<vmem>>, vector<1x128xf32>
    %c9_509 = arith.constant 9 : index
    %c0_510 = arith.constant 0 : index
    %300 = vector.load %arg14[%c9_509, %c0_510] : memref<24x2048xf32, #tpu.memory_space<vmem>>, vector<1x128xf32>
    tpu.vector_store %arg14[%c9_509, %c0_510], %299 {strides = array<i32>} : memref<24x2048xf32, #tpu.memory_space<vmem>>, vector<1x128xf32>,
    %c82 = arith.constant 82 : index
    %c0_511 = arith.constant 0 : index
    %301 = vector.load %arg13[%c82, %c0_511] : memref<168x128xf32, #tpu.memory_space<vmem>>, vector<1x128xf32>
    %c9_512 = arith.constant 9 : index
    %c128_513 = arith.constant 128 : index
    %302 = vector.load %arg14[%c9_512, %c128_513] : memref<24x2048xf32, #tpu.memory_space<vmem>>, vector<1x128xf32>
    tpu.vector_store %arg14[%c9_512, %c128_513], %301 {strides = array<i32>} : memref<24x2048xf32, #tpu.memory_space<vmem>>, vector<1x128xf32>,
    %c83 = arith.constant 83 : index
    %c0_514 = arith.constant 0 : index
    %303 = vector.load %arg13[%c83, %c0_514] : memref<168x128xf32, #tpu.memory_space<vmem>>, vector<1x128xf32>
    %c9_515 = arith.constant 9 : index
    %c256_516 = arith.constant 256 : index
    %304 = vector.load %arg14[%c9_515, %c256_516] : memref<24x2048xf32, #tpu.memory_space<vmem>>, vector<1x128xf32>
    tpu.vector_store %arg14[%c9_515, %c256_516], %303 {strides = array<i32>} : memref<24x2048xf32, #tpu.memory_space<vmem>>, vector<1x128xf32>,
    %c84 = arith.constant 84 : index
    %c0_517 = arith.constant 0 : index
    %305 = vector.load %arg13[%c84, %c0_517] : memref<168x128xf32, #tpu.memory_space<vmem>>, vector<1x128xf32>
    %c9_518 = arith.constant 9 : index
    %c384_519 = arith.constant 384 : index
    %306 = vector.load %arg14[%c9_518, %c384_519] : memref<24x2048xf32, #tpu.memory_space<vmem>>, vector<1x128xf32>
    tpu.vector_store %arg14[%c9_518, %c384_519], %305 {strides = array<i32>} : memref<24x2048xf32, #tpu.memory_space<vmem>>, vector<1x128xf32>,
    %c90 = arith.constant 90 : index
    %c0_520 = arith.constant 0 : index
    %307 = vector.load %arg13[%c90, %c0_520] : memref<168x128xf32, #tpu.memory_space<vmem>>, vector<1x128xf32>
    %c9_521 = arith.constant 9 : index
    %c512_522 = arith.constant 512 : index
    %308 = vector.load %arg14[%c9_521, %c512_522] : memref<24x2048xf32, #tpu.memory_space<vmem>>, vector<1x128xf32>
    tpu.vector_store %arg14[%c9_521, %c512_522], %307 {strides = array<i32>} : memref<24x2048xf32, #tpu.memory_space<vmem>>, vector<1x128xf32>,
    %c91 = arith.constant 91 : index
    %c0_523 = arith.constant 0 : index
    %309 = vector.load %arg13[%c91, %c0_523] : memref<168x128xf32, #tpu.memory_space<vmem>>, vector<1x128xf32>
    %c9_524 = arith.constant 9 : index
    %c640_525 = arith.constant 640 : index
    %310 = vector.load %arg14[%c9_524, %c640_525] : memref<24x2048xf32, #tpu.memory_space<vmem>>, vector<1x128xf32>
    tpu.vector_store %arg14[%c9_524, %c640_525], %309 {strides = array<i32>} : memref<24x2048xf32, #tpu.memory_space<vmem>>, vector<1x128xf32>,
    %c92 = arith.constant 92 : index
    %c0_526 = arith.constant 0 : index
    %311 = vector.load %arg13[%c92, %c0_526] : memref<168x128xf32, #tpu.memory_space<vmem>>, vector<1x128xf32>
    %c9_527 = arith.constant 9 : index
    %c768_528 = arith.constant 768 : index
    %312 = vector.load %arg14[%c9_527, %c768_528] : memref<24x2048xf32, #tpu.memory_space<vmem>>, vector<1x128xf32>
    tpu.vector_store %arg14[%c9_527, %c768_528], %311 {strides = array<i32>} : memref<24x2048xf32, #tpu.memory_space<vmem>>, vector<1x128xf32>,
    %c93 = arith.constant 93 : index
    %c0_529 = arith.constant 0 : index
    %313 = vector.load %arg13[%c93, %c0_529] : memref<168x128xf32, #tpu.memory_space<vmem>>, vector<1x128xf32>
    %c9_530 = arith.constant 9 : index
    %c896_531 = arith.constant 896 : index
    %314 = vector.load %arg14[%c9_530, %c896_531] : memref<24x2048xf32, #tpu.memory_space<vmem>>, vector<1x128xf32>
    tpu.vector_store %arg14[%c9_530, %c896_531], %313 {strides = array<i32>} : memref<24x2048xf32, #tpu.memory_space<vmem>>, vector<1x128xf32>,
    %c99 = arith.constant 99 : index
    %c0_532 = arith.constant 0 : index
    %315 = vector.load %arg13[%c99, %c0_532] : memref<168x128xf32, #tpu.memory_space<vmem>>, vector<1x128xf32>
    %c9_533 = arith.constant 9 : index
    %c1024_534 = arith.constant 1024 : index
    %316 = vector.load %arg14[%c9_533, %c1024_534] : memref<24x2048xf32, #tpu.memory_space<vmem>>, vector<1x128xf32>
    tpu.vector_store %arg14[%c9_533, %c1024_534], %315 {strides = array<i32>} : memref<24x2048xf32, #tpu.memory_space<vmem>>, vector<1x128xf32>,
    %c100 = arith.constant 100 : index
    %c0_535 = arith.constant 0 : index
    %317 = vector.load %arg13[%c100, %c0_535] : memref<168x128xf32, #tpu.memory_space<vmem>>, vector<1x128xf32>
    %c9_536 = arith.constant 9 : index
    %c1152_537 = arith.constant 1152 : index
    %318 = vector.load %arg14[%c9_536, %c1152_537] : memref<24x2048xf32, #tpu.memory_space<vmem>>, vector<1x128xf32>
    tpu.vector_store %arg14[%c9_536, %c1152_537], %317 {strides = array<i32>} : memref<24x2048xf32, #tpu.memory_space<vmem>>, vector<1x128xf32>,
    %c101 = arith.constant 101 : index
    %c0_538 = arith.constant 0 : index
    %319 = vector.load %arg13[%c101, %c0_538] : memref<168x128xf32, #tpu.memory_space<vmem>>, vector<1x128xf32>
    %c9_539 = arith.constant 9 : index
    %c1280_540 = arith.constant 1280 : index
    %320 = vector.load %arg14[%c9_539, %c1280_540] : memref<24x2048xf32, #tpu.memory_space<vmem>>, vector<1x128xf32>
    tpu.vector_store %arg14[%c9_539, %c1280_540], %319 {strides = array<i32>} : memref<24x2048xf32, #tpu.memory_space<vmem>>, vector<1x128xf32>,
    %c102 = arith.constant 102 : index
    %c0_541 = arith.constant 0 : index
    %321 = vector.load %arg13[%c102, %c0_541] : memref<168x128xf32, #tpu.memory_space<vmem>>, vector<1x128xf32>
    %c9_542 = arith.constant 9 : index
    %c1408_543 = arith.constant 1408 : index
    %322 = vector.load %arg14[%c9_542, %c1408_543] : memref<24x2048xf32, #tpu.memory_space<vmem>>, vector<1x128xf32>
    tpu.vector_store %arg14[%c9_542, %c1408_543], %321 {strides = array<i32>} : memref<24x2048xf32, #tpu.memory_space<vmem>>, vector<1x128xf32>,
    %c108 = arith.constant 108 : index
    %c0_544 = arith.constant 0 : index
    %323 = vector.load %arg13[%c108, %c0_544] : memref<168x128xf32, #tpu.memory_space<vmem>>, vector<1x128xf32>
    %c9_545 = arith.constant 9 : index
    %c1536_546 = arith.constant 1536 : index
    %324 = vector.load %arg14[%c9_545, %c1536_546] : memref<24x2048xf32, #tpu.memory_space<vmem>>, vector<1x128xf32>
    tpu.vector_store %arg14[%c9_545, %c1536_546], %323 {strides = array<i32>} : memref<24x2048xf32, #tpu.memory_space<vmem>>, vector<1x128xf32>,
    %c109 = arith.constant 109 : index
    %c0_547 = arith.constant 0 : index
    %325 = vector.load %arg13[%c109, %c0_547] : memref<168x128xf32, #tpu.memory_space<vmem>>, vector<1x128xf32>
    %c9_548 = arith.constant 9 : index
    %c1664_549 = arith.constant 1664 : index
    %326 = vector.load %arg14[%c9_548, %c1664_549] : memref<24x2048xf32, #tpu.memory_space<vmem>>, vector<1x128xf32>
    tpu.vector_store %arg14[%c9_548, %c1664_549], %325 {strides = array<i32>} : memref<24x2048xf32, #tpu.memory_space<vmem>>, vector<1x128xf32>,
    %c110 = arith.constant 110 : index
    %c0_550 = arith.constant 0 : index
    %327 = vector.load %arg13[%c110, %c0_550] : memref<168x128xf32, #tpu.memory_space<vmem>>, vector<1x128xf32>
    %c9_551 = arith.constant 9 : index
    %c1792_552 = arith.constant 1792 : index
    %328 = vector.load %arg14[%c9_551, %c1792_552] : memref<24x2048xf32, #tpu.memory_space<vmem>>, vector<1x128xf32>
    tpu.vector_store %arg14[%c9_551, %c1792_552], %327 {strides = array<i32>} : memref<24x2048xf32, #tpu.memory_space<vmem>>, vector<1x128xf32>,
    %c111 = arith.constant 111 : index
    %c0_553 = arith.constant 0 : index
    %329 = vector.load %arg13[%c111, %c0_553] : memref<168x128xf32, #tpu.memory_space<vmem>>, vector<1x128xf32>
    %c9_554 = arith.constant 9 : index
    %c1920_555 = arith.constant 1920 : index
    %330 = vector.load %arg14[%c9_554, %c1920_555] : memref<24x2048xf32, #tpu.memory_space<vmem>>, vector<1x128xf32>
    tpu.vector_store %arg14[%c9_554, %c1920_555], %329 {strides = array<i32>} : memref<24x2048xf32, #tpu.memory_space<vmem>>, vector<1x128xf32>,
    %c83_556 = arith.constant 83 : index
    %c0_557 = arith.constant 0 : index
    %331 = vector.load %arg13[%c83_556, %c0_557] : memref<168x128xf32, #tpu.memory_space<vmem>>, vector<1x128xf32>
    %c10_558 = arith.constant 10 : index
    %c0_559 = arith.constant 0 : index
    %332 = vector.load %arg14[%c10_558, %c0_559] : memref<24x2048xf32, #tpu.memory_space<vmem>>, vector<1x128xf32>
    tpu.vector_store %arg14[%c10_558, %c0_559], %331 {strides = array<i32>} : memref<24x2048xf32, #tpu.memory_space<vmem>>, vector<1x128xf32>,
    %c84_560 = arith.constant 84 : index
    %c0_561 = arith.constant 0 : index
    %333 = vector.load %arg13[%c84_560, %c0_561] : memref<168x128xf32, #tpu.memory_space<vmem>>, vector<1x128xf32>
    %c10_562 = arith.constant 10 : index
    %c128_563 = arith.constant 128 : index
    %334 = vector.load %arg14[%c10_562, %c128_563] : memref<24x2048xf32, #tpu.memory_space<vmem>>, vector<1x128xf32>
    tpu.vector_store %arg14[%c10_562, %c128_563], %333 {strides = array<i32>} : memref<24x2048xf32, #tpu.memory_space<vmem>>, vector<1x128xf32>,
    %c85 = arith.constant 85 : index
    %c0_564 = arith.constant 0 : index
    %335 = vector.load %arg13[%c85, %c0_564] : memref<168x128xf32, #tpu.memory_space<vmem>>, vector<1x128xf32>
    %c10_565 = arith.constant 10 : index
    %c256_566 = arith.constant 256 : index
    %336 = vector.load %arg14[%c10_565, %c256_566] : memref<24x2048xf32, #tpu.memory_space<vmem>>, vector<1x128xf32>
    tpu.vector_store %arg14[%c10_565, %c256_566], %335 {strides = array<i32>} : memref<24x2048xf32, #tpu.memory_space<vmem>>, vector<1x128xf32>,
    %c86 = arith.constant 86 : index
    %c0_567 = arith.constant 0 : index
    %337 = vector.load %arg13[%c86, %c0_567] : memref<168x128xf32, #tpu.memory_space<vmem>>, vector<1x128xf32>
    %c10_568 = arith.constant 10 : index
    %c384_569 = arith.constant 384 : index
    %338 = vector.load %arg14[%c10_568, %c384_569] : memref<24x2048xf32, #tpu.memory_space<vmem>>, vector<1x128xf32>
    tpu.vector_store %arg14[%c10_568, %c384_569], %337 {strides = array<i32>} : memref<24x2048xf32, #tpu.memory_space<vmem>>, vector<1x128xf32>,
    %c92_570 = arith.constant 92 : index
    %c0_571 = arith.constant 0 : index
    %339 = vector.load %arg13[%c92_570, %c0_571] : memref<168x128xf32, #tpu.memory_space<vmem>>, vector<1x128xf32>
    %c10_572 = arith.constant 10 : index
    %c512_573 = arith.constant 512 : index
    %340 = vector.load %arg14[%c10_572, %c512_573] : memref<24x2048xf32, #tpu.memory_space<vmem>>, vector<1x128xf32>
    tpu.vector_store %arg14[%c10_572, %c512_573], %339 {strides = array<i32>} : memref<24x2048xf32, #tpu.memory_space<vmem>>, vector<1x128xf32>,
    %c93_574 = arith.constant 93 : index
    %c0_575 = arith.constant 0 : index
    %341 = vector.load %arg13[%c93_574, %c0_575] : memref<168x128xf32, #tpu.memory_space<vmem>>, vector<1x128xf32>
    %c10_576 = arith.constant 10 : index
    %c640_577 = arith.constant 640 : index
    %342 = vector.load %arg14[%c10_576, %c640_577] : memref<24x2048xf32, #tpu.memory_space<vmem>>, vector<1x128xf32>
    tpu.vector_store %arg14[%c10_576, %c640_577], %341 {strides = array<i32>} : memref<24x2048xf32, #tpu.memory_space<vmem>>, vector<1x128xf32>,
    %c94 = arith.constant 94 : index
    %c0_578 = arith.constant 0 : index
    %343 = vector.load %arg13[%c94, %c0_578] : memref<168x128xf32, #tpu.memory_space<vmem>>, vector<1x128xf32>
    %c10_579 = arith.constant 10 : index
    %c768_580 = arith.constant 768 : index
    %344 = vector.load %arg14[%c10_579, %c768_580] : memref<24x2048xf32, #tpu.memory_space<vmem>>, vector<1x128xf32>
    tpu.vector_store %arg14[%c10_579, %c768_580], %343 {strides = array<i32>} : memref<24x2048xf32, #tpu.memory_space<vmem>>, vector<1x128xf32>,
    %c95 = arith.constant 95 : index
    %c0_581 = arith.constant 0 : index
    %345 = vector.load %arg13[%c95, %c0_581] : memref<168x128xf32, #tpu.memory_space<vmem>>, vector<1x128xf32>
    %c10_582 = arith.constant 10 : index
    %c896_583 = arith.constant 896 : index
    %346 = vector.load %arg14[%c10_582, %c896_583] : memref<24x2048xf32, #tpu.memory_space<vmem>>, vector<1x128xf32>
    tpu.vector_store %arg14[%c10_582, %c896_583], %345 {strides = array<i32>} : memref<24x2048xf32, #tpu.memory_space<vmem>>, vector<1x128xf32>,
    %c101_584 = arith.constant 101 : index
    %c0_585 = arith.constant 0 : index
    %347 = vector.load %arg13[%c101_584, %c0_585] : memref<168x128xf32, #tpu.memory_space<vmem>>, vector<1x128xf32>
    %c10_586 = arith.constant 10 : index
    %c1024_587 = arith.constant 1024 : index
    %348 = vector.load %arg14[%c10_586, %c1024_587] : memref<24x2048xf32, #tpu.memory_space<vmem>>, vector<1x128xf32>
    tpu.vector_store %arg14[%c10_586, %c1024_587], %347 {strides = array<i32>} : memref<24x2048xf32, #tpu.memory_space<vmem>>, vector<1x128xf32>,
    %c102_588 = arith.constant 102 : index
    %c0_589 = arith.constant 0 : index
    %349 = vector.load %arg13[%c102_588, %c0_589] : memref<168x128xf32, #tpu.memory_space<vmem>>, vector<1x128xf32>
    %c10_590 = arith.constant 10 : index
    %c1152_591 = arith.constant 1152 : index
    %350 = vector.load %arg14[%c10_590, %c1152_591] : memref<24x2048xf32, #tpu.memory_space<vmem>>, vector<1x128xf32>
    tpu.vector_store %arg14[%c10_590, %c1152_591], %349 {strides = array<i32>} : memref<24x2048xf32, #tpu.memory_space<vmem>>, vector<1x128xf32>,
    %c103 = arith.constant 103 : index
    %c0_592 = arith.constant 0 : index
    %351 = vector.load %arg13[%c103, %c0_592] : memref<168x128xf32, #tpu.memory_space<vmem>>, vector<1x128xf32>
    %c10_593 = arith.constant 10 : index
    %c1280_594 = arith.constant 1280 : index
    %352 = vector.load %arg14[%c10_593, %c1280_594] : memref<24x2048xf32, #tpu.memory_space<vmem>>, vector<1x128xf32>
    tpu.vector_store %arg14[%c10_593, %c1280_594], %351 {strides = array<i32>} : memref<24x2048xf32, #tpu.memory_space<vmem>>, vector<1x128xf32>,
    %c104 = arith.constant 104 : index
    %c0_595 = arith.constant 0 : index
    %353 = vector.load %arg13[%c104, %c0_595] : memref<168x128xf32, #tpu.memory_space<vmem>>, vector<1x128xf32>
    %c10_596 = arith.constant 10 : index
    %c1408_597 = arith.constant 1408 : index
    %354 = vector.load %arg14[%c10_596, %c1408_597] : memref<24x2048xf32, #tpu.memory_space<vmem>>, vector<1x128xf32>
    tpu.vector_store %arg14[%c10_596, %c1408_597], %353 {strides = array<i32>} : memref<24x2048xf32, #tpu.memory_space<vmem>>, vector<1x128xf32>,
    %c110_598 = arith.constant 110 : index
    %c0_599 = arith.constant 0 : index
    %355 = vector.load %arg13[%c110_598, %c0_599] : memref<168x128xf32, #tpu.memory_space<vmem>>, vector<1x128xf32>
    %c10_600 = arith.constant 10 : index
    %c1536_601 = arith.constant 1536 : index
    %356 = vector.load %arg14[%c10_600, %c1536_601] : memref<24x2048xf32, #tpu.memory_space<vmem>>, vector<1x128xf32>
    tpu.vector_store %arg14[%c10_600, %c1536_601], %355 {strides = array<i32>} : memref<24x2048xf32, #tpu.memory_space<vmem>>, vector<1x128xf32>,
    %c111_602 = arith.constant 111 : index
    %c0_603 = arith.constant 0 : index
    %357 = vector.load %arg13[%c111_602, %c0_603] : memref<168x128xf32, #tpu.memory_space<vmem>>, vector<1x128xf32>
    %c10_604 = arith.constant 10 : index
    %c1664_605 = arith.constant 1664 : index
    %358 = vector.load %arg14[%c10_604, %c1664_605] : memref<24x2048xf32, #tpu.memory_space<vmem>>, vector<1x128xf32>
    tpu.vector_store %arg14[%c10_604, %c1664_605], %357 {strides = array<i32>} : memref<24x2048xf32, #tpu.memory_space<vmem>>, vector<1x128xf32>,
    %c112 = arith.constant 112 : index
    %c0_606 = arith.constant 0 : index
    %359 = vector.load %arg13[%c112, %c0_606] : memref<168x128xf32, #tpu.memory_space<vmem>>, vector<1x128xf32>
    %c10_607 = arith.constant 10 : index
    %c1792_608 = arith.constant 1792 : index
    %360 = vector.load %arg14[%c10_607, %c1792_608] : memref<24x2048xf32, #tpu.memory_space<vmem>>, vector<1x128xf32>
    tpu.vector_store %arg14[%c10_607, %c1792_608], %359 {strides = array<i32>} : memref<24x2048xf32, #tpu.memory_space<vmem>>, vector<1x128xf32>,
    %c113 = arith.constant 113 : index
    %c0_609 = arith.constant 0 : index
    %361 = vector.load %arg13[%c113, %c0_609] : memref<168x128xf32, #tpu.memory_space<vmem>>, vector<1x128xf32>
    %c10_610 = arith.constant 10 : index
    %c1920_611 = arith.constant 1920 : index
    %362 = vector.load %arg14[%c10_610, %c1920_611] : memref<24x2048xf32, #tpu.memory_space<vmem>>, vector<1x128xf32>
    tpu.vector_store %arg14[%c10_610, %c1920_611], %361 {strides = array<i32>} : memref<24x2048xf32, #tpu.memory_space<vmem>>, vector<1x128xf32>,
    %c85_612 = arith.constant 85 : index
    %c0_613 = arith.constant 0 : index
    %363 = vector.load %arg13[%c85_612, %c0_613] : memref<168x128xf32, #tpu.memory_space<vmem>>, vector<1x128xf32>
    %c11_614 = arith.constant 11 : index
    %c0_615 = arith.constant 0 : index
    %364 = vector.load %arg14[%c11_614, %c0_615] : memref<24x2048xf32, #tpu.memory_space<vmem>>, vector<1x128xf32>
    tpu.vector_store %arg14[%c11_614, %c0_615], %363 {strides = array<i32>} : memref<24x2048xf32, #tpu.memory_space<vmem>>, vector<1x128xf32>,
    %c86_616 = arith.constant 86 : index
    %c0_617 = arith.constant 0 : index
    %365 = vector.load %arg13[%c86_616, %c0_617] : memref<168x128xf32, #tpu.memory_space<vmem>>, vector<1x128xf32>
    %c11_618 = arith.constant 11 : index
    %c128_619 = arith.constant 128 : index
    %366 = vector.load %arg14[%c11_618, %c128_619] : memref<24x2048xf32, #tpu.memory_space<vmem>>, vector<1x128xf32>
    tpu.vector_store %arg14[%c11_618, %c128_619], %365 {strides = array<i32>} : memref<24x2048xf32, #tpu.memory_space<vmem>>, vector<1x128xf32>,
    %c87 = arith.constant 87 : index
    %c0_620 = arith.constant 0 : index
    %367 = vector.load %arg13[%c87, %c0_620] : memref<168x128xf32, #tpu.memory_space<vmem>>, vector<1x128xf32>
    %c11_621 = arith.constant 11 : index
    %c256_622 = arith.constant 256 : index
    %368 = vector.load %arg14[%c11_621, %c256_622] : memref<24x2048xf32, #tpu.memory_space<vmem>>, vector<1x128xf32>
    tpu.vector_store %arg14[%c11_621, %c256_622], %367 {strides = array<i32>} : memref<24x2048xf32, #tpu.memory_space<vmem>>, vector<1x128xf32>,
    %c88 = arith.constant 88 : index
    %c0_623 = arith.constant 0 : index
    %369 = vector.load %arg13[%c88, %c0_623] : memref<168x128xf32, #tpu.memory_space<vmem>>, vector<1x128xf32>
    %c11_624 = arith.constant 11 : index
    %c384_625 = arith.constant 384 : index
    %370 = vector.load %arg14[%c11_624, %c384_625] : memref<24x2048xf32, #tpu.memory_space<vmem>>, vector<1x128xf32>
    tpu.vector_store %arg14[%c11_624, %c384_625], %369 {strides = array<i32>} : memref<24x2048xf32, #tpu.memory_space<vmem>>, vector<1x128xf32>,
    %c94_626 = arith.constant 94 : index
    %c0_627 = arith.constant 0 : index
    %371 = vector.load %arg13[%c94_626, %c0_627] : memref<168x128xf32, #tpu.memory_space<vmem>>, vector<1x128xf32>
    %c11_628 = arith.constant 11 : index
    %c512_629 = arith.constant 512 : index
    %372 = vector.load %arg14[%c11_628, %c512_629] : memref<24x2048xf32, #tpu.memory_space<vmem>>, vector<1x128xf32>
    tpu.vector_store %arg14[%c11_628, %c512_629], %371 {strides = array<i32>} : memref<24x2048xf32, #tpu.memory_space<vmem>>, vector<1x128xf32>,
    %c95_630 = arith.constant 95 : index
    %c0_631 = arith.constant 0 : index
    %373 = vector.load %arg13[%c95_630, %c0_631] : memref<168x128xf32, #tpu.memory_space<vmem>>, vector<1x128xf32>
    %c11_632 = arith.constant 11 : index
    %c640_633 = arith.constant 640 : index
    %374 = vector.load %arg14[%c11_632, %c640_633] : memref<24x2048xf32, #tpu.memory_space<vmem>>, vector<1x128xf32>
    tpu.vector_store %arg14[%c11_632, %c640_633], %373 {strides = array<i32>} : memref<24x2048xf32, #tpu.memory_space<vmem>>, vector<1x128xf32>,
    %c96 = arith.constant 96 : index
    %c0_634 = arith.constant 0 : index
    %375 = vector.load %arg13[%c96, %c0_634] : memref<168x128xf32, #tpu.memory_space<vmem>>, vector<1x128xf32>
    %c11_635 = arith.constant 11 : index
    %c768_636 = arith.constant 768 : index
    %376 = vector.load %arg14[%c11_635, %c768_636] : memref<24x2048xf32, #tpu.memory_space<vmem>>, vector<1x128xf32>
    tpu.vector_store %arg14[%c11_635, %c768_636], %375 {strides = array<i32>} : memref<24x2048xf32, #tpu.memory_space<vmem>>, vector<1x128xf32>,
    %c97 = arith.constant 97 : index
    %c0_637 = arith.constant 0 : index
    %377 = vector.load %arg13[%c97, %c0_637] : memref<168x128xf32, #tpu.memory_space<vmem>>, vector<1x128xf32>
    %c11_638 = arith.constant 11 : index
    %c896_639 = arith.constant 896 : index
    %378 = vector.load %arg14[%c11_638, %c896_639] : memref<24x2048xf32, #tpu.memory_space<vmem>>, vector<1x128xf32>
    tpu.vector_store %arg14[%c11_638, %c896_639], %377 {strides = array<i32>} : memref<24x2048xf32, #tpu.memory_space<vmem>>, vector<1x128xf32>,
    %c103_640 = arith.constant 103 : index
    %c0_641 = arith.constant 0 : index
    %379 = vector.load %arg13[%c103_640, %c0_641] : memref<168x128xf32, #tpu.memory_space<vmem>>, vector<1x128xf32>
    %c11_642 = arith.constant 11 : index
    %c1024_643 = arith.constant 1024 : index
    %380 = vector.load %arg14[%c11_642, %c1024_643] : memref<24x2048xf32, #tpu.memory_space<vmem>>, vector<1x128xf32>
    tpu.vector_store %arg14[%c11_642, %c1024_643], %379 {strides = array<i32>} : memref<24x2048xf32, #tpu.memory_space<vmem>>, vector<1x128xf32>,
    %c104_644 = arith.constant 104 : index
    %c0_645 = arith.constant 0 : index
    %381 = vector.load %arg13[%c104_644, %c0_645] : memref<168x128xf32, #tpu.memory_space<vmem>>, vector<1x128xf32>
    %c11_646 = arith.constant 11 : index
    %c1152_647 = arith.constant 1152 : index
    %382 = vector.load %arg14[%c11_646, %c1152_647] : memref<24x2048xf32, #tpu.memory_space<vmem>>, vector<1x128xf32>
    tpu.vector_store %arg14[%c11_646, %c1152_647], %381 {strides = array<i32>} : memref<24x2048xf32, #tpu.memory_space<vmem>>, vector<1x128xf32>,
    %c105 = arith.constant 105 : index
    %c0_648 = arith.constant 0 : index
    %383 = vector.load %arg13[%c105, %c0_648] : memref<168x128xf32, #tpu.memory_space<vmem>>, vector<1x128xf32>
    %c11_649 = arith.constant 11 : index
    %c1280_650 = arith.constant 1280 : index
    %384 = vector.load %arg14[%c11_649, %c1280_650] : memref<24x2048xf32, #tpu.memory_space<vmem>>, vector<1x128xf32>
    tpu.vector_store %arg14[%c11_649, %c1280_650], %383 {strides = array<i32>} : memref<24x2048xf32, #tpu.memory_space<vmem>>, vector<1x128xf32>,
    %c106 = arith.constant 106 : index
    %c0_651 = arith.constant 0 : index
    %385 = vector.load %arg13[%c106, %c0_651] : memref<168x128xf32, #tpu.memory_space<vmem>>, vector<1x128xf32>
    %c11_652 = arith.constant 11 : index
    %c1408_653 = arith.constant 1408 : index
    %386 = vector.load %arg14[%c11_652, %c1408_653] : memref<24x2048xf32, #tpu.memory_space<vmem>>, vector<1x128xf32>
    tpu.vector_store %arg14[%c11_652, %c1408_653], %385 {strides = array<i32>} : memref<24x2048xf32, #tpu.memory_space<vmem>>, vector<1x128xf32>,
    %c112_654 = arith.constant 112 : index
    %c0_655 = arith.constant 0 : index
    %387 = vector.load %arg13[%c112_654, %c0_655] : memref<168x128xf32, #tpu.memory_space<vmem>>, vector<1x128xf32>
    %c11_656 = arith.constant 11 : index
    %c1536_657 = arith.constant 1536 : index
    %388 = vector.load %arg14[%c11_656, %c1536_657] : memref<24x2048xf32, #tpu.memory_space<vmem>>, vector<1x128xf32>
    tpu.vector_store %arg14[%c11_656, %c1536_657], %387 {strides = array<i32>} : memref<24x2048xf32, #tpu.memory_space<vmem>>, vector<1x128xf32>,
    %c113_658 = arith.constant 113 : index
    %c0_659 = arith.constant 0 : index
    %389 = vector.load %arg13[%c113_658, %c0_659] : memref<168x128xf32, #tpu.memory_space<vmem>>, vector<1x128xf32>
    %c11_660 = arith.constant 11 : index
    %c1664_661 = arith.constant 1664 : index
    %390 = vector.load %arg14[%c11_660, %c1664_661] : memref<24x2048xf32, #tpu.memory_space<vmem>>, vector<1x128xf32>
    tpu.vector_store %arg14[%c11_660, %c1664_661], %389 {strides = array<i32>} : memref<24x2048xf32, #tpu.memory_space<vmem>>, vector<1x128xf32>,
    %c114 = arith.constant 114 : index
    %c0_662 = arith.constant 0 : index
    %391 = vector.load %arg13[%c114, %c0_662] : memref<168x128xf32, #tpu.memory_space<vmem>>, vector<1x128xf32>
    %c11_663 = arith.constant 11 : index
    %c1792_664 = arith.constant 1792 : index
    %392 = vector.load %arg14[%c11_663, %c1792_664] : memref<24x2048xf32, #tpu.memory_space<vmem>>, vector<1x128xf32>
    tpu.vector_store %arg14[%c11_663, %c1792_664], %391 {strides = array<i32>} : memref<24x2048xf32, #tpu.memory_space<vmem>>, vector<1x128xf32>,
    %c115 = arith.constant 115 : index
    %c0_665 = arith.constant 0 : index
    %393 = vector.load %arg13[%c115, %c0_665] : memref<168x128xf32, #tpu.memory_space<vmem>>, vector<1x128xf32>
    %c11_666 = arith.constant 11 : index
    %c1920_667 = arith.constant 1920 : index
    %394 = vector.load %arg14[%c11_666, %c1920_667] : memref<24x2048xf32, #tpu.memory_space<vmem>>, vector<1x128xf32>
    tpu.vector_store %arg14[%c11_666, %c1920_667], %393 {strides = array<i32>} : memref<24x2048xf32, #tpu.memory_space<vmem>>, vector<1x128xf32>,
    %c99_668 = arith.constant 99 : index
    %c0_669 = arith.constant 0 : index
    %395 = vector.load %arg13[%c99_668, %c0_669] : memref<168x128xf32, #tpu.memory_space<vmem>>, vector<1x128xf32>
    %c12_670 = arith.constant 12 : index
    %c0_671 = arith.constant 0 : index
    %396 = vector.load %arg14[%c12_670, %c0_671] : memref<24x2048xf32, #tpu.memory_space<vmem>>, vector<1x128xf32>
    tpu.vector_store %arg14[%c12_670, %c0_671], %395 {strides = array<i32>} : memref<24x2048xf32, #tpu.memory_space<vmem>>, vector<1x128xf32>,
    %c100_672 = arith.constant 100 : index
    %c0_673 = arith.constant 0 : index
    %397 = vector.load %arg13[%c100_672, %c0_673] : memref<168x128xf32, #tpu.memory_space<vmem>>, vector<1x128xf32>
    %c12_674 = arith.constant 12 : index
    %c128_675 = arith.constant 128 : index
    %398 = vector.load %arg14[%c12_674, %c128_675] : memref<24x2048xf32, #tpu.memory_space<vmem>>, vector<1x128xf32>
    tpu.vector_store %arg14[%c12_674, %c128_675], %397 {strides = array<i32>} : memref<24x2048xf32, #tpu.memory_space<vmem>>, vector<1x128xf32>,
    %c101_676 = arith.constant 101 : index
    %c0_677 = arith.constant 0 : index
    %399 = vector.load %arg13[%c101_676, %c0_677] : memref<168x128xf32, #tpu.memory_space<vmem>>, vector<1x128xf32>
    %c12_678 = arith.constant 12 : index
    %c256_679 = arith.constant 256 : index
    %400 = vector.load %arg14[%c12_678, %c256_679] : memref<24x2048xf32, #tpu.memory_space<vmem>>, vector<1x128xf32>
    tpu.vector_store %arg14[%c12_678, %c256_679], %399 {strides = array<i32>} : memref<24x2048xf32, #tpu.memory_space<vmem>>, vector<1x128xf32>,
    %c102_680 = arith.constant 102 : index
    %c0_681 = arith.constant 0 : index
    %401 = vector.load %arg13[%c102_680, %c0_681] : memref<168x128xf32, #tpu.memory_space<vmem>>, vector<1x128xf32>
    %c12_682 = arith.constant 12 : index
    %c384_683 = arith.constant 384 : index
    %402 = vector.load %arg14[%c12_682, %c384_683] : memref<24x2048xf32, #tpu.memory_space<vmem>>, vector<1x128xf32>
    tpu.vector_store %arg14[%c12_682, %c384_683], %401 {strides = array<i32>} : memref<24x2048xf32, #tpu.memory_space<vmem>>, vector<1x128xf32>,
    %c108_684 = arith.constant 108 : index
    %c0_685 = arith.constant 0 : index
    %403 = vector.load %arg13[%c108_684, %c0_685] : memref<168x128xf32, #tpu.memory_space<vmem>>, vector<1x128xf32>
    %c12_686 = arith.constant 12 : index
    %c512_687 = arith.constant 512 : index
    %404 = vector.load %arg14[%c12_686, %c512_687] : memref<24x2048xf32, #tpu.memory_space<vmem>>, vector<1x128xf32>
    tpu.vector_store %arg14[%c12_686, %c512_687], %403 {strides = array<i32>} : memref<24x2048xf32, #tpu.memory_space<vmem>>, vector<1x128xf32>,
    %c109_688 = arith.constant 109 : index
    %c0_689 = arith.constant 0 : index
    %405 = vector.load %arg13[%c109_688, %c0_689] : memref<168x128xf32, #tpu.memory_space<vmem>>, vector<1x128xf32>
    %c12_690 = arith.constant 12 : index
    %c640_691 = arith.constant 640 : index
    %406 = vector.load %arg14[%c12_690, %c640_691] : memref<24x2048xf32, #tpu.memory_space<vmem>>, vector<1x128xf32>
    tpu.vector_store %arg14[%c12_690, %c640_691], %405 {strides = array<i32>} : memref<24x2048xf32, #tpu.memory_space<vmem>>, vector<1x128xf32>,
    %c110_692 = arith.constant 110 : index
    %c0_693 = arith.constant 0 : index
    %407 = vector.load %arg13[%c110_692, %c0_693] : memref<168x128xf32, #tpu.memory_space<vmem>>, vector<1x128xf32>
    %c12_694 = arith.constant 12 : index
    %c768_695 = arith.constant 768 : index
    %408 = vector.load %arg14[%c12_694, %c768_695] : memref<24x2048xf32, #tpu.memory_space<vmem>>, vector<1x128xf32>
    tpu.vector_store %arg14[%c12_694, %c768_695], %407 {strides = array<i32>} : memref<24x2048xf32, #tpu.memory_space<vmem>>, vector<1x128xf32>,
    %c111_696 = arith.constant 111 : index
    %c0_697 = arith.constant 0 : index
    %409 = vector.load %arg13[%c111_696, %c0_697] : memref<168x128xf32, #tpu.memory_space<vmem>>, vector<1x128xf32>
    %c12_698 = arith.constant 12 : index
    %c896_699 = arith.constant 896 : index
    %410 = vector.load %arg14[%c12_698, %c896_699] : memref<24x2048xf32, #tpu.memory_space<vmem>>, vector<1x128xf32>
    tpu.vector_store %arg14[%c12_698, %c896_699], %409 {strides = array<i32>} : memref<24x2048xf32, #tpu.memory_space<vmem>>, vector<1x128xf32>,
    %c117 = arith.constant 117 : index
    %c0_700 = arith.constant 0 : index
    %411 = vector.load %arg13[%c117, %c0_700] : memref<168x128xf32, #tpu.memory_space<vmem>>, vector<1x128xf32>
    %c12_701 = arith.constant 12 : index
    %c1024_702 = arith.constant 1024 : index
    %412 = vector.load %arg14[%c12_701, %c1024_702] : memref<24x2048xf32, #tpu.memory_space<vmem>>, vector<1x128xf32>
    tpu.vector_store %arg14[%c12_701, %c1024_702], %411 {strides = array<i32>} : memref<24x2048xf32, #tpu.memory_space<vmem>>, vector<1x128xf32>,
    %c118 = arith.constant 118 : index
    %c0_703 = arith.constant 0 : index
    %413 = vector.load %arg13[%c118, %c0_703] : memref<168x128xf32, #tpu.memory_space<vmem>>, vector<1x128xf32>
    %c12_704 = arith.constant 12 : index
    %c1152_705 = arith.constant 1152 : index
    %414 = vector.load %arg14[%c12_704, %c1152_705] : memref<24x2048xf32, #tpu.memory_space<vmem>>, vector<1x128xf32>
    tpu.vector_store %arg14[%c12_704, %c1152_705], %413 {strides = array<i32>} : memref<24x2048xf32, #tpu.memory_space<vmem>>, vector<1x128xf32>,
    %c119 = arith.constant 119 : index
    %c0_706 = arith.constant 0 : index
    %415 = vector.load %arg13[%c119, %c0_706] : memref<168x128xf32, #tpu.memory_space<vmem>>, vector<1x128xf32>
    %c12_707 = arith.constant 12 : index
    %c1280_708 = arith.constant 1280 : index
    %416 = vector.load %arg14[%c12_707, %c1280_708] : memref<24x2048xf32, #tpu.memory_space<vmem>>, vector<1x128xf32>
    tpu.vector_store %arg14[%c12_707, %c1280_708], %415 {strides = array<i32>} : memref<24x2048xf32, #tpu.memory_space<vmem>>, vector<1x128xf32>,
    %c120 = arith.constant 120 : index
    %c0_709 = arith.constant 0 : index
    %417 = vector.load %arg13[%c120, %c0_709] : memref<168x128xf32, #tpu.memory_space<vmem>>, vector<1x128xf32>
    %c12_710 = arith.constant 12 : index
    %c1408_711 = arith.constant 1408 : index
    %418 = vector.load %arg14[%c12_710, %c1408_711] : memref<24x2048xf32, #tpu.memory_space<vmem>>, vector<1x128xf32>
    tpu.vector_store %arg14[%c12_710, %c1408_711], %417 {strides = array<i32>} : memref<24x2048xf32, #tpu.memory_space<vmem>>, vector<1x128xf32>,
    %c126 = arith.constant 126 : index
    %c0_712 = arith.constant 0 : index
    %419 = vector.load %arg13[%c126, %c0_712] : memref<168x128xf32, #tpu.memory_space<vmem>>, vector<1x128xf32>
    %c12_713 = arith.constant 12 : index
    %c1536_714 = arith.constant 1536 : index
    %420 = vector.load %arg14[%c12_713, %c1536_714] : memref<24x2048xf32, #tpu.memory_space<vmem>>, vector<1x128xf32>
    tpu.vector_store %arg14[%c12_713, %c1536_714], %419 {strides = array<i32>} : memref<24x2048xf32, #tpu.memory_space<vmem>>, vector<1x128xf32>,
    %c127 = arith.constant 127 : index
    %c0_715 = arith.constant 0 : index
    %421 = vector.load %arg13[%c127, %c0_715] : memref<168x128xf32, #tpu.memory_space<vmem>>, vector<1x128xf32>
    %c12_716 = arith.constant 12 : index
    %c1664_717 = arith.constant 1664 : index
    %422 = vector.load %arg14[%c12_716, %c1664_717] : memref<24x2048xf32, #tpu.memory_space<vmem>>, vector<1x128xf32>
    tpu.vector_store %arg14[%c12_716, %c1664_717], %421 {strides = array<i32>} : memref<24x2048xf32, #tpu.memory_space<vmem>>, vector<1x128xf32>,
    %c128_718 = arith.constant 128 : index
    %c0_719 = arith.constant 0 : index
    %423 = vector.load %arg13[%c128_718, %c0_719] : memref<168x128xf32, #tpu.memory_space<vmem>>, vector<1x128xf32>
    %c12_720 = arith.constant 12 : index
    %c1792_721 = arith.constant 1792 : index
    %424 = vector.load %arg14[%c12_720, %c1792_721] : memref<24x2048xf32, #tpu.memory_space<vmem>>, vector<1x128xf32>
    tpu.vector_store %arg14[%c12_720, %c1792_721], %423 {strides = array<i32>} : memref<24x2048xf32, #tpu.memory_space<vmem>>, vector<1x128xf32>,
    %c129 = arith.constant 129 : index
    %c0_722 = arith.constant 0 : index
    %425 = vector.load %arg13[%c129, %c0_722] : memref<168x128xf32, #tpu.memory_space<vmem>>, vector<1x128xf32>
    %c12_723 = arith.constant 12 : index
    %c1920_724 = arith.constant 1920 : index
    %426 = vector.load %arg14[%c12_723, %c1920_724] : memref<24x2048xf32, #tpu.memory_space<vmem>>, vector<1x128xf32>
    tpu.vector_store %arg14[%c12_723, %c1920_724], %425 {strides = array<i32>} : memref<24x2048xf32, #tpu.memory_space<vmem>>, vector<1x128xf32>,
    %c101_725 = arith.constant 101 : index
    %c0_726 = arith.constant 0 : index
    %427 = vector.load %arg13[%c101_725, %c0_726] : memref<168x128xf32, #tpu.memory_space<vmem>>, vector<1x128xf32>
    %c13_727 = arith.constant 13 : index
    %c0_728 = arith.constant 0 : index
    %428 = vector.load %arg14[%c13_727, %c0_728] : memref<24x2048xf32, #tpu.memory_space<vmem>>, vector<1x128xf32>
    tpu.vector_store %arg14[%c13_727, %c0_728], %427 {strides = array<i32>} : memref<24x2048xf32, #tpu.memory_space<vmem>>, vector<1x128xf32>,
    %c102_729 = arith.constant 102 : index
    %c0_730 = arith.constant 0 : index
    %429 = vector.load %arg13[%c102_729, %c0_730] : memref<168x128xf32, #tpu.memory_space<vmem>>, vector<1x128xf32>
    %c13_731 = arith.constant 13 : index
    %c128_732 = arith.constant 128 : index
    %430 = vector.load %arg14[%c13_731, %c128_732] : memref<24x2048xf32, #tpu.memory_space<vmem>>, vector<1x128xf32>
    tpu.vector_store %arg14[%c13_731, %c128_732], %429 {strides = array<i32>} : memref<24x2048xf32, #tpu.memory_space<vmem>>, vector<1x128xf32>,
    %c103_733 = arith.constant 103 : index
    %c0_734 = arith.constant 0 : index
    %431 = vector.load %arg13[%c103_733, %c0_734] : memref<168x128xf32, #tpu.memory_space<vmem>>, vector<1x128xf32>
    %c13_735 = arith.constant 13 : index
    %c256_736 = arith.constant 256 : index
    %432 = vector.load %arg14[%c13_735, %c256_736] : memref<24x2048xf32, #tpu.memory_space<vmem>>, vector<1x128xf32>
    tpu.vector_store %arg14[%c13_735, %c256_736], %431 {strides = array<i32>} : memref<24x2048xf32, #tpu.memory_space<vmem>>, vector<1x128xf32>,
    %c104_737 = arith.constant 104 : index
    %c0_738 = arith.constant 0 : index
    %433 = vector.load %arg13[%c104_737, %c0_738] : memref<168x128xf32, #tpu.memory_space<vmem>>, vector<1x128xf32>
    %c13_739 = arith.constant 13 : index
    %c384_740 = arith.constant 384 : index
    %434 = vector.load %arg14[%c13_739, %c384_740] : memref<24x2048xf32, #tpu.memory_space<vmem>>, vector<1x128xf32>
    tpu.vector_store %arg14[%c13_739, %c384_740], %433 {strides = array<i32>} : memref<24x2048xf32, #tpu.memory_space<vmem>>, vector<1x128xf32>,
    %c110_741 = arith.constant 110 : index
    %c0_742 = arith.constant 0 : index
    %435 = vector.load %arg13[%c110_741, %c0_742] : memref<168x128xf32, #tpu.memory_space<vmem>>, vector<1x128xf32>
    %c13_743 = arith.constant 13 : index
    %c512_744 = arith.constant 512 : index
    %436 = vector.load %arg14[%c13_743, %c512_744] : memref<24x2048xf32, #tpu.memory_space<vmem>>, vector<1x128xf32>
    tpu.vector_store %arg14[%c13_743, %c512_744], %435 {strides = array<i32>} : memref<24x2048xf32, #tpu.memory_space<vmem>>, vector<1x128xf32>,
    %c111_745 = arith.constant 111 : index
    %c0_746 = arith.constant 0 : index
    %437 = vector.load %arg13[%c111_745, %c0_746] : memref<168x128xf32, #tpu.memory_space<vmem>>, vector<1x128xf32>
    %c13_747 = arith.constant 13 : index
    %c640_748 = arith.constant 640 : index
    %438 = vector.load %arg14[%c13_747, %c640_748] : memref<24x2048xf32, #tpu.memory_space<vmem>>, vector<1x128xf32>
    tpu.vector_store %arg14[%c13_747, %c640_748], %437 {strides = array<i32>} : memref<24x2048xf32, #tpu.memory_space<vmem>>, vector<1x128xf32>,
    %c112_749 = arith.constant 112 : index
    %c0_750 = arith.constant 0 : index
    %439 = vector.load %arg13[%c112_749, %c0_750] : memref<168x128xf32, #tpu.memory_space<vmem>>, vector<1x128xf32>
    %c13_751 = arith.constant 13 : index
    %c768_752 = arith.constant 768 : index
    %440 = vector.load %arg14[%c13_751, %c768_752] : memref<24x2048xf32, #tpu.memory_space<vmem>>, vector<1x128xf32>
    tpu.vector_store %arg14[%c13_751, %c768_752], %439 {strides = array<i32>} : memref<24x2048xf32, #tpu.memory_space<vmem>>, vector<1x128xf32>,
    %c113_753 = arith.constant 113 : index
    %c0_754 = arith.constant 0 : index
    %441 = vector.load %arg13[%c113_753, %c0_754] : memref<168x128xf32, #tpu.memory_space<vmem>>, vector<1x128xf32>
    %c13_755 = arith.constant 13 : index
    %c896_756 = arith.constant 896 : index
    %442 = vector.load %arg14[%c13_755, %c896_756] : memref<24x2048xf32, #tpu.memory_space<vmem>>, vector<1x128xf32>
    tpu.vector_store %arg14[%c13_755, %c896_756], %441 {strides = array<i32>} : memref<24x2048xf32, #tpu.memory_space<vmem>>, vector<1x128xf32>,
    %c119_757 = arith.constant 119 : index
    %c0_758 = arith.constant 0 : index
    %443 = vector.load %arg13[%c119_757, %c0_758] : memref<168x128xf32, #tpu.memory_space<vmem>>, vector<1x128xf32>
    %c13_759 = arith.constant 13 : index
    %c1024_760 = arith.constant 1024 : index
    %444 = vector.load %arg14[%c13_759, %c1024_760] : memref<24x2048xf32, #tpu.memory_space<vmem>>, vector<1x128xf32>
    tpu.vector_store %arg14[%c13_759, %c1024_760], %443 {strides = array<i32>} : memref<24x2048xf32, #tpu.memory_space<vmem>>, vector<1x128xf32>,
    %c120_761 = arith.constant 120 : index
    %c0_762 = arith.constant 0 : index
    %445 = vector.load %arg13[%c120_761, %c0_762] : memref<168x128xf32, #tpu.memory_space<vmem>>, vector<1x128xf32>
    %c13_763 = arith.constant 13 : index
    %c1152_764 = arith.constant 1152 : index
    %446 = vector.load %arg14[%c13_763, %c1152_764] : memref<24x2048xf32, #tpu.memory_space<vmem>>, vector<1x128xf32>
    tpu.vector_store %arg14[%c13_763, %c1152_764], %445 {strides = array<i32>} : memref<24x2048xf32, #tpu.memory_space<vmem>>, vector<1x128xf32>,
    %c121 = arith.constant 121 : index
    %c0_765 = arith.constant 0 : index
    %447 = vector.load %arg13[%c121, %c0_765] : memref<168x128xf32, #tpu.memory_space<vmem>>, vector<1x128xf32>
    %c13_766 = arith.constant 13 : index
    %c1280_767 = arith.constant 1280 : index
    %448 = vector.load %arg14[%c13_766, %c1280_767] : memref<24x2048xf32, #tpu.memory_space<vmem>>, vector<1x128xf32>
    tpu.vector_store %arg14[%c13_766, %c1280_767], %447 {strides = array<i32>} : memref<24x2048xf32, #tpu.memory_space<vmem>>, vector<1x128xf32>,
    %c122 = arith.constant 122 : index
    %c0_768 = arith.constant 0 : index
    %449 = vector.load %arg13[%c122, %c0_768] : memref<168x128xf32, #tpu.memory_space<vmem>>, vector<1x128xf32>
    %c13_769 = arith.constant 13 : index
    %c1408_770 = arith.constant 1408 : index
    %450 = vector.load %arg14[%c13_769, %c1408_770] : memref<24x2048xf32, #tpu.memory_space<vmem>>, vector<1x128xf32>
    tpu.vector_store %arg14[%c13_769, %c1408_770], %449 {strides = array<i32>} : memref<24x2048xf32, #tpu.memory_space<vmem>>, vector<1x128xf32>,
    %c128_771 = arith.constant 128 : index
    %c0_772 = arith.constant 0 : index
    %451 = vector.load %arg13[%c128_771, %c0_772] : memref<168x128xf32, #tpu.memory_space<vmem>>, vector<1x128xf32>
    %c13_773 = arith.constant 13 : index
    %c1536_774 = arith.constant 1536 : index
    %452 = vector.load %arg14[%c13_773, %c1536_774] : memref<24x2048xf32, #tpu.memory_space<vmem>>, vector<1x128xf32>
    tpu.vector_store %arg14[%c13_773, %c1536_774], %451 {strides = array<i32>} : memref<24x2048xf32, #tpu.memory_space<vmem>>, vector<1x128xf32>,
    %c129_775 = arith.constant 129 : index
    %c0_776 = arith.constant 0 : index
    %453 = vector.load %arg13[%c129_775, %c0_776] : memref<168x128xf32, #tpu.memory_space<vmem>>, vector<1x128xf32>
    %c13_777 = arith.constant 13 : index
    %c1664_778 = arith.constant 1664 : index
    %454 = vector.load %arg14[%c13_777, %c1664_778] : memref<24x2048xf32, #tpu.memory_space<vmem>>, vector<1x128xf32>
    tpu.vector_store %arg14[%c13_777, %c1664_778], %453 {strides = array<i32>} : memref<24x2048xf32, #tpu.memory_space<vmem>>, vector<1x128xf32>,
    %c130 = arith.constant 130 : index
    %c0_779 = arith.constant 0 : index
    %455 = vector.load %arg13[%c130, %c0_779] : memref<168x128xf32, #tpu.memory_space<vmem>>, vector<1x128xf32>
    %c13_780 = arith.constant 13 : index
    %c1792_781 = arith.constant 1792 : index
    %456 = vector.load %arg14[%c13_780, %c1792_781] : memref<24x2048xf32, #tpu.memory_space<vmem>>, vector<1x128xf32>
    tpu.vector_store %arg14[%c13_780, %c1792_781], %455 {strides = array<i32>} : memref<24x2048xf32, #tpu.memory_space<vmem>>, vector<1x128xf32>,
    %c131 = arith.constant 131 : index
    %c0_782 = arith.constant 0 : index
    %457 = vector.load %arg13[%c131, %c0_782] : memref<168x128xf32, #tpu.memory_space<vmem>>, vector<1x128xf32>
    %c13_783 = arith.constant 13 : index
    %c1920_784 = arith.constant 1920 : index
    %458 = vector.load %arg14[%c13_783, %c1920_784] : memref<24x2048xf32, #tpu.memory_space<vmem>>, vector<1x128xf32>
    tpu.vector_store %arg14[%c13_783, %c1920_784], %457 {strides = array<i32>} : memref<24x2048xf32, #tpu.memory_space<vmem>>, vector<1x128xf32>,
    %c103_785 = arith.constant 103 : index
    %c0_786 = arith.constant 0 : index
    %459 = vector.load %arg13[%c103_785, %c0_786] : memref<168x128xf32, #tpu.memory_space<vmem>>, vector<1x128xf32>
    %c14_787 = arith.constant 14 : index
    %c0_788 = arith.constant 0 : index
    %460 = vector.load %arg14[%c14_787, %c0_788] : memref<24x2048xf32, #tpu.memory_space<vmem>>, vector<1x128xf32>
    tpu.vector_store %arg14[%c14_787, %c0_788], %459 {strides = array<i32>} : memref<24x2048xf32, #tpu.memory_space<vmem>>, vector<1x128xf32>,
    %c104_789 = arith.constant 104 : index
    %c0_790 = arith.constant 0 : index
    %461 = vector.load %arg13[%c104_789, %c0_790] : memref<168x128xf32, #tpu.memory_space<vmem>>, vector<1x128xf32>
    %c14_791 = arith.constant 14 : index
    %c128_792 = arith.constant 128 : index
    %462 = vector.load %arg14[%c14_791, %c128_792] : memref<24x2048xf32, #tpu.memory_space<vmem>>, vector<1x128xf32>
    tpu.vector_store %arg14[%c14_791, %c128_792], %461 {strides = array<i32>} : memref<24x2048xf32, #tpu.memory_space<vmem>>, vector<1x128xf32>,
    %c105_793 = arith.constant 105 : index
    %c0_794 = arith.constant 0 : index
    %463 = vector.load %arg13[%c105_793, %c0_794] : memref<168x128xf32, #tpu.memory_space<vmem>>, vector<1x128xf32>
    %c14_795 = arith.constant 14 : index
    %c256_796 = arith.constant 256 : index
    %464 = vector.load %arg14[%c14_795, %c256_796] : memref<24x2048xf32, #tpu.memory_space<vmem>>, vector<1x128xf32>
    tpu.vector_store %arg14[%c14_795, %c256_796], %463 {strides = array<i32>} : memref<24x2048xf32, #tpu.memory_space<vmem>>, vector<1x128xf32>,
    %c106_797 = arith.constant 106 : index
    %c0_798 = arith.constant 0 : index
    %465 = vector.load %arg13[%c106_797, %c0_798] : memref<168x128xf32, #tpu.memory_space<vmem>>, vector<1x128xf32>
    %c14_799 = arith.constant 14 : index
    %c384_800 = arith.constant 384 : index
    %466 = vector.load %arg14[%c14_799, %c384_800] : memref<24x2048xf32, #tpu.memory_space<vmem>>, vector<1x128xf32>
    tpu.vector_store %arg14[%c14_799, %c384_800], %465 {strides = array<i32>} : memref<24x2048xf32, #tpu.memory_space<vmem>>, vector<1x128xf32>,
    %c112_801 = arith.constant 112 : index
    %c0_802 = arith.constant 0 : index
    %467 = vector.load %arg13[%c112_801, %c0_802] : memref<168x128xf32, #tpu.memory_space<vmem>>, vector<1x128xf32>
    %c14_803 = arith.constant 14 : index
    %c512_804 = arith.constant 512 : index
    %468 = vector.load %arg14[%c14_803, %c512_804] : memref<24x2048xf32, #tpu.memory_space<vmem>>, vector<1x128xf32>
    tpu.vector_store %arg14[%c14_803, %c512_804], %467 {strides = array<i32>} : memref<24x2048xf32, #tpu.memory_space<vmem>>, vector<1x128xf32>,
    %c113_805 = arith.constant 113 : index
    %c0_806 = arith.constant 0 : index
    %469 = vector.load %arg13[%c113_805, %c0_806] : memref<168x128xf32, #tpu.memory_space<vmem>>, vector<1x128xf32>
    %c14_807 = arith.constant 14 : index
    %c640_808 = arith.constant 640 : index
    %470 = vector.load %arg14[%c14_807, %c640_808] : memref<24x2048xf32, #tpu.memory_space<vmem>>, vector<1x128xf32>
    tpu.vector_store %arg14[%c14_807, %c640_808], %469 {strides = array<i32>} : memref<24x2048xf32, #tpu.memory_space<vmem>>, vector<1x128xf32>,
    %c114_809 = arith.constant 114 : index
    %c0_810 = arith.constant 0 : index
    %471 = vector.load %arg13[%c114_809, %c0_810] : memref<168x128xf32, #tpu.memory_space<vmem>>, vector<1x128xf32>
    %c14_811 = arith.constant 14 : index
    %c768_812 = arith.constant 768 : index
    %472 = vector.load %arg14[%c14_811, %c768_812] : memref<24x2048xf32, #tpu.memory_space<vmem>>, vector<1x128xf32>
    tpu.vector_store %arg14[%c14_811, %c768_812], %471 {strides = array<i32>} : memref<24x2048xf32, #tpu.memory_space<vmem>>, vector<1x128xf32>,
    %c115_813 = arith.constant 115 : index
    %c0_814 = arith.constant 0 : index
    %473 = vector.load %arg13[%c115_813, %c0_814] : memref<168x128xf32, #tpu.memory_space<vmem>>, vector<1x128xf32>
    %c14_815 = arith.constant 14 : index
    %c896_816 = arith.constant 896 : index
    %474 = vector.load %arg14[%c14_815, %c896_816] : memref<24x2048xf32, #tpu.memory_space<vmem>>, vector<1x128xf32>
    tpu.vector_store %arg14[%c14_815, %c896_816], %473 {strides = array<i32>} : memref<24x2048xf32, #tpu.memory_space<vmem>>, vector<1x128xf32>,
    %c121_817 = arith.constant 121 : index
    %c0_818 = arith.constant 0 : index
    %475 = vector.load %arg13[%c121_817, %c0_818] : memref<168x128xf32, #tpu.memory_space<vmem>>, vector<1x128xf32>
    %c14_819 = arith.constant 14 : index
    %c1024_820 = arith.constant 1024 : index
    %476 = vector.load %arg14[%c14_819, %c1024_820] : memref<24x2048xf32, #tpu.memory_space<vmem>>, vector<1x128xf32>
    tpu.vector_store %arg14[%c14_819, %c1024_820], %475 {strides = array<i32>} : memref<24x2048xf32, #tpu.memory_space<vmem>>, vector<1x128xf32>,
    %c122_821 = arith.constant 122 : index
    %c0_822 = arith.constant 0 : index
    %477 = vector.load %arg13[%c122_821, %c0_822] : memref<168x128xf32, #tpu.memory_space<vmem>>, vector<1x128xf32>
    %c14_823 = arith.constant 14 : index
    %c1152_824 = arith.constant 1152 : index
    %478 = vector.load %arg14[%c14_823, %c1152_824] : memref<24x2048xf32, #tpu.memory_space<vmem>>, vector<1x128xf32>
    tpu.vector_store %arg14[%c14_823, %c1152_824], %477 {strides = array<i32>} : memref<24x2048xf32, #tpu.memory_space<vmem>>, vector<1x128xf32>,
    %c123 = arith.constant 123 : index
    %c0_825 = arith.constant 0 : index
    %479 = vector.load %arg13[%c123, %c0_825] : memref<168x128xf32, #tpu.memory_space<vmem>>, vector<1x128xf32>
    %c14_826 = arith.constant 14 : index
    %c1280_827 = arith.constant 1280 : index
    %480 = vector.load %arg14[%c14_826, %c1280_827] : memref<24x2048xf32, #tpu.memory_space<vmem>>, vector<1x128xf32>
    tpu.vector_store %arg14[%c14_826, %c1280_827], %479 {strides = array<i32>} : memref<24x2048xf32, #tpu.memory_space<vmem>>, vector<1x128xf32>,
    %c124 = arith.constant 124 : index
    %c0_828 = arith.constant 0 : index
    %481 = vector.load %arg13[%c124, %c0_828] : memref<168x128xf32, #tpu.memory_space<vmem>>, vector<1x128xf32>
    %c14_829 = arith.constant 14 : index
    %c1408_830 = arith.constant 1408 : index
    %482 = vector.load %arg14[%c14_829, %c1408_830] : memref<24x2048xf32, #tpu.memory_space<vmem>>, vector<1x128xf32>
    tpu.vector_store %arg14[%c14_829, %c1408_830], %481 {strides = array<i32>} : memref<24x2048xf32, #tpu.memory_space<vmem>>, vector<1x128xf32>,
    %c130_831 = arith.constant 130 : index
    %c0_832 = arith.constant 0 : index
    %483 = vector.load %arg13[%c130_831, %c0_832] : memref<168x128xf32, #tpu.memory_space<vmem>>, vector<1x128xf32>
    %c14_833 = arith.constant 14 : index
    %c1536_834 = arith.constant 1536 : index
    %484 = vector.load %arg14[%c14_833, %c1536_834] : memref<24x2048xf32, #tpu.memory_space<vmem>>, vector<1x128xf32>
    tpu.vector_store %arg14[%c14_833, %c1536_834], %483 {strides = array<i32>} : memref<24x2048xf32, #tpu.memory_space<vmem>>, vector<1x128xf32>,
    %c131_835 = arith.constant 131 : index
    %c0_836 = arith.constant 0 : index
    %485 = vector.load %arg13[%c131_835, %c0_836] : memref<168x128xf32, #tpu.memory_space<vmem>>, vector<1x128xf32>
    %c14_837 = arith.constant 14 : index
    %c1664_838 = arith.constant 1664 : index
    %486 = vector.load %arg14[%c14_837, %c1664_838] : memref<24x2048xf32, #tpu.memory_space<vmem>>, vector<1x128xf32>
    tpu.vector_store %arg14[%c14_837, %c1664_838], %485 {strides = array<i32>} : memref<24x2048xf32, #tpu.memory_space<vmem>>, vector<1x128xf32>,
    %c132 = arith.constant 132 : index
    %c0_839 = arith.constant 0 : index
    %487 = vector.load %arg13[%c132, %c0_839] : memref<168x128xf32, #tpu.memory_space<vmem>>, vector<1x128xf32>
    %c14_840 = arith.constant 14 : index
    %c1792_841 = arith.constant 1792 : index
    %488 = vector.load %arg14[%c14_840, %c1792_841] : memref<24x2048xf32, #tpu.memory_space<vmem>>, vector<1x128xf32>
    tpu.vector_store %arg14[%c14_840, %c1792_841], %487 {strides = array<i32>} : memref<24x2048xf32, #tpu.memory_space<vmem>>, vector<1x128xf32>,
    %c133 = arith.constant 133 : index
    %c0_842 = arith.constant 0 : index
    %489 = vector.load %arg13[%c133, %c0_842] : memref<168x128xf32, #tpu.memory_space<vmem>>, vector<1x128xf32>
    %c14_843 = arith.constant 14 : index
    %c1920_844 = arith.constant 1920 : index
    %490 = vector.load %arg14[%c14_843, %c1920_844] : memref<24x2048xf32, #tpu.memory_space<vmem>>, vector<1x128xf32>
    tpu.vector_store %arg14[%c14_843, %c1920_844], %489 {strides = array<i32>} : memref<24x2048xf32, #tpu.memory_space<vmem>>, vector<1x128xf32>,
    %c117_845 = arith.constant 117 : index
    %c0_846 = arith.constant 0 : index
    %491 = vector.load %arg13[%c117_845, %c0_846] : memref<168x128xf32, #tpu.memory_space<vmem>>, vector<1x128xf32>
    %c15_847 = arith.constant 15 : index
    %c0_848 = arith.constant 0 : index
    %492 = vector.load %arg14[%c15_847, %c0_848] : memref<24x2048xf32, #tpu.memory_space<vmem>>, vector<1x128xf32>
    tpu.vector_store %arg14[%c15_847, %c0_848], %491 {strides = array<i32>} : memref<24x2048xf32, #tpu.memory_space<vmem>>, vector<1x128xf32>,
    %c118_849 = arith.constant 118 : index
    %c0_850 = arith.constant 0 : index
    %493 = vector.load %arg13[%c118_849, %c0_850] : memref<168x128xf32, #tpu.memory_space<vmem>>, vector<1x128xf32>
    %c15_851 = arith.constant 15 : index
    %c128_852 = arith.constant 128 : index
    %494 = vector.load %arg14[%c15_851, %c128_852] : memref<24x2048xf32, #tpu.memory_space<vmem>>, vector<1x128xf32>
    tpu.vector_store %arg14[%c15_851, %c128_852], %493 {strides = array<i32>} : memref<24x2048xf32, #tpu.memory_space<vmem>>, vector<1x128xf32>,
    %c119_853 = arith.constant 119 : index
    %c0_854 = arith.constant 0 : index
    %495 = vector.load %arg13[%c119_853, %c0_854] : memref<168x128xf32, #tpu.memory_space<vmem>>, vector<1x128xf32>
    %c15_855 = arith.constant 15 : index
    %c256_856 = arith.constant 256 : index
    %496 = vector.load %arg14[%c15_855, %c256_856] : memref<24x2048xf32, #tpu.memory_space<vmem>>, vector<1x128xf32>
    tpu.vector_store %arg14[%c15_855, %c256_856], %495 {strides = array<i32>} : memref<24x2048xf32, #tpu.memory_space<vmem>>, vector<1x128xf32>,
    %c120_857 = arith.constant 120 : index
    %c0_858 = arith.constant 0 : index
    %497 = vector.load %arg13[%c120_857, %c0_858] : memref<168x128xf32, #tpu.memory_space<vmem>>, vector<1x128xf32>
    %c15_859 = arith.constant 15 : index
    %c384_860 = arith.constant 384 : index
    %498 = vector.load %arg14[%c15_859, %c384_860] : memref<24x2048xf32, #tpu.memory_space<vmem>>, vector<1x128xf32>
    tpu.vector_store %arg14[%c15_859, %c384_860], %497 {strides = array<i32>} : memref<24x2048xf32, #tpu.memory_space<vmem>>, vector<1x128xf32>,
    %c126_861 = arith.constant 126 : index
    %c0_862 = arith.constant 0 : index
    %499 = vector.load %arg13[%c126_861, %c0_862] : memref<168x128xf32, #tpu.memory_space<vmem>>, vector<1x128xf32>
    %c15_863 = arith.constant 15 : index
    %c512_864 = arith.constant 512 : index
    %500 = vector.load %arg14[%c15_863, %c512_864] : memref<24x2048xf32, #tpu.memory_space<vmem>>, vector<1x128xf32>
    tpu.vector_store %arg14[%c15_863, %c512_864], %499 {strides = array<i32>} : memref<24x2048xf32, #tpu.memory_space<vmem>>, vector<1x128xf32>,
    %c127_865 = arith.constant 127 : index
    %c0_866 = arith.constant 0 : index
    %501 = vector.load %arg13[%c127_865, %c0_866] : memref<168x128xf32, #tpu.memory_space<vmem>>, vector<1x128xf32>
    %c15_867 = arith.constant 15 : index
    %c640_868 = arith.constant 640 : index
    %502 = vector.load %arg14[%c15_867, %c640_868] : memref<24x2048xf32, #tpu.memory_space<vmem>>, vector<1x128xf32>
    tpu.vector_store %arg14[%c15_867, %c640_868], %501 {strides = array<i32>} : memref<24x2048xf32, #tpu.memory_space<vmem>>, vector<1x128xf32>,
    %c128_869 = arith.constant 128 : index
    %c0_870 = arith.constant 0 : index
    %503 = vector.load %arg13[%c128_869, %c0_870] : memref<168x128xf32, #tpu.memory_space<vmem>>, vector<1x128xf32>
    %c15_871 = arith.constant 15 : index
    %c768_872 = arith.constant 768 : index
    %504 = vector.load %arg14[%c15_871, %c768_872] : memref<24x2048xf32, #tpu.memory_space<vmem>>, vector<1x128xf32>
    tpu.vector_store %arg14[%c15_871, %c768_872], %503 {strides = array<i32>} : memref<24x2048xf32, #tpu.memory_space<vmem>>, vector<1x128xf32>,
    %c129_873 = arith.constant 129 : index
    %c0_874 = arith.constant 0 : index
    %505 = vector.load %arg13[%c129_873, %c0_874] : memref<168x128xf32, #tpu.memory_space<vmem>>, vector<1x128xf32>
    %c15_875 = arith.constant 15 : index
    %c896_876 = arith.constant 896 : index
    %506 = vector.load %arg14[%c15_875, %c896_876] : memref<24x2048xf32, #tpu.memory_space<vmem>>, vector<1x128xf32>
    tpu.vector_store %arg14[%c15_875, %c896_876], %505 {strides = array<i32>} : memref<24x2048xf32, #tpu.memory_space<vmem>>, vector<1x128xf32>,
    %c135 = arith.constant 135 : index
    %c0_877 = arith.constant 0 : index
    %507 = vector.load %arg13[%c135, %c0_877] : memref<168x128xf32, #tpu.memory_space<vmem>>, vector<1x128xf32>
    %c15_878 = arith.constant 15 : index
    %c1024_879 = arith.constant 1024 : index
    %508 = vector.load %arg14[%c15_878, %c1024_879] : memref<24x2048xf32, #tpu.memory_space<vmem>>, vector<1x128xf32>
    tpu.vector_store %arg14[%c15_878, %c1024_879], %507 {strides = array<i32>} : memref<24x2048xf32, #tpu.memory_space<vmem>>, vector<1x128xf32>,
    %c136 = arith.constant 136 : index
    %c0_880 = arith.constant 0 : index
    %509 = vector.load %arg13[%c136, %c0_880] : memref<168x128xf32, #tpu.memory_space<vmem>>, vector<1x128xf32>
    %c15_881 = arith.constant 15 : index
    %c1152_882 = arith.constant 1152 : index
    %510 = vector.load %arg14[%c15_881, %c1152_882] : memref<24x2048xf32, #tpu.memory_space<vmem>>, vector<1x128xf32>
    tpu.vector_store %arg14[%c15_881, %c1152_882], %509 {strides = array<i32>} : memref<24x2048xf32, #tpu.memory_space<vmem>>, vector<1x128xf32>,
    %c137 = arith.constant 137 : index
    %c0_883 = arith.constant 0 : index
    %511 = vector.load %arg13[%c137, %c0_883] : memref<168x128xf32, #tpu.memory_space<vmem>>, vector<1x128xf32>
    %c15_884 = arith.constant 15 : index
    %c1280_885 = arith.constant 1280 : index
    %512 = vector.load %arg14[%c15_884, %c1280_885] : memref<24x2048xf32, #tpu.memory_space<vmem>>, vector<1x128xf32>
    tpu.vector_store %arg14[%c15_884, %c1280_885], %511 {strides = array<i32>} : memref<24x2048xf32, #tpu.memory_space<vmem>>, vector<1x128xf32>,
    %c138 = arith.constant 138 : index
    %c0_886 = arith.constant 0 : index
    %513 = vector.load %arg13[%c138, %c0_886] : memref<168x128xf32, #tpu.memory_space<vmem>>, vector<1x128xf32>
    %c15_887 = arith.constant 15 : index
    %c1408_888 = arith.constant 1408 : index
    %514 = vector.load %arg14[%c15_887, %c1408_888] : memref<24x2048xf32, #tpu.memory_space<vmem>>, vector<1x128xf32>
    tpu.vector_store %arg14[%c15_887, %c1408_888], %513 {strides = array<i32>} : memref<24x2048xf32, #tpu.memory_space<vmem>>, vector<1x128xf32>,
    %c144 = arith.constant 144 : index
    %c0_889 = arith.constant 0 : index
    %515 = vector.load %arg13[%c144, %c0_889] : memref<168x128xf32, #tpu.memory_space<vmem>>, vector<1x128xf32>
    %c15_890 = arith.constant 15 : index
    %c1536_891 = arith.constant 1536 : index
    %516 = vector.load %arg14[%c15_890, %c1536_891] : memref<24x2048xf32, #tpu.memory_space<vmem>>, vector<1x128xf32>
    tpu.vector_store %arg14[%c15_890, %c1536_891], %515 {strides = array<i32>} : memref<24x2048xf32, #tpu.memory_space<vmem>>, vector<1x128xf32>,
    %c145 = arith.constant 145 : index
    %c0_892 = arith.constant 0 : index
    %517 = vector.load %arg13[%c145, %c0_892] : memref<168x128xf32, #tpu.memory_space<vmem>>, vector<1x128xf32>
    %c15_893 = arith.constant 15 : index
    %c1664_894 = arith.constant 1664 : index
    %518 = vector.load %arg14[%c15_893, %c1664_894] : memref<24x2048xf32, #tpu.memory_space<vmem>>, vector<1x128xf32>
    tpu.vector_store %arg14[%c15_893, %c1664_894], %517 {strides = array<i32>} : memref<24x2048xf32, #tpu.memory_space<vmem>>, vector<1x128xf32>,
    %c146 = arith.constant 146 : index
    %c0_895 = arith.constant 0 : index
    %519 = vector.load %arg13[%c146, %c0_895] : memref<168x128xf32, #tpu.memory_space<vmem>>, vector<1x128xf32>
    %c15_896 = arith.constant 15 : index
    %c1792_897 = arith.constant 1792 : index
    %520 = vector.load %arg14[%c15_896, %c1792_897] : memref<24x2048xf32, #tpu.memory_space<vmem>>, vector<1x128xf32>
    tpu.vector_store %arg14[%c15_896, %c1792_897], %519 {strides = array<i32>} : memref<24x2048xf32, #tpu.memory_space<vmem>>, vector<1x128xf32>,
    %c147 = arith.constant 147 : index
    %c0_898 = arith.constant 0 : index
    %521 = vector.load %arg13[%c147, %c0_898] : memref<168x128xf32, #tpu.memory_space<vmem>>, vector<1x128xf32>
    %c15_899 = arith.constant 15 : index
    %c1920_900 = arith.constant 1920 : index
    %522 = vector.load %arg14[%c15_899, %c1920_900] : memref<24x2048xf32, #tpu.memory_space<vmem>>, vector<1x128xf32>
    tpu.vector_store %arg14[%c15_899, %c1920_900], %521 {strides = array<i32>} : memref<24x2048xf32, #tpu.memory_space<vmem>>, vector<1x128xf32>,
    %c119_901 = arith.constant 119 : index
    %c0_902 = arith.constant 0 : index
    %523 = vector.load %arg13[%c119_901, %c0_902] : memref<168x128xf32, #tpu.memory_space<vmem>>, vector<1x128xf32>
    %c16_903 = arith.constant 16 : index
    %c0_904 = arith.constant 0 : index
    %524 = vector.load %arg14[%c16_903, %c0_904] : memref<24x2048xf32, #tpu.memory_space<vmem>>, vector<1x128xf32>
    tpu.vector_store %arg14[%c16_903, %c0_904], %523 {strides = array<i32>} : memref<24x2048xf32, #tpu.memory_space<vmem>>, vector<1x128xf32>,
    %c120_905 = arith.constant 120 : index
    %c0_906 = arith.constant 0 : index
    %525 = vector.load %arg13[%c120_905, %c0_906] : memref<168x128xf32, #tpu.memory_space<vmem>>, vector<1x128xf32>
    %c16_907 = arith.constant 16 : index
    %c128_908 = arith.constant 128 : index
    %526 = vector.load %arg14[%c16_907, %c128_908] : memref<24x2048xf32, #tpu.memory_space<vmem>>, vector<1x128xf32>
    tpu.vector_store %arg14[%c16_907, %c128_908], %525 {strides = array<i32>} : memref<24x2048xf32, #tpu.memory_space<vmem>>, vector<1x128xf32>,
    %c121_909 = arith.constant 121 : index
    %c0_910 = arith.constant 0 : index
    %527 = vector.load %arg13[%c121_909, %c0_910] : memref<168x128xf32, #tpu.memory_space<vmem>>, vector<1x128xf32>
    %c16_911 = arith.constant 16 : index
    %c256_912 = arith.constant 256 : index
    %528 = vector.load %arg14[%c16_911, %c256_912] : memref<24x2048xf32, #tpu.memory_space<vmem>>, vector<1x128xf32>
    tpu.vector_store %arg14[%c16_911, %c256_912], %527 {strides = array<i32>} : memref<24x2048xf32, #tpu.memory_space<vmem>>, vector<1x128xf32>,
    %c122_913 = arith.constant 122 : index
    %c0_914 = arith.constant 0 : index
    %529 = vector.load %arg13[%c122_913, %c0_914] : memref<168x128xf32, #tpu.memory_space<vmem>>, vector<1x128xf32>
    %c16_915 = arith.constant 16 : index
    %c384_916 = arith.constant 384 : index
    %530 = vector.load %arg14[%c16_915, %c384_916] : memref<24x2048xf32, #tpu.memory_space<vmem>>, vector<1x128xf32>
    tpu.vector_store %arg14[%c16_915, %c384_916], %529 {strides = array<i32>} : memref<24x2048xf32, #tpu.memory_space<vmem>>, vector<1x128xf32>,
    %c128_917 = arith.constant 128 : index
    %c0_918 = arith.constant 0 : index
    %531 = vector.load %arg13[%c128_917, %c0_918] : memref<168x128xf32, #tpu.memory_space<vmem>>, vector<1x128xf32>
    %c16_919 = arith.constant 16 : index
    %c512_920 = arith.constant 512 : index
    %532 = vector.load %arg14[%c16_919, %c512_920] : memref<24x2048xf32, #tpu.memory_space<vmem>>, vector<1x128xf32>
    tpu.vector_store %arg14[%c16_919, %c512_920], %531 {strides = array<i32>} : memref<24x2048xf32, #tpu.memory_space<vmem>>, vector<1x128xf32>,
    %c129_921 = arith.constant 129 : index
    %c0_922 = arith.constant 0 : index
    %533 = vector.load %arg13[%c129_921, %c0_922] : memref<168x128xf32, #tpu.memory_space<vmem>>, vector<1x128xf32>
    %c16_923 = arith.constant 16 : index
    %c640_924 = arith.constant 640 : index
    %534 = vector.load %arg14[%c16_923, %c640_924] : memref<24x2048xf32, #tpu.memory_space<vmem>>, vector<1x128xf32>
    tpu.vector_store %arg14[%c16_923, %c640_924], %533 {strides = array<i32>} : memref<24x2048xf32, #tpu.memory_space<vmem>>, vector<1x128xf32>,
    %c130_925 = arith.constant 130 : index
    %c0_926 = arith.constant 0 : index
    %535 = vector.load %arg13[%c130_925, %c0_926] : memref<168x128xf32, #tpu.memory_space<vmem>>, vector<1x128xf32>
    %c16_927 = arith.constant 16 : index
    %c768_928 = arith.constant 768 : index
    %536 = vector.load %arg14[%c16_927, %c768_928] : memref<24x2048xf32, #tpu.memory_space<vmem>>, vector<1x128xf32>
    tpu.vector_store %arg14[%c16_927, %c768_928], %535 {strides = array<i32>} : memref<24x2048xf32, #tpu.memory_space<vmem>>, vector<1x128xf32>,
    %c131_929 = arith.constant 131 : index
    %c0_930 = arith.constant 0 : index
    %537 = vector.load %arg13[%c131_929, %c0_930] : memref<168x128xf32, #tpu.memory_space<vmem>>, vector<1x128xf32>
    %c16_931 = arith.constant 16 : index
    %c896_932 = arith.constant 896 : index
    %538 = vector.load %arg14[%c16_931, %c896_932] : memref<24x2048xf32, #tpu.memory_space<vmem>>, vector<1x128xf32>
    tpu.vector_store %arg14[%c16_931, %c896_932], %537 {strides = array<i32>} : memref<24x2048xf32, #tpu.memory_space<vmem>>, vector<1x128xf32>,
    %c137_933 = arith.constant 137 : index
    %c0_934 = arith.constant 0 : index
    %539 = vector.load %arg13[%c137_933, %c0_934] : memref<168x128xf32, #tpu.memory_space<vmem>>, vector<1x128xf32>
    %c16_935 = arith.constant 16 : index
    %c1024_936 = arith.constant 1024 : index
    %540 = vector.load %arg14[%c16_935, %c1024_936] : memref<24x2048xf32, #tpu.memory_space<vmem>>, vector<1x128xf32>
    tpu.vector_store %arg14[%c16_935, %c1024_936], %539 {strides = array<i32>} : memref<24x2048xf32, #tpu.memory_space<vmem>>, vector<1x128xf32>,
    %c138_937 = arith.constant 138 : index
    %c0_938 = arith.constant 0 : index
    %541 = vector.load %arg13[%c138_937, %c0_938] : memref<168x128xf32, #tpu.memory_space<vmem>>, vector<1x128xf32>
    %c16_939 = arith.constant 16 : index
    %c1152_940 = arith.constant 1152 : index
    %542 = vector.load %arg14[%c16_939, %c1152_940] : memref<24x2048xf32, #tpu.memory_space<vmem>>, vector<1x128xf32>
    tpu.vector_store %arg14[%c16_939, %c1152_940], %541 {strides = array<i32>} : memref<24x2048xf32, #tpu.memory_space<vmem>>, vector<1x128xf32>,
    %c139 = arith.constant 139 : index
    %c0_941 = arith.constant 0 : index
    %543 = vector.load %arg13[%c139, %c0_941] : memref<168x128xf32, #tpu.memory_space<vmem>>, vector<1x128xf32>
    %c16_942 = arith.constant 16 : index
    %c1280_943 = arith.constant 1280 : index
    %544 = vector.load %arg14[%c16_942, %c1280_943] : memref<24x2048xf32, #tpu.memory_space<vmem>>, vector<1x128xf32>
    tpu.vector_store %arg14[%c16_942, %c1280_943], %543 {strides = array<i32>} : memref<24x2048xf32, #tpu.memory_space<vmem>>, vector<1x128xf32>,
    %c140 = arith.constant 140 : index
    %c0_944 = arith.constant 0 : index
    %545 = vector.load %arg13[%c140, %c0_944] : memref<168x128xf32, #tpu.memory_space<vmem>>, vector<1x128xf32>
    %c16_945 = arith.constant 16 : index
    %c1408_946 = arith.constant 1408 : index
    %546 = vector.load %arg14[%c16_945, %c1408_946] : memref<24x2048xf32, #tpu.memory_space<vmem>>, vector<1x128xf32>
    tpu.vector_store %arg14[%c16_945, %c1408_946], %545 {strides = array<i32>} : memref<24x2048xf32, #tpu.memory_space<vmem>>, vector<1x128xf32>,
    %c146_947 = arith.constant 146 : index
    %c0_948 = arith.constant 0 : index
    %547 = vector.load %arg13[%c146_947, %c0_948] : memref<168x128xf32, #tpu.memory_space<vmem>>, vector<1x128xf32>
    %c16_949 = arith.constant 16 : index
    %c1536_950 = arith.constant 1536 : index
    %548 = vector.load %arg14[%c16_949, %c1536_950] : memref<24x2048xf32, #tpu.memory_space<vmem>>, vector<1x128xf32>
    tpu.vector_store %arg14[%c16_949, %c1536_950], %547 {strides = array<i32>} : memref<24x2048xf32, #tpu.memory_space<vmem>>, vector<1x128xf32>,
    %c147_951 = arith.constant 147 : index
    %c0_952 = arith.constant 0 : index
    %549 = vector.load %arg13[%c147_951, %c0_952] : memref<168x128xf32, #tpu.memory_space<vmem>>, vector<1x128xf32>
    %c16_953 = arith.constant 16 : index
    %c1664_954 = arith.constant 1664 : index
    %550 = vector.load %arg14[%c16_953, %c1664_954] : memref<24x2048xf32, #tpu.memory_space<vmem>>, vector<1x128xf32>
    tpu.vector_store %arg14[%c16_953, %c1664_954], %549 {strides = array<i32>} : memref<24x2048xf32, #tpu.memory_space<vmem>>, vector<1x128xf32>,
    %c148 = arith.constant 148 : index
    %c0_955 = arith.constant 0 : index
    %551 = vector.load %arg13[%c148, %c0_955] : memref<168x128xf32, #tpu.memory_space<vmem>>, vector<1x128xf32>
    %c16_956 = arith.constant 16 : index
    %c1792_957 = arith.constant 1792 : index
    %552 = vector.load %arg14[%c16_956, %c1792_957] : memref<24x2048xf32, #tpu.memory_space<vmem>>, vector<1x128xf32>
    tpu.vector_store %arg14[%c16_956, %c1792_957], %551 {strides = array<i32>} : memref<24x2048xf32, #tpu.memory_space<vmem>>, vector<1x128xf32>,
    %c149 = arith.constant 149 : index
    %c0_958 = arith.constant 0 : index
    %553 = vector.load %arg13[%c149, %c0_958] : memref<168x128xf32, #tpu.memory_space<vmem>>, vector<1x128xf32>
    %c16_959 = arith.constant 16 : index
    %c1920_960 = arith.constant 1920 : index
    %554 = vector.load %arg14[%c16_959, %c1920_960] : memref<24x2048xf32, #tpu.memory_space<vmem>>, vector<1x128xf32>
    tpu.vector_store %arg14[%c16_959, %c1920_960], %553 {strides = array<i32>} : memref<24x2048xf32, #tpu.memory_space<vmem>>, vector<1x128xf32>,
    %c121_961 = arith.constant 121 : index
    %c0_962 = arith.constant 0 : index
    %555 = vector.load %arg13[%c121_961, %c0_962] : memref<168x128xf32, #tpu.memory_space<vmem>>, vector<1x128xf32>
    %c17 = arith.constant 17 : index
    %c0_963 = arith.constant 0 : index
    %556 = vector.load %arg14[%c17, %c0_963] : memref<24x2048xf32, #tpu.memory_space<vmem>>, vector<1x128xf32>
    tpu.vector_store %arg14[%c17, %c0_963], %555 {strides = array<i32>} : memref<24x2048xf32, #tpu.memory_space<vmem>>, vector<1x128xf32>,
    %c122_964 = arith.constant 122 : index
    %c0_965 = arith.constant 0 : index
    %557 = vector.load %arg13[%c122_964, %c0_965] : memref<168x128xf32, #tpu.memory_space<vmem>>, vector<1x128xf32>
    %c17_966 = arith.constant 17 : index
    %c128_967 = arith.constant 128 : index
    %558 = vector.load %arg14[%c17_966, %c128_967] : memref<24x2048xf32, #tpu.memory_space<vmem>>, vector<1x128xf32>
    tpu.vector_store %arg14[%c17_966, %c128_967], %557 {strides = array<i32>} : memref<24x2048xf32, #tpu.memory_space<vmem>>, vector<1x128xf32>,
    %c123_968 = arith.constant 123 : index
    %c0_969 = arith.constant 0 : index
    %559 = vector.load %arg13[%c123_968, %c0_969] : memref<168x128xf32, #tpu.memory_space<vmem>>, vector<1x128xf32>
    %c17_970 = arith.constant 17 : index
    %c256_971 = arith.constant 256 : index
    %560 = vector.load %arg14[%c17_970, %c256_971] : memref<24x2048xf32, #tpu.memory_space<vmem>>, vector<1x128xf32>
    tpu.vector_store %arg14[%c17_970, %c256_971], %559 {strides = array<i32>} : memref<24x2048xf32, #tpu.memory_space<vmem>>, vector<1x128xf32>,
    %c124_972 = arith.constant 124 : index
    %c0_973 = arith.constant 0 : index
    %561 = vector.load %arg13[%c124_972, %c0_973] : memref<168x128xf32, #tpu.memory_space<vmem>>, vector<1x128xf32>
    %c17_974 = arith.constant 17 : index
    %c384_975 = arith.constant 384 : index
    %562 = vector.load %arg14[%c17_974, %c384_975] : memref<24x2048xf32, #tpu.memory_space<vmem>>, vector<1x128xf32>
    tpu.vector_store %arg14[%c17_974, %c384_975], %561 {strides = array<i32>} : memref<24x2048xf32, #tpu.memory_space<vmem>>, vector<1x128xf32>,
    %c130_976 = arith.constant 130 : index
    %c0_977 = arith.constant 0 : index
    %563 = vector.load %arg13[%c130_976, %c0_977] : memref<168x128xf32, #tpu.memory_space<vmem>>, vector<1x128xf32>
    %c17_978 = arith.constant 17 : index
    %c512_979 = arith.constant 512 : index
    %564 = vector.load %arg14[%c17_978, %c512_979] : memref<24x2048xf32, #tpu.memory_space<vmem>>, vector<1x128xf32>
    tpu.vector_store %arg14[%c17_978, %c512_979], %563 {strides = array<i32>} : memref<24x2048xf32, #tpu.memory_space<vmem>>, vector<1x128xf32>,
    %c131_980 = arith.constant 131 : index
    %c0_981 = arith.constant 0 : index
    %565 = vector.load %arg13[%c131_980, %c0_981] : memref<168x128xf32, #tpu.memory_space<vmem>>, vector<1x128xf32>
    %c17_982 = arith.constant 17 : index
    %c640_983 = arith.constant 640 : index
    %566 = vector.load %arg14[%c17_982, %c640_983] : memref<24x2048xf32, #tpu.memory_space<vmem>>, vector<1x128xf32>
    tpu.vector_store %arg14[%c17_982, %c640_983], %565 {strides = array<i32>} : memref<24x2048xf32, #tpu.memory_space<vmem>>, vector<1x128xf32>,
    %c132_984 = arith.constant 132 : index
    %c0_985 = arith.constant 0 : index
    %567 = vector.load %arg13[%c132_984, %c0_985] : memref<168x128xf32, #tpu.memory_space<vmem>>, vector<1x128xf32>
    %c17_986 = arith.constant 17 : index
    %c768_987 = arith.constant 768 : index
    %568 = vector.load %arg14[%c17_986, %c768_987] : memref<24x2048xf32, #tpu.memory_space<vmem>>, vector<1x128xf32>
    tpu.vector_store %arg14[%c17_986, %c768_987], %567 {strides = array<i32>} : memref<24x2048xf32, #tpu.memory_space<vmem>>, vector<1x128xf32>,
    %c133_988 = arith.constant 133 : index
    %c0_989 = arith.constant 0 : index
    %569 = vector.load %arg13[%c133_988, %c0_989] : memref<168x128xf32, #tpu.memory_space<vmem>>, vector<1x128xf32>
    %c17_990 = arith.constant 17 : index
    %c896_991 = arith.constant 896 : index
    %570 = vector.load %arg14[%c17_990, %c896_991] : memref<24x2048xf32, #tpu.memory_space<vmem>>, vector<1x128xf32>
    tpu.vector_store %arg14[%c17_990, %c896_991], %569 {strides = array<i32>} : memref<24x2048xf32, #tpu.memory_space<vmem>>, vector<1x128xf32>,
    %c139_992 = arith.constant 139 : index
    %c0_993 = arith.constant 0 : index
    %571 = vector.load %arg13[%c139_992, %c0_993] : memref<168x128xf32, #tpu.memory_space<vmem>>, vector<1x128xf32>
    %c17_994 = arith.constant 17 : index
    %c1024_995 = arith.constant 1024 : index
    %572 = vector.load %arg14[%c17_994, %c1024_995] : memref<24x2048xf32, #tpu.memory_space<vmem>>, vector<1x128xf32>
    tpu.vector_store %arg14[%c17_994, %c1024_995], %571 {strides = array<i32>} : memref<24x2048xf32, #tpu.memory_space<vmem>>, vector<1x128xf32>,
    %c140_996 = arith.constant 140 : index
    %c0_997 = arith.constant 0 : index
    %573 = vector.load %arg13[%c140_996, %c0_997] : memref<168x128xf32, #tpu.memory_space<vmem>>, vector<1x128xf32>
    %c17_998 = arith.constant 17 : index
    %c1152_999 = arith.constant 1152 : index
    %574 = vector.load %arg14[%c17_998, %c1152_999] : memref<24x2048xf32, #tpu.memory_space<vmem>>, vector<1x128xf32>
    tpu.vector_store %arg14[%c17_998, %c1152_999], %573 {strides = array<i32>} : memref<24x2048xf32, #tpu.memory_space<vmem>>, vector<1x128xf32>,
    %c141 = arith.constant 141 : index
    %c0_1000 = arith.constant 0 : index
    %575 = vector.load %arg13[%c141, %c0_1000] : memref<168x128xf32, #tpu.memory_space<vmem>>, vector<1x128xf32>
    %c17_1001 = arith.constant 17 : index
    %c1280_1002 = arith.constant 1280 : index
    %576 = vector.load %arg14[%c17_1001, %c1280_1002] : memref<24x2048xf32, #tpu.memory_space<vmem>>, vector<1x128xf32>
    tpu.vector_store %arg14[%c17_1001, %c1280_1002], %575 {strides = array<i32>} : memref<24x2048xf32, #tpu.memory_space<vmem>>, vector<1x128xf32>,
    %c142 = arith.constant 142 : index
    %c0_1003 = arith.constant 0 : index
    %577 = vector.load %arg13[%c142, %c0_1003] : memref<168x128xf32, #tpu.memory_space<vmem>>, vector<1x128xf32>
    %c17_1004 = arith.constant 17 : index
    %c1408_1005 = arith.constant 1408 : index
    %578 = vector.load %arg14[%c17_1004, %c1408_1005] : memref<24x2048xf32, #tpu.memory_space<vmem>>, vector<1x128xf32>
    tpu.vector_store %arg14[%c17_1004, %c1408_1005], %577 {strides = array<i32>} : memref<24x2048xf32, #tpu.memory_space<vmem>>, vector<1x128xf32>,
    %c148_1006 = arith.constant 148 : index
    %c0_1007 = arith.constant 0 : index
    %579 = vector.load %arg13[%c148_1006, %c0_1007] : memref<168x128xf32, #tpu.memory_space<vmem>>, vector<1x128xf32>
    %c17_1008 = arith.constant 17 : index
    %c1536_1009 = arith.constant 1536 : index
    %580 = vector.load %arg14[%c17_1008, %c1536_1009] : memref<24x2048xf32, #tpu.memory_space<vmem>>, vector<1x128xf32>
    tpu.vector_store %arg14[%c17_1008, %c1536_1009], %579 {strides = array<i32>} : memref<24x2048xf32, #tpu.memory_space<vmem>>, vector<1x128xf32>,
    %c149_1010 = arith.constant 149 : index
    %c0_1011 = arith.constant 0 : index
    %581 = vector.load %arg13[%c149_1010, %c0_1011] : memref<168x128xf32, #tpu.memory_space<vmem>>, vector<1x128xf32>
    %c17_1012 = arith.constant 17 : index
    %c1664_1013 = arith.constant 1664 : index
    %582 = vector.load %arg14[%c17_1012, %c1664_1013] : memref<24x2048xf32, #tpu.memory_space<vmem>>, vector<1x128xf32>
    tpu.vector_store %arg14[%c17_1012, %c1664_1013], %581 {strides = array<i32>} : memref<24x2048xf32, #tpu.memory_space<vmem>>, vector<1x128xf32>,
    %c150 = arith.constant 150 : index
    %c0_1014 = arith.constant 0 : index
    %583 = vector.load %arg13[%c150, %c0_1014] : memref<168x128xf32, #tpu.memory_space<vmem>>, vector<1x128xf32>
    %c17_1015 = arith.constant 17 : index
    %c1792_1016 = arith.constant 1792 : index
    %584 = vector.load %arg14[%c17_1015, %c1792_1016] : memref<24x2048xf32, #tpu.memory_space<vmem>>, vector<1x128xf32>
    tpu.vector_store %arg14[%c17_1015, %c1792_1016], %583 {strides = array<i32>} : memref<24x2048xf32, #tpu.memory_space<vmem>>, vector<1x128xf32>,
    %c151 = arith.constant 151 : index
    %c0_1017 = arith.constant 0 : index
    %585 = vector.load %arg13[%c151, %c0_1017] : memref<168x128xf32, #tpu.memory_space<vmem>>, vector<1x128xf32>
    %c17_1018 = arith.constant 17 : index
    %c1920_1019 = arith.constant 1920 : index
    %586 = vector.load %arg14[%c17_1018, %c1920_1019] : memref<24x2048xf32, #tpu.memory_space<vmem>>, vector<1x128xf32>
    tpu.vector_store %arg14[%c17_1018, %c1920_1019], %585 {strides = array<i32>} : memref<24x2048xf32, #tpu.memory_space<vmem>>, vector<1x128xf32>,
    %c0_1020 = arith.constant 0 : index
    %c0_1021 = arith.constant 0 : index
    %587 = vector.load %arg14[%c0_1020, %c0_1021] : memref<24x2048xf32, #tpu.memory_space<vmem>>, vector<24x2048xf32>
    %588 = arith.truncf %587 : vector<24x2048xf32> to vector<24x2048xbf16>
    %c0_1022 = arith.constant 0 : index
    %c0_1023 = arith.constant 0 : index
    %589 = vector.load %arg4[%c0_1022, %c0_1023] : memref<2048x128xbf16, #tpu.memory_space<vmem>>, vector<2048x128xbf16>
    %cst_1024 = arith.constant dense<0.000000e+00> : vector<24x128xf32>
    %590 = tpu.matmul %588, %589, %cst_1024 {dimension_numbers = #tpu.dot_dimension_numbers<[1], [0], [0], [1], [0, 0, 1, 1], [], []>} : vector<24x2048xbf16>, vector<2048x128xbf16>, vector<24x128xf32> -> vector<24x128xf32>
    %c0_1025 = arith.constant 0 : index
    %c0_1026 = arith.constant 0 : index
    %591 = vector.load %arg5[%c0_1025, %c0_1026] : memref<1x128xf32, #tpu.memory_space<vmem>>, vector<1x128xf32>
    %592 = vector.broadcast %591 : vector<1x128xf32> to vector<24x128xf32>
    %593 = arith.addf %590, %592 : vector<24x128xf32>
    %cst_1027 = arith.constant 0.000000e+00 : f32
    %594 = vector.broadcast %cst_1027 : f32 to vector<24x128xf32>
    %595 = arith.maximumf %593, %594 : vector<24x128xf32>
    %c0_1028 = arith.constant 0 : index
    %c0_1029 = arith.constant 0 : index
    %596 = vector.load %arg15[%c0_1028, %c0_1029] : memref<24x128xf32, #tpu.memory_space<vmem>>, vector<24x128xf32>
    tpu.vector_store %arg15[%c0_1028, %c0_1029], %595 {strides = array<i32>} : memref<24x128xf32, #tpu.memory_space<vmem>>, vector<24x128xf32>,
    %cst_1030 = arith.constant 0.000000e+00 : f32
    %597 = vector.broadcast %cst_1030 : f32 to vector<8x1152xf32>
    %c0_1031 = arith.constant 0 : index
    %c0_1032 = arith.constant 0 : index
    %598 = vector.load %arg16[%c0_1031, %c0_1032] : memref<8x1152xf32, #tpu.memory_space<vmem>>, vector<8x1152xf32>
    tpu.vector_store %arg16[%c0_1031, %c0_1032], %597 {strides = array<i32>} : memref<8x1152xf32, #tpu.memory_space<vmem>>, vector<8x1152xf32>,
    %c0_1033 = arith.constant 0 : index
    %c0_1034 = arith.constant 0 : index
    %599 = vector.load %arg15[%c0_1033, %c0_1034] : memref<24x128xf32, #tpu.memory_space<vmem>>, vector<1x128xf32>
    %c0_1035 = arith.constant 0 : index
    %c0_1036 = arith.constant 0 : index
    %600 = vector.load %arg16[%c0_1035, %c0_1036] : memref<8x1152xf32, #tpu.memory_space<vmem>>, vector<1x128xf32>
    tpu.vector_store %arg16[%c0_1035, %c0_1036], %599 {strides = array<i32>} : memref<8x1152xf32, #tpu.memory_space<vmem>>, vector<1x128xf32>,
    %c1_1037 = arith.constant 1 : index
    %c0_1038 = arith.constant 0 : index
    %601 = vector.load %arg15[%c1_1037, %c0_1038] : memref<24x128xf32, #tpu.memory_space<vmem>>, vector<1x128xf32>
    %c0_1039 = arith.constant 0 : index
    %c128_1040 = arith.constant 128 : index
    %602 = vector.load %arg16[%c0_1039, %c128_1040] : memref<8x1152xf32, #tpu.memory_space<vmem>>, vector<1x128xf32>
    tpu.vector_store %arg16[%c0_1039, %c128_1040], %601 {strides = array<i32>} : memref<8x1152xf32, #tpu.memory_space<vmem>>, vector<1x128xf32>,
    %c2_1041 = arith.constant 2 : index
    %c0_1042 = arith.constant 0 : index
    %603 = vector.load %arg15[%c2_1041, %c0_1042] : memref<24x128xf32, #tpu.memory_space<vmem>>, vector<1x128xf32>
    %c0_1043 = arith.constant 0 : index
    %c256_1044 = arith.constant 256 : index
    %604 = vector.load %arg16[%c0_1043, %c256_1044] : memref<8x1152xf32, #tpu.memory_space<vmem>>, vector<1x128xf32>
    tpu.vector_store %arg16[%c0_1043, %c256_1044], %603 {strides = array<i32>} : memref<8x1152xf32, #tpu.memory_space<vmem>>, vector<1x128xf32>,
    %c3_1045 = arith.constant 3 : index
    %c0_1046 = arith.constant 0 : index
    %605 = vector.load %arg15[%c3_1045, %c0_1046] : memref<24x128xf32, #tpu.memory_space<vmem>>, vector<1x128xf32>
    %c0_1047 = arith.constant 0 : index
    %c384_1048 = arith.constant 384 : index
    %606 = vector.load %arg16[%c0_1047, %c384_1048] : memref<8x1152xf32, #tpu.memory_space<vmem>>, vector<1x128xf32>
    tpu.vector_store %arg16[%c0_1047, %c384_1048], %605 {strides = array<i32>} : memref<8x1152xf32, #tpu.memory_space<vmem>>, vector<1x128xf32>,
    %c4_1049 = arith.constant 4 : index
    %c0_1050 = arith.constant 0 : index
    %607 = vector.load %arg15[%c4_1049, %c0_1050] : memref<24x128xf32, #tpu.memory_space<vmem>>, vector<1x128xf32>
    %c0_1051 = arith.constant 0 : index
    %c512_1052 = arith.constant 512 : index
    %608 = vector.load %arg16[%c0_1051, %c512_1052] : memref<8x1152xf32, #tpu.memory_space<vmem>>, vector<1x128xf32>
    tpu.vector_store %arg16[%c0_1051, %c512_1052], %607 {strides = array<i32>} : memref<8x1152xf32, #tpu.memory_space<vmem>>, vector<1x128xf32>,
    %c5_1053 = arith.constant 5 : index
    %c0_1054 = arith.constant 0 : index
    %609 = vector.load %arg15[%c5_1053, %c0_1054] : memref<24x128xf32, #tpu.memory_space<vmem>>, vector<1x128xf32>
    %c0_1055 = arith.constant 0 : index
    %c640_1056 = arith.constant 640 : index
    %610 = vector.load %arg16[%c0_1055, %c640_1056] : memref<8x1152xf32, #tpu.memory_space<vmem>>, vector<1x128xf32>
    tpu.vector_store %arg16[%c0_1055, %c640_1056], %609 {strides = array<i32>} : memref<8x1152xf32, #tpu.memory_space<vmem>>, vector<1x128xf32>,
    %c6_1057 = arith.constant 6 : index
    %c0_1058 = arith.constant 0 : index
    %611 = vector.load %arg15[%c6_1057, %c0_1058] : memref<24x128xf32, #tpu.memory_space<vmem>>, vector<1x128xf32>
    %c0_1059 = arith.constant 0 : index
    %c768_1060 = arith.constant 768 : index
    %612 = vector.load %arg16[%c0_1059, %c768_1060] : memref<8x1152xf32, #tpu.memory_space<vmem>>, vector<1x128xf32>
    tpu.vector_store %arg16[%c0_1059, %c768_1060], %611 {strides = array<i32>} : memref<8x1152xf32, #tpu.memory_space<vmem>>, vector<1x128xf32>,
    %c7_1061 = arith.constant 7 : index
    %c0_1062 = arith.constant 0 : index
    %613 = vector.load %arg15[%c7_1061, %c0_1062] : memref<24x128xf32, #tpu.memory_space<vmem>>, vector<1x128xf32>
    %c0_1063 = arith.constant 0 : index
    %c896_1064 = arith.constant 896 : index
    %614 = vector.load %arg16[%c0_1063, %c896_1064] : memref<8x1152xf32, #tpu.memory_space<vmem>>, vector<1x128xf32>
    tpu.vector_store %arg16[%c0_1063, %c896_1064], %613 {strides = array<i32>} : memref<8x1152xf32, #tpu.memory_space<vmem>>, vector<1x128xf32>,
    %c8_1065 = arith.constant 8 : index
    %c0_1066 = arith.constant 0 : index
    %615 = vector.load %arg15[%c8_1065, %c0_1066] : memref<24x128xf32, #tpu.memory_space<vmem>>, vector<1x128xf32>
    %c0_1067 = arith.constant 0 : index
    %c1024_1068 = arith.constant 1024 : index
    %616 = vector.load %arg16[%c0_1067, %c1024_1068] : memref<8x1152xf32, #tpu.memory_space<vmem>>, vector<1x128xf32>
    tpu.vector_store %arg16[%c0_1067, %c1024_1068], %615 {strides = array<i32>} : memref<8x1152xf32, #tpu.memory_space<vmem>>, vector<1x128xf32>,
    %c9_1069 = arith.constant 9 : index
    %c0_1070 = arith.constant 0 : index
    %617 = vector.load %arg15[%c9_1069, %c0_1070] : memref<24x128xf32, #tpu.memory_space<vmem>>, vector<1x128xf32>
    %c1_1071 = arith.constant 1 : index
    %c0_1072 = arith.constant 0 : index
    %618 = vector.load %arg16[%c1_1071, %c0_1072] : memref<8x1152xf32, #tpu.memory_space<vmem>>, vector<1x128xf32>
    tpu.vector_store %arg16[%c1_1071, %c0_1072], %617 {strides = array<i32>} : memref<8x1152xf32, #tpu.memory_space<vmem>>, vector<1x128xf32>,
    %c10_1073 = arith.constant 10 : index
    %c0_1074 = arith.constant 0 : index
    %619 = vector.load %arg15[%c10_1073, %c0_1074] : memref<24x128xf32, #tpu.memory_space<vmem>>, vector<1x128xf32>
    %c1_1075 = arith.constant 1 : index
    %c128_1076 = arith.constant 128 : index
    %620 = vector.load %arg16[%c1_1075, %c128_1076] : memref<8x1152xf32, #tpu.memory_space<vmem>>, vector<1x128xf32>
    tpu.vector_store %arg16[%c1_1075, %c128_1076], %619 {strides = array<i32>} : memref<8x1152xf32, #tpu.memory_space<vmem>>, vector<1x128xf32>,
    %c11_1077 = arith.constant 11 : index
    %c0_1078 = arith.constant 0 : index
    %621 = vector.load %arg15[%c11_1077, %c0_1078] : memref<24x128xf32, #tpu.memory_space<vmem>>, vector<1x128xf32>
    %c1_1079 = arith.constant 1 : index
    %c256_1080 = arith.constant 256 : index
    %622 = vector.load %arg16[%c1_1079, %c256_1080] : memref<8x1152xf32, #tpu.memory_space<vmem>>, vector<1x128xf32>
    tpu.vector_store %arg16[%c1_1079, %c256_1080], %621 {strides = array<i32>} : memref<8x1152xf32, #tpu.memory_space<vmem>>, vector<1x128xf32>,
    %c12_1081 = arith.constant 12 : index
    %c0_1082 = arith.constant 0 : index
    %623 = vector.load %arg15[%c12_1081, %c0_1082] : memref<24x128xf32, #tpu.memory_space<vmem>>, vector<1x128xf32>
    %c1_1083 = arith.constant 1 : index
    %c384_1084 = arith.constant 384 : index
    %624 = vector.load %arg16[%c1_1083, %c384_1084] : memref<8x1152xf32, #tpu.memory_space<vmem>>, vector<1x128xf32>
    tpu.vector_store %arg16[%c1_1083, %c384_1084], %623 {strides = array<i32>} : memref<8x1152xf32, #tpu.memory_space<vmem>>, vector<1x128xf32>,
    %c13_1085 = arith.constant 13 : index
    %c0_1086 = arith.constant 0 : index
    %625 = vector.load %arg15[%c13_1085, %c0_1086] : memref<24x128xf32, #tpu.memory_space<vmem>>, vector<1x128xf32>
    %c1_1087 = arith.constant 1 : index
    %c512_1088 = arith.constant 512 : index
    %626 = vector.load %arg16[%c1_1087, %c512_1088] : memref<8x1152xf32, #tpu.memory_space<vmem>>, vector<1x128xf32>
    tpu.vector_store %arg16[%c1_1087, %c512_1088], %625 {strides = array<i32>} : memref<8x1152xf32, #tpu.memory_space<vmem>>, vector<1x128xf32>,
    %c14_1089 = arith.constant 14 : index
    %c0_1090 = arith.constant 0 : index
    %627 = vector.load %arg15[%c14_1089, %c0_1090] : memref<24x128xf32, #tpu.memory_space<vmem>>, vector<1x128xf32>
    %c1_1091 = arith.constant 1 : index
    %c640_1092 = arith.constant 640 : index
    %628 = vector.load %arg16[%c1_1091, %c640_1092] : memref<8x1152xf32, #tpu.memory_space<vmem>>, vector<1x128xf32>
    tpu.vector_store %arg16[%c1_1091, %c640_1092], %627 {strides = array<i32>} : memref<8x1152xf32, #tpu.memory_space<vmem>>, vector<1x128xf32>,
    %c15_1093 = arith.constant 15 : index
    %c0_1094 = arith.constant 0 : index
    %629 = vector.load %arg15[%c15_1093, %c0_1094] : memref<24x128xf32, #tpu.memory_space<vmem>>, vector<1x128xf32>
    %c1_1095 = arith.constant 1 : index
    %c768_1096 = arith.constant 768 : index
    %630 = vector.load %arg16[%c1_1095, %c768_1096] : memref<8x1152xf32, #tpu.memory_space<vmem>>, vector<1x128xf32>
    tpu.vector_store %arg16[%c1_1095, %c768_1096], %629 {strides = array<i32>} : memref<8x1152xf32, #tpu.memory_space<vmem>>, vector<1x128xf32>,
    %c16_1097 = arith.constant 16 : index
    %c0_1098 = arith.constant 0 : index
    %631 = vector.load %arg15[%c16_1097, %c0_1098] : memref<24x128xf32, #tpu.memory_space<vmem>>, vector<1x128xf32>
    %c1_1099 = arith.constant 1 : index
    %c896_1100 = arith.constant 896 : index
    %632 = vector.load %arg16[%c1_1099, %c896_1100] : memref<8x1152xf32, #tpu.memory_space<vmem>>, vector<1x128xf32>
    tpu.vector_store %arg16[%c1_1099, %c896_1100], %631 {strides = array<i32>} : memref<8x1152xf32, #tpu.memory_space<vmem>>, vector<1x128xf32>,
    %c17_1101 = arith.constant 17 : index
    %c0_1102 = arith.constant 0 : index
    %633 = vector.load %arg15[%c17_1101, %c0_1102] : memref<24x128xf32, #tpu.memory_space<vmem>>, vector<1x128xf32>
    %c1_1103 = arith.constant 1 : index
    %c1024_1104 = arith.constant 1024 : index
    %634 = vector.load %arg16[%c1_1103, %c1024_1104] : memref<8x1152xf32, #tpu.memory_space<vmem>>, vector<1x128xf32>
    tpu.vector_store %arg16[%c1_1103, %c1024_1104], %633 {strides = array<i32>} : memref<8x1152xf32, #tpu.memory_space<vmem>>, vector<1x128xf32>,
    %c0_1105 = arith.constant 0 : index
    %c0_1106 = arith.constant 0 : index
    %635 = vector.load %arg16[%c0_1105, %c0_1106] : memref<8x1152xf32, #tpu.memory_space<vmem>>, vector<8x1152xf32>
    %636 = arith.truncf %635 : vector<8x1152xf32> to vector<8x1152xbf16>
    %c0_1107 = arith.constant 0 : index
    %c0_1108 = arith.constant 0 : index
    %637 = vector.load %arg6[%c0_1107, %c0_1108] : memref<1152x128xbf16, #tpu.memory_space<vmem>>, vector<1152x128xbf16>
    %cst_1109 = arith.constant dense<0.000000e+00> : vector<8x128xf32>
    %638 = tpu.matmul %636, %637, %cst_1109 {dimension_numbers = #tpu.dot_dimension_numbers<[1], [0], [0], [1], [0, 0, 1, 1], [], []>} : vector<8x1152xbf16>, vector<1152x128xbf16>, vector<8x128xf32> -> vector<8x128xf32>
    %c0_1110 = arith.constant 0 : index
    %c0_1111 = arith.constant 0 : index
    %639 = vector.load %arg7[%c0_1110, %c0_1111] : memref<1x128xf32, #tpu.memory_space<vmem>>, vector<1x128xf32>
    %640 = vector.broadcast %639 : vector<1x128xf32> to vector<8x128xf32>
    %641 = arith.addf %638, %640 : vector<8x128xf32>
    %cst_1112 = arith.constant 0.000000e+00 : f32
    %642 = vector.broadcast %cst_1112 : f32 to vector<8x128xf32>
    %643 = arith.maximumf %641, %642 : vector<8x128xf32>
    %c0_1113 = arith.constant 0 : index
    %c0_1114 = arith.constant 0 : index
    %644 = vector.load %arg17[%c0_1113, %c0_1114] : memref<8x128xf32, #tpu.memory_space<vmem>>, vector<8x128xf32>
    tpu.vector_store %arg17[%c0_1113, %c0_1114], %643 {strides = array<i32>} : memref<8x128xf32, #tpu.memory_space<vmem>>, vector<8x128xf32>,
    %cst_1115 = arith.constant 0.000000e+00 : f32
    %645 = vector.broadcast %cst_1115 : f32 to vector<8x128xf32>
    %c0_1116 = arith.constant 0 : index
    %c0_1117 = arith.constant 0 : index
    %646 = vector.load %arg18[%c0_1116, %c0_1117] : memref<8x128xf32, #tpu.memory_space<vmem>>, vector<8x128xf32>
    tpu.vector_store %arg18[%c0_1116, %c0_1117], %645 {strides = array<i32>} : memref<8x128xf32, #tpu.memory_space<vmem>>, vector<8x128xf32>,
    %c0_1118 = arith.constant 0 : index
    %c0_1119 = arith.constant 0 : index
    %647 = vector.load %arg17[%c0_1118, %c0_1119] : memref<8x128xf32, #tpu.memory_space<vmem>>, vector<1x128xf32>
    %c0_1120 = arith.constant 0 : index
    %c0_1121 = arith.constant 0 : index
    %648 = vector.load %arg18[%c0_1120, %c0_1121] : memref<8x128xf32, #tpu.memory_space<vmem>>, vector<1x128xf32>
    tpu.vector_store %arg18[%c0_1120, %c0_1121], %647 {strides = array<i32>} : memref<8x128xf32, #tpu.memory_space<vmem>>, vector<1x128xf32>,
    %c1_1122 = arith.constant 1 : index
    %c0_1123 = arith.constant 0 : index
    %649 = vector.load %arg17[%c1_1122, %c0_1123] : memref<8x128xf32, #tpu.memory_space<vmem>>, vector<1x128xf32>
    %c1_1124 = arith.constant 1 : index
    %c0_1125 = arith.constant 0 : index
    %650 = vector.load %arg18[%c1_1124, %c0_1125] : memref<8x128xf32, #tpu.memory_space<vmem>>, vector<1x128xf32>
    tpu.vector_store %arg18[%c1_1124, %c0_1125], %649 {strides = array<i32>} : memref<8x128xf32, #tpu.memory_space<vmem>>, vector<1x128xf32>,
    %c0_1126 = arith.constant 0 : index
    %c0_1127 = arith.constant 0 : index
    %651 = vector.load %arg18[%c0_1126, %c0_1127] : memref<8x128xf32, #tpu.memory_space<vmem>>, vector<8x128xf32>
    %652 = arith.truncf %651 : vector<8x128xf32> to vector<8x128xbf16>
    %c0_1128 = arith.constant 0 : index
    %c0_1129 = arith.constant 0 : index
    %653 = vector.load %arg8[%c0_1128, %c0_1129] : memref<128x512xbf16, #tpu.memory_space<vmem>>, vector<128x512xbf16>
    %cst_1130 = arith.constant dense<0.000000e+00> : vector<8x512xf32>
    %654 = tpu.matmul %652, %653, %cst_1130 {dimension_numbers = #tpu.dot_dimension_numbers<[1], [0], [0], [1], [0, 0, 1, 1], [], []>} : vector<8x128xbf16>, vector<128x512xbf16>, vector<8x512xf32> -> vector<8x512xf32>
    %c0_1131 = arith.constant 0 : index
    %c0_1132 = arith.constant 0 : index
    %655 = vector.load %arg9[%c0_1131, %c0_1132] : memref<1x512xf32, #tpu.memory_space<vmem>>, vector<1x512xf32>
    %656 = vector.broadcast %655 : vector<1x512xf32> to vector<8x512xf32>
    %657 = arith.addf %654, %656 : vector<8x512xf32>
    %cst_1133 = arith.constant 0.000000e+00 : f32
    %658 = vector.broadcast %cst_1133 : f32 to vector<8x512xf32>
    %659 = arith.maximumf %657, %658 : vector<8x512xf32>
    %660 = arith.truncf %659 : vector<8x512xf32> to vector<8x512xbf16>
    %c0_1134 = arith.constant 0 : index
    %c0_1135 = arith.constant 0 : index
    %661 = vector.load %arg10[%c0_1134, %c0_1135] : memref<512x128xbf16, #tpu.memory_space<vmem>>, vector<512x128xbf16>
    %cst_1136 = arith.constant dense<0.000000e+00> : vector<8x128xf32>
    %662 = tpu.matmul %660, %661, %cst_1136 {dimension_numbers = #tpu.dot_dimension_numbers<[1], [0], [0], [1], [0, 0, 1, 1], [], []>} : vector<8x512xbf16>, vector<512x128xbf16>, vector<8x128xf32> -> vector<8x128xf32>
    %c0_1137 = arith.constant 0 : index
    %c0_1138 = arith.constant 0 : index
    %663 = vector.load %arg11[%c0_1137, %c0_1138] : memref<1x128xf32, #tpu.memory_space<vmem>>, vector<1x128xf32>
    %664 = vector.broadcast %663 : vector<1x128xf32> to vector<8x128xf32>
    %665 = arith.addf %662, %664 : vector<8x128xf32>
    %c0_1139 = arith.constant 0 : index
    %c0_1140 = arith.constant 0 : index
    %666 = vector.load %arg12[%c0_1139, %c0_1140] : memref<8x128xf32, #tpu.memory_space<vmem>>, vector<8x128xf32>
    tpu.vector_store %arg12[%c0_1139, %c0_1140], %665 {strides = array<i32>} : memref<8x128xf32, #tpu.memory_space<vmem>>, vector<8x128xf32>,
    return
  }
  func.func @transform_0(%arg0: i32) -> (i32, i32) {
    %c0_i32 = arith.constant 0 : i32
    %c0_i32_0 = arith.constant 0 : i32
    %c0_i32_1 = arith.constant 0 : i32
    return %c0_i32, %c0_i32_0 : i32, i32
  }
  func.func @transform_1(%arg0: i32) -> (i32, i32) {
    %c0_i32 = arith.constant 0 : i32
    %c0_i32_0 = arith.constant 0 : i32
    %c0_i32_1 = arith.constant 0 : i32
    return %c0_i32, %c0_i32_0 : i32, i32
  }
  func.func @transform_2(%arg0: i32) -> (i32, i32) {
    %c0_i32 = arith.constant 0 : i32
    %c0_i32_0 = arith.constant 0 : i32
    %c0_i32_1 = arith.constant 0 : i32
    return %c0_i32, %c0_i32_0 : i32, i32
  }
  func.func @transform_3(%arg0: i32) -> (i32, i32) {
    %c0_i32 = arith.constant 0 : i32
    %c0_i32_0 = arith.constant 0 : i32
    %c0_i32_1 = arith.constant 0 : i32
    return %c0_i32, %c0_i32_0 : i32, i32
  }
  func.func @transform_4(%arg0: i32) -> (i32, i32) {
    %c0_i32 = arith.constant 0 : i32
    %c0_i32_0 = arith.constant 0 : i32
    %c0_i32_1 = arith.constant 0 : i32
    return %c0_i32, %c0_i32_0 : i32, i32
  }
  func.func @transform_5(%arg0: i32) -> (i32, i32) {
    %c0_i32 = arith.constant 0 : i32
    %c0_i32_0 = arith.constant 0 : i32
    %c0_i32_1 = arith.constant 0 : i32
    return %c0_i32, %c0_i32_0 : i32, i32
  }
  func.func @transform_6(%arg0: i32) -> (i32, i32) {
    %c0_i32 = arith.constant 0 : i32
    %c0_i32_0 = arith.constant 0 : i32
    %c0_i32_1 = arith.constant 0 : i32
    return %c0_i32, %c0_i32_0 : i32, i32
  }
  func.func @transform_7(%arg0: i32) -> (i32, i32) {
    %c0_i32 = arith.constant 0 : i32
    %c0_i32_0 = arith.constant 0 : i32
    %c0_i32_1 = arith.constant 0 : i32
    return %c0_i32, %c0_i32_0 : i32, i32
  }
  func.func @transform_8(%arg0: i32) -> (i32, i32) {
    %c0_i32 = arith.constant 0 : i32
    %c0_i32_0 = arith.constant 0 : i32
    %c0_i32_1 = arith.constant 0 : i32
    return %c0_i32, %c0_i32_0 : i32, i32
  }
  func.func @transform_9(%arg0: i32) -> (i32, i32) {
    %c0_i32 = arith.constant 0 : i32
    %c0_i32_0 = arith.constant 0 : i32
    %c0_i32_1 = arith.constant 0 : i32
    return %c0_i32, %c0_i32_0 : i32, i32
  }
  func.func @transform_10(%arg0: i32) -> (i32, i32) {
    %c0_i32 = arith.constant 0 : i32
    %c0_i32_0 = arith.constant 0 : i32
    %c0_i32_1 = arith.constant 0 : i32
    return %c0_i32, %c0_i32_0 : i32, i32
  }
  func.func @transform_11(%arg0: i32) -> (i32, i32) {
    %c0_i32 = arith.constant 0 : i32
    %c0_i32_0 = arith.constant 0 : i32
    %c0_i32_1 = arith.constant 0 : i32
    return %c0_i32, %c0_i32_0 : i32, i32
  }
}

</mosaic_0001>

<bundles_post_ra>
// kernel: dqn_forward.1
= control target key start
LH: loop header
LB: loop body
LE: loop exit
PB: predicated region body
PF: predicated region fallthrough
CT: control target
= control target key end

     0   :  { %v5203_v36 = vmov 0.0   ;;  %vm5204_vm0 = vmmov 0   ;;  %s6261_s1 = inlined_call_operand.vmem [shape: bf16[256,128], index: 1, kind: input, shape index: {}]   ;;  %s6262_s0 = inlined_call_operand.vmem [shape: bf16[168,256], index: 0, kind: input, shape index: {}]   ;;  %s6263_s3 = inlined_call_operand.vmem [shape: bf16[2048,128], index: 3, kind: input, shape index: {}]   ;;  %s6264_s2 = inlined_call_operand.vmem [shape: f32[1,128], index: 2, kind: input, shape index: {}]   ;;  %s6265_s5 = inlined_call_operand.vmem [shape: bf16[1152,128], index: 5, kind: input, shape index: {}]   ;;  %s6266_s4 = inlined_call_operand.vmem [shape: f32[1,128], index: 4, kind: input, shape index: {}]   ;;  %s6267_s7 = inlined_call_operand.vmem [shape: bf16[128,512], index: 7, kind: input, shape index: {}]   ;;  %s6268_s9 = inlined_call_operand.vmem [shape: bf16[512,128], index: 9, kind: input, shape index: {}]   ;;  %s6269_s6 = inlined_call_operand.vmem [shape: f32[1,128], index: 6, kind: input, shape index: {}]   ;;  %s6270_s8 = inlined_call_operand.vmem [shape: f32[1,512], index: 8, kind: input, shape index: {}]   ;;  %s6271_s10 = inlined_call_operand.vmem [shape: f32[1,128], index: 10, kind: input, shape index: {}]   ;;  %s6272_s11 = inlined_call_operand.vmem [shape: f32[8,128], index: 11, kind: output, shape index: {}]  }
   0x1   :  { %v4872_v0 = vld [vmem:[%s6261_s1 + $0x40] sm:$0xff]   ;;  %v4874_v2 = vld [vmem:[%s6261_s1 + $0x48] sm:$0xff]   ;;  %v4876_v4 = vld [vmem:[%s6261_s1 + $0x50] sm:$0xff]   ;;  %464 = vst [vmem:[#allocation3] sm:$0xff] %v5203_v36 }
   0x2   :  { %v4873_v1 = vld [vmem:[%s6261_s1] sm:$0xff]   ;;  %4402 = vmatprep.subr.bf16.mxu0 %v4872_v0  ;;  %v4875_v3 = vld [vmem:[%s6261_s1 + $0x8] sm:$0xff]   ;;  %v4877_v5 = vld [vmem:[%s6261_s1 + $0x10] sm:$0xff]   ;;  %466 = vst [vmem:[#allocation3 + $0x10] sm:$0xff] %v5203_v36 }
   0x3   :  { %4403 = vmatpush3.bf16.msra.mxu0 %v4873_v1  ;;  %v4878_v6 = vld [vmem:[%s6261_s1 + $0x58] sm:$0xff]   ;;  %v4880_v8 = vld [vmem:[%s6261_s1 + $0x60] sm:$0xff]   ;;  %v4882_v10 = vld [vmem:[%s6261_s1 + $0x68] sm:$0xff]   ;;  %467 = vst [vmem:[#allocation3 + $0x18] sm:$0xff] %v5203_v36 }
   0x4   :  { %4404 = vmatprep.subr.bf16.mxu0 %v4874_v2  ;;  %v4879_v7 = vld [vmem:[%s6261_s1 + $0x18] sm:$0xff]   ;;  %v4881_v9 = vld [vmem:[%s6261_s1 + $0x20] sm:$0xff]   ;;  %v4883_v12 = vld [vmem:[%s6261_s1 + $0x28] sm:$0xff]   ;;  %465 = vst [vmem:[#allocation3 + $0x8] sm:$0xff] %v5203_v36 }
   0x5   :  { %v4890_v11 = vld [vmem:[%s6262_s0 + $0x4] ss:$8 sps:$4 sm:$0xff]   ;;  %v4884_v13 = vld [vmem:[%s6261_s1 + $0x70] sm:$0xff]   ;;  %v4886_v15 = vld [vmem:[%s6261_s1 + $0x78] sm:$0xff]   ;;  %468 = vst [vmem:[#allocation3 + $0x20] sm:$0xff] %v5203_v36 }
   0x6   :  { %334 = vmatprep.mubr.bf16.mxu0 %v4890_v11  ;;  %v4885_v14 = vld [vmem:[%s6261_s1 + $0x30] sm:$0xff]   ;;  %v4887_v16 = vld [vmem:[%s6261_s1 + $0x38] sm:$0xff]   ;;  %v4888_v17 = vld [vmem:[%s6262_s0] ss:$8 sps:$4 sm:$0xff]   ;;  %469 = vst [vmem:[#allocation3 + $0x28] sm:$0xff] %v5203_v36 }
   0x7   :  { %4405 = vmatpush3.bf16.msra.mxu0 %v4875_v3  ;;  %v4891_v18 = vld [vmem:[%s6262_s0 + $0x14] ss:$8 sps:$4 sm:$0xff]   ;;  %v4893_v19 = vld [vmem:[%s6262_s0 + $0x10] ss:$8 sps:$4 sm:$0xff]   ;;  %v4894_v20 = vld [vmem:[%s6262_s0 + $0x24] ss:$8 sps:$4 sm:$0xff]  }
   0x8   :  { %4406 = vmatprep.subr.bf16.mxu0 %v4876_v4  ;;  %v4896_v21 = vld [vmem:[%s6262_s0 + $0x20] ss:$8 sps:$4 sm:$0xff]   ;;  %v4897_v22 = vld [vmem:[%s6262_s0 + $0x34] ss:$8 sps:$4 sm:$0xff]   ;;  %v4899_v23 = vld [vmem:[%s6262_s0 + $0x30] ss:$8 sps:$4 sm:$0xff]  }
   0x9   :  { %v4900_v24 = vld [vmem:[%s6262_s0 + $0x44] ss:$8 sps:$4 sm:$0xff]   ;;  %v4902_v25 = vld [vmem:[%s6262_s0 + $0x40] ss:$8 sps:$4 sm:$0xff]   ;;  %v4903_v26 = vld [vmem:[%s6262_s0 + $0x54] ss:$8 sps:$4 sm:$0xff]  }
   0xa   :  { %v4905_v27 = vld [vmem:[%s6262_s0 + $0x50] ss:$8 sps:$4 sm:$0xff]   ;;  %v4906_v28 = vld [vmem:[%s6262_s0 + $0x64] ss:$8 sps:$4 sm:$0xff]   ;;  %v4908_v29 = vld [vmem:[%s6262_s0 + $0x60] ss:$8 sps:$4 sm:$0xff]  }
   0xb   :  { %4407 = vmatpush3.bf16.msra.mxu0 %v4877_v5  ;;  %v4909_v30 = vld [vmem:[%s6262_s0 + $0x74] ss:$8 sps:$4 sm:$0xff]   ;;  %v4911_v31 = vld [vmem:[%s6262_s0 + $0x70] ss:$8 sps:$4 sm:$0xff]   ;;  %v4912_v32 = vld [vmem:[%s6262_s0 + $0x84] ss:$8 sps:$4 sm:$0xff]  }
   0xc   :  { %4408 = vmatprep.subr.bf16.mxu0 %v4878_v6  ;;  %v4914_v33 = vld [vmem:[%s6262_s0 + $0x80] ss:$8 sps:$4 sm:$0xff]   ;;  %v4915_v34 = vld [vmem:[%s6262_s0 + $0x94] ss:$8 sps:$4 sm:$0xff]   ;;  %v4917_v35 = vld [vmem:[%s6262_s0 + $0x90] ss:$8 sps:$4 sm:$0xff]  }
   0xd   :  { %470 = vst [vmem:[#allocation3 + $0x30] sm:$0xff] %v5203_v36  ;;  %471 = vst [vmem:[#allocation3 + $0x38] sm:$0xff] %v5203_v36  ;;  %v4918_v37 = vld [vmem:[%s6263_s3 + $0x40] sm:$0xff]   ;;  %v4920_v39 = vld [vmem:[%s6263_s3 + $0x48] sm:$0xff]  }
   0xe   :  { %472 = vst [vmem:[#allocation3 + $0x40] sm:$0xff] %v5203_v36  ;;  %473 = vst [vmem:[#allocation3 + $0x48] sm:$0xff] %v5203_v36  ;;  %4484 = vmatprep.subr.bf16.mxu1 %v4918_v37  ;;  %v4919_v38 = vld [vmem:[%s6263_s3] sm:$0xff]   ;;  %v4921_v40 = vld [vmem:[%s6263_s3 + $0x8] sm:$0xff]  }
   0xf   :  { %4409 = vmatpush3.bf16.msra.mxu0 %v4879_v7  ;;  %474 = vst [vmem:[#allocation3 + $0x50] sm:$0xff] %v5203_v36  ;;  %475 = vst [vmem:[#allocation3 + $0x58] sm:$0xff] %v5203_v36  ;;  %4485 = vmatpush3.bf16.msra.mxu1 %v4919_v38  ;;  %v4922_v41 = vld [vmem:[%s6263_s3 + $0x50] sm:$0xff]   ;;  %v4923_v42 = vld [vmem:[%s6263_s3 + $0x1c0] sm:$0xff]  }
  0x10   :  { %4410 = vmatprep.subr.bf16.mxu0 %v4880_v8  ;;  %476 = vst [vmem:[#allocation3 + $0x60] sm:$0xff] %v5203_v36  ;;  %477 = vst [vmem:[#allocation3 + $0x68] sm:$0xff] %v5203_v36  ;;  %4486 = vmatprep.subr.bf16.mxu1 %v4920_v39  ;;  %v4924_v43 = vld [vmem:[%s6263_s3 + $0x10] sm:$0xff]   ;;  %v4925_v44 = vld [vmem:[%s6263_s3 + $0x180] sm:$0xff]  }
  0x11   :  { %478 = vst [vmem:[#allocation3 + $0x70] sm:$0xff] %v5203_v36  ;;  %479 = vst [vmem:[#allocation3 + $0x78] sm:$0xff] %v5203_v36  ;;  %v4926_v45 = vld [vmem:[%s6263_s3 + $0x58] sm:$0xff]   ;;  %v4927_v46 = vld [vmem:[%s6263_s3 + $0x1c8] sm:$0xff]  }
  0x12   :  { %480 = vst [vmem:[#allocation3 + $0x80] sm:$0xff] %v5203_v36  ;;  %481 = vst [vmem:[#allocation3 + $0x88] sm:$0xff] %v5203_v36  ;;  %v4928_v47 = vld [vmem:[%s6263_s3 + $0x18] sm:$0xff]   ;;  %v4929_v48 = vld [vmem:[%s6263_s3 + $0x188] sm:$0xff]  }
  0x13   :  { %4411 = vmatpush3.bf16.msra.mxu0 %v4881_v9  ;;  %482 = vst [vmem:[#allocation3 + $0x90] sm:$0xff] %v5203_v36  ;;  %483 = vst [vmem:[#allocation3 + $0x98] sm:$0xff] %v5203_v36  ;;  %4487 = vmatpush3.bf16.msra.mxu1 %v4921_v40  ;;  %v4930_v49 = vld [vmem:[%s6263_s3 + $0x60] sm:$0xff]   ;;  %v4931_v50 = vld [vmem:[%s6263_s3 + $0x1d0] sm:$0xff]  }
  0x14   :  { %4412 = vmatprep.subr.bf16.mxu0 %v4882_v10  ;;  %484 = vst [vmem:[#allocation3 + $0xa0] sm:$0xff] %v5203_v36  ;;  %485 = vst [vmem:[#allocation3 + $0xa8] sm:$0xff] %v5203_v36  ;;  %4488 = vmatprep.subr.bf16.mxu1 %v4922_v41  ;;  %v4932_v51 = vld [vmem:[%s6263_s3 + $0x20] sm:$0xff]   ;;  %v4933_v52 = vld [vmem:[%s6263_s3 + $0x190] sm:$0xff]  }
  0x15   :  { %486 = vst [vmem:[#allocation3 + $0xb0] sm:$0xff] %v5203_v36  ;;  %487 = vst [vmem:[#allocation3 + $0xb8] sm:$0xff] %v5203_v36  ;;  %v4934_v53 = vld [vmem:[%s6263_s3 + $0x68] sm:$0xff]   ;;  %v4935_v54 = vld [vmem:[%s6263_s3 + $0x1d8] sm:$0xff]  }
  0x16   :  { %488 = vst [vmem:[#allocation3 + $0xc0] sm:$0xff] %v5203_v36  ;;  %489 = vst [vmem:[#allocation3 + $0xc8] sm:$0xff] %v5203_v36  ;;  %v4936_v55 = vld [vmem:[%s6263_s3 + $0x28] sm:$0xff]   ;;  %v4937_v56 = vld [vmem:[%s6263_s3 + $0x198] sm:$0xff]  }
  0x17   :  { %4413 = vmatpush3.bf16.msra.mxu0 %v4883_v12  ;;  %490 = vst [vmem:[#allocation3 + $0xd0] sm:$0xff] %v5203_v36  ;;  %491 = vst [vmem:[#allocation3 + $0xd8] sm:$0xff] %v5203_v36  ;;  %4489 = vmatpush3.bf16.msra.mxu1 %v4924_v43  ;;  %v5437_v57 = vld [vmem:[%s6264_s2] ss:$0 sm:$0xff]  ;;  %v4938_v59 = vld [vmem:[%s6263_s3 + $0x70] sm:$0xff]  }
  0x18   :  { %4414 = vmatprep.subr.bf16.mxu0 %v4884_v13  ;;  %492 = vst [vmem:[#allocation3 + $0xe0] sm:$0xff] %v5203_v36  ;;  %493 = vst [vmem:[#allocation3 + $0xe8] sm:$0xff] %v5203_v36  ;;  %4490 = vmatprep.subr.bf16.mxu1 %v4926_v45  ;;  %v4939_v60 = vld [vmem:[%s6263_s3 + $0x1e0] sm:$0xff]   ;;  %v4940_v62 = vld [vmem:[%s6263_s3 + $0x30] sm:$0xff]  }
  0x19   :  { %494 = vst [vmem:[#allocation3 + $0xf0] sm:$0xff] %v5203_v36  ;;  %495 = vst [vmem:[#allocation3 + $0xf8] sm:$0xff] %v5203_v36  ;;  %v4941_v63 = vld [vmem:[%s6263_s3 + $0x1a0] sm:$0xff]   ;;  %v4942_v5 = vld [vmem:[%s6263_s3 + $0x78] sm:$0xff]  }
  0x1a   :  { %496 = vst [vmem:[#allocation3 + $0x100] sm:$0xff] %v5203_v36  ;;  %497 = vst [vmem:[#allocation3 + $0x108] sm:$0xff] %v5203_v36  ;;  %v4943_v6 = vld [vmem:[%s6263_s3 + $0x1e8] sm:$0xff]   ;;  %v4944_v7 = vld [vmem:[%s6263_s3 + $0x38] sm:$0xff]  }
  0x1b   :  { %4415 = vmatpush3.bf16.msra.mxu0 %v4885_v14  ;;  %498 = vst [vmem:[#allocation3 + $0x110] sm:$0xff] %v5203_v36  ;;  %499 = vst [vmem:[#allocation3 + $0x118] sm:$0xff] %v5203_v36  ;;  %4491 = vmatpush3.bf16.msra.mxu1 %v4928_v47  ;;  %v4945_v8 = vld [vmem:[%s6263_s3 + $0x1a8] sm:$0xff]   ;;  %v59_v11 = vld [vmem:[%s6262_s0 + $0xa0] sm:$0xff] }
  0x1c   :  { %4416 = vmatprep.subr.bf16.mxu0 %v4886_v15  ;;  %500 = vst [vmem:[#allocation3 + $0x120] sm:$0xff] %v5203_v36  ;;  %501 = vst [vmem:[#allocation3 + $0x128] sm:$0xff] %v5203_v36  ;;  %4492 = vmatprep.subr.bf16.mxu1 %v4930_v49  ;;  %v4118_v14 = vcombine.high %v59_v11, %v59_v11  ;;  %v4947_v49 = vld [vmem:[%s6263_s3 + $0xc0] sm:$0xff]  }
  0x1d   :  { %502 = vst [vmem:[#allocation3 + $0x130] sm:$0xff] %v5203_v36  ;;  %503 = vst [vmem:[#allocation3 + $0x138] sm:$0xff] %v5203_v36 }
  0x1e   :  { %504 = vst [vmem:[#allocation3 + $0x140] sm:$0xff] %v5203_v36  ;;  %505 = vst [vmem:[#allocation3 + $0x148] sm:$0xff] %v5203_v36 }
  0x1f   :  { %4417 = vmatpush3.bf16.msra.mxu0 %v4887_v16  ;;  %506 = vst [vmem:[#allocation3 + $0x150] sm:$0xff] %v5203_v36  ;;  %507 = vst [vmem:[#allocation3 + $0x158] sm:$0xff] %v5203_v36  ;;  %4493 = vmatpush3.bf16.msra.mxu1 %v4932_v51 }
  0x20   :  { %508 = vst [vmem:[#allocation3 + $0x160] sm:$0xff] %v5203_v36  ;;  %509 = vst [vmem:[#allocation3 + $0x168] sm:$0xff] %v5203_v36  ;;  %4568 = vmatprep.subr.bf16.mxu0 %v4923_v42  ;;  %4494 = vmatprep.subr.bf16.mxu1 %v4934_v53 }
  0x21   :  { %510 = vst [vmem:[#allocation3 + $0x170] sm:$0xff] %v5203_v36  ;;  %511 = vst [vmem:[#allocation3 + $0x178] sm:$0xff] %v5203_v36 }
  0x22   :  { %335 = vmatmul.mubr.bf16.vlgmr.msra.gmra.mrb[0].mxu0 %v4888_v17  ;;  %2589 = vst [vmem:[#allocation5] sm:$0xff] %v5203_v36  ;;  %2590 = vst [vmem:[#allocation5 + $0x8] sm:$0xff] %v5203_v36 }
  0x23   :  { %342 = vmatprep.mubr.bf16.mxu0 %v4891_v18  ;;  %2591 = vst [vmem:[#allocation5 + $0x10] sm:$0xff] %v5203_v36  ;;  %2592 = vst [vmem:[#allocation5 + $0x18] sm:$0xff] %v5203_v36  ;;  %4569 = vmatpush3.bf16.msra.mxu0 %v4925_v44 }
  0x24   :  { %2593 = vst [vmem:[#allocation5 + $0x20] sm:$0xff] %v5203_v36  ;;  %2594 = vst [vmem:[#allocation5 + $0x28] sm:$0xff] %v5203_v36  ;;  %4570 = vmatprep.subr.bf16.mxu0 %v4927_v46  ;;  %4495 = vmatpush3.bf16.msra.mxu1 %v4936_v55 }
  0x25   :  { %2595 = vst [vmem:[#allocation5 + $0x30] sm:$0xff] %v5203_v36  ;;  %2596 = vst [vmem:[#allocation5 + $0x38] sm:$0xff] %v5203_v36  ;;  %4496 = vmatprep.subr.bf16.mxu1 %v4938_v59 }
  0x26   :  { %2597 = vst [vmem:[#allocation5 + $0x40] sm:$0xff] %v5203_v36  ;;  %3437 = vst [vmem:[#allocation7] sm:$0xff] %v5203_v36 }
  0x27   :  { %4571 = vmatpush3.bf16.msra.mxu0 %v4929_v48 }
  0x28   :  { %4572 = vmatprep.subr.bf16.mxu0 %v4931_v50  ;;  %4497 = vmatpush3.bf16.msra.mxu1 %v4940_v62 }
  0x29   :  { %4498 = vmatprep.subr.bf16.mxu1 %v4942_v5 }
  0x2a   :  { %343 = vmatmul.mubr.bf16.gmra.mrb[4].mxu0 %v4893_v19 }
  0x2b   :  { %350 = vmatprep.mubr.bf16.mxu0 %v4894_v20  ;;  %4573 = vmatpush3.bf16.msra.mxu0 %v4933_v52 }
  0x2c   :  { %4574 = vmatprep.subr.bf16.mxu0 %v4935_v54  ;;  %4499 = vmatpush3.bf16.msra.mxu1 %v4944_v7 }
  0x2d   :  { %4512 = vmatprep.subr.bf16.mxu1 %v4947_v49 }
  0x2f   :  { %4575 = vmatpush3.bf16.msra.mxu0 %v4937_v56 }
  0x30   :  { %4576 = vmatprep.subr.bf16.mxu0 %v4939_v60 }
  0x32   :  { %351 = vmatmul.mubr.bf16.gmra.mrb[8].mxu0 %v4896_v21 }
  0x33   :  { %358 = vmatprep.mubr.bf16.mxu0 %v4897_v22  ;;  %4577 = vmatpush3.bf16.msra.mxu0 %v4941_v63 }
  0x34   :  { %4578 = vmatprep.subr.bf16.mxu0 %v4943_v6 }
  0x37   :  { %4579 = vmatpush3.bf16.msra.mxu0 %v4945_v8 }
  0x3a   :  { %359 = vmatmul.mubr.bf16.gmra.mrb[12].mxu0 %v4899_v23 }
  0x3b   :  { %366 = vmatprep.mubr.bf16.mxu0 %v4900_v24 }
  0x42   :  { %367 = vmatmul.mubr.bf16.gmra.mrb[16].mxu0 %v4902_v25 }
  0x43   :  { %374 = vmatprep.mubr.bf16.mxu0 %v4903_v26 }
  0x4a   :  { %375 = vmatmul.mubr.bf16.gmra.mrb[20].mxu0 %v4905_v27 }
  0x4b   :  { %382 = vmatprep.mubr.bf16.mxu0 %v4906_v28 }
  0x52   :  { %383 = vmatmul.mubr.bf16.gmra.mrb[24].mxu0 %v4908_v29 }
  0x53   :  { %390 = vmatprep.mubr.bf16.mxu0 %v4909_v30 }
  0x5a   :  { %391 = vmatmul.mubr.bf16.gmra.mrb[28].mxu0 %v4911_v31 }
  0x5b   :  { %398 = vmatprep.mubr.bf16.mxu0 %v4912_v32 }
  0x62   :  { %399 = vmatmul.mubr.bf16.gmra.mrb[32].mxu0 %v4914_v33 }
  0x63   :  { %406 = vmatprep.mubr.bf16.mxu0 %v4915_v34 }
  0x6a   :  { %407 = vmatmul.mubr.bf16.gmra.mrb[36].mxu0 %v4917_v35  ;;  %v4117_v35 = vcombine.low %v59_v11, %v59_v11 }
  0x6b   :  { %414 = vmatprep.mubr.bf16.mxu0 %v4118_v14 }
  0x72   :  { %415 = vmatmul.mubr.bf16.gmra.mrb[40].mxu0 %v4117_v35 }
  0xf5   :  { %v4418_v58 = vpop.f32.mrb[0].mxu0 }
  0xf6   :  { %v4419_v61 = vpop.f32.mrb[1].mxu0 }
  0xf7   :  { %v4420_v0 = vadd.f32 %v4419_v61, %v4418_v58  ;;  %v4421_v1 = vpop.f32.mrb[2].mxu0 }
  0xf8   :  { %v4422_v2 = vpop.f32.mrb[3].mxu0 }
  0xf9   :  { %v337_v3 = vadd.f32 %v4420_v0, %v5437_v57  ;;  %v4423_v4 = vadd.f32 %v4422_v2, %v4421_v1 }
  0xfb   :  { %v422_v9 = vmax.f32 %v337_v3, 0.0  ;;  %v340_v10 = vadd.f32 %v4423_v4, %v5437_v57 }
  0xfd   :  { %443 = vst [vmem:[#allocation2] sm:$0xff] %v422_v9  ;;  %v423_v12 = vmax.f32 %v340_v10, 0.0  ;;  %v4424_v13 = vpop.f32.mrb[4].mxu0 }
  0xfe   :  { %v4425_v15 = vpop.f32.mrb[5].mxu0 }
  0xff   :  { %444 = vst [vmem:[#allocation2 + $0x8] sm:$0xff] %v423_v12  ;;  %v4426_v16 = vadd.f32 %v4425_v15, %v4424_v13  ;;  %v4427_v17 = vpop.f32.mrb[6].mxu0 }
 0x100   :  { %v4428_v18 = vpop.f32.mrb[7].mxu0 }
 0x101   :  { %v345_v19 = vadd.f32 %v4426_v16, %v5437_v57  ;;  %v4429_v20 = vadd.f32 %v4428_v18, %v4427_v17 }
 0x103   :  { %v424_v21 = vmax.f32 %v345_v19, 0.0  ;;  %v348_v31 = vadd.f32 %v4429_v20, %v5437_v57 }
 0x104   :  { %v512_v22 = vld [vmem:[#allocation2] sm:$0x1]  ;;  %v516_v23 = vld [vmem:[#allocation2 + $0x2] sm:$0x1]  ;;  %v518_v24 = vld [vmem:[#allocation2 + $0x3] sm:$0x1] }
 0x105   :  { %513 = vst [vmem:[#allocation3] sm:$0x1] %v512_v22  ;;  %517 = vst [vmem:[#allocation3 + $0x10] sm:$0x1] %v516_v23  ;;  %v544_v25 = vld [vmem:[#allocation2 + $0x2] sm:$0x1] }
 0x106   :  { %519 = vst [vmem:[#allocation3 + $0x18] sm:$0x1] %v518_v24  ;;  %v548_v26 = vld [vmem:[#allocation2 + $0x4] sm:$0x1]  ;;  %v550_v27 = vld [vmem:[#allocation2 + $0x5] sm:$0x1] }
 0x107   :  { %445 = vst [vmem:[#allocation2 + $0x10] sm:$0xff] %v424_v21  ;;  %545 = vst [vmem:[#allocation3 + $0x1] sm:$0x1] %v544_v25  ;;  %v576_v28 = vld [vmem:[#allocation2 + $0x4] sm:$0x1]  ;;  %v425_v44 = vmax.f32 %v348_v31, 0.0 }
 0x108   :  { %549 = vst [vmem:[#allocation3 + $0x11] sm:$0x1] %v548_v26  ;;  %551 = vst [vmem:[#allocation3 + $0x19] sm:$0x1] %v550_v27  ;;  %v580_v29 = vld [vmem:[#allocation2 + $0x6] sm:$0x1] }
 0x109   :  { %v582_v30 = vld [vmem:[#allocation2 + $0x7] sm:$0x1]  ;;  %577 = vst [vmem:[#allocation3 + $0x2] sm:$0x1] %v576_v28  ;;  %581 = vst [vmem:[#allocation3 + $0x12] sm:$0x1] %v580_v29 }
 0x10a   :  { %583 = vst [vmem:[#allocation3 + $0x1a] sm:$0x1] %v582_v30  ;;  %v520_v32 = vld [vmem:[#allocation2 + $0x9] sm:$0x1]  ;;  %v522_v33 = vld [vmem:[#allocation2 + $0xa] sm:$0x1] }
 0x10b   :  { %v524_v34 = vld [vmem:[#allocation2 + $0xb] sm:$0x1]  ;;  %521 = vst [vmem:[#allocation3 + $0x20] sm:$0x1] %v520_v32  ;;  %523 = vst [vmem:[#allocation3 + $0x28] sm:$0x1] %v522_v33 }
 0x10c   :  { %525 = vst [vmem:[#allocation3 + $0x30] sm:$0x1] %v524_v34  ;;  %v526_v36 = vld [vmem:[#allocation2 + $0xc] sm:$0x1]  ;;  %v552_v37 = vld [vmem:[#allocation2 + $0xb] sm:$0x1] }
 0x10d   :  { %v554_v38 = vld [vmem:[#allocation2 + $0xc] sm:$0x1]  ;;  %527 = vst [vmem:[#allocation3 + $0x38] sm:$0x1] %v526_v36  ;;  %553 = vst [vmem:[#allocation3 + $0x21] sm:$0x1] %v552_v37 }
 0x10e   :  { %555 = vst [vmem:[#allocation3 + $0x29] sm:$0x1] %v554_v38  ;;  %v556_v39 = vld [vmem:[#allocation2 + $0xd] sm:$0x1]  ;;  %v558_v40 = vld [vmem:[#allocation2 + $0xe] sm:$0x1] }
 0x10f   :  { %v584_v41 = vld [vmem:[#allocation2 + $0xd] sm:$0x1]  ;;  %557 = vst [vmem:[#allocation3 + $0x31] sm:$0x1] %v556_v39  ;;  %559 = vst [vmem:[#allocation3 + $0x39] sm:$0x1] %v558_v40 }
 0x110   :  { %585 = vst [vmem:[#allocation3 + $0x22] sm:$0x1] %v584_v41  ;;  %v586_v42 = vld [vmem:[#allocation2 + $0xe] sm:$0x1]  ;;  %v588_v43 = vld [vmem:[#allocation2 + $0xf] sm:$0x1] }
 0x111   :  { %v4430_v45 = vpop.f32.mrb[8].mxu0  ;;  %587 = vst [vmem:[#allocation3 + $0x2a] sm:$0x1] %v586_v42  ;;  %589 = vst [vmem:[#allocation3 + $0x32] sm:$0x1] %v588_v43  ;;  %v4948_v32 = vld [vmem:[%s6263_s3 + $0x1f0] sm:$0xff]  }
 0x112   :  { %v4431_v46 = vpop.f32.mrb[9].mxu0  ;;  %v514_v47 = vld [vmem:[#allocation2 + $0x1] sm:$0x1]  ;;  %v546_v48 = vld [vmem:[#allocation2 + $0x3] sm:$0x1]  ;;  %446 = vst [vmem:[#allocation2 + $0x18] sm:$0xff] %v425_v44  ;;  %4580 = vmatprep.subr.bf16.mxu0 %v4948_v32 }
 0x113   :  { %v528_v50 = vld [vmem:[#allocation2 + $0x12] sm:$0x1]  ;;  %v530_v51 = vld [vmem:[#allocation2 + $0x13] sm:$0x1]  ;;  %v532_v52 = vld [vmem:[#allocation2 + $0x14] sm:$0x1]  ;;  %v4432_v53 = vadd.f32 %v4431_v46, %v4430_v45 }
 0x114   :  { %515 = vst [vmem:[#allocation3 + $0x8] sm:$0x1] %v514_v47  ;;  %547 = vst [vmem:[#allocation3 + $0x9] sm:$0x1] %v546_v48  ;;  %v534_v54 = vld [vmem:[#allocation2 + $0x15] sm:$0x1] }
 0x115   :  { %529 = vst [vmem:[#allocation3 + $0x40] sm:$0x1] %v528_v50  ;;  %531 = vst [vmem:[#allocation3 + $0x48] sm:$0x1] %v530_v51  ;;  %v560_v55 = vld [vmem:[#allocation2 + $0x14] sm:$0x1]  ;;  %v353_v61 = vadd.f32 %v4432_v53, %v5437_v57 }
 0x116   :  { %533 = vst [vmem:[#allocation3 + $0x50] sm:$0x1] %v532_v52  ;;  %v562_v56 = vld [vmem:[#allocation2 + $0x15] sm:$0x1]  ;;  %535 = vst [vmem:[#allocation3 + $0x58] sm:$0x1] %v534_v54 }
 0x117   :  { %561 = vst [vmem:[#allocation3 + $0x41] sm:$0x1] %v560_v55  ;;  %563 = vst [vmem:[#allocation3 + $0x49] sm:$0x1] %v562_v56  ;;  %v564_v58 = vld [vmem:[#allocation2 + $0x16] sm:$0x1] }
 0x118   :  { %v566_v59 = vld [vmem:[#allocation2 + $0x17] sm:$0x1]  ;;  %v590_v60 = vld [vmem:[#allocation2 + $0x10] sm:$0x1]  ;;  %565 = vst [vmem:[#allocation3 + $0x51] sm:$0x1] %v564_v58 }
 0x119   :  { %567 = vst [vmem:[#allocation3 + $0x59] sm:$0x1] %v566_v59  ;;  %591 = vst [vmem:[#allocation3 + $0x3a] sm:$0x1] %v590_v60  ;;  %v592_v62 = vld [vmem:[#allocation2 + $0x16] sm:$0x1] }
 0x11a   :  { %v594_v63 = vld [vmem:[#allocation2 + $0x17] sm:$0x1]  ;;  %v608_v0 = vld [vmem:[#allocation2 + $0x12] sm:$0x1]  ;;  %593 = vst [vmem:[#allocation3 + $0x42] sm:$0x1] %v592_v62 }
 0x11b   :  { %595 = vst [vmem:[#allocation3 + $0x4a] sm:$0x1] %v594_v63  ;;  %609 = vst [vmem:[#allocation3 + $0x3] sm:$0x1] %v608_v0  ;;  %v612_v1 = vld [vmem:[#allocation2 + $0x14] sm:$0x1] }
 0x11c   :  { %v614_v2 = vld [vmem:[#allocation2 + $0x15] sm:$0x1]  ;;  %v640_v3 = vld [vmem:[#allocation2 + $0x14] sm:$0x1]  ;;  %613 = vst [vmem:[#allocation3 + $0x13] sm:$0x1] %v612_v1 }
 0x11d   :  { %615 = vst [vmem:[#allocation3 + $0x1b] sm:$0x1] %v614_v2  ;;  %641 = vst [vmem:[#allocation3 + $0x4] sm:$0x1] %v640_v3  ;;  %v644_v4 = vld [vmem:[#allocation2 + $0x16] sm:$0x1] }
 0x11e   :  { %v646_v5 = vld [vmem:[#allocation2 + $0x17] sm:$0x1]  ;;  %v672_v6 = vld [vmem:[#allocation2 + $0x16] sm:$0x1]  ;;  %645 = vst [vmem:[#allocation3 + $0x14] sm:$0x1] %v644_v4 }
 0x11f   :  { %647 = vst [vmem:[#allocation3 + $0x1c] sm:$0x1] %v646_v5  ;;  %673 = vst [vmem:[#allocation3 + $0x5] sm:$0x1] %v672_v6  ;;  %v426_v7 = vmax.f32 %v353_v61, 0.0  ;;  %v4433_v8 = vpop.f32.mrb[10].mxu0 }
 0x120   :  { %v578_v9 = vld [vmem:[#allocation2 + $0x5] sm:$0x1]  ;;  %v610_v10 = vld [vmem:[#allocation2 + $0x13] sm:$0x1]  ;;  %v536_v11 = vld [vmem:[#allocation2 + $0x1b] sm:$0x1] }
 0x121   :  { %v538_v12 = vld [vmem:[#allocation2 + $0x1c] sm:$0x1]  ;;  %v540_v13 = vld [vmem:[#allocation2 + $0x1d] sm:$0x1]  ;;  %579 = vst [vmem:[#allocation3 + $0xa] sm:$0x1] %v578_v9 }
 0x122   :  { %611 = vst [vmem:[#allocation3 + $0xb] sm:$0x1] %v610_v10  ;;  %537 = vst [vmem:[#allocation3 + $0x60] sm:$0x1] %v536_v11  ;;  %v542_v14 = vld [vmem:[#allocation2 + $0x1e] sm:$0x1] }
 0x123   :  { %539 = vst [vmem:[#allocation3 + $0x68] sm:$0x1] %v538_v12  ;;  %541 = vst [vmem:[#allocation3 + $0x70] sm:$0x1] %v540_v13  ;;  %v568_v15 = vld [vmem:[#allocation2 + $0x1d] sm:$0x1] }
 0x124   :  { %v570_v16 = vld [vmem:[#allocation2 + $0x1e] sm:$0x1]  ;;  %447 = vst [vmem:[#allocation2 + $0x20] sm:$0xff] %v426_v7  ;;  %543 = vst [vmem:[#allocation3 + $0x78] sm:$0x1] %v542_v14  ;;  %v4434_v31 = vpop.f32.mrb[11].mxu0 }
 0x125   :  { %569 = vst [vmem:[#allocation3 + $0x61] sm:$0x1] %v568_v15  ;;  %571 = vst [vmem:[#allocation3 + $0x69] sm:$0x1] %v570_v16  ;;  %v572_v17 = vld [vmem:[#allocation2 + $0x1f] sm:$0x1]  ;;  %v4435_v33 = vadd.f32 %v4434_v31, %v4433_v8 }
 0x126   :  { %v596_v18 = vld [vmem:[#allocation2 + $0x18] sm:$0x1]  ;;  %v598_v19 = vld [vmem:[#allocation2 + $0x19] sm:$0x1]  ;;  %573 = vst [vmem:[#allocation3 + $0x71] sm:$0x1] %v572_v17 }
 0x127   :  { %597 = vst [vmem:[#allocation3 + $0x52] sm:$0x1] %v596_v18  ;;  %599 = vst [vmem:[#allocation3 + $0x5a] sm:$0x1] %v598_v19  ;;  %v600_v20 = vld [vmem:[#allocation2 + $0x1f] sm:$0x1]  ;;  %v356_v46 = vadd.f32 %v4435_v33, %v5437_v57 }
 0x128   :  { %v616_v21 = vld [vmem:[#allocation2 + $0x1b] sm:$0x1]  ;;  %v618_v22 = vld [vmem:[#allocation2 + $0x1c] sm:$0x1]  ;;  %601 = vst [vmem:[#allocation3 + $0x62] sm:$0x1] %v600_v20 }
 0x129   :  { %617 = vst [vmem:[#allocation3 + $0x23] sm:$0x1] %v616_v21  ;;  %619 = vst [vmem:[#allocation3 + $0x2b] sm:$0x1] %v618_v22  ;;  %v620_v23 = vld [vmem:[#allocation2 + $0x1d] sm:$0x1] }
 0x12a   :  { %v622_v24 = vld [vmem:[#allocation2 + $0x1e] sm:$0x1]  ;;  %v648_v25 = vld [vmem:[#allocation2 + $0x1d] sm:$0x1]  ;;  %621 = vst [vmem:[#allocation3 + $0x33] sm:$0x1] %v620_v23 }
 0x12b   :  { %623 = vst [vmem:[#allocation3 + $0x3b] sm:$0x1] %v622_v24  ;;  %649 = vst [vmem:[#allocation3 + $0x24] sm:$0x1] %v648_v25  ;;  %v650_v26 = vld [vmem:[#allocation2 + $0x1e] sm:$0x1] }
 0x12c   :  { %v652_v27 = vld [vmem:[#allocation2 + $0x1f] sm:$0x1]  ;;  %v676_v28 = vld [vmem:[#allocation2 + $0x18] sm:$0x1]  ;;  %651 = vst [vmem:[#allocation3 + $0x2c] sm:$0x1] %v650_v26 }
 0x12d   :  { %653 = vst [vmem:[#allocation3 + $0x34] sm:$0x1] %v652_v27  ;;  %677 = vst [vmem:[#allocation3 + $0x15] sm:$0x1] %v676_v28  ;;  %v678_v29 = vld [vmem:[#allocation2 + $0x19] sm:$0x1] }
 0x12e   :  { %v680_v30 = vld [vmem:[#allocation2 + $0x1f] sm:$0x1]  ;;  %679 = vst [vmem:[#allocation3 + $0x1d] sm:$0x1] %v678_v29  ;;  %v4436_v34 = vpop.f32.mrb[12].mxu0  ;;  %v427_v56 = vmax.f32 %v356_v46, 0.0 }
 0x12f   :  { %681 = vst [vmem:[#allocation3 + $0x25] sm:$0x1] %v680_v30  ;;  %v642_v35 = vld [vmem:[#allocation2 + $0x15] sm:$0x1]  ;;  %v674_v36 = vld [vmem:[#allocation2 + $0x17] sm:$0x1] }
 0x130   :  { %v574_v37 = vld [vmem:[#allocation2 + $0x20] sm:$0x1]  ;;  %v604_v39 = vld [vmem:[#allocation2 + $0x21] sm:$0x1]  ;;  %643 = vst [vmem:[#allocation3 + $0xc] sm:$0x1] %v642_v35 }
 0x131   :  { %v602_v38 = vld [vmem:[#allocation2 + $0x20] sm:$0x1]  ;;  %675 = vst [vmem:[#allocation3 + $0xd] sm:$0x1] %v674_v36  ;;  %575 = vst [vmem:[#allocation3 + $0x79] sm:$0x1] %v574_v37 }
 0x132   :  { %603 = vst [vmem:[#allocation3 + $0x6a] sm:$0x1] %v602_v38  ;;  %605 = vst [vmem:[#allocation3 + $0x72] sm:$0x1] %v604_v39  ;;  %v606_v40 = vld [vmem:[#allocation2 + $0x22] sm:$0x1] }
 0x133   :  { %v624_v41 = vld [vmem:[#allocation2 + $0x24] sm:$0x1]  ;;  %v626_v42 = vld [vmem:[#allocation2 + $0x25] sm:$0x1]  ;;  %607 = vst [vmem:[#allocation3 + $0x7a] sm:$0x1] %v606_v40 }
 0x134   :  { %625 = vst [vmem:[#allocation3 + $0x43] sm:$0x1] %v624_v41  ;;  %627 = vst [vmem:[#allocation3 + $0x4b] sm:$0x1] %v626_v42  ;;  %v628_v43 = vld [vmem:[#allocation2 + $0x26] sm:$0x1] }
 0x135   :  { %v630_v44 = vld [vmem:[#allocation2 + $0x27] sm:$0x1]  ;;  %v654_v45 = vld [vmem:[#allocation2 + $0x20] sm:$0x1]  ;;  %629 = vst [vmem:[#allocation3 + $0x53] sm:$0x1] %v628_v43 }
 0x136   :  { %631 = vst [vmem:[#allocation3 + $0x5b] sm:$0x1] %v630_v44  ;;  %655 = vst [vmem:[#allocation3 + $0x3c] sm:$0x1] %v654_v45  ;;  %v656_v47 = vld [vmem:[#allocation2 + $0x26] sm:$0x1] }
 0x137   :  { %v658_v48 = vld [vmem:[#allocation2 + $0x27] sm:$0x1]  ;;  %v682_v49 = vld [vmem:[#allocation2 + $0x20] sm:$0x1]  ;;  %657 = vst [vmem:[#allocation3 + $0x44] sm:$0x1] %v656_v47 }
 0x138   :  { %659 = vst [vmem:[#allocation3 + $0x4c] sm:$0x1] %v658_v48  ;;  %683 = vst [vmem:[#allocation3 + $0x2d] sm:$0x1] %v682_v49  ;;  %v684_v50 = vld [vmem:[#allocation2 + $0x21] sm:$0x1] }
 0x139   :  { %v686_v51 = vld [vmem:[#allocation2 + $0x22] sm:$0x1]  ;;  %v704_v52 = vld [vmem:[#allocation2 + $0x24] sm:$0x1]  ;;  %685 = vst [vmem:[#allocation3 + $0x35] sm:$0x1] %v684_v50 }
 0x13a   :  { %687 = vst [vmem:[#allocation3 + $0x3d] sm:$0x1] %v686_v51  ;;  %705 = vst [vmem:[#allocation3 + $0x6] sm:$0x1] %v704_v52  ;;  %v708_v53 = vld [vmem:[#allocation2 + $0x26] sm:$0x1] }
 0x13b   :  { %v710_v54 = vld [vmem:[#allocation2 + $0x27] sm:$0x1]  ;;  %v736_v55 = vld [vmem:[#allocation2 + $0x26] sm:$0x1]  ;;  %709 = vst [vmem:[#allocation3 + $0x16] sm:$0x1] %v708_v53 }
 0x13c   :  { %711 = vst [vmem:[#allocation3 + $0x1e] sm:$0x1] %v710_v54  ;;  %737 = vst [vmem:[#allocation3 + $0x7] sm:$0x1] %v736_v55  ;;  %v4437_v58 = vpop.f32.mrb[13].mxu0  ;;  %v4951_v63 = vld [vmem:[%s6263_s3 + $0x1b0] sm:$0xff]  }
 0x13d   :  { %v706_v59 = vld [vmem:[#allocation2 + $0x25] sm:$0x1]  ;;  %v738_v60 = vld [vmem:[#allocation2 + $0x27] sm:$0x1]  ;;  %v4438_v61 = vadd.f32 %v4437_v58, %v4436_v34  ;;  %v4439_v62 = vpop.f32.mrb[14].mxu0  ;;  %v4953_v0 = vld [vmem:[%s6263_s3 + $0x1f8] sm:$0xff]   ;;  %4581 = vmatpush3.bf16.msra.mxu0 %v4951_v63 }
 0x13e   :  { %707 = vst [vmem:[#allocation3 + $0xe] sm:$0x1] %v706_v59  ;;  %739 = vst [vmem:[#allocation3 + $0xf] sm:$0x1] %v738_v60  ;;  %v4440_v1 = vpop.f32.mrb[15].mxu0  ;;  %v4955_v5 = vld [vmem:[%s6263_s3 + $0x1b8] sm:$0xff]   ;;  %4582 = vmatprep.subr.bf16.mxu0 %v4953_v0 }
 0x13f   :  { %448 = vst [vmem:[#allocation2 + $0x28] sm:$0xff] %v427_v56  ;;  %v361_v2 = vadd.f32 %v4438_v61, %v5437_v57  ;;  %v4441_v3 = vadd.f32 %v4440_v1, %v4439_v62  ;;  %v4442_v4 = vpop.f32.mrb[16].mxu0  ;;  %v4957_v7 = vld [vmem:[%s6263_s3 + $0x2c0] sm:$0xff]  }
 0x140   :  { %v4443_v6 = vpop.f32.mrb[17].mxu0 }
 0x141   :  { %v428_v8 = vmax.f32 %v361_v2, 0.0  ;;  %v364_v9 = vadd.f32 %v4441_v3, %v5437_v57  ;;  %v5492_v10 = vadd.f32 %v4443_v6, %v4442_v4  ;;  %v4445_v11 = vpop.f32.mrb[18].mxu0  ;;  %4583 = vmatpush3.bf16.msra.mxu0 %v4955_v5 }
 0x142   :  { %v4446_v12 = vpop.f32.mrb[19].mxu0  ;;  %4624 = vmatprep.subr.bf16.mxu0 %v4957_v7 }
 0x143   :  { %449 = vst [vmem:[#allocation2 + $0x30] sm:$0xff] %v428_v8  ;;  %v429_v13 = vmax.f32 %v364_v9, 0.0  ;;  %v4448_v14 = vpop.f32.mrb[20].mxu0  ;;  %v369_v56 = vadd.f32 %v5492_v10, %v5437_v57 }
 0x144   :  { %v4449_v15 = vpop.f32.mrb[21].mxu0 }
 0x145   :  { %450 = vst [vmem:[#allocation2 + $0x38] sm:$0xff] %v429_v13  ;;  %v5494_v19 = vadd.f32 %v4449_v15, %v4448_v14  ;;  %v430_v4 = vmax.f32 %v369_v56, 0.0  ;;  %v4451_v6 = vpop.f32.mrb[22].mxu0 }
 0x146   :  { %v632_v16 = vld [vmem:[#allocation2 + $0x2d] sm:$0x1]  ;;  %v634_v17 = vld [vmem:[#allocation2 + $0x2e] sm:$0x1]  ;;  %v636_v18 = vld [vmem:[#allocation2 + $0x2f] sm:$0x1] }
 0x147   :  { %633 = vst [vmem:[#allocation3 + $0x63] sm:$0x1] %v632_v16  ;;  %635 = vst [vmem:[#allocation3 + $0x6b] sm:$0x1] %v634_v17  ;;  %v660_v20 = vld [vmem:[#allocation2 + $0x28] sm:$0x1]  ;;  %v377_v58 = vadd.f32 %v5494_v19, %v5437_v57 }
 0x148   :  { %637 = vst [vmem:[#allocation3 + $0x73] sm:$0x1] %v636_v18  ;;  %v662_v21 = vld [vmem:[#allocation2 + $0x29] sm:$0x1]  ;;  %v664_v22 = vld [vmem:[#allocation2 + $0x2f] sm:$0x1] }
 0x149   :  { %661 = vst [vmem:[#allocation3 + $0x54] sm:$0x1] %v660_v20  ;;  %663 = vst [vmem:[#allocation3 + $0x5c] sm:$0x1] %v662_v21  ;;  %v688_v23 = vld [vmem:[#allocation2 + $0x28] sm:$0x1] }
 0x14a   :  { %665 = vst [vmem:[#allocation3 + $0x64] sm:$0x1] %v664_v22  ;;  %v690_v24 = vld [vmem:[#allocation2 + $0x29] sm:$0x1]  ;;  %v692_v25 = vld [vmem:[#allocation2 + $0x2a] sm:$0x1] }
 0x14b   :  { %689 = vst [vmem:[#allocation3 + $0x45] sm:$0x1] %v688_v23  ;;  %691 = vst [vmem:[#allocation3 + $0x4d] sm:$0x1] %v690_v24  ;;  %v694_v26 = vld [vmem:[#allocation2 + $0x2b] sm:$0x1] }
 0x14c   :  { %693 = vst [vmem:[#allocation3 + $0x55] sm:$0x1] %v692_v25  ;;  %v712_v27 = vld [vmem:[#allocation2 + $0x2d] sm:$0x1]  ;;  %v714_v28 = vld [vmem:[#allocation2 + $0x2e] sm:$0x1] }
 0x14d   :  { %695 = vst [vmem:[#allocation3 + $0x5d] sm:$0x1] %v694_v26  ;;  %713 = vst [vmem:[#allocation3 + $0x26] sm:$0x1] %v712_v27  ;;  %v716_v29 = vld [vmem:[#allocation2 + $0x2f] sm:$0x1] }
 0x14e   :  { %715 = vst [vmem:[#allocation3 + $0x2e] sm:$0x1] %v714_v28  ;;  %v740_v30 = vld [vmem:[#allocation2 + $0x28] sm:$0x1]  ;;  %v742_v31 = vld [vmem:[#allocation2 + $0x29] sm:$0x1] }
 0x14f   :  { %717 = vst [vmem:[#allocation3 + $0x36] sm:$0x1] %v716_v29  ;;  %741 = vst [vmem:[#allocation3 + $0x17] sm:$0x1] %v740_v30  ;;  %v744_v32 = vld [vmem:[#allocation2 + $0x2f] sm:$0x1] }
 0x150   :  { %743 = vst [vmem:[#allocation3 + $0x1f] sm:$0x1] %v742_v31  ;;  %v768_v33 = vld [vmem:[#allocation2 + $0x28] sm:$0x1]  ;;  %v772_v34 = vld [vmem:[#allocation2 + $0x2a] sm:$0x1] }
 0x151   :  { %745 = vst [vmem:[#allocation3 + $0x27] sm:$0x1] %v744_v32  ;;  %769 = vst [vmem:[#allocation3 + $0x80] sm:$0x1] %v768_v33  ;;  %v774_v35 = vld [vmem:[#allocation2 + $0x2b] sm:$0x1] }
 0x152   :  { %773 = vst [vmem:[#allocation3 + $0x90] sm:$0x1] %v772_v34  ;;  %v638_v36 = vld [vmem:[#allocation2 + $0x30] sm:$0x1]  ;;  %775 = vst [vmem:[#allocation3 + $0x98] sm:$0x1] %v774_v35 }
 0x153   :  { %v666_v37 = vld [vmem:[#allocation2 + $0x30] sm:$0x1]  ;;  %639 = vst [vmem:[#allocation3 + $0x7b] sm:$0x1] %v638_v36  ;;  %v668_v38 = vld [vmem:[#allocation2 + $0x31] sm:$0x1] }
 0x154   :  { %667 = vst [vmem:[#allocation3 + $0x6c] sm:$0x1] %v666_v37  ;;  %v670_v39 = vld [vmem:[#allocation2 + $0x32] sm:$0x1]  ;;  %v696_v40 = vld [vmem:[#allocation2 + $0x31] sm:$0x1] }
 0x155   :  { %669 = vst [vmem:[#allocation3 + $0x74] sm:$0x1] %v668_v38  ;;  %671 = vst [vmem:[#allocation3 + $0x7c] sm:$0x1] %v670_v39  ;;  %v698_v41 = vld [vmem:[#allocation2 + $0x32] sm:$0x1] }
 0x156   :  { %697 = vst [vmem:[#allocation3 + $0x65] sm:$0x1] %v696_v40  ;;  %v700_v42 = vld [vmem:[#allocation2 + $0x33] sm:$0x1]  ;;  %v702_v43 = vld [vmem:[#allocation2 + $0x34] sm:$0x1] }
 0x157   :  { %699 = vst [vmem:[#allocation3 + $0x6d] sm:$0x1] %v698_v41  ;;  %701 = vst [vmem:[#allocation3 + $0x75] sm:$0x1] %v700_v42  ;;  %v718_v44 = vld [vmem:[#allocation2 + $0x30] sm:$0x1] }
 0x158   :  { %703 = vst [vmem:[#allocation3 + $0x7d] sm:$0x1] %v702_v43  ;;  %v720_v45 = vld [vmem:[#allocation2 + $0x36] sm:$0x1]  ;;  %v722_v46 = vld [vmem:[#allocation2 + $0x37] sm:$0x1] }
 0x159   :  { %719 = vst [vmem:[#allocation3 + $0x3e] sm:$0x1] %v718_v44  ;;  %721 = vst [vmem:[#allocation3 + $0x46] sm:$0x1] %v720_v45  ;;  %v746_v47 = vld [vmem:[#allocation2 + $0x30] sm:$0x1] }
 0x15a   :  { %723 = vst [vmem:[#allocation3 + $0x4e] sm:$0x1] %v722_v46  ;;  %v748_v48 = vld [vmem:[#allocation2 + $0x31] sm:$0x1]  ;;  %v750_v49 = vld [vmem:[#allocation2 + $0x32] sm:$0x1] }
 0x15b   :  { %747 = vst [vmem:[#allocation3 + $0x2f] sm:$0x1] %v746_v47  ;;  %749 = vst [vmem:[#allocation3 + $0x37] sm:$0x1] %v748_v48  ;;  %v776_v50 = vld [vmem:[#allocation2 + $0x31] sm:$0x1] }
 0x15c   :  { %751 = vst [vmem:[#allocation3 + $0x3f] sm:$0x1] %v750_v49  ;;  %v778_v51 = vld [vmem:[#allocation2 + $0x32] sm:$0x1]  ;;  %v780_v52 = vld [vmem:[#allocation2 + $0x33] sm:$0x1] }
 0x15d   :  { %777 = vst [vmem:[#allocation3 + $0xa0] sm:$0x1] %v776_v50  ;;  %779 = vst [vmem:[#allocation3 + $0xa8] sm:$0x1] %v778_v51  ;;  %v782_v53 = vld [vmem:[#allocation2 + $0x34] sm:$0x1] }
 0x15e   :  { %781 = vst [vmem:[#allocation3 + $0xb0] sm:$0x1] %v780_v52  ;;  %v724_v54 = vld [vmem:[#allocation2 + $0x38] sm:$0x1]  ;;  %v726_v55 = vld [vmem:[#allocation2 + $0x39] sm:$0x1] }
 0x15f   :  { %783 = vst [vmem:[#allocation3 + $0xb8] sm:$0x1] %v782_v53  ;;  %725 = vst [vmem:[#allocation3 + $0x56] sm:$0x1] %v724_v54  ;;  %v728_v59 = vld [vmem:[#allocation2 + $0x3f] sm:$0x1] }
 0x160   :  { %727 = vst [vmem:[#allocation3 + $0x5e] sm:$0x1] %v726_v55  ;;  %v752_v60 = vld [vmem:[#allocation2 + $0x38] sm:$0x1]  ;;  %v754_v61 = vld [vmem:[#allocation2 + $0x39] sm:$0x1] }
 0x161   :  { %729 = vst [vmem:[#allocation3 + $0x66] sm:$0x1] %v728_v59  ;;  %753 = vst [vmem:[#allocation3 + $0x47] sm:$0x1] %v752_v60  ;;  %v756_v62 = vld [vmem:[#allocation2 + $0x3a] sm:$0x1] }
 0x162   :  { %755 = vst [vmem:[#allocation3 + $0x4f] sm:$0x1] %v754_v61  ;;  %v758_v63 = vld [vmem:[#allocation2 + $0x3b] sm:$0x1]  ;;  %v784_v0 = vld [vmem:[#allocation2 + $0x3a] sm:$0x1] }
 0x163   :  { %757 = vst [vmem:[#allocation3 + $0x57] sm:$0x1] %v756_v62  ;;  %759 = vst [vmem:[#allocation3 + $0x5f] sm:$0x1] %v758_v63  ;;  %v786_v1 = vld [vmem:[#allocation2 + $0x3b] sm:$0x1] }
 0x164   :  { %785 = vst [vmem:[#allocation3 + $0xc0] sm:$0x1] %v784_v0  ;;  %v788_v2 = vld [vmem:[#allocation2 + $0x3c] sm:$0x1]  ;;  %v790_v3 = vld [vmem:[#allocation2 + $0x3d] sm:$0x1] }
 0x165   :  { %787 = vst [vmem:[#allocation3 + $0xc8] sm:$0x1] %v786_v1  ;;  %789 = vst [vmem:[#allocation3 + $0xd0] sm:$0x1] %v788_v2  ;;  %v432_v5 = vmax.f32 %v377_v58, 0.0  ;;  %v4452_v8 = vpop.f32.mrb[23].mxu0 }
 0x166   :  { %791 = vst [vmem:[#allocation3 + $0xd8] sm:$0x1] %v790_v3  ;;  %v770_v7 = vld [vmem:[#allocation2 + $0x29] sm:$0x1]  ;;  %451 = vst [vmem:[#allocation2 + $0x40] sm:$0xff] %v430_v4  ;;  %v4453_v9 = vadd.f32 %v4452_v8, %v4451_v6  ;;  %v4454_v10 = vpop.f32.mrb[24].mxu0 }
 0x167   :  { %771 = vst [vmem:[#allocation3 + $0x88] sm:$0x1] %v770_v7  ;;  %453 = vst [vmem:[#allocation2 + $0x50] sm:$0xff] %v432_v5  ;;  %v4455_v11 = vpop.f32.mrb[25].mxu0 }
 0x168   :  { %v380_v12 = vadd.f32 %v4453_v9, %v5437_v57  ;;  %v4456_v13 = vadd.f32 %v4455_v11, %v4454_v10  ;;  %v4457_v14 = vpop.f32.mrb[26].mxu0 }
 0x169   :  { %v4458_v15 = vpop.f32.mrb[27].mxu0 }
 0x16a   :  { %v433_v16 = vmax.f32 %v380_v12, 0.0  ;;  %v385_v17 = vadd.f32 %v4456_v13, %v5437_v57  ;;  %v5502_v18 = vadd.f32 %v4458_v15, %v4457_v14  ;;  %v4460_v19 = vpop.f32.mrb[28].mxu0 }
 0x16b   :  { %v4461_v20 = vpop.f32.mrb[29].mxu0 }
 0x16c   :  { %454 = vst [vmem:[#allocation2 + $0x58] sm:$0xff] %v433_v16  ;;  %v434_v21 = vmax.f32 %v385_v17, 0.0  ;;  %v5504_v22 = vadd.f32 %v4461_v20, %v4460_v19  ;;  %v5506_v23 = vpop.f32.mrb[30].mxu0  ;;  %v388_v61 = vadd.f32 %v5502_v18, %v5437_v57  ;;  %v5516_v18 = vld [vmem:[%s6264_s2] ss:$0 sm:$0xff] }
 0x16d   :  { %v730_v24 = vld [vmem:[#allocation2 + $0x40] sm:$0x1]  ;;  %v732_v25 = vld [vmem:[#allocation2 + $0x41] sm:$0x1]  ;;  %v734_v26 = vld [vmem:[#allocation2 + $0x42] sm:$0x1] }
 0x16e   :  { %731 = vst [vmem:[#allocation3 + $0x6e] sm:$0x1] %v730_v24  ;;  %733 = vst [vmem:[#allocation3 + $0x76] sm:$0x1] %v732_v25  ;;  %v760_v27 = vld [vmem:[#allocation2 + $0x41] sm:$0x1]  ;;  %v393_v62 = vadd.f32 %v5504_v22, %v5437_v57 }
 0x16f   :  { %735 = vst [vmem:[#allocation3 + $0x7e] sm:$0x1] %v734_v26  ;;  %v762_v28 = vld [vmem:[#allocation2 + $0x42] sm:$0x1]  ;;  %v764_v29 = vld [vmem:[#allocation2 + $0x43] sm:$0x1] }
 0x170   :  { %455 = vst [vmem:[#allocation2 + $0x60] sm:$0xff] %v434_v21  ;;  %761 = vst [vmem:[#allocation3 + $0x67] sm:$0x1] %v760_v27  ;;  %v766_v30 = vld [vmem:[#allocation2 + $0x44] sm:$0x1]  ;;  %v435_v8 = vmax.f32 %v388_v61, 0.0 }
 0x171   :  { %763 = vst [vmem:[#allocation3 + $0x6f] sm:$0x1] %v762_v28  ;;  %765 = vst [vmem:[#allocation3 + $0x77] sm:$0x1] %v764_v29  ;;  %v792_v31 = vld [vmem:[#allocation2 + $0x43] sm:$0x1] }
 0x172   :  { %v794_v32 = vld [vmem:[#allocation2 + $0x44] sm:$0x1]  ;;  %767 = vst [vmem:[#allocation3 + $0x7f] sm:$0x1] %v766_v30  ;;  %793 = vst [vmem:[#allocation3 + $0xe0] sm:$0x1] %v792_v31 }
 0x173   :  { %795 = vst [vmem:[#allocation3 + $0xe8] sm:$0x1] %v794_v32  ;;  %v796_v33 = vld [vmem:[#allocation2 + $0x45] sm:$0x1]  ;;  %v798_v34 = vld [vmem:[#allocation2 + $0x46] sm:$0x1] }
 0x174   :  { %v800_v35 = vld [vmem:[#allocation2 + $0x51] sm:$0x1]  ;;  %797 = vst [vmem:[#allocation3 + $0xf0] sm:$0x1] %v796_v33  ;;  %799 = vst [vmem:[#allocation3 + $0xf8] sm:$0x1] %v798_v34 }
 0x175   :  { %801 = vst [vmem:[#allocation3 + $0x81] sm:$0x1] %v800_v35  ;;  %v804_v36 = vld [vmem:[#allocation2 + $0x53] sm:$0x1]  ;;  %v806_v37 = vld [vmem:[#allocation2 + $0x54] sm:$0x1] }
 0x176   :  { %v832_v38 = vld [vmem:[#allocation2 + $0x53] sm:$0x1]  ;;  %805 = vst [vmem:[#allocation3 + $0x91] sm:$0x1] %v804_v36  ;;  %807 = vst [vmem:[#allocation3 + $0x99] sm:$0x1] %v806_v37 }
 0x177   :  { %833 = vst [vmem:[#allocation3 + $0x82] sm:$0x1] %v832_v38  ;;  %v836_v39 = vld [vmem:[#allocation2 + $0x55] sm:$0x1]  ;;  %v838_v40 = vld [vmem:[#allocation2 + $0x56] sm:$0x1] }
 0x178   :  { %v864_v41 = vld [vmem:[#allocation2 + $0x55] sm:$0x1]  ;;  %837 = vst [vmem:[#allocation3 + $0x92] sm:$0x1] %v836_v39  ;;  %839 = vst [vmem:[#allocation3 + $0x9a] sm:$0x1] %v838_v40 }
 0x179   :  { %865 = vst [vmem:[#allocation3 + $0x83] sm:$0x1] %v864_v41  ;;  %v868_v42 = vld [vmem:[#allocation2 + $0x57] sm:$0x1]  ;;  %v808_v43 = vld [vmem:[#allocation2 + $0x5a] sm:$0x1] }
 0x17a   :  { %v810_v44 = vld [vmem:[#allocation2 + $0x5b] sm:$0x1]  ;;  %869 = vst [vmem:[#allocation3 + $0x93] sm:$0x1] %v868_v42  ;;  %809 = vst [vmem:[#allocation3 + $0xa1] sm:$0x1] %v808_v43 }
 0x17b   :  { %811 = vst [vmem:[#allocation3 + $0xa9] sm:$0x1] %v810_v44  ;;  %v812_v45 = vld [vmem:[#allocation2 + $0x5c] sm:$0x1]  ;;  %v814_v46 = vld [vmem:[#allocation2 + $0x5d] sm:$0x1] }
 0x17c   :  { %v840_v47 = vld [vmem:[#allocation2 + $0x5c] sm:$0x1]  ;;  %813 = vst [vmem:[#allocation3 + $0xb1] sm:$0x1] %v812_v45  ;;  %815 = vst [vmem:[#allocation3 + $0xb9] sm:$0x1] %v814_v46 }
 0x17d   :  { %841 = vst [vmem:[#allocation3 + $0xa2] sm:$0x1] %v840_v47  ;;  %v842_v48 = vld [vmem:[#allocation2 + $0x5d] sm:$0x1]  ;;  %v844_v49 = vld [vmem:[#allocation2 + $0x5e] sm:$0x1] }
 0x17e   :  { %v846_v50 = vld [vmem:[#allocation2 + $0x5f] sm:$0x1]  ;;  %843 = vst [vmem:[#allocation3 + $0xaa] sm:$0x1] %v842_v48  ;;  %845 = vst [vmem:[#allocation3 + $0xb2] sm:$0x1] %v844_v49 }
 0x17f   :  { %847 = vst [vmem:[#allocation3 + $0xba] sm:$0x1] %v846_v50  ;;  %v870_v51 = vld [vmem:[#allocation2 + $0x58] sm:$0x1]  ;;  %v872_v52 = vld [vmem:[#allocation2 + $0x5e] sm:$0x1] }
 0x180   :  { %v874_v53 = vld [vmem:[#allocation2 + $0x5f] sm:$0x1]  ;;  %871 = vst [vmem:[#allocation3 + $0x9b] sm:$0x1] %v870_v51  ;;  %873 = vst [vmem:[#allocation3 + $0xa3] sm:$0x1] %v872_v52 }
 0x181   :  { %875 = vst [vmem:[#allocation3 + $0xab] sm:$0x1] %v874_v53  ;;  %v816_v54 = vld [vmem:[#allocation2 + $0x63] sm:$0x1]  ;;  %v818_v55 = vld [vmem:[#allocation2 + $0x64] sm:$0x1] }
 0x182   :  { %v820_v56 = vld [vmem:[#allocation2 + $0x65] sm:$0x1]  ;;  %817 = vst [vmem:[#allocation3 + $0xc1] sm:$0x1] %v816_v54  ;;  %819 = vst [vmem:[#allocation3 + $0xc9] sm:$0x1] %v818_v55 }
 0x183   :  { %821 = vst [vmem:[#allocation3 + $0xd1] sm:$0x1] %v820_v56  ;;  %v822_v58 = vld [vmem:[#allocation2 + $0x66] sm:$0x1]  ;;  %v848_v59 = vld [vmem:[#allocation2 + $0x65] sm:$0x1] }
 0x184   :  { %v850_v60 = vld [vmem:[#allocation2 + $0x66] sm:$0x1]  ;;  %823 = vst [vmem:[#allocation3 + $0xd9] sm:$0x1] %v822_v58  ;;  %849 = vst [vmem:[#allocation3 + $0xc2] sm:$0x1] %v848_v59 }
 0x185   :  { %851 = vst [vmem:[#allocation3 + $0xca] sm:$0x1] %v850_v60  ;;  %v852_v63 = vld [vmem:[#allocation2 + $0x67] sm:$0x1]  ;;  %v876_v0 = vld [vmem:[#allocation2 + $0x60] sm:$0x1] }
 0x186   :  { %v878_v1 = vld [vmem:[#allocation2 + $0x61] sm:$0x1]  ;;  %853 = vst [vmem:[#allocation3 + $0xd2] sm:$0x1] %v852_v63  ;;  %877 = vst [vmem:[#allocation3 + $0xb3] sm:$0x1] %v876_v0 }
 0x187   :  { %879 = vst [vmem:[#allocation3 + $0xbb] sm:$0x1] %v878_v1  ;;  %v880_v2 = vld [vmem:[#allocation2 + $0x67] sm:$0x1]  ;;  %v896_v3 = vld [vmem:[#allocation2 + $0x63] sm:$0x1] }
 0x188   :  { %v900_v4 = vld [vmem:[#allocation2 + $0x65] sm:$0x1]  ;;  %881 = vst [vmem:[#allocation3 + $0xc3] sm:$0x1] %v880_v2  ;;  %897 = vst [vmem:[#allocation3 + $0x84] sm:$0x1] %v896_v3 }
 0x189   :  { %901 = vst [vmem:[#allocation3 + $0x94] sm:$0x1] %v900_v4  ;;  %v902_v5 = vld [vmem:[#allocation2 + $0x66] sm:$0x1]  ;;  %v928_v6 = vld [vmem:[#allocation2 + $0x65] sm:$0x1] }
 0x18a   :  { %v932_v7 = vld [vmem:[#allocation2 + $0x67] sm:$0x1]  ;;  %903 = vst [vmem:[#allocation3 + $0x9c] sm:$0x1] %v902_v5  ;;  %929 = vst [vmem:[#allocation3 + $0x85] sm:$0x1] %v928_v6 }
 0x18b   :  { %933 = vst [vmem:[#allocation3 + $0x95] sm:$0x1] %v932_v7  ;;  %v960_v57 = vld [vmem:[#allocation2 + $0x67] sm:$0x1]  ;;  %v436_v9 = vmax.f32 %v393_v62, 0.0  ;;  %v4464_v10 = vpop.f32.mrb[31].mxu0 }
 0x18c   :  { %961 = vst [vmem:[#allocation3 + $0x86] sm:$0x1] %v960_v57  ;;  %v4465_v11 = vadd.f32 %v4464_v10, %v5506_v23  ;;  %v4466_v12 = vpop.f32.mrb[32].mxu0  ;;  %v802_v13 = vld [vmem:[#allocation2 + $0x52] sm:$0x1]  ;;  %456 = vst [vmem:[#allocation2 + $0x68] sm:$0xff] %v435_v8 }
 0x18d   :  { %v834_v14 = vld [vmem:[#allocation2 + $0x54] sm:$0x1]  ;;  %457 = vst [vmem:[#allocation2 + $0x70] sm:$0xff] %v436_v9  ;;  %v4467_v15 = vpop.f32.mrb[33].mxu0  ;;  %803 = vst [vmem:[#allocation3 + $0x89] sm:$0x1] %v802_v13 }
 0x18e   :  { %835 = vst [vmem:[#allocation3 + $0x8a] sm:$0x1] %v834_v14  ;;  %v866_v16 = vld [vmem:[#allocation2 + $0x56] sm:$0x1]  ;;  %v898_v17 = vld [vmem:[#allocation2 + $0x64] sm:$0x1]  ;;  %v396_v19 = vadd.f32 %v5516_v18, %v4465_v11  ;;  %v4468_v20 = vadd.f32 %v4467_v15, %v4466_v12 }
 0x18f   :  { %v4469_v21 = vpop.f32.mrb[34].mxu0  ;;  %867 = vst [vmem:[#allocation3 + $0x8b] sm:$0x1] %v866_v16  ;;  %899 = vst [vmem:[#allocation3 + $0x8c] sm:$0x1] %v898_v17 }
 0x190   :  { %v930_v22 = vld [vmem:[#allocation2 + $0x66] sm:$0x1]  ;;  %v4470_v23 = vpop.f32.mrb[35].mxu0  ;;  %v437_v24 = vmax.f32 %v396_v19, 0.0  ;;  %v401_v25 = vadd.f32 %v5516_v18, %v4468_v20 }
 0x191   :  { %931 = vst [vmem:[#allocation3 + $0x8d] sm:$0x1] %v930_v22  ;;  %v5520_v26 = vadd.f32 %v4470_v23, %v4469_v21  ;;  %v4472_v27 = vpop.f32.mrb[36].mxu0 }
 0x192   :  { %v4473_v28 = vpop.f32.mrb[37].mxu0  ;;  %458 = vst [vmem:[#allocation2 + $0x78] sm:$0xff] %v437_v24  ;;  %v438_v29 = vmax.f32 %v401_v25, 0.0 }
 0x193   :  { %v5522_v30 = vadd.f32 %v4473_v28, %v4472_v27  ;;  %v824_v31 = vld [vmem:[#allocation2 + $0x6c] sm:$0x1]  ;;  %v826_v32 = vld [vmem:[#allocation2 + $0x6d] sm:$0x1]  ;;  %v828_v33 = vld [vmem:[#allocation2 + $0x6e] sm:$0x1] }
 0x194   :  { %459 = vst [vmem:[#allocation2 + $0x80] sm:$0xff] %v438_v29  ;;  %825 = vst [vmem:[#allocation3 + $0xe1] sm:$0x1] %v824_v31  ;;  %v830_v34 = vld [vmem:[#allocation2 + $0x6f] sm:$0x1] }
 0x195   :  { %827 = vst [vmem:[#allocation3 + $0xe9] sm:$0x1] %v826_v32  ;;  %829 = vst [vmem:[#allocation3 + $0xf1] sm:$0x1] %v828_v33  ;;  %v854_v35 = vld [vmem:[#allocation2 + $0x68] sm:$0x1] }
 0x196   :  { %v856_v36 = vld [vmem:[#allocation2 + $0x6e] sm:$0x1]  ;;  %831 = vst [vmem:[#allocation3 + $0xf9] sm:$0x1] %v830_v34  ;;  %855 = vst [vmem:[#allocation3 + $0xda] sm:$0x1] %v854_v35 }
 0x197   :  { %857 = vst [vmem:[#allocation3 + $0xe2] sm:$0x1] %v856_v36  ;;  %v858_v37 = vld [vmem:[#allocation2 + $0x6f] sm:$0x1]  ;;  %v882_v38 = vld [vmem:[#allocation2 + $0x68] sm:$0x1] }
 0x198   :  { %v884_v39 = vld [vmem:[#allocation2 + $0x69] sm:$0x1]  ;;  %859 = vst [vmem:[#allocation3 + $0xea] sm:$0x1] %v858_v37  ;;  %883 = vst [vmem:[#allocation3 + $0xcb] sm:$0x1] %v882_v38 }
 0x199   :  { %885 = vst [vmem:[#allocation3 + $0xd3] sm:$0x1] %v884_v39  ;;  %v886_v40 = vld [vmem:[#allocation2 + $0x6a] sm:$0x1]  ;;  %v904_v41 = vld [vmem:[#allocation2 + $0x6c] sm:$0x1]  ;;  %v404_v39 = vadd.f32 %v5516_v18, %v5520_v26 }
 0x19a   :  { %v906_v42 = vld [vmem:[#allocation2 + $0x6d] sm:$0x1]  ;;  %887 = vst [vmem:[#allocation3 + $0xdb] sm:$0x1] %v886_v40  ;;  %905 = vst [vmem:[#allocation3 + $0xa4] sm:$0x1] %v904_v41  ;;  %v409_v40 = vadd.f32 %v5516_v18, %v5522_v30 }
 0x19b   :  { %907 = vst [vmem:[#allocation3 + $0xac] sm:$0x1] %v906_v42  ;;  %v908_v43 = vld [vmem:[#allocation2 + $0x6e] sm:$0x1]  ;;  %v910_v44 = vld [vmem:[#allocation2 + $0x6f] sm:$0x1] }
 0x19c   :  { %v934_v45 = vld [vmem:[#allocation2 + $0x68] sm:$0x1]  ;;  %909 = vst [vmem:[#allocation3 + $0xb4] sm:$0x1] %v908_v43  ;;  %911 = vst [vmem:[#allocation3 + $0xbc] sm:$0x1] %v910_v44 }
 0x19d   :  { %935 = vst [vmem:[#allocation3 + $0x9d] sm:$0x1] %v934_v45  ;;  %v936_v46 = vld [vmem:[#allocation2 + $0x6e] sm:$0x1]  ;;  %v938_v47 = vld [vmem:[#allocation2 + $0x6f] sm:$0x1] }
 0x19e   :  { %v964_v48 = vld [vmem:[#allocation2 + $0x69] sm:$0x1]  ;;  %937 = vst [vmem:[#allocation3 + $0xa5] sm:$0x1] %v936_v46  ;;  %939 = vst [vmem:[#allocation3 + $0xad] sm:$0x1] %v938_v47 }
 0x19f   :  { %965 = vst [vmem:[#allocation3 + $0x96] sm:$0x1] %v964_v48  ;;  %v966_v49 = vld [vmem:[#allocation2 + $0x6a] sm:$0x1]  ;;  %v860_v50 = vld [vmem:[#allocation2 + $0x70] sm:$0x1] }
 0x1a0   :  { %v862_v51 = vld [vmem:[#allocation2 + $0x71] sm:$0x1]  ;;  %967 = vst [vmem:[#allocation3 + $0x9e] sm:$0x1] %v966_v49  ;;  %861 = vst [vmem:[#allocation3 + $0xf2] sm:$0x1] %v860_v50 }
 0x1a1   :  { %863 = vst [vmem:[#allocation3 + $0xfa] sm:$0x1] %v862_v51  ;;  %v888_v52 = vld [vmem:[#allocation2 + $0x70] sm:$0x1]  ;;  %v890_v53 = vld [vmem:[#allocation2 + $0x71] sm:$0x1] }
 0x1a2   :  { %v892_v54 = vld [vmem:[#allocation2 + $0x72] sm:$0x1]  ;;  %889 = vst [vmem:[#allocation3 + $0xe3] sm:$0x1] %v888_v52  ;;  %891 = vst [vmem:[#allocation3 + $0xeb] sm:$0x1] %v890_v53 }
 0x1a3   :  { %893 = vst [vmem:[#allocation3 + $0xf3] sm:$0x1] %v892_v54  ;;  %v894_v55 = vld [vmem:[#allocation2 + $0x73] sm:$0x1]  ;;  %v912_v56 = vld [vmem:[#allocation2 + $0x75] sm:$0x1] }
 0x1a4   :  { %v914_v58 = vld [vmem:[#allocation2 + $0x76] sm:$0x1]  ;;  %895 = vst [vmem:[#allocation3 + $0xfb] sm:$0x1] %v894_v55  ;;  %913 = vst [vmem:[#allocation3 + $0xc4] sm:$0x1] %v912_v56 }
 0x1a5   :  { %915 = vst [vmem:[#allocation3 + $0xcc] sm:$0x1] %v914_v58  ;;  %v916_v59 = vld [vmem:[#allocation2 + $0x77] sm:$0x1]  ;;  %v940_v60 = vld [vmem:[#allocation2 + $0x70] sm:$0x1] }
 0x1a6   :  { %v942_v61 = vld [vmem:[#allocation2 + $0x71] sm:$0x1]  ;;  %917 = vst [vmem:[#allocation3 + $0xd4] sm:$0x1] %v916_v59  ;;  %941 = vst [vmem:[#allocation3 + $0xb5] sm:$0x1] %v940_v60 }
 0x1a7   :  { %943 = vst [vmem:[#allocation3 + $0xbd] sm:$0x1] %v942_v61  ;;  %v944_v62 = vld [vmem:[#allocation2 + $0x77] sm:$0x1]  ;;  %v968_v63 = vld [vmem:[#allocation2 + $0x70] sm:$0x1] }
 0x1a8   :  { %v970_v0 = vld [vmem:[#allocation2 + $0x71] sm:$0x1]  ;;  %945 = vst [vmem:[#allocation3 + $0xc5] sm:$0x1] %v944_v62  ;;  %969 = vst [vmem:[#allocation3 + $0xa6] sm:$0x1] %v968_v63 }
 0x1a9   :  { %971 = vst [vmem:[#allocation3 + $0xae] sm:$0x1] %v970_v0  ;;  %v972_v1 = vld [vmem:[#allocation2 + $0x72] sm:$0x1]  ;;  %v974_v2 = vld [vmem:[#allocation2 + $0x73] sm:$0x1] }
 0x1aa   :  { %v992_v3 = vld [vmem:[#allocation2 + $0x75] sm:$0x1]  ;;  %973 = vst [vmem:[#allocation3 + $0xb6] sm:$0x1] %v972_v1  ;;  %975 = vst [vmem:[#allocation3 + $0xbe] sm:$0x1] %v974_v2 }
 0x1ab   :  { %993 = vst [vmem:[#allocation3 + $0x87] sm:$0x1] %v992_v3  ;;  %v996_v4 = vld [vmem:[#allocation2 + $0x77] sm:$0x1]  ;;  %v918_v6 = vld [vmem:[#allocation2 + $0x78] sm:$0x1] }
 0x1ac   :  { %v1024_v5 = vld [vmem:[#allocation2 + $0x77] sm:$0x1]  ;;  %997 = vst [vmem:[#allocation3 + $0x97] sm:$0x1] %v996_v4  ;;  %919 = vst [vmem:[#allocation3 + $0xdc] sm:$0x1] %v918_v6 }
 0x1ad   :  { %1025 = vst [vmem:[#allocation3 + $0x100] sm:$0x1] %v1024_v5  ;;  %v920_v7 = vld [vmem:[#allocation2 + $0x7e] sm:$0x1]  ;;  %v922_v57 = vld [vmem:[#allocation2 + $0x7f] sm:$0x1] }
 0x1ae   :  { %v946_v8 = vld [vmem:[#allocation2 + $0x78] sm:$0x1]  ;;  %921 = vst [vmem:[#allocation3 + $0xe4] sm:$0x1] %v920_v7  ;;  %923 = vst [vmem:[#allocation3 + $0xec] sm:$0x1] %v922_v57 }
 0x1af   :  { %947 = vst [vmem:[#allocation3 + $0xcd] sm:$0x1] %v946_v8  ;;  %v948_v9 = vld [vmem:[#allocation2 + $0x79] sm:$0x1]  ;;  %v950_v10 = vld [vmem:[#allocation2 + $0x7a] sm:$0x1] }
 0x1b0   :  { %v976_v11 = vld [vmem:[#allocation2 + $0x79] sm:$0x1]  ;;  %949 = vst [vmem:[#allocation3 + $0xd5] sm:$0x1] %v948_v9  ;;  %951 = vst [vmem:[#allocation3 + $0xdd] sm:$0x1] %v950_v10 }
 0x1b1   :  { %977 = vst [vmem:[#allocation3 + $0xc6] sm:$0x1] %v976_v11  ;;  %v978_v12 = vld [vmem:[#allocation2 + $0x7a] sm:$0x1]  ;;  %v980_v13 = vld [vmem:[#allocation2 + $0x7b] sm:$0x1] }
 0x1b2   :  { %v982_v14 = vld [vmem:[#allocation2 + $0x7c] sm:$0x1]  ;;  %979 = vst [vmem:[#allocation3 + $0xce] sm:$0x1] %v978_v12  ;;  %981 = vst [vmem:[#allocation3 + $0xd6] sm:$0x1] %v980_v13 }
 0x1b3   :  { %983 = vst [vmem:[#allocation3 + $0xde] sm:$0x1] %v982_v14  ;;  %v998_v15 = vld [vmem:[#allocation2 + $0x78] sm:$0x1]  ;;  %v1000_v16 = vld [vmem:[#allocation2 + $0x7e] sm:$0x1] }
 0x1b4   :  { %v1002_v17 = vld [vmem:[#allocation2 + $0x7f] sm:$0x1]  ;;  %999 = vst [vmem:[#allocation3 + $0x9f] sm:$0x1] %v998_v15  ;;  %1001 = vst [vmem:[#allocation3 + $0xa7] sm:$0x1] %v1000_v16 }
 0x1b5   :  { %1003 = vst [vmem:[#allocation3 + $0xaf] sm:$0x1] %v1002_v17  ;;  %v1026_v19 = vld [vmem:[#allocation2 + $0x78] sm:$0x1]  ;;  %v1028_v20 = vld [vmem:[#allocation2 + $0x79] sm:$0x1] }
 0x1b6   :  { %v1030_v21 = vld [vmem:[#allocation2 + $0x7a] sm:$0x1]  ;;  %v1056_v22 = vld [vmem:[#allocation2 + $0x79] sm:$0x1]  ;;  %v1060_v24 = vld [vmem:[#allocation2 + $0x7b] sm:$0x1] }
 0x1b7   :  { %v1058_v23 = vld [vmem:[#allocation2 + $0x7a] sm:$0x1]  ;;  %1027 = vst [vmem:[#allocation3 + $0x108] sm:$0x1] %v1026_v19  ;;  %1029 = vst [vmem:[#allocation3 + $0x110] sm:$0x1] %v1028_v20 }
 0x1b8   :  { %1031 = vst [vmem:[#allocation3 + $0x118] sm:$0x1] %v1030_v21  ;;  %v1062_v25 = vld [vmem:[#allocation2 + $0x7c] sm:$0x1]  ;;  %1057 = vst [vmem:[#allocation3 + $0x101] sm:$0x1] %v1056_v22 }
 0x1b9   :  { %1059 = vst [vmem:[#allocation3 + $0x109] sm:$0x1] %v1058_v23  ;;  %1061 = vst [vmem:[#allocation3 + $0x111] sm:$0x1] %v1060_v24  ;;  %v924_v27 = vld [vmem:[#allocation2 + $0x80] sm:$0x1] }
 0x1ba   :  { %v926_v28 = vld [vmem:[#allocation2 + $0x81] sm:$0x1]  ;;  %1063 = vst [vmem:[#allocation3 + $0x119] sm:$0x1] %v1062_v25  ;;  %925 = vst [vmem:[#allocation3 + $0xf4] sm:$0x1] %v924_v27 }
 0x1bb   :  { %927 = vst [vmem:[#allocation3 + $0xfc] sm:$0x1] %v926_v28  ;;  %v952_v29 = vld [vmem:[#allocation2 + $0x80] sm:$0x1]  ;;  %v954_v31 = vld [vmem:[#allocation2 + $0x81] sm:$0x1] }
 0x1bc   :  { %v956_v32 = vld [vmem:[#allocation2 + $0x82] sm:$0x1]  ;;  %953 = vst [vmem:[#allocation3 + $0xe5] sm:$0x1] %v952_v29  ;;  %955 = vst [vmem:[#allocation3 + $0xed] sm:$0x1] %v954_v31 }
 0x1bd   :  { %957 = vst [vmem:[#allocation3 + $0xf5] sm:$0x1] %v956_v32  ;;  %v958_v33 = vld [vmem:[#allocation2 + $0x83] sm:$0x1]  ;;  %v984_v34 = vld [vmem:[#allocation2 + $0x82] sm:$0x1] }
 0x1be   :  { %v986_v35 = vld [vmem:[#allocation2 + $0x83] sm:$0x1]  ;;  %959 = vst [vmem:[#allocation3 + $0xfd] sm:$0x1] %v958_v33  ;;  %985 = vst [vmem:[#allocation3 + $0xe6] sm:$0x1] %v984_v34 }
 0x1bf   :  { %987 = vst [vmem:[#allocation3 + $0xee] sm:$0x1] %v986_v35  ;;  %v988_v36 = vld [vmem:[#allocation2 + $0x84] sm:$0x1]  ;;  %v990_v37 = vld [vmem:[#allocation2 + $0x85] sm:$0x1] }
 0x1c0   :  { %v1004_v38 = vld [vmem:[#allocation2 + $0x80] sm:$0x1]  ;;  %989 = vst [vmem:[#allocation3 + $0xf6] sm:$0x1] %v988_v36  ;;  %991 = vst [vmem:[#allocation3 + $0xfe] sm:$0x1] %v990_v37 }
 0x1c1   :  { %1005 = vst [vmem:[#allocation3 + $0xb7] sm:$0x1] %v1004_v38  ;;  %v1006_v41 = vld [vmem:[#allocation2 + $0x81] sm:$0x1]  ;;  %v1008_v42 = vld [vmem:[#allocation2 + $0x87] sm:$0x1] }
 0x1c2   :  { %v1032_v43 = vld [vmem:[#allocation2 + $0x80] sm:$0x1]  ;;  %1007 = vst [vmem:[#allocation3 + $0xbf] sm:$0x1] %v1006_v41  ;;  %1009 = vst [vmem:[#allocation3 + $0xc7] sm:$0x1] %v1008_v42 }
 0x1c3   :  { %v1034_v44 = vld [vmem:[#allocation2 + $0x81] sm:$0x1]  ;;  %v1036_v45 = vld [vmem:[#allocation2 + $0x82] sm:$0x1]  ;;  %v1038_v46 = vld [vmem:[#allocation2 + $0x83] sm:$0x1] }
 0x1c4   :  { %1033 = vst [vmem:[#allocation3 + $0x120] sm:$0x1] %v1032_v43  ;;  %v1064_v47 = vld [vmem:[#allocation2 + $0x82] sm:$0x1]  ;;  %v1066_v48 = vld [vmem:[#allocation2 + $0x83] sm:$0x1] }
 0x1c5   :  { %v1068_v49 = vld [vmem:[#allocation2 + $0x84] sm:$0x1]  ;;  %1035 = vst [vmem:[#allocation3 + $0x128] sm:$0x1] %v1034_v44  ;;  %1037 = vst [vmem:[#allocation3 + $0x130] sm:$0x1] %v1036_v45 }
 0x1c6   :  { %1039 = vst [vmem:[#allocation3 + $0x138] sm:$0x1] %v1038_v46  ;;  %v1070_v26 = vld [vmem:[#allocation2 + $0x85] sm:$0x1]  ;;  %1065 = vst [vmem:[#allocation3 + $0x121] sm:$0x1] %v1064_v47 }
 0x1c7   :  { %1067 = vst [vmem:[#allocation3 + $0x129] sm:$0x1] %v1066_v48  ;;  %1069 = vst [vmem:[#allocation3 + $0x131] sm:$0x1] %v1068_v49  ;;  %v439_v18 = vmax.f32 %v404_v39, 0.0  ;;  %v440_v30 = vmax.f32 %v409_v40, 0.0 }
 0x1c8   :  { %v962_v50 = vld [vmem:[#allocation2 + $0x68] sm:$0x1]  ;;  %1071 = vst [vmem:[#allocation3 + $0x139] sm:$0x1] %v1070_v26  ;;  %v994_v51 = vld [vmem:[#allocation2 + $0x76] sm:$0x1] }
 0x1c9   :  { %963 = vst [vmem:[#allocation3 + $0x8e] sm:$0x1] %v962_v50  ;;  %v4475_v52 = vpop.f32.mrb[38].mxu0  ;;  %460 = vst [vmem:[#allocation2 + $0x88] sm:$0xff] %v439_v18  ;;  %v1095_v54 = vld [vmem:[#allocation3 + $0x38] sm:$0xff]  ;;  %v1094_v55 = vld [vmem:[#allocation3 + $0x30] sm:$0xff] }
 0x1ca   :  { %461 = vst [vmem:[#allocation2 + $0x90] sm:$0xff] %v440_v30  ;;  %995 = vst [vmem:[#allocation3 + $0x8f] sm:$0x1] %v994_v51  ;;  %v4476_v53 = vpop.f32.mrb[39].mxu0  ;;  %v1110_v56 = vld [vmem:[#allocation3 + $0xb0] sm:$0xff]  ;;  %v1111_v58 = vld [vmem:[#allocation3 + $0xb8] sm:$0xff] }
 0x1cb   :  { %v1142_v59 = vpack.c.bf16 %v1110_v56, %v1094_v55  ;;  %v1143_v60 = vpack.c.bf16 %v1111_v58, %v1095_v54  ;;  %v4959_v61 = vld [vmem:[%s6263_s3 + $0x280] sm:$0xff]   ;;  %v4961_v62 = vld [vmem:[%s6263_s3 + $0x2c8] sm:$0xff]   ;;  %v4965_v6 = vld [vmem:[%s6263_s3 + $0x2d0] sm:$0xff]  }
 0x1cc   :  { %v4963_v63 = vld [vmem:[%s6263_s3 + $0x288] sm:$0xff]   ;;  %v1121_v16 = vld [vmem:[#allocation3 + $0x108] sm:$0xff]  ;;  %v4969_v24 = vld [vmem:[%s6263_s3 + $0x2d8] sm:$0xff]  }
 0x1cd   :  { %2375 = vmatprep.mubr.bf16.mxu0 %v1143_v60  ;;  %v1104_v12 = vld [vmem:[#allocation3 + $0x80] sm:$0xff]  ;;  %v4967_v17 = vld [vmem:[%s6263_s3 + $0x290] sm:$0xff]   ;;  %v4950_v34 = vld [vmem:[%s6263_s3 + $0x80] sm:$0xff]   ;;  %v1153_v40 = vpack.c.bf16 %v1121_v16, %v1121_v16 }
 0x1ce   :  { %v5537_v1 = vld [vmem:[#allocation3 + $0x130] sm:$0xff]  ;;  %2376 = vmatmul.mubr.bf16.vlgmr.msra.gmra.mrb[44].mxu0 %v1142_v59  ;;  %v1088_v22 = vld [vmem:[#allocation3] sm:$0xff]  ;;  %v1089_v29 = vld [vmem:[#allocation3 + $0x8] sm:$0xff] }
 0x1cf   :  { %v1127_v0 = vld [vmem:[#allocation3 + $0x138] sm:$0xff]  ;;  %4625 = vmatpush3.bf16.msra.mxu0 %v4959_v61  ;;  %v1158_v23 = vpack.c.bf16 %v5537_v1, %v5537_v1  ;;  %v1136_v38 = vpack.c.bf16 %v1104_v12, %v1088_v22  ;;  %v4952_v41 = vld [vmem:[%s6263_s3 + $0xc8] sm:$0xff]   ;;  %v4971_v45 = vld [vmem:[%s6263_s3 + $0x298] sm:$0xff]  }
 0x1d0   :  { %v1010_v2 = vld [vmem:[#allocation2 + $0x88] sm:$0x1]  ;;  %v1012_v3 = vld [vmem:[#allocation2 + $0x89] sm:$0x1]  ;;  %v1014_v4 = vld [vmem:[#allocation2 + $0x8a] sm:$0x1]  ;;  %v1159_v5 = vpack.c.bf16 %v1127_v0, %v1127_v0  ;;  %4626 = vmatprep.subr.bf16.mxu0 %v4961_v62 }
 0x1d1   :  { %1011 = vst [vmem:[#allocation3 + $0xcf] sm:$0x1] %v1010_v2  ;;  %1013 = vst [vmem:[#allocation3 + $0xd7] sm:$0x1] %v1012_v3  ;;  %v1040_v7 = vld [vmem:[#allocation2 + $0x89] sm:$0x1] }
 0x1d2   :  { %1015 = vst [vmem:[#allocation3 + $0xdf] sm:$0x1] %v1014_v4  ;;  %v1042_v57 = vld [vmem:[#allocation2 + $0x8a] sm:$0x1]  ;;  %v1044_v8 = vld [vmem:[#allocation2 + $0x8b] sm:$0x1]  ;;  %2383 = vmatprep.mubr.bf16.mxu0 %v1159_v5 }
 0x1d3   :  { %v1046_v9 = vld [vmem:[#allocation2 + $0x8c] sm:$0x1]  ;;  %v1072_v10 = vld [vmem:[#allocation2 + $0x8b] sm:$0x1]  ;;  %1041 = vst [vmem:[#allocation3 + $0x140] sm:$0x1] %v1040_v7  ;;  %4627 = vmatpush3.bf16.msra.mxu0 %v4963_v63 }
 0x1d4   :  { %v1074_v11 = vld [vmem:[#allocation2 + $0x8c] sm:$0x1]  ;;  %1043 = vst [vmem:[#allocation3 + $0x148] sm:$0x1] %v1042_v57  ;;  %1045 = vst [vmem:[#allocation3 + $0x150] sm:$0x1] %v1044_v8  ;;  %4628 = vmatprep.subr.bf16.mxu0 %v4965_v6 }
 0x1d5   :  { %v1076_v13 = vld [vmem:[#allocation2 + $0x8d] sm:$0x1]  ;;  %v1078_v14 = vld [vmem:[#allocation2 + $0x8e] sm:$0x1]  ;;  %1047 = vst [vmem:[#allocation3 + $0x158] sm:$0x1] %v1046_v9 }
 0x1d6   :  { %1073 = vst [vmem:[#allocation3 + $0x141] sm:$0x1] %v1072_v10  ;;  %1075 = vst [vmem:[#allocation3 + $0x149] sm:$0x1] %v1074_v11  ;;  %v1016_v15 = vld [vmem:[#allocation2 + $0x90] sm:$0x1]  ;;  %2384 = vmatmul.mubr.bf16.gmra.mrb[48].mxu0 %v1158_v23 }
 0x1d7   :  { %1077 = vst [vmem:[#allocation3 + $0x151] sm:$0x1] %v1076_v13  ;;  %1079 = vst [vmem:[#allocation3 + $0x159] sm:$0x1] %v1078_v14  ;;  %v1018_v19 = vld [vmem:[#allocation2 + $0x91] sm:$0x1]  ;;  %4629 = vmatpush3.bf16.msra.mxu0 %v4967_v17 }
 0x1d8   :  { %1017 = vst [vmem:[#allocation3 + $0xe7] sm:$0x1] %v1016_v15  ;;  %v1020_v20 = vld [vmem:[#allocation2 + $0x92] sm:$0x1]  ;;  %v1022_v21 = vld [vmem:[#allocation2 + $0x93] sm:$0x1]  ;;  %4630 = vmatprep.subr.bf16.mxu0 %v4969_v24 }
 0x1d9   :  { %1019 = vst [vmem:[#allocation3 + $0xef] sm:$0x1] %v1018_v19  ;;  %1021 = vst [vmem:[#allocation3 + $0xf7] sm:$0x1] %v1020_v20  ;;  %v1048_v25 = vld [vmem:[#allocation2 + $0x92] sm:$0x1] }
 0x1da   :  { %1023 = vst [vmem:[#allocation3 + $0xff] sm:$0x1] %v1022_v21  ;;  %v1050_v27 = vld [vmem:[#allocation2 + $0x93] sm:$0x1]  ;;  %v1052_v28 = vld [vmem:[#allocation2 + $0x94] sm:$0x1] }
 0x1db   :  { %v1054_v31 = vld [vmem:[#allocation2 + $0x95] sm:$0x1]  ;;  %v1080_v32 = vld [vmem:[#allocation2 + $0x94] sm:$0x1]  ;;  %1049 = vst [vmem:[#allocation3 + $0x160] sm:$0x1] %v1048_v25  ;;  %4631 = vmatpush3.bf16.msra.mxu0 %v4971_v45 }
 0x1dc   :  { %v1082_v33 = vld [vmem:[#allocation2 + $0x95] sm:$0x1]  ;;  %1051 = vst [vmem:[#allocation3 + $0x168] sm:$0x1] %v1050_v27  ;;  %1053 = vst [vmem:[#allocation3 + $0x170] sm:$0x1] %v1052_v28 }
 0x1dd   :  { %v1084_v35 = vld [vmem:[#allocation2 + $0x96] sm:$0x1]  ;;  %v1086_v36 = vld [vmem:[#allocation2 + $0x97] sm:$0x1]  ;;  %1055 = vst [vmem:[#allocation3 + $0x178] sm:$0x1] %v1054_v31 }
 0x1de   :  { %1081 = vst [vmem:[#allocation3 + $0x161] sm:$0x1] %v1080_v32  ;;  %1083 = vst [vmem:[#allocation3 + $0x169] sm:$0x1] %v1082_v33  ;;  %v1105_v37 = vld [vmem:[#allocation3 + $0x88] sm:$0xff]  ;;  %v1099_v42 = vld [vmem:[#allocation3 + $0x58] sm:$0xff] }
 0x1df   :  { %1085 = vst [vmem:[#allocation3 + $0x171] sm:$0x1] %v1084_v35  ;;  %1087 = vst [vmem:[#allocation3 + $0x179] sm:$0x1] %v1086_v36  ;;  %v1137_v39 = vpack.c.bf16 %v1105_v37, %v1089_v29  ;;  %v1115_v43 = vld [vmem:[#allocation3 + $0xd8] sm:$0xff]  ;;  %v4954_v47 = vld [vmem:[%s6263_s3 + $0x88] sm:$0xff]  }
 0x1e0   :  { %v1147_v44 = vpack.c.bf16 %v1115_v43, %v1099_v42  ;;  %v4973_v46 = vld [vmem:[%s6263_s3 + $0x2e0] sm:$0xff]   ;;  %v4956_v48 = vld [vmem:[%s6263_s3 + $0xd0] sm:$0xff]   ;;  %v4977_v26 = vld [vmem:[%s6263_s3 + $0x2e8] sm:$0xff]  }
 0x1e1   :  { %2231 = vmatprep.mubr.bf16.mxu1 %v1137_v39  ;;  %v4975_v49 = vld [vmem:[%s6263_s3 + $0x2a0] sm:$0xff]   ;;  %v1120_v18 = vld [vmem:[#allocation3 + $0x100] sm:$0xff]  ;;  %v4958_v30 = vld [vmem:[%s6263_s3 + $0x90] sm:$0xff]   ;;  %4632 = vmatprep.subr.bf16.mxu0 %v4973_v46 }
 0x1e2   :  { %2232 = vmatmul.mubr.bf16.vlgmr.msra.gmra.mrb[0].mxu1 %v1136_v38  ;;  %2471 = vmatprep.mubr.bf16.mxu0 %v1147_v44  ;;  %v1107_v50 = vld [vmem:[#allocation3 + $0x98] sm:$0xff]  ;;  %v4960_v51 = vld [vmem:[%s6263_s3 + $0xd8] sm:$0xff]   ;;  %v1152_v53 = vpack.c.bf16 %v1120_v18, %v1120_v18  ;;  %v4979_v54 = vld [vmem:[%s6263_s3 + $0x2a8] sm:$0xff]  }
 0x1e3   :  { %4513 = vmatpush3.bf16.msra.mxu1 %v4950_v34  ;;  %2239 = vmatprep.mubr.bf16.mxu1 %v1153_v40  ;;  %v1091_v52 = vld [vmem:[#allocation3 + $0x18] sm:$0xff]  ;;  %v4981_v56 = vld [vmem:[%s6263_s3 + $0x2f0] sm:$0xff]   ;;  %v4962_v58 = vld [vmem:[%s6263_s3 + $0x98] sm:$0xff]  }
 0x1e4   :  { %4514 = vmatprep.subr.bf16.mxu1 %v4952_v41  ;;  %4633 = vmatpush3.bf16.msra.mxu0 %v4975_v49  ;;  %v1139_v55 = vpack.c.bf16 %v1107_v50, %v1091_v52  ;;  %v4964_v59 = vld [vmem:[%s6263_s3 + $0xe0] sm:$0xff]   ;;  %v4983_v60 = vld [vmem:[%s6263_s3 + $0x2b0] sm:$0xff]   ;;  %v4985_v62 = vld [vmem:[%s6263_s3 + $0x2f8] sm:$0xff]  }
 0x1e5   :  { %4634 = vmatprep.subr.bf16.mxu0 %v4977_v26  ;;  %v4966_v61 = vld [vmem:[%s6263_s3 + $0xa0] sm:$0xff]   ;;  %v4968_v63 = vld [vmem:[%s6263_s3 + $0xe8] sm:$0xff]   ;;  %v4987_v0 = vld [vmem:[%s6263_s3 + $0x2b8] sm:$0xff]  }
 0x1e6   :  { %v4989_v1 = vld [vmem:[%s6263_s3 + $0x3c0] sm:$0xff]   ;;  %v4970_v2 = vld [vmem:[%s6263_s3 + $0xa8] sm:$0xff]   ;;  %v1114_v3 = vld [vmem:[#allocation3 + $0xd0] sm:$0xff] }
 0x1e7   :  { %4515 = vmatpush3.bf16.msra.mxu1 %v4954_v47  ;;  %v4972_v4 = vld [vmem:[%s6263_s3 + $0xf0] sm:$0xff]   ;;  %v1131_v5 = vld [vmem:[#allocation3 + $0x158] sm:$0xff]  ;;  %v1098_v6 = vld [vmem:[#allocation3 + $0x50] sm:$0xff] }
 0x1e8   :  { %4516 = vmatprep.subr.bf16.mxu1 %v4956_v48  ;;  %4635 = vmatpush3.bf16.msra.mxu0 %v4979_v54  ;;  %v4991_v7 = vld [vmem:[%s6263_s3 + $0x380] sm:$0xff]   ;;  %v1146_v57 = vpack.c.bf16 %v1114_v3, %v1098_v6  ;;  %v4993_v8 = vld [vmem:[%s6263_s3 + $0x3c8] sm:$0xff]   ;;  %v1163_v9 = vpack.c.bf16 %v1131_v5, %v1131_v5  ;;  %v4974_v10 = vld [vmem:[%s6263_s3 + $0xb0] sm:$0xff]  }
 0x1e9   :  { %4636 = vmatprep.subr.bf16.mxu0 %v4981_v56  ;;  %v4976_v11 = vld [vmem:[%s6263_s3 + $0xf8] sm:$0xff]   ;;  %v4995_v12 = vld [vmem:[%s6263_s3 + $0x388] sm:$0xff]   ;;  %v4997_v15 = vld [vmem:[%s6263_s3 + $0x3d0] sm:$0xff]  }
 0x1ea   :  { %2240 = vmatmul.mubr.bf16.gmra.mrb[4].mxu1 %v1152_v53  ;;  %v1130_v13 = vld [vmem:[#allocation3 + $0x150] sm:$0xff]  ;;  %v4980_v16 = vld [vmem:[%s6263_s3 + $0x140] sm:$0xff]   ;;  %v4999_v20 = vld [vmem:[%s6263_s3 + $0x390] sm:$0xff]  }
 0x1eb   :  { %4517 = vmatpush3.bf16.msra.mxu1 %v4958_v30  ;;  %2279 = vmatprep.mubr.bf16.mxu1 %v1139_v55  ;;  %v4978_v14 = vld [vmem:[%s6263_s3 + $0xb8] sm:$0xff]   ;;  %v1162_v19 = vpack.c.bf16 %v1130_v13, %v1130_v13  ;;  %v1123_v21 = vld [vmem:[#allocation3 + $0x118] sm:$0xff]  ;;  %v4984_v28 = vld [vmem:[%s6263_s3 + $0x148] sm:$0xff]  }
 0x1ec   :  { %4518 = vmatprep.subr.bf16.mxu1 %v4960_v51  ;;  %4637 = vmatpush3.bf16.msra.mxu0 %v4983_v60  ;;  %v1106_v17 = vld [vmem:[#allocation3 + $0x90] sm:$0xff]  ;;  %v1119_v22 = vld [vmem:[#allocation3 + $0xf8] sm:$0xff]  ;;  %v1155_v33 = vpack.c.bf16 %v1123_v21, %v1123_v21  ;;  %v4986_v35 = vld [vmem:[%s6263_s3 + $0x108] sm:$0xff]  }
 0x1ed   :  { %4638 = vmatprep.subr.bf16.mxu0 %v4985_v62  ;;  %v1090_v23 = vld [vmem:[#allocation3 + $0x10] sm:$0xff]  ;;  %v4982_v24 = vld [vmem:[%s6263_s3 + $0x100] sm:$0xff]   ;;  %v4988_v37 = vld [vmem:[%s6263_s3 + $0x150] sm:$0xff]  }
 0x1ee   :  { %v5001_v25 = vld [vmem:[%s6263_s3 + $0x3d8] sm:$0xff]   ;;  %v1103_v27 = vld [vmem:[#allocation3 + $0x78] sm:$0xff]  ;;  %v1138_v31 = vpack.c.bf16 %v1106_v17, %v1090_v23  ;;  %v4990_v39 = vld [vmem:[%s6263_s3 + $0x110] sm:$0xff]  }
 0x1ef   :  { %4519 = vmatpush3.bf16.msra.mxu1 %v4962_v58  ;;  %v1151_v29 = vpack.c.bf16 %v1119_v22, %v1103_v27  ;;  %v5003_v32 = vld [vmem:[%s6263_s3 + $0x398] sm:$0xff]   ;;  %v5005_v34 = vld [vmem:[%s6263_s3 + $0x3e0] sm:$0xff]   ;;  %v5009_v40 = vld [vmem:[%s6263_s3 + $0x3e8] sm:$0xff]  }
 0x1f0   :  { %4520 = vmatprep.subr.bf16.mxu1 %v4964_v59  ;;  %4639 = vmatpush3.bf16.msra.mxu0 %v4987_v0  ;;  %v1122_v36 = vld [vmem:[#allocation3 + $0x110] sm:$0xff]  ;;  %v5007_v38 = vld [vmem:[%s6263_s3 + $0x3a0] sm:$0xff]   ;;  %v1093_v41 = vld [vmem:[#allocation3 + $0x28] sm:$0xff] }
 0x1f1   :  { %4680 = vmatprep.subr.bf16.mxu0 %v4989_v1  ;;  %v1109_v42 = vld [vmem:[#allocation3 + $0xa8] sm:$0xff]  ;;  %v4992_v43 = vld [vmem:[%s6263_s3 + $0x158] sm:$0xff]   ;;  %v1154_v44 = vpack.c.bf16 %v1122_v36, %v1122_v36  ;;  %v5011_v45 = vld [vmem:[%s6263_s3 + $0x3a8] sm:$0xff]  }
 0x1f2   :  { %v1141_v46 = vpack.c.bf16 %v1109_v42, %v1093_v41  ;;  %v5013_v47 = vld [vmem:[%s6263_s3 + $0x3f0] sm:$0xff]   ;;  %v4994_v48 = vld [vmem:[%s6263_s3 + $0x118] sm:$0xff]   ;;  %v4996_v49 = vld [vmem:[%s6263_s3 + $0x160] sm:$0xff]  }
 0x1f3   :  { %4521 = vmatpush3.bf16.msra.mxu1 %v4966_v61  ;;  %2472 = vmatmul.mubr.bf16.vlgmr.msra.gmra.mrb[52].mxu0 %v1146_v57  ;;  %v5015_v26 = vld [vmem:[%s6263_s3 + $0x3b0] sm:$0xff]   ;;  %v5017_v18 = vld [vmem:[%s6263_s3 + $0x3f8] sm:$0xff]   ;;  %v4998_v30 = vld [vmem:[%s6263_s3 + $0x120] sm:$0xff]  }
 0x1f4   :  { %4522 = vmatprep.subr.bf16.mxu1 %v4968_v63  ;;  %4681 = vmatpush3.bf16.msra.mxu0 %v4991_v7  ;;  %v5000_v50 = vld [vmem:[%s6263_s3 + $0x168] sm:$0xff]   ;;  %v5019_v51 = vld [vmem:[%s6263_s3 + $0x3b8] sm:$0xff]   ;;  %v1135_v52 = vld [vmem:[#allocation3 + $0x178] sm:$0xff] }
 0x1f5   :  { %4682 = vmatprep.subr.bf16.mxu0 %v4993_v8  ;;  %2479 = vmatprep.mubr.bf16.mxu0 %v1163_v9  ;;  %v1118_v53 = vld [vmem:[#allocation3 + $0xf0] sm:$0xff]  ;;  %v5002_v54 = vld [vmem:[%s6263_s3 + $0x128] sm:$0xff]   ;;  %v5004_v55 = vld [vmem:[%s6263_s3 + $0x170] sm:$0xff]   ;;  %v1167_v58 = vpack.c.bf16 %v1135_v52, %v1135_v52 }
 0x1f6   :  { %v1102_v56 = vld [vmem:[#allocation3 + $0x70] sm:$0xff]  ;;  %v5006_v60 = vld [vmem:[%s6263_s3 + $0x130] sm:$0xff]   ;;  %v5012_v1 = vld [vmem:[%s6263_s3 + $0x240] sm:$0xff]  }
 0x1f7   :  { %4523 = vmatpush3.bf16.msra.mxu1 %v4970_v2  ;;  %v1150_v59 = vpack.c.bf16 %v1118_v53, %v1102_v56  ;;  %v5008_v61 = vld [vmem:[%s6263_s3 + $0x178] sm:$0xff]   ;;  %v1125_v2 = vld [vmem:[#allocation3 + $0x128] sm:$0xff]  ;;  %v1108_v3 = vld [vmem:[#allocation3 + $0xa0] sm:$0xff] }
 0x1f8   :  { %4524 = vmatprep.subr.bf16.mxu1 %v4972_v4  ;;  %4683 = vmatpush3.bf16.msra.mxu0 %v4995_v12  ;;  %v1134_v62 = vld [vmem:[#allocation3 + $0x170] sm:$0xff]  ;;  %v1092_v4 = vld [vmem:[#allocation3 + $0x20] sm:$0xff]  ;;  %v1157_v5 = vpack.c.bf16 %v1125_v2, %v1125_v2  ;;  %v5014_v6 = vld [vmem:[%s6263_s3 + $0x200] sm:$0xff]  }
 0x1f9   :  { %4684 = vmatprep.subr.bf16.mxu0 %v4997_v15  ;;  %v5010_v63 = vld [vmem:[%s6263_s3 + $0x138] sm:$0xff]   ;;  %v1166_v0 = vpack.c.bf16 %v1134_v62, %v1134_v62  ;;  %v1140_v7 = vpack.c.bf16 %v1108_v3, %v1092_v4  ;;  %v5016_v57 = vld [vmem:[%s6263_s3 + $0x248] sm:$0xff]   ;;  %v5020_v9 = vld [vmem:[%s6263_s3 + $0x250] sm:$0xff]  }
 0x1fa   :  { %v5018_v8 = vld [vmem:[%s6263_s3 + $0x208] sm:$0xff]   ;;  %v5021_v12 = vld [vmem:[%s6263_s3 + $0x210] sm:$0xff]   ;;  %v5022_v15 = vld [vmem:[%s6263_s3 + $0x258] sm:$0xff]  }
 0x1fb   :  { %4525 = vmatpush3.bf16.msra.mxu1 %v4974_v10  ;;  %2480 = vmatmul.mubr.bf16.gmra.mrb[56].mxu0 %v1162_v19  ;;  %v1124_v10 = vld [vmem:[#allocation3 + $0x120] sm:$0xff]  ;;  %v5023_v17 = vld [vmem:[%s6263_s3 + $0x218] sm:$0xff]   ;;  %v5024_v19 = vld [vmem:[%s6263_s3 + $0x260] sm:$0xff]  }
 0x1fc   :  { %4526 = vmatprep.subr.bf16.mxu1 %v4976_v11  ;;  %4685 = vmatpush3.bf16.msra.mxu0 %v4999_v20  ;;  %v1113_v11 = vld [vmem:[#allocation3 + $0xc8] sm:$0xff]  ;;  %v1156_v13 = vpack.c.bf16 %v1124_v10, %v1124_v10  ;;  %v5025_v20 = vld [vmem:[%s6263_s3 + $0x220] sm:$0xff]   ;;  %v5026_v21 = vld [vmem:[%s6263_s3 + $0x268] sm:$0xff]  }
 0x1fd   :  { %2567 = vmatprep.mubr.bf16.mxu0 %v1151_v29  ;;  %4686 = vmatprep.subr.bf16.mxu0 %v5001_v25  ;;  %v5027_v22 = vld [vmem:[%s6263_s3 + $0x228] sm:$0xff]   ;;  %v5028_v23 = vld [vmem:[%s6263_s3 + $0x270] sm:$0xff]   ;;  %v5030_v25 = vld [vmem:[%s6263_s3 + $0x278] sm:$0xff]  }
 0x1fe   :  { %v5031_v27 = vld [vmem:[%s6263_s3 + $0x238] sm:$0xff]   ;;  %v5032_v29 = vld [vmem:[%s6263_s3 + $0x340] sm:$0xff]   ;;  %v1096_v36 = vld [vmem:[#allocation3 + $0x40] sm:$0xff] }
 0x1ff   :  { %4527 = vmatpush3.bf16.msra.mxu1 %v4978_v14  ;;  %v1097_v14 = vld [vmem:[#allocation3 + $0x48] sm:$0xff]  ;;  %v5035_v41 = vld [vmem:[%s6263_s3 + $0x308] sm:$0xff]   ;;  %v5050_v2 = vld [vmem:[%s6265_s5] sm:$0xff]  }
 0x200   :  { %4540 = vmatprep.subr.bf16.mxu1 %v4980_v16  ;;  %4687 = vmatpush3.bf16.msra.mxu0 %v5003_v32  ;;  %v1145_v16 = vpack.c.bf16 %v1113_v11, %v1097_v14  ;;  %v1112_v32 = vld [vmem:[#allocation3 + $0xc0] sm:$0xff]  ;;  %v5036_v42 = vld [vmem:[%s6263_s3 + $0x350] sm:$0xff]   ;;  %v5051_v3 = vld [vmem:[%s6265_s5 + $0x80] sm:$0xff]  }
 0x201   :  { %4688 = vmatprep.subr.bf16.mxu0 %v5005_v34  ;;  %v1129_v34 = vld [vmem:[#allocation3 + $0x148] sm:$0xff]  ;;  %v1116_v56 = vld [vmem:[#allocation3 + $0xe0] sm:$0xff] }
 0x202   :  { %2280 = vmatmul.mubr.bf16.vlgmr.msra.gmra.mrb[8].mxu1 %v1138_v31  ;;  %v5044_v52 = vld [vmem:[%s6263_s3 + $0x370] sm:$0xff]   ;;  %v1132_v62 = vld [vmem:[#allocation3 + $0x160] sm:$0xff] }
 0x203   :  { %2287 = vmatprep.mubr.bf16.mxu1 %v1155_v33  ;;  %4541 = vmatpush3.bf16.msra.mxu1 %v4982_v24  ;;  %v5029_v24 = vld [vmem:[%s6263_s3 + $0x230] sm:$0xff]  }
 0x204   :  { %4542 = vmatprep.subr.bf16.mxu1 %v4984_v28  ;;  %4689 = vmatpush3.bf16.msra.mxu0 %v5007_v38  ;;  %v4478_v28 = vpop.f32.mrb[40].mxu0  ;;  %v1144_v38 = vpack.c.bf16 %v1112_v32, %v1096_v36  ;;  %v5045_v53 = vld [vmem:[%s6263_s3 + $0x330] sm:$0xff]   ;;  %v5055_v32 = vld [vmem:[%s6265_s5 + $0x88] sm:$0xff]  }
 0x205   :  { %4690 = vmatprep.subr.bf16.mxu0 %v5009_v40  ;;  %v4479_v31 = vpop.f32.mrb[41].mxu0  ;;  %v1161_v40 = vpack.c.bf16 %v1129_v34, %v1129_v34  ;;  %v5053_v28 = vld [vmem:[%s6265_s5 + $0xc8] sm:$0xff]   ;;  %v5058_v36 = vld [vmem:[%s6265_s5 + $0x10] sm:$0xff]  }
 0x206   :  { %v4481_v33 = vpop.f32.mrb[42].mxu0  ;;  %v5054_v31 = vld [vmem:[%s6265_s5 + $0x8] sm:$0xff]  }
 0x207   :  { %4543 = vmatpush3.bf16.msra.mxu1 %v4986_v35  ;;  %v4482_v35 = vpop.f32.mrb[43].mxu0  ;;  %v5056_v33 = vld [vmem:[%s6265_s5 + $0x50] sm:$0xff]  }
 0x208   :  { %4544 = vmatprep.subr.bf16.mxu1 %v4988_v37  ;;  %4691 = vmatpush3.bf16.msra.mxu0 %v5011_v45  ;;  %v5033_v37 = vld [vmem:[%s6263_s3 + $0x300] sm:$0xff]   ;;  %v5037_v45 = vld [vmem:[%s6263_s3 + $0x310] sm:$0xff]  }
 0x209   :  { %4692 = vmatprep.subr.bf16.mxu0 %v5013_v47  ;;  %v1101_v47 = vld [vmem:[#allocation3 + $0x68] sm:$0xff] }
 0x20a   :  { %2288 = vmatmul.mubr.bf16.gmra.mrb[12].mxu1 %v1154_v44  ;;  %v1117_v44 = vld [vmem:[#allocation3 + $0xe8] sm:$0xff] }
 0x20b   :  { %4545 = vmatpush3.bf16.msra.mxu1 %v4990_v39  ;;  %2327 = vmatprep.mubr.bf16.mxu1 %v1141_v46  ;;  %v5034_v39 = vld [vmem:[%s6263_s3 + $0x348] sm:$0xff]   ;;  %v5057_v35 = vld [vmem:[%s6265_s5 + $0xd0] sm:$0xff]  }
 0x20c   :  { %4546 = vmatprep.subr.bf16.mxu1 %v4992_v43  ;;  %4693 = vmatpush3.bf16.msra.mxu0 %v5015_v26  ;;  %v1128_v43 = vld [vmem:[#allocation3 + $0x140] sm:$0xff]  ;;  %v5039_v26 = vld [vmem:[%s6263_s3 + $0x318] sm:$0xff]  }
 0x20d   :  { %4694 = vmatprep.subr.bf16.mxu0 %v5017_v18  ;;  %v1160_v46 = vpack.c.bf16 %v1128_v43, %v1128_v43  ;;  %v5040_v18 = vld [vmem:[%s6263_s3 + $0x360] sm:$0xff]   ;;  %v5061_v43 = vld [vmem:[%s6265_s5 + $0xd8] sm:$0xff]  }
 0x20f   :  { %4547 = vmatpush3.bf16.msra.mxu1 %v4994_v48  ;;  %v5038_v48 = vld [vmem:[%s6263_s3 + $0x358] sm:$0xff]  }
 0x210   :  { %4548 = vmatprep.subr.bf16.mxu1 %v4996_v49  ;;  %4695 = vmatpush3.bf16.msra.mxu0 %v5019_v51  ;;  %v1149_v49 = vpack.c.bf16 %v1117_v44, %v1101_v47  ;;  %v5043_v51 = vld [vmem:[%s6263_s3 + $0x328] sm:$0xff]   ;;  %v5062_v44 = vld [vmem:[%s6265_s5 + $0x18] sm:$0xff]   ;;  %v5065_v47 = vld [vmem:[%s6265_s5 + $0xe0] sm:$0xff]  }
 0x213   :  { %4549 = vmatpush3.bf16.msra.mxu1 %v4998_v30  ;;  %2568 = vmatmul.mubr.bf16.vlgmr.msra.gmra.mrb[60].mxu0 %v1150_v59  ;;  %v5041_v30 = vld [vmem:[%s6263_s3 + $0x320] sm:$0xff]   ;;  %v1100_v59 = vld [vmem:[#allocation3 + $0x60] sm:$0xff] }
 0x214   :  { %4550 = vmatprep.subr.bf16.mxu1 %v5000_v50  ;;  %2575 = vmatprep.mubr.bf16.mxu0 %v1167_v58  ;;  %v5042_v50 = vld [vmem:[%s6263_s3 + $0x368] sm:$0xff]   ;;  %v1133_v58 = vld [vmem:[#allocation3 + $0x168] sm:$0xff] }
 0x217   :  { %4551 = vmatpush3.bf16.msra.mxu1 %v5002_v54  ;;  %v5046_v54 = vld [vmem:[%s6263_s3 + $0x378] sm:$0xff]  }
 0x218   :  { %4552 = vmatprep.subr.bf16.mxu1 %v5004_v55  ;;  %v5047_v55 = vld [vmem:[%s6263_s3 + $0x338] sm:$0xff]  }
 0x21b   :  { %4553 = vmatpush3.bf16.msra.mxu1 %v5006_v60  ;;  %2576 = vmatmul.mubr.bf16.gmra.mrb[64].mxu0 %v1166_v0  ;;  %v1148_v60 = vpack.c.bf16 %v1116_v56, %v1100_v59  ;;  %v5048_v0 = vld [vmem:[%s6265_s5 + $0x40] sm:$0xff]  }
 0x21c   :  { %4554 = vmatprep.subr.bf16.mxu1 %v5008_v61  ;;  %v1165_v61 = vpack.c.bf16 %v1133_v58, %v1133_v58  ;;  %v5070_v58 = vld [vmem:[%s6265_s5 + $0x28] sm:$0xff]  }
 0x21f   :  { %4555 = vmatpush3.bf16.msra.mxu1 %v5010_v63  ;;  %v1164_v63 = vpack.c.bf16 %v1132_v62, %v1132_v62  ;;  %v5071_v62 = vld [vmem:[%s6265_s5 + $0xa8] sm:$0xff]  }
 0x220   :  { %4596 = vmatprep.subr.bf16.mxu1 %v5012_v1  ;;  %v5049_v1 = vld [vmem:[%s6265_s5 + $0xc0] sm:$0xff]  }
 0x221   :  { %4730 = vmatprep.subr.bf16.mxu0 %v5049_v1  ;;  %v5073_v1 = vld [vmem:[%s6265_s5 + $0xf0] sm:$0xff]  }
 0x222   :  { %2328 = vmatmul.mubr.bf16.vlgmr.msra.gmra.mrb[16].mxu1 %v1140_v7  ;;  %4731 = vmatpush3.bf16.msra.mxu0 %v5051_v3 }
 0x223   :  { %2335 = vmatprep.mubr.bf16.mxu1 %v1157_v5  ;;  %4597 = vmatpush3.bf16.msra.mxu1 %v5014_v6 }
 0x224   :  { %4598 = vmatprep.subr.bf16.mxu1 %v5016_v57  ;;  %4732 = vmatprep.subr.bf16.mxu0 %v5053_v28 }
 0x226   :  { %4733 = vmatpush3.bf16.msra.mxu0 %v5055_v32 }
 0x227   :  { %4599 = vmatpush3.bf16.msra.mxu1 %v5018_v8  ;;  %4734 = vmatprep.subr.bf16.mxu0 %v5057_v35 }
 0x228   :  { %4600 = vmatprep.subr.bf16.mxu1 %v5020_v9 }
 0x22a   :  { %2336 = vmatmul.mubr.bf16.gmra.mrb[20].mxu1 %v1156_v13 }
 0x22b   :  { %4601 = vmatpush3.bf16.msra.mxu1 %v5021_v12  ;;  %2423 = vmatprep.mubr.bf16.mxu1 %v1145_v16 }
 0x22c   :  { %4602 = vmatprep.subr.bf16.mxu1 %v5022_v15 }
 0x22f   :  { %4603 = vmatpush3.bf16.msra.mxu1 %v5023_v17 }
 0x230   :  { %4604 = vmatprep.subr.bf16.mxu1 %v5024_v19 }
 0x233   :  { %4605 = vmatpush3.bf16.msra.mxu1 %v5025_v20 }
 0x234   :  { %4606 = vmatprep.subr.bf16.mxu1 %v5026_v21 }
 0x237   :  { %4607 = vmatpush3.bf16.msra.mxu1 %v5027_v22 }
 0x238   :  { %4608 = vmatprep.subr.bf16.mxu1 %v5028_v23 }
 0x23b   :  { %4609 = vmatpush3.bf16.msra.mxu1 %v5029_v24 }
 0x23c   :  { %4610 = vmatprep.subr.bf16.mxu1 %v5030_v25 }
 0x23f   :  { %4611 = vmatpush3.bf16.msra.mxu1 %v5031_v27  ;;  %v5052_v27 = vld [vmem:[%s6265_s5 + $0x48] sm:$0xff]  }
 0x240   :  { %4652 = vmatprep.subr.bf16.mxu1 %v5032_v29 }
 0x242   :  { %2424 = vmatmul.mubr.bf16.vlgmr.msra.gmra.mrb[24].mxu1 %v1144_v38 }
 0x243   :  { %2431 = vmatprep.mubr.bf16.mxu1 %v1161_v40  ;;  %4653 = vmatpush3.bf16.msra.mxu1 %v5033_v37 }
 0x244   :  { %4654 = vmatprep.subr.bf16.mxu1 %v5034_v39  ;;  %v5059_v39 = vld [vmem:[%s6265_s5 + $0x90] sm:$0xff]  }
 0x245   :  { %4735 = vmatpush3.bf16.msra.mxu0 %v5059_v39 }
 0x246   :  { %4736 = vmatprep.subr.bf16.mxu0 %v5061_v43 }
 0x247   :  { %4655 = vmatpush3.bf16.msra.mxu1 %v5035_v41 }
 0x248   :  { %4656 = vmatprep.subr.bf16.mxu1 %v5036_v42  ;;  %v5060_v42 = vld [vmem:[%s6265_s5 + $0x58] sm:$0xff]  }
 0x24a   :  { %2432 = vmatmul.mubr.bf16.gmra.mrb[28].mxu1 %v1160_v46  ;;  %v5064_v46 = vld [vmem:[%s6265_s5 + $0x60] sm:$0xff]  }
 0x24b   :  { %4657 = vmatpush3.bf16.msra.mxu1 %v5037_v45  ;;  %2519 = vmatprep.mubr.bf16.mxu1 %v1149_v49  ;;  %v5063_v45 = vld [vmem:[%s6265_s5 + $0x98] sm:$0xff]  }
 0x24c   :  { %4658 = vmatprep.subr.bf16.mxu1 %v5038_v48  ;;  %4737 = vmatpush3.bf16.msra.mxu0 %v5063_v45 }
 0x24d   :  { %4738 = vmatprep.subr.bf16.mxu0 %v5065_v47 }
 0x24f   :  { %4659 = vmatpush3.bf16.msra.mxu1 %v5039_v26  ;;  %v4135_v26 = vld [vmem:[%s6266_s4] ss:$0 sm:$0xff] }
 0x250   :  { %4660 = vmatprep.subr.bf16.mxu1 %v5040_v18 }
 0x253   :  { %4661 = vmatpush3.bf16.msra.mxu1 %v5041_v30 }
 0x254   :  { %4662 = vmatprep.subr.bf16.mxu1 %v5042_v50  ;;  %v5066_v50 = vld [vmem:[%s6265_s5 + $0x20] sm:$0xff]  }
 0x257   :  { %4663 = vmatpush3.bf16.msra.mxu1 %v5043_v51  ;;  %v5067_v51 = vld [vmem:[%s6265_s5 + $0xa0] sm:$0xff]  }
 0x258   :  { %4664 = vmatprep.subr.bf16.mxu1 %v5044_v52  ;;  %4739 = vmatpush3.bf16.msra.mxu0 %v5067_v51 }
 0x25b   :  { %4665 = vmatpush3.bf16.msra.mxu1 %v5045_v53 }
 0x25c   :  { %4666 = vmatprep.subr.bf16.mxu1 %v5046_v54  ;;  %v5068_v54 = vld [vmem:[%s6265_s5 + $0x68] sm:$0xff]  }
 0x25f   :  { %4667 = vmatpush3.bf16.msra.mxu1 %v5047_v55  ;;  %v5069_v55 = vld [vmem:[%s6265_s5 + $0xe8] sm:$0xff]  }
 0x260   :  { %4708 = vmatprep.subr.bf16.mxu1 %v5048_v0  ;;  %v5072_v0 = vld [vmem:[%s6265_s5 + $0x70] sm:$0xff]   ;;  %4740 = vmatprep.subr.bf16.mxu0 %v5069_v55 }
 0x261   :  { %4741 = vmatpush3.bf16.msra.mxu0 %v5071_v62 }
 0x262   :  { %2520 = vmatmul.mubr.bf16.vlgmr.msra.gmra.mrb[32].mxu1 %v1148_v60  ;;  %4742 = vmatprep.subr.bf16.mxu0 %v5073_v1 }
 0x263   :  { %2527 = vmatprep.mubr.bf16.mxu1 %v1165_v61  ;;  %4709 = vmatpush3.bf16.msra.mxu1 %v5050_v2 }
 0x264   :  { %4710 = vmatprep.subr.bf16.mxu1 %v5052_v27 }
 0x267   :  { %4711 = vmatpush3.bf16.msra.mxu1 %v5054_v31 }
 0x268   :  { %4712 = vmatprep.subr.bf16.mxu1 %v5056_v33 }
 0x26a   :  { %2528 = vmatmul.mubr.bf16.gmra.mrb[36].mxu1 %v1164_v63 }
 0x26b   :  { %4713 = vmatpush3.bf16.msra.mxu1 %v5058_v36 }
 0x26c   :  { %4714 = vmatprep.subr.bf16.mxu1 %v5060_v42 }
 0x26f   :  { %4715 = vmatpush3.bf16.msra.mxu1 %v5062_v44 }
 0x270   :  { %4716 = vmatprep.subr.bf16.mxu1 %v5064_v46 }
 0x273   :  { %4717 = vmatpush3.bf16.msra.mxu1 %v5066_v50 }
 0x274   :  { %4718 = vmatprep.subr.bf16.mxu1 %v5068_v54 }
 0x277   :  { %4719 = vmatpush3.bf16.msra.mxu1 %v5070_v58 }
 0x278   :  { %4720 = vmatprep.subr.bf16.mxu1 %v5072_v0 }
 0x2a1   :  { %v4584_v4 = vpop.f32.mrb[44].mxu0 }
 0x2a2   :  { %v4585_v5 = vpop.f32.mrb[45].mxu0 }
 0x2a3   :  { %v5826_v6 = vadd.f32 %v4585_v5, %v4584_v4  ;;  %v4587_v7 = vpop.f32.mrb[46].mxu0 }
 0x2a4   :  { %v4588_v57 = vpop.f32.mrb[47].mxu0 }
 0x2a5   :  { %v5828_v8 = vadd.f32 %v4588_v57, %v4587_v7  ;;  %v5074_v7 = vld [vmem:[%s6265_s5 + $0x30] sm:$0xff]  }
 0x2a6   :  { %v5075_v57 = vld [vmem:[%s6265_s5 + $0xb0] sm:$0xff]   ;;  %4721 = vmatpush3.bf16.msra.mxu1 %v5074_v7 }
 0x2a7   :  { %4743 = vmatpush3.bf16.msra.mxu0 %v5075_v57 }
 0x2a9   :  { %v4590_v9 = vpop.f32.mrb[48].mxu0 }
 0x2aa   :  { %v4591_v10 = vpop.f32.mrb[49].mxu0 }
 0x2ab   :  { %v5830_v11 = vadd.f32 %v4591_v10, %v4590_v9  ;;  %v4593_v12 = vpop.f32.mrb[50].mxu0  ;;  %v5076_v9 = vld [vmem:[%s6265_s5 + $0x78] sm:$0xff]  }
 0x2ac   :  { %v4594_v14 = vpop.f32.mrb[51].mxu0  ;;  %v5077_v12 = vld [vmem:[%s6265_s5 + $0xf8] sm:$0xff]   ;;  %4722 = vmatprep.subr.bf16.mxu1 %v5076_v9 }
 0x2ad   :  { %v5078_v14 = vld [vmem:[%s6265_s5 + $0x38] sm:$0xff]   ;;  %4744 = vmatprep.subr.bf16.mxu0 %v5077_v12 }
 0x2ae   :  { %4723 = vmatpush3.bf16.msra.mxu1 %v5078_v14 }
 0x2b5   :  { %v4500_v13 = vpop.f32.mrb[0].mxu1 }
 0x2b6   :  { %v4501_v15 = vpop.f32.mrb[1].mxu1 }
 0x2b7   :  { %v4502_v16 = vadd.f32 %v4501_v15, %v4500_v13  ;;  %v4503_v17 = vpop.f32.mrb[2].mxu1 }
 0x2b8   :  { %v4504_v19 = vpop.f32.mrb[3].mxu1 }
 0x2b9   :  { %v5832_v20 = vadd.f32 %v4504_v19, %v4503_v17  ;;  %v2234_v59 = vadd.f32 %v4502_v16, %v4135_v26  ;;  %v5079_v19 = vld [vmem:[%s6265_s5 + $0xb8] sm:$0xff]  }
 0x2ba   :  { %4745 = vmatpush3.bf16.msra.mxu0 %v5079_v19 }
 0x2bb   :  { %v2237_v2 = vadd.f32 %v5832_v20, %v4135_v26  ;;  %v5080_v20 = vld [vmem:[%s6265_s5 + $0x140] sm:$0xff]  }
 0x2bc   :  { %4752 = vmatprep.subr.bf16.mxu1 %v5080_v20 }
 0x2bd   :  { %v4506_v21 = vpop.f32.mrb[4].mxu1 }
 0x2be   :  { %v4507_v22 = vpop.f32.mrb[5].mxu1 }
 0x2bf   :  { %v5834_v23 = vadd.f32 %v4507_v22, %v4506_v21  ;;  %v4509_v24 = vpop.f32.mrb[6].mxu1  ;;  %v5081_v22 = vld [vmem:[%s6265_s5 + $0x1c0] sm:$0xff]  }
 0x2c0   :  { %v4510_v25 = vpop.f32.mrb[7].mxu1  ;;  %4774 = vmatprep.subr.bf16.mxu0 %v5081_v22 }
 0x2c1   :  { %v2242_v15 = vadd.f32 %v5834_v23, %v4135_v26 }
 0x2c6   :  { %v4640_v29 = vpop.f32.mrb[52].mxu0 }
 0x2c7   :  { %v4641_v34 = vpop.f32.mrb[53].mxu0 }
 0x2c8   :  { %v5857_v37 = vadd.f32 %v4641_v34, %v4640_v29  ;;  %v4643_v38 = vpop.f32.mrb[54].mxu0 }
 0x2c9   :  { %v4644_v40 = vpop.f32.mrb[55].mxu0 }
 0x2ca   :  { %v5862_v41 = vadd.f32 %v4644_v40, %v4643_v38 }
 0x2ce   :  { %v4646_v48 = vpop.f32.mrb[56].mxu0 }
 0x2cf   :  { %v4647_v49 = vpop.f32.mrb[57].mxu0 }
 0x2d0   :  { %v5885_v18 = vadd.f32 %v4647_v49, %v4646_v48  ;;  %v4649_v30 = vpop.f32.mrb[58].mxu0 }
 0x2d1   :  { %v4650_v53 = vpop.f32.mrb[59].mxu0 }
 0x2d5   :  { %v4528_v52 = vpop.f32.mrb[8].mxu1 }
 0x2d6   :  { %v4529_v56 = vpop.f32.mrb[9].mxu1 }
 0x2d7   :  { %v4530_v60 = vadd.f32 %v4529_v56, %v4528_v52  ;;  %v4531_v61 = vpop.f32.mrb[10].mxu1 }
 0x2d8   :  { %v4532_v63 = vpop.f32.mrb[11].mxu1 }
 0x2d9   :  { %v2282_v3 = vadd.f32 %v4530_v60, %v2234_v59  ;;  %v4533_v4 = vadd.f32 %v4532_v63, %v4531_v61 }
 0x2db   :  { %v2285_v5 = vadd.f32 %v4533_v4, %v2237_v2 }
 0x2dd   :  { %v4534_v10 = vpop.f32.mrb[12].mxu1 }
 0x2de   :  { %v4535_v13 = vpop.f32.mrb[13].mxu1 }
 0x2df   :  { %v4536_v16 = vadd.f32 %v4535_v13, %v4534_v10  ;;  %v4537_v17 = vpop.f32.mrb[14].mxu1 }
 0x2e0   :  { %v4538_v21 = vpop.f32.mrb[15].mxu1 }
 0x2e1   :  { %v2290_v24 = vadd.f32 %v4536_v16, %v2242_v15 }
 0x2e6   :  { %v4696_v23 = vpop.f32.mrb[60].mxu0 }
 0x2e7   :  { %v4697_v25 = vpop.f32.mrb[61].mxu0 }
 0x2e8   :  { %v4698_v27 = vadd.f32 %v4697_v25, %v4696_v23  ;;  %v4699_v28 = vpop.f32.mrb[62].mxu0 }
 0x2e9   :  { %v4700_v29 = vpop.f32.mrb[63].mxu0 }
 0x2ea   :  { %v4701_v31 = vadd.f32 %v4700_v29, %v4699_v28 }
 0x2ee   :  { %v4702_v32 = vpop.f32.mrb[64].mxu0 }
 0x2ef   :  { %v4703_v33 = vpop.f32.mrb[65].mxu0 }
 0x2f0   :  { %v4704_v34 = vadd.f32 %v4703_v33, %v4702_v32  ;;  %v4705_v35 = vpop.f32.mrb[66].mxu0 }
 0x2f1   :  { %v4706_v38 = vpop.f32.mrb[67].mxu0 }
 0x2f5   :  { %v4556_v36 = vpop.f32.mrb[16].mxu1 }
 0x2f6   :  { %v4557_v39 = vpop.f32.mrb[17].mxu1 }
 0x2f7   :  { %v4558_v40 = vadd.f32 %v4557_v39, %v4556_v36  ;;  %v4559_v42 = vpop.f32.mrb[18].mxu1 }
 0x2f8   :  { %v4560_v43 = vpop.f32.mrb[19].mxu1 }
 0x2f9   :  { %v2330_v44 = vadd.f32 %v4558_v40, %v2282_v3  ;;  %v4561_v45 = vadd.f32 %v4560_v43, %v4559_v42 }
 0x2fb   :  { %v2333_v46 = vadd.f32 %v4561_v45, %v2285_v5  ;;  %v2378_v47 = vadd.f32 %v5826_v6, %v2330_v44 }
 0x2fd   :  { %v4562_v48 = vpop.f32.mrb[20].mxu1  ;;  %v2381_v49 = vadd.f32 %v5828_v8, %v2333_v46 }
 0x2fe   :  { %v4563_v26 = vpop.f32.mrb[21].mxu1 }
 0x2ff   :  { %v4564_v30 = vadd.f32 %v4563_v26, %v4562_v48  ;;  %v4565_v50 = vpop.f32.mrb[22].mxu1 }
 0x300   :  { %v4566_v51 = vpop.f32.mrb[23].mxu1 }
 0x301   :  { %v2338_v52 = vadd.f32 %v4564_v30, %v2290_v24 }
 0x303   :  { %v2386_v53 = vadd.f32 %v5830_v11, %v2338_v52  ;;  %v5082_v52 = vld [vmem:[%s6265_s5 + $0x100] sm:$0xff]  }
 0x315   :  { %v4612_v54 = vpop.f32.mrb[24].mxu1 }
 0x316   :  { %v4613_v55 = vpop.f32.mrb[25].mxu1 }
 0x317   :  { %v4614_v56 = vadd.f32 %v4613_v55, %v4612_v54  ;;  %v4615_v58 = vpop.f32.mrb[26].mxu1  ;;  %v5083_v55 = vld [vmem:[%s6265_s5 + $0x180] sm:$0xff]  }
 0x318   :  { %v4616_v59 = vpop.f32.mrb[27].mxu1 }
 0x319   :  { %v2426_v60 = vadd.f32 %v4614_v56, %v2378_v47  ;;  %v4617_v61 = vadd.f32 %v4616_v59, %v4615_v58  ;;  %v5084_v56 = vld [vmem:[%s6265_s5 + $0x148] sm:$0xff]  }
 0x31a   :  { %v5085_v58 = vld [vmem:[%s6265_s5 + $0x1c8] sm:$0xff]  }
 0x31b   :  { %v2429_v62 = vadd.f32 %v4617_v61, %v2381_v49  ;;  %v2474_v6 = vadd.f32 %v5857_v37, %v2426_v60  ;;  %v5086_v60 = vld [vmem:[%s6265_s5 + $0x108] sm:$0xff]  }
 0x31d   :  { %v4618_v63 = vpop.f32.mrb[28].mxu1  ;;  %v2477_v8 = vadd.f32 %v5862_v41, %v2429_v62  ;;  %v5087_v62 = vld [vmem:[%s6265_s5 + $0x188] sm:$0xff]  }
 0x31e   :  { %v4619_v0 = vpop.f32.mrb[29].mxu1 }
 0x31f   :  { %v4620_v1 = vadd.f32 %v4619_v0, %v4618_v63  ;;  %v4621_v2 = vpop.f32.mrb[30].mxu1  ;;  %v5088_v63 = vld [vmem:[%s6265_s5 + $0x150] sm:$0xff]  }
 0x320   :  { %v4622_v3 = vpop.f32.mrb[31].mxu1  ;;  %v5090_v0 = vld [vmem:[%s6265_s5 + $0x110] sm:$0xff]   ;;  %v5092_v2 = vld [vmem:[%s6265_s5 + $0x158] sm:$0xff]  }
 0x321   :  { %v2434_v4 = vadd.f32 %v4620_v1, %v2386_v53  ;;  %v5091_v1 = vld [vmem:[%s6265_s5 + $0x190] sm:$0xff]   ;;  %v5093_v3 = vld [vmem:[%s6265_s5 + $0x1d8] sm:$0xff]  }
 0x323   :  { %v2482_v11 = vadd.f32 %v5885_v18, %v2434_v4  ;;  %v5094_v4 = vld [vmem:[%s6265_s5 + $0x118] sm:$0xff]  }
 0x335   :  { %v4668_v5 = vpop.f32.mrb[32].mxu1 }
 0x336   :  { %v4669_v7 = vpop.f32.mrb[33].mxu1 }
 0x337   :  { %v4670_v57 = vadd.f32 %v4669_v7, %v4668_v5  ;;  %v4671_v9 = vpop.f32.mrb[34].mxu1  ;;  %v5096_v5 = vld [vmem:[%s6265_s5 + $0x160] sm:$0xff]  }
 0x338   :  { %v4672_v10 = vpop.f32.mrb[35].mxu1  ;;  %v5097_v7 = vld [vmem:[%s6265_s5 + $0x1e0] sm:$0xff]  }
 0x339   :  { %v2522_v12 = vadd.f32 %v4670_v57, %v2474_v6  ;;  %v4673_v13 = vadd.f32 %v4672_v10, %v4671_v9  ;;  %v5098_v57 = vld [vmem:[%s6265_s5 + $0x120] sm:$0xff]   ;;  %v5100_v10 = vld [vmem:[%s6265_s5 + $0x168] sm:$0xff]  }
 0x33a   :  { %v5099_v9 = vld [vmem:[%s6265_s5 + $0x1a0] sm:$0xff]  }
 0x33b   :  { %v2570_v14 = vadd.f32 %v4698_v27, %v2522_v12  ;;  %v2525_v15 = vadd.f32 %v4673_v13, %v2477_v8  ;;  %v5089_v8 = vld [vmem:[%s6265_s5 + $0x1d0] sm:$0xff]   ;;  %v5101_v12 = vld [vmem:[%s6265_s5 + $0x1e8] sm:$0xff]  }
 0x33c   :  { %v5102_v13 = vld [vmem:[%s6265_s5 + $0x128] sm:$0xff]  }
 0x33d   :  { %v2583_v37 = vmax.f32 %v2570_v14, 0.0  ;;  %v2573_v16 = vadd.f32 %v4701_v31, %v2525_v15  ;;  %v4674_v17 = vpop.f32.mrb[36].mxu1  ;;  %v5103_v14 = vld [vmem:[%s6265_s5 + $0x1a8] sm:$0xff]   ;;  %v5104_v15 = vld [vmem:[%s6265_s5 + $0x170] sm:$0xff]  }
 0x33e   :  { %v4675_v41 = vpop.f32.mrb[37].mxu1 }
 0x33f   :  { %2586 = vst [vmem:[#allocation4] sm:$0xff] %v2583_v37  ;;  %v2584_v19 = vmax.f32 %v2573_v16, 0.0  ;;  %v4676_v20 = vadd.f32 %v4675_v41, %v4674_v17  ;;  %v4677_v21 = vpop.f32.mrb[38].mxu1  ;;  %v5105_v37 = vld [vmem:[%s6265_s5 + $0x1f0] sm:$0xff]   ;;  %v5108_v41 = vld [vmem:[%s6265_s5 + $0x178] sm:$0xff]  }
 0x340   :  { %v4678_v22 = vpop.f32.mrb[39].mxu1  ;;  %v5106_v16 = vld [vmem:[%s6265_s5 + $0x130] sm:$0xff]   ;;  %v5111_v21 = vld [vmem:[%s6265_s5 + $0x1b8] sm:$0xff]  }
 0x341   :  { %2587 = vst [vmem:[#allocation4 + $0x8] sm:$0xff] %v2584_v19  ;;  %v2530_v18 = vadd.f32 %v4676_v20, %v2482_v11  ;;  %v5095_v11 = vld [vmem:[%s6265_s5 + $0x198] sm:$0xff]   ;;  %v5107_v17 = vld [vmem:[%s6265_s5 + $0x1b0] sm:$0xff]  }
 0x342   :  { %v5109_v19 = vld [vmem:[%s6265_s5 + $0x1f8] sm:$0xff]  }
 0x343   :  { %v2578_v24 = vadd.f32 %v4704_v34, %v2530_v18  ;;  %v5110_v20 = vld [vmem:[%s6265_s5 + $0x138] sm:$0xff]  }
 0x345   :  { %v2585_v23 = vmax.f32 %v2578_v24, 0.0  ;;  %v5112_v24 = vld [vmem:[%s6265_s5 + $0x200] sm:$0xff]  }
 0x346   :  { %v2598_v25 = vld [vmem:[#allocation4] sm:$0x1]  ;;  %v2602_v28 = vld [vmem:[#allocation4 + $0x2] sm:$0x1]  ;;  %v2606_v29 = vld [vmem:[#allocation4 + $0x4] sm:$0x1] }
 0x347   :  { %2599 = vst [vmem:[#allocation5] sm:$0x1] %v2598_v25  ;;  %2603 = vst [vmem:[#allocation5 + $0x10] sm:$0x1] %v2602_v28  ;;  %v2610_v27 = vld [vmem:[#allocation4 + $0x6] sm:$0x1] }
 0x348   :  { %2607 = vst [vmem:[#allocation5 + $0x20] sm:$0x1] %v2606_v29  ;;  %2588 = vst [vmem:[#allocation4 + $0x10] sm:$0xff] %v2585_v23  ;;  %v2600_v31 = vld [vmem:[#allocation4 + $0x1] sm:$0x1]  ;;  %v5202_v25 = vld [vmem:[#allocation7] sm:$0xff] }
 0x349   :  { %v2604_v32 = vld [vmem:[#allocation4 + $0x3] sm:$0x1]  ;;  %2611 = vst [vmem:[#allocation5 + $0x30] sm:$0x1] %v2610_v27  ;;  %v2614_v33 = vld [vmem:[#allocation4 + $0x8] sm:$0x1] }
 0x34a   :  { %v2616_v35 = vld [vmem:[#allocation4 + $0x9] sm:$0x1]  ;;  %v2620_v36 = vld [vmem:[#allocation4 + $0xb] sm:$0x1]  ;;  %2601 = vst [vmem:[#allocation5 + $0x8] sm:$0x1] %v2600_v31 }
 0x34b   :  { %2605 = vst [vmem:[#allocation5 + $0x18] sm:$0x1] %v2604_v32  ;;  %2615 = vst [vmem:[#allocation5 + $0x40] sm:$0x1] %v2614_v33  ;;  %v2624_v34 = vld [vmem:[#allocation4 + $0xd] sm:$0x1] }
 0x34c   :  { %2617 = vst [vmem:[#allocation5 + $0x1] sm:$0x1] %v2616_v35  ;;  %2621 = vst [vmem:[#allocation5 + $0x11] sm:$0x1] %v2620_v36  ;;  %v2628_v38 = vld [vmem:[#allocation4 + $0xf] sm:$0x1] }
 0x34d   :  { %v2618_v39 = vld [vmem:[#allocation4 + $0xa] sm:$0x1]  ;;  %2625 = vst [vmem:[#allocation5 + $0x21] sm:$0x1] %v2624_v34  ;;  %2629 = vst [vmem:[#allocation5 + $0x31] sm:$0x1] %v2628_v38 }
 0x34e   :  { %2619 = vst [vmem:[#allocation5 + $0x9] sm:$0x1] %v2618_v39  ;;  %v2622_v40 = vld [vmem:[#allocation4 + $0xc] sm:$0x1]  ;;  %v2608_v42 = vld [vmem:[#allocation4 + $0x5] sm:$0x1] }
 0x34f   :  { %v2626_v43 = vld [vmem:[#allocation4 + $0xe] sm:$0x1]  ;;  %2623 = vst [vmem:[#allocation5 + $0x19] sm:$0x1] %v2622_v40  ;;  %2609 = vst [vmem:[#allocation5 + $0x28] sm:$0x1] %v2608_v42 }
 0x350   :  { %2627 = vst [vmem:[#allocation5 + $0x29] sm:$0x1] %v2626_v43  ;;  %v2612_v44 = vld [vmem:[#allocation4 + $0x7] sm:$0x1]  ;;  %v2632_v45 = vld [vmem:[#allocation4 + $0x11] sm:$0x1] }
 0x351   :  { %2613 = vst [vmem:[#allocation5 + $0x38] sm:$0x1] %v2612_v44  ;;  %v2630_v46 = vld [vmem:[#allocation4 + $0x10] sm:$0x1]  ;;  %2633 = vst [vmem:[#allocation5 + $0x41] sm:$0x1] %v2632_v45 }
 0x352   :  { %2631 = vst [vmem:[#allocation5 + $0x39] sm:$0x1] %v2630_v46  ;;  %v5113_v29 = vld [vmem:[%s6265_s5 + $0x208] sm:$0xff]   ;;  %v5114_v27 = vld [vmem:[%s6265_s5 + $0x210] sm:$0xff]   ;;  %v5115_v31 = vld [vmem:[%s6265_s5 + $0x218] sm:$0xff]  }
 0x353   :  { %v2634_v47 = vld [vmem:[#allocation5] sm:$0xff]  ;;  %v2636_v48 = vld [vmem:[#allocation5 + $0x10] sm:$0xff]  ;;  %v5117_v33 = vld [vmem:[%s6265_s5 + $0x228] sm:$0xff]  }
 0x354   :  { %v2643_v26 = vpack.c.bf16 %v2634_v47, %v2634_v47  ;;  %v2645_v51 = vpack.c.bf16 %v2636_v48, %v2636_v48  ;;  %v2638_v22 = vld [vmem:[#allocation5 + $0x20] sm:$0xff]  ;;  %v2640_v18 = vld [vmem:[#allocation5 + $0x30] sm:$0xff]  ;;  %v5119_v36 = vld [vmem:[%s6265_s5 + $0x238] sm:$0xff]  }
 0x355   :  { %v2635_v49 = vld [vmem:[#allocation5 + $0x8] sm:$0xff]  ;;  %v2647_v23 = vpack.c.bf16 %v2638_v22, %v2638_v22  ;;  %v2649_v28 = vpack.c.bf16 %v2640_v18, %v2640_v18  ;;  %v5116_v32 = vld [vmem:[%s6265_s5 + $0x220] sm:$0xff]   ;;  %v5118_v35 = vld [vmem:[%s6265_s5 + $0x230] sm:$0xff]  }
 0x356   :  { %v2644_v30 = vpack.c.bf16 %v2635_v49, %v2635_v49  ;;  %v2637_v50 = vld [vmem:[#allocation5 + $0x18] sm:$0xff]  ;;  %v5120_v39 = vld [vmem:[%s6267_s7] ss:$16 sps:$4 sm:$0xff]   ;;  %v5122_v40 = vld [vmem:[%s6267_s7 + $0x4] ss:$16 sps:$4 sm:$0xff]  }
 0x357   :  { %v2639_v53 = vld [vmem:[#allocation5 + $0x28] sm:$0xff]  ;;  %v2646_v54 = vpack.c.bf16 %v2637_v50, %v2637_v50  ;;  %v5126_v44 = vld [vmem:[%s6267_s7 + $0x20] ss:$16 sps:$4 sm:$0xff]   ;;  %v5128_v45 = vld [vmem:[%s6267_s7 + $0x24] ss:$16 sps:$4 sm:$0xff]  }
 0x358   :  { %3267 = vmatprep.mubr.bf16.mxu1 %v2644_v30  ;;  %v2648_v59 = vpack.c.bf16 %v2639_v53, %v2639_v53  ;;  %v2642_v34 = vld [vmem:[#allocation5 + $0x40] sm:$0xff]  ;;  %v5123_v42 = vld [vmem:[%s6267_s7 + $0x8] ss:$16 sps:$4 sm:$0xff]   ;;  %v5125_v43 = vld [vmem:[%s6267_s7 + $0xc] ss:$16 sps:$4 sm:$0xff]  }
 0x359   :  { %3307 = vmatprep.mubr.bf16.mxu0 %v2646_v54  ;;  %3268 = vmatmul.mubr.bf16.vlgmr.msra.gmra.mrb[40].mxu1 %v2643_v26  ;;  %v2641_v61 = vld [vmem:[#allocation5 + $0x38] sm:$0xff]  ;;  %v2651_v38 = vpack.c.bf16 %v2642_v34, %v2642_v34  ;;  %v5132_v48 = vld [vmem:[%s6267_s7 + $0x40] ss:$16 sps:$4 sm:$0xff]   ;;  %v5134_v49 = vld [vmem:[%s6267_s7 + $0x44] ss:$16 sps:$4 sm:$0xff]  }
 0x35a   :  { %3308 = vmatmul.mubr.bf16.vlgmr.msra.gmra.mrb[68].mxu0 %v2645_v51  ;;  %4753 = vmatpush3.bf16.msra.mxu1 %v5082_v52  ;;  %v2650_v6 = vpack.c.bf16 %v2641_v61, %v2641_v61  ;;  %v5129_v46 = vld [vmem:[%s6267_s7 + $0x28] ss:$16 sps:$4 sm:$0xff]   ;;  %v5131_v47 = vld [vmem:[%s6267_s7 + $0x2c] ss:$16 sps:$4 sm:$0xff]   ;;  %v5138_v50 = vld [vmem:[%s6267_s7 + $0x60] ss:$16 sps:$4 sm:$0xff]  }
 0x35b   :  { %4775 = vmatpush3.bf16.msra.mxu0 %v5083_v55  ;;  %3347 = vmatprep.mubr.bf16.mxu1 %v2648_v59  ;;  %v5135_v26 = vld [vmem:[%s6267_s7 + $0x48] ss:$16 sps:$4 sm:$0xff]   ;;  %v5137_v30 = vld [vmem:[%s6267_s7 + $0x4c] ss:$16 sps:$4 sm:$0xff]   ;;  %v5140_v51 = vld [vmem:[%s6267_s7 + $0x64] ss:$16 sps:$4 sm:$0xff]  }
 0x35c   :  { %4754 = vmatprep.subr.bf16.mxu1 %v5084_v56  ;;  %4776 = vmatprep.subr.bf16.mxu0 %v5085_v58  ;;  %v5141_v52 = vld [vmem:[%s6267_s7 + $0x68] ss:$16 sps:$4 sm:$0xff]   ;;  %v5143_v53 = vld [vmem:[%s6267_s7 + $0x6c] ss:$16 sps:$4 sm:$0xff]   ;;  %v5146_v54 = vld [vmem:[%s6267_s7 + $0x84] ss:$16 sps:$4 sm:$0xff]  }
 0x35d   :  { %3387 = vmatprep.mubr.bf16.mxu0 %v2650_v6  ;;  %v5149_v55 = vld [vmem:[%s6267_s7 + $0x8c] ss:$16 sps:$4 sm:$0xff]   ;;  %v5144_v56 = vld [vmem:[%s6267_s7 + $0x80] ss:$16 sps:$4 sm:$0xff]   ;;  %v5147_v58 = vld [vmem:[%s6267_s7 + $0x88] ss:$16 sps:$4 sm:$0xff]  }
 0x35e   :  { %4755 = vmatpush3.bf16.msra.mxu1 %v5086_v60  ;;  %v5152_v59 = vld [vmem:[%s6267_s7 + $0xa4] ss:$16 sps:$4 sm:$0xff]   ;;  %v5155_v60 = vld [vmem:[%s6267_s7 + $0xac] ss:$16 sps:$4 sm:$0xff]   ;;  %v5150_v61 = vld [vmem:[%s6267_s7 + $0xa0] ss:$16 sps:$4 sm:$0xff]  }
 0x35f   :  { %4777 = vmatpush3.bf16.msra.mxu0 %v5087_v62  ;;  %4756 = vmatprep.subr.bf16.mxu1 %v5088_v63  ;;  %v5205_v62 = vmov 0   ;;  %v5153_v6 = vld [vmem:[%s6267_s7 + $0xa8] ss:$16 sps:$4 sm:$0xff]   ;;  %v5158_v63 = vld [vmem:[%s6267_s7 + $0xc4] ss:$16 sps:$4 sm:$0xff]  }
 0x360   :  { %4778 = vmatprep.subr.bf16.mxu0 %v5089_v8  ;;  %v5161_v8 = vld [vmem:[%s6267_s7 + $0xcc] ss:$16 sps:$4 sm:$0xff]  }
 0x362   :  { %4757 = vmatpush3.bf16.msra.mxu1 %v5090_v0  ;;  %v5156_v0 = vld [vmem:[%s6267_s7 + $0xc0] ss:$16 sps:$4 sm:$0xff]  }
 0x363   :  { %4779 = vmatpush3.bf16.msra.mxu0 %v5091_v1  ;;  %4758 = vmatprep.subr.bf16.mxu1 %v5092_v2  ;;  %v5159_v1 = vld [vmem:[%s6267_s7 + $0xc8] ss:$16 sps:$4 sm:$0xff]   ;;  %v5164_v2 = vld [vmem:[%s6267_s7 + $0xe4] ss:$16 sps:$4 sm:$0xff]  }
 0x364   :  { %4780 = vmatprep.subr.bf16.mxu0 %v5093_v3  ;;  %v5167_v3 = vld [vmem:[%s6267_s7 + $0xec] ss:$16 sps:$4 sm:$0xff]  }
 0x366   :  { %4759 = vmatpush3.bf16.msra.mxu1 %v5094_v4  ;;  %v5162_v4 = vld [vmem:[%s6267_s7 + $0xe0] ss:$16 sps:$4 sm:$0xff]  }
 0x367   :  { %4781 = vmatpush3.bf16.msra.mxu0 %v5095_v11  ;;  %4760 = vmatprep.subr.bf16.mxu1 %v5096_v5  ;;  %v5165_v11 = vld [vmem:[%s6267_s7 + $0xe8] ss:$16 sps:$4 sm:$0xff]   ;;  %v5168_v5 = vld [vmem:[%s6268_s9 + $0x40] sm:$0xff]  }
 0x368   :  { %4782 = vmatprep.subr.bf16.mxu0 %v5097_v7  ;;  %v5169_v7 = vld [vmem:[%s6268_s9 + $0xc0] sm:$0xff]  }
 0x36a   :  { %4761 = vmatpush3.bf16.msra.mxu1 %v5098_v57 }
 0x36b   :  { %4783 = vmatpush3.bf16.msra.mxu0 %v5099_v9  ;;  %4762 = vmatprep.subr.bf16.mxu1 %v5100_v10  ;;  %v4264_v10 = vld [vmem:[%s6269_s6] ss:$0 sm:$0xff] }
 0x36c   :  { %4784 = vmatprep.subr.bf16.mxu0 %v5101_v12 }
 0x36e   :  { %4763 = vmatpush3.bf16.msra.mxu1 %v5102_v13 }
 0x36f   :  { %4785 = vmatpush3.bf16.msra.mxu0 %v5103_v14  ;;  %4764 = vmatprep.subr.bf16.mxu1 %v5104_v15 }
 0x370   :  { %4786 = vmatprep.subr.bf16.mxu0 %v5105_v37 }
 0x372   :  { %4765 = vmatpush3.bf16.msra.mxu1 %v5106_v16 }
 0x373   :  { %4787 = vmatpush3.bf16.msra.mxu0 %v5107_v17  ;;  %4766 = vmatprep.subr.bf16.mxu1 %v5108_v41 }
 0x374   :  { %4788 = vmatprep.subr.bf16.mxu0 %v5109_v19 }
 0x376   :  { %4767 = vmatpush3.bf16.msra.mxu1 %v5110_v20 }
 0x377   :  { %4789 = vmatpush3.bf16.msra.mxu0 %v5111_v21  ;;  %4849 = vmatprep.subr.bf16.mxu1 %v5202_v25 }
 0x378   :  { %3658 = vmatprep.subr.bf16.mxu0 %v5122_v40 }
 0x379   :  { %3348 = vmatmul.mubr.bf16.vlgmr.msra.gmra.mrb[44].mxu1 %v2647_v23 }
 0x37a   :  { %3388 = vmatmul.mubr.bf16.vlgmr.msra.gmra.mrb[72].mxu0 %v2649_v28  ;;  %4850 = vmatpush3.bf16.msra.mxu1 %v5112_v24 }
 0x37b   :  { %4851 = vmatprep.subr.bf16.mxu1 %v5202_v25  ;;  %4865 = vmatprep.mubr.msk.bf16.mxu1 %vm5204_vm0, %v5202_v25 }
 0x37c   :  { %3659 = vmatpush1.bf16.msra.mxu0 %v5120_v39  ;;  %3690 = vmatprep.mubr.bf16.mxu0 %v5205_v62 }
 0x37d   :  { %3660 = vmatprep.subr.bf16.mxu0 %v5128_v45  ;;  %v5171_v45 = vld [vmem:[%s6268_s9 + $0x80] sm:$0xff]  }
 0x37e   :  { %4852 = vmatpush3.bf16.msra.mxu1 %v5113_v29 }
 0x37f   :  { %4853 = vmatprep.subr.bf16.mxu1 %v5202_v25 }
 0x380   :  { %3661 = vmatpush1.bf16.msra.mxu0 %v5126_v44  ;;  %v5170_v44 = vld [vmem:[%s6268_s9] sm:$0xff]  }
 0x381   :  { %3662 = vmatprep.subr.bf16.mxu0 %v5134_v49  ;;  %v5174_v49 = vld [vmem:[%s6268_s9 + $0x8] sm:$0xff]  }
 0x382   :  { %4854 = vmatpush3.bf16.msra.mxu1 %v5114_v27 }
 0x383   :  { %4855 = vmatprep.subr.bf16.mxu1 %v5202_v25 }
 0x384   :  { %3663 = vmatpush1.bf16.msra.mxu0 %v5132_v48  ;;  %v5173_v48 = vld [vmem:[%s6268_s9 + $0xc8] sm:$0xff]  }
 0x385   :  { %3664 = vmatprep.subr.bf16.mxu0 %v5140_v51  ;;  %v5178_v51 = vld [vmem:[%s6268_s9 + $0x10] sm:$0xff]  }
 0x386   :  { %4856 = vmatpush3.bf16.msra.mxu1 %v5115_v31 }
 0x387   :  { %4857 = vmatprep.subr.bf16.mxu1 %v5202_v25 }
 0x388   :  { %3665 = vmatpush1.bf16.msra.mxu0 %v5138_v50  ;;  %v5177_v50 = vld [vmem:[%s6268_s9 + $0xd0] sm:$0xff]  }
 0x389   :  { %3666 = vmatprep.subr.bf16.mxu0 %v5146_v54  ;;  %v5181_v54 = vld [vmem:[%s6268_s9 + $0xd8] sm:$0xff]  }
 0x38a   :  { %4858 = vmatpush3.bf16.msra.mxu1 %v5116_v32 }
 0x38b   :  { %4859 = vmatprep.subr.bf16.mxu1 %v5202_v25 }
 0x38c   :  { %3667 = vmatpush1.bf16.msra.mxu0 %v5144_v56  ;;  %v5183_v56 = vld [vmem:[%s6268_s9 + $0x98] sm:$0xff]  }
 0x38d   :  { %3668 = vmatprep.subr.bf16.mxu0 %v5152_v59  ;;  %v5185_v59 = vld [vmem:[%s6268_s9 + $0xe0] sm:$0xff]  }
 0x38e   :  { %4860 = vmatpush3.bf16.msra.mxu1 %v5117_v33 }
 0x38f   :  { %4861 = vmatprep.subr.bf16.mxu1 %v5202_v25 }
 0x390   :  { %3669 = vmatpush1.bf16.msra.mxu0 %v5150_v61  ;;  %v5187_v61 = vld [vmem:[%s6268_s9 + $0xa0] sm:$0xff]  }
 0x391   :  { %3670 = vmatprep.subr.bf16.mxu0 %v5158_v63  ;;  %v5190_v63 = vld [vmem:[%s6268_s9 + $0x28] sm:$0xff]  }
 0x392   :  { %4862 = vmatpush3.bf16.msra.mxu1 %v5118_v35 }
 0x393   :  { %4863 = vmatprep.subr.bf16.mxu1 %v5202_v25 }
 0x394   :  { %3671 = vmatpush1.bf16.msra.mxu0 %v5156_v0  ;;  %v5192_v0 = vld [vmem:[%s6268_s9 + $0x70] sm:$0xff]  }
 0x395   :  { %3672 = vmatprep.subr.bf16.mxu0 %v5164_v2  ;;  %v5194_v2 = vld [vmem:[%s6268_s9 + $0x30] sm:$0xff]  }
 0x396   :  { %4864 = vmatpush3.bf16.msra.mxu1 %v5119_v36 }
 0x397   :  { %3699 = vmatprep.subr.bf16.mxu1 %v5125_v43 }
 0x398   :  { %3673 = vmatpush1.bf16.msra.mxu0 %v5162_v4  ;;  %v5196_v4 = vld [vmem:[%s6268_s9 + $0x78] sm:$0xff]  }
 0x399   :  { %4866 = vmatmul.mubr.bf16.vlgmr.msra.gmra.mrb[48].mxu1 %v2651_v38  ;;  %4805 = vmatprep.subr.bf16.mxu0 %v5168_v5  ;;  %v5198_v5 = vld [vmem:[%s6268_s9 + $0x38] sm:$0xff]  }
 0x39a   :  { %3700 = vmatpush1.bf16.msra.mxu1 %v5123_v42  ;;  %3731 = vmatprep.mubr.bf16.mxu1 %v5205_v62  ;;  %v5188_v62 = vld [vmem:[%s6268_s9 + $0x68] sm:$0xff]  }
 0x39b   :  { %3701 = vmatprep.subr.bf16.mxu1 %v5131_v47  ;;  %v5172_v47 = vld [vmem:[%s6268_s9 + $0x48] sm:$0xff]  }
 0x39e   :  { %3702 = vmatpush1.bf16.msra.mxu1 %v5129_v46 }
 0x39f   :  { %3703 = vmatprep.subr.bf16.mxu1 %v5137_v30  ;;  %v5176_v30 = vld [vmem:[%s6268_s9 + $0x50] sm:$0xff]  }
 0x3a2   :  { %3704 = vmatpush1.bf16.msra.mxu1 %v5135_v26  ;;  %v5175_v26 = vld [vmem:[%s6268_s9 + $0x88] sm:$0xff]  }
 0x3a3   :  { %3705 = vmatprep.subr.bf16.mxu1 %v5143_v53  ;;  %v5180_v53 = vld [vmem:[%s6268_s9 + $0x58] sm:$0xff]  }
 0x3a6   :  { %3706 = vmatpush1.bf16.msra.mxu1 %v5141_v52  ;;  %v5179_v52 = vld [vmem:[%s6268_s9 + $0x90] sm:$0xff]  }
 0x3a7   :  { %3707 = vmatprep.subr.bf16.mxu1 %v5149_v55  ;;  %v5182_v55 = vld [vmem:[%s6268_s9 + $0x18] sm:$0xff]  }
 0x3aa   :  { %3708 = vmatpush1.bf16.msra.mxu1 %v5147_v58  ;;  %v5184_v58 = vld [vmem:[%s6268_s9 + $0x60] sm:$0xff]  }
 0x3ab   :  { %3709 = vmatprep.subr.bf16.mxu1 %v5155_v60  ;;  %v5186_v60 = vld [vmem:[%s6268_s9 + $0x20] sm:$0xff]  }
 0x3ae   :  { %3710 = vmatpush1.bf16.msra.mxu1 %v5153_v6  ;;  %v5189_v6 = vld [vmem:[%s6268_s9 + $0xe8] sm:$0xff]  }
 0x3af   :  { %3711 = vmatprep.subr.bf16.mxu1 %v5161_v8  ;;  %v5191_v8 = vld [vmem:[%s6268_s9 + $0xa8] sm:$0xff]  }
 0x3b2   :  { %3712 = vmatpush1.bf16.msra.mxu1 %v5159_v1  ;;  %v5193_v1 = vld [vmem:[%s6268_s9 + $0xf0] sm:$0xff]  }
 0x3b3   :  { %3713 = vmatprep.subr.bf16.mxu1 %v5167_v3  ;;  %v5195_v3 = vld [vmem:[%s6268_s9 + $0xb0] sm:$0xff]  }
 0x3b6   :  { %3714 = vmatpush1.bf16.msra.mxu1 %v5165_v11  ;;  %v5197_v11 = vld [vmem:[%s6268_s9 + $0xf8] sm:$0xff]  }
 0x3b7   :  { %4827 = vmatprep.subr.bf16.mxu1 %v5169_v7  ;;  %v5199_v7 = vld [vmem:[%s6268_s9 + $0xb8] sm:$0xff]  }
 0x42c   :  { %v4724_v57 = vpop.f32.mrb[40].mxu1 }
 0x42d   :  { %v4746_v9 = vpop.f32.mrb[68].mxu0  ;;  %v4725_v12 = vpop.f32.mrb[41].mxu1 }
 0x42e   :  { %v4726_v13 = vadd.f32 %v4725_v12, %v4724_v57  ;;  %v4747_v14 = vpop.f32.mrb[69].mxu0  ;;  %v4727_v15 = vpop.f32.mrb[42].mxu1  ;;  %v3478_v57 = vlaneseq }
 0x42f   :  { %v4748_v37 = vadd.f32 %v4747_v14, %v4746_v9  ;;  %v4749_v16 = vpop.f32.mrb[70].mxu0  ;;  %v4728_v17 = vpop.f32.mrb[43].mxu1 }
 0x430   :  { %v3270_v41 = vadd.f32 %v4726_v13, %v4264_v10  ;;  %v4750_v19 = vpop.f32.mrb[71].mxu0  ;;  %v3479_v9 = vshrl.u32 %v3478_v57, 7  ;;  %v3476_v13 = vld [vmem:[%s6270_s8] sm:$0xf] }
 0x432   :  { %v3310_v20 = vadd.f32 %v4748_v37, %v3270_v41  ;;  %v3480_v10 = vsub.s32 0, %v3479_v9  ;;  %v3488_v12 = vsub.s32 2, %v3479_v9  ;;  %v3484_v14 = vsub.s32 1, %v3479_v9 }
 0x433   :  { %v3492_v15 = vsub.s32 3, %v3479_v9 }
 0x434   :  { %v3481_v37 = vrot.slane %v3476_v13, %v3480_v10  ;;  %v3489_v16 = vrot.slane %v3476_v13, %v3488_v12  ;;  %v3485_v17 = vrot.slane %v3476_v13, %v3484_v14 }
 0x435   :  { %v3493_v41 = vrot.slane %v3476_v13, %v3492_v15 }
 0x44c   :  { %v4768_v21 = vpop.f32.mrb[44].mxu1 }
 0x44d   :  { %v4790_v22 = vpop.f32.mrb[72].mxu0  ;;  %v4769_v18 = vpop.f32.mrb[45].mxu1 }
 0x44e   :  { %v4770_v24 = vadd.f32 %v4769_v18, %v4768_v21  ;;  %v4791_v23 = vpop.f32.mrb[73].mxu0  ;;  %v4771_v25 = vpop.f32.mrb[46].mxu1 }
 0x44f   :  { %v4792_v28 = vadd.f32 %v4791_v23, %v4790_v22  ;;  %v4793_v29 = vpop.f32.mrb[74].mxu0  ;;  %v4772_v27 = vpop.f32.mrb[47].mxu1 }
 0x450   :  { %v3350_v31 = vadd.f32 %v4770_v24, %v3310_v20  ;;  %v4794_v32 = vpop.f32.mrb[75].mxu0 }
 0x452   :  { %v3390_v33 = vadd.f32 %v4792_v28, %v3350_v31 }
 0x46c   :  { %v3429_v35 = vpop.f32.mrb[48].mxu1 }
 0x46d   :  { %v3430_v36 = vadd.f32 %v3429_v35, %v3390_v33  ;;  %v4867_v34 = vpop.f32.mrb[49].mxu1 }
 0x46e   :  { %v3432_v38 = vpop.f32.mrb[50].mxu1 }
 0x46f   :  { %v3435_v39 = vmax.f32 %v3430_v36, 0.0  ;;  %v4868_v40 = vpop.f32.mrb[51].mxu1 }
 0x471   :  { %3436 = vst [vmem:[#allocation6] sm:$0xff] %v3435_v39 }
 0x478   :  { %v3438_v42 = vld [vmem:[#allocation6] sm:$0x3]  }
 0x479   :  { %3439 = vst [vmem:[#allocation7] sm:$0x3] %v3438_v42  }
 0x480   :  { %v3442_v43 = vld [vmem:[#allocation7] sm:$0xff] }
 0x481   :  { %v3443_v46 = vpack.c.bf16 %v3442_v43, %v3442_v43 }
 0x483   :  { %3691 = vmatmul.mubr.bf16.vlgmr.msra.gmra.mrb[76].mxu0 %v3443_v46  ;;  %3732 = vmatmul.mubr.bf16.vlgmr.msra.gmra.mrb[52].mxu1 %v3443_v46 }
 0x484   :  { %4806 = vmatpush3.bf16.msra.mxu0 %v5170_v44  ;;  %4828 = vmatpush3.bf16.msra.mxu1 %v5171_v45  ;;  %v4369_v44 = vld [vmem:[%s6271_s10] ss:$0 sm:$0xff] }
 0x485   :  { %4807 = vmatprep.subr.bf16.mxu0 %v5172_v47  ;;  %4829 = vmatprep.subr.bf16.mxu1 %v5173_v48 }
 0x488   :  { %4808 = vmatpush3.bf16.msra.mxu0 %v5174_v49  ;;  %4830 = vmatpush3.bf16.msra.mxu1 %v5175_v26 }
 0x489   :  { %4809 = vmatprep.subr.bf16.mxu0 %v5176_v30  ;;  %4831 = vmatprep.subr.bf16.mxu1 %v5177_v50 }
 0x48c   :  { %4810 = vmatpush3.bf16.msra.mxu0 %v5178_v51  ;;  %4832 = vmatpush3.bf16.msra.mxu1 %v5179_v52 }
 0x48d   :  { %4811 = vmatprep.subr.bf16.mxu0 %v5180_v53  ;;  %4833 = vmatprep.subr.bf16.mxu1 %v5181_v54 }
 0x490   :  { %4812 = vmatpush3.bf16.msra.mxu0 %v5182_v55  ;;  %4834 = vmatpush3.bf16.msra.mxu1 %v5183_v56 }
 0x491   :  { %4813 = vmatprep.subr.bf16.mxu0 %v5184_v58  ;;  %4835 = vmatprep.subr.bf16.mxu1 %v5185_v59 }
 0x494   :  { %4814 = vmatpush3.bf16.msra.mxu0 %v5186_v60  ;;  %4836 = vmatpush3.bf16.msra.mxu1 %v5187_v61 }
 0x495   :  { %4815 = vmatprep.subr.bf16.mxu0 %v5188_v62  ;;  %4837 = vmatprep.subr.bf16.mxu1 %v5189_v6 }
 0x498   :  { %4816 = vmatpush3.bf16.msra.mxu0 %v5190_v63  ;;  %4838 = vmatpush3.bf16.msra.mxu1 %v5191_v8 }
 0x499   :  { %4817 = vmatprep.subr.bf16.mxu0 %v5192_v0  ;;  %4839 = vmatprep.subr.bf16.mxu1 %v5193_v1 }
 0x49c   :  { %4818 = vmatpush3.bf16.msra.mxu0 %v5194_v2  ;;  %4840 = vmatpush3.bf16.msra.mxu1 %v5195_v3 }
 0x49d   :  { %4819 = vmatprep.subr.bf16.mxu0 %v5196_v4  ;;  %4841 = vmatprep.subr.bf16.mxu1 %v5197_v11 }
 0x4a0   :  { %4820 = vmatpush3.bf16.msra.mxu0 %v5198_v5  ;;  %4842 = vmatpush3.bf16.msra.mxu1 %v5199_v7 }
 0x556   :  { %v3692_v19 = vpop.f32.mrb[76].mxu0  ;;  %v3733_v20 = vpop.f32.mrb[52].mxu1 }
 0x557   :  { %v3693_v21 = vadd.f32 %v3692_v19, %v3481_v37  ;;  %v3734_v22 = vadd.f32 %v3733_v20, %v3489_v16  ;;  %v3694_v18 = vpop.f32.mrb[77].mxu0  ;;  %v3735_v24 = vpop.f32.mrb[53].mxu1 }
 0x558   :  { %v3695_v23 = vadd.f32 %v3694_v18, %v3485_v17  ;;  %v3736_v25 = vadd.f32 %v3735_v24, %v3493_v41  ;;  %v3696_v28 = vpop.f32.mrb[78].mxu0  ;;  %v3737_v29 = vpop.f32.mrb[54].mxu1 }
 0x559   :  { %v3740_v27 = vmax.f32 %v3693_v21, 0.0  ;;  %v3742_v31 = vmax.f32 %v3734_v22, 0.0  ;;  %v3697_v32 = vpop.f32.mrb[79].mxu0  ;;  %v3738_v33 = vpop.f32.mrb[55].mxu1 }
 0x55a   :  { %v3741_v35 = vmax.f32 %v3695_v23, 0.0  ;;  %v3743_v36 = vmax.f32 %v3736_v25, 0.0 }
 0x55b   :  { %v3744_v39 = vpack.c.bf16 %v3740_v27, %v3740_v27  ;;  %v3746_v40 = vpack.c.bf16 %v3742_v31, %v3742_v31 }
 0x55c   :  { %v3745_v34 = vpack.c.bf16 %v3741_v35, %v3741_v35  ;;  %v3747_v38 = vpack.c.bf16 %v3743_v36, %v3743_v36 }
 0x55e   :  { %4043 = vmatprep.mubr.bf16.mxu0 %v3745_v34  ;;  %4083 = vmatprep.mubr.bf16.mxu1 %v3747_v38 }
 0x55f   :  { %4044 = vmatmul.mubr.bf16.vlgmr.msra.gmra.mrb[80].mxu0 %v3744_v39  ;;  %4084 = vmatmul.mubr.bf16.vlgmr.msra.gmra.mrb[56].mxu1 %v3746_v40 }
 0x632   :  { %v4821_v42 = vpop.f32.mrb[80].mxu0  ;;  %v4843_v43 = vpop.f32.mrb[56].mxu1 }
 0x633   :  { %v4822_v45 = vpop.f32.mrb[81].mxu0  ;;  %v4844_v46 = vpop.f32.mrb[57].mxu1 }
 0x634   :  { %v4823_v47 = vadd.f32 %v4822_v45, %v4821_v42  ;;  %v4845_v48 = vadd.f32 %v4844_v46, %v4843_v43  ;;  %v4824_v49 = vpop.f32.mrb[82].mxu0  ;;  %v4846_v26 = vpop.f32.mrb[58].mxu1 }
 0x635   :  { %v4825_v30 = vpop.f32.mrb[83].mxu0  ;;  %v4847_v50 = vpop.f32.mrb[59].mxu1 }
 0x636   :  { %v4046_v51 = vadd.f32 %v4823_v47, %v4369_v44 }
 0x638   :  { %v4086_v52 = vadd.f32 %v4845_v48, %v4046_v51 }
 0x63a   :  { %4091 = vst [vmem:[%s6272_s11] sm:$0xff] %v4086_v52 }

</bundles_post_ra>
